<compile_context>
chip_gen: v6e
topology: v6e:2x2x1
jax: 0.10.0
libtpu: 0.0.40
codegen_flags: <defaults>
</compile_context>

<pallas_src>
import functools

import numpy as np
import jax
import jax.numpy as jnp
from jax.experimental import pallas as pl
from jax.experimental.pallas import tpu as pltpu


# ---------------------------------------------------------------------------
# Fused forward kernel builder
# ---------------------------------------------------------------------------
def _make_cnn_kernel(*, kernel_size, num_conv_layers, num_kernels, layer_dims):
    """layer_dims[l] = (cin, ho, wo, hp, wp) for conv layer l (all static)."""
    k = kernel_size
    cout = num_kernels

    def kernel(x_ref, wc1_ref, bc1_ref, wc2_ref, bc2_ref,
               wfc1_ref, bfc1_ref, wfc2_ref, bfc2_ref, *rest):
        # rest = (sh_0, sw_0, sh_1, sw_1, ..., out_ref, act_scratch_0, act_scratch_1, ...)
        n_sel = 2 * num_conv_layers
        sel_refs = rest[:n_sel]
        out_ref = rest[n_sel]
        act_refs = rest[n_sel + 1:]

        n_batch = x_ref.shape[0]

        def conv_relu(read_tap, cin, w_s, b_s, ho, wo):
            # Tap hoisting: each (ci, kh, kw) window is read ONCE and reused for all cout
            # output channels; cout accumulators stay live (well under the vreg budget).
            accs = [None] * cout
            for ci in range(cin):
                for kh in range(k):
                    for kw in range(k):
                        tap = read_tap(ci, kh, kw, ho, wo)          # (N, ho, wo)
                        base = (ci * k + kh) * k + kw
                        for co in range(cout):
                            contrib = tap * w_s[co * (cin * k * k) + base]
                            accs[co] = contrib if accs[co] is None else accs[co] + contrib
            return [jnp.maximum(accs[co] + b_s[co], 0.0) for co in range(cout)]

        def maxpool_packed(act_r, sh_ref, sw_ref, ho, wo, hp, wp):
            # act_r: (N, ho, cout*wo), channel c occupies lanes [c*wo, (c+1)*wo).
            # MaxPool2d(2,2) = adjacent-pair max (lane shift) + stride-2 lane pick via ONE
            # batched 0/1 matmul, then adjacent-pair max (sublane shift) + stride-2 row pick
            # via ONE batched 0/1 matmul.  Channel-boundary lanes are never selected.
            wfull = cout * wo
            cpm = jnp.maximum(act_r[:, :, 0:wfull - 1], act_r[:, :, 1:wfull])
            sw = jnp.broadcast_to(sw_ref[...], (n_batch,) + sw_ref.shape)
            colred = jnp.einsum('nhw,nwp->nhp', cpm, sw,
                                preferred_element_type=jnp.float32)   # (N, ho, cout*wp)
            rpm = jnp.maximum(colred[:, 0:ho - 1, :], colred[:, 1:ho, :])
            sh = jnp.broadcast_to(sh_ref[...], (n_batch,) + sh_ref.shape)
            return jnp.einsum('nph,nhw->npw', sh, rpm,
                              preferred_element_type=jnp.float32)     # (N, hp, cout*wp)

        # --- conv tower -----------------------------------------------------------------
        pooled = None
        for layer in range(num_conv_layers):
            cin, ho, wo, hp, wp = layer_dims[layer]
            w_s = wc1_ref if layer == 0 else wc2_ref    # conv2 reused for layers >= 1
            b_s = bc1_ref if layer == 0 else bc2_ref

            if layer == 0:
                def read_tap(ci, kh, kw, ho_, wo_):
                    # NCHW input consumed directly; batch stays vectorized.
                    return x_ref[:, ci, kh:kh + ho_, kw:kw + wo_]
            else:
                prev, prev_wp = pooled, layer_dims[layer - 1][4]

                def read_tap(ci, kh, kw, ho_, wo_, _p=prev, _wp=prev_wp):
                    c0 = ci * _wp + kw
                    return _p[:, kh:kh + ho_, c0:c0 + wo_]

            acts = conv_relu(read_tap, cin, w_s, b_s, ho, wo)

            act_r = act_refs[layer]                     # (N, ho, cout*wo) VMEM scratch
            for co in range(cout):
                act_r[:, :, co * wo:(co + 1) * wo] = acts[co]

            pooled = maxpool_packed(act_r, sel_refs[2 * layer], sel_refs[2 * layer + 1],
                                    ho, wo, hp, wp)

        # --- flatten + fc1 + ReLU + fc2: hp_last + 1 matmuls, one full-width store -------
        hp_l, wp_l = layer_dims[-1][3], layer_dims[-1][4]
        row_w = cout * wp_l                             # features per pooled spatial row
        acc = bfc1_ref[...]                             # (1, nn), broadcasts against (N, nn)
        for i in range(hp_l):
            acc = acc + jnp.dot(pooled[:, i, :],
                                wfc1_ref[i * row_w:(i + 1) * row_w, :],
                                preferred_element_type=jnp.float32)
        h1 = jnp.maximum(acc, 0.0)
        out_ref[...] = (jnp.dot(h1, wfc2_ref[...], preferred_element_type=jnp.float32)
                        + bfc2_ref[...])

    return kernel


# ---------------------------------------------------------------------------
# Wrapper: single pallas_call, whole arrays as blocks (no grid, no tiling)
# ---------------------------------------------------------------------------
def cnn_forward(x, params, *, kernel_size, num_conv_layers):
    n, in_ch, h, w = x.shape
    num_kernels = params["b_conv1"].shape[0]
    num_neurons = params["w_fc1"].shape[1]
    num_classes = params["w_fc2"].shape[1]
    k = kernel_size

    # Per-layer static dims.
    layer_dims = []
    hh, ww, cin = h, w, in_ch
    for _ in range(num_conv_layers):
        ho, wo = hh - k + 1, ww - k + 1
        hp, wp = ho // 2, wo // 2
        layer_dims.append((cin, ho, wo, hp, wp))
        hh, ww, cin = hp, wp, num_kernels
    assert hh > 0 and ww > 0, "Too many conv layers for the input size."
    assert params["w_conv1"].shape[0] == num_kernels * in_ch * k * k
    assert params["w_conv2"].shape[0] == num_kernels * num_kernels * k * k
    assert params["w_fc1"].shape[0] == num_kernels * hh * ww

    # Host-built 0/1 stride-2 selection matrices (shape-only -> constant-folded under jit).
    sels = []
    for (_, ho, wo, hp, wp) in layer_dims:
        sh = np.zeros((hp, ho - 1), np.float32)
        sh[np.arange(hp), 2 * np.arange(hp)] = 1.0
        sw = np.zeros((num_kernels * wo - 1, num_kernels * wp), np.float32)
        for c in range(num_kernels):
            sw[c * wo + 2 * np.arange(wp), c * wp + np.arange(wp)] = 1.0
        sels += [jnp.asarray(sh), jnp.asarray(sw)]

    # w_fc1 rows: PyTorch NCHW flatten order (c, i, j) -> kernel row order (i, c, j) so the
    # kernel consumes lane-dense pooled rows with no in-kernel flatten/transpose.
    hp_l, wp_l = layer_dims[-1][3], layer_dims[-1][4]
    w_fc1 = params["w_fc1"].reshape(num_kernels, hp_l, wp_l, num_neurons)
    w_fc1 = jnp.transpose(w_fc1, (1, 0, 2, 3)).reshape(num_kernels * hp_l * wp_l,
                                                       num_neurons)

    kernel = _make_cnn_kernel(kernel_size=k, num_conv_layers=num_conv_layers,
                              num_kernels=num_kernels, layer_dims=layer_dims)

    smem = pl.BlockSpec(memory_space=pltpu.MemorySpace.SMEM)
    vmem = pl.BlockSpec(memory_space=pltpu.MemorySpace.VMEM)
    in_specs = [vmem, smem, smem, smem, smem, vmem, vmem, vmem, vmem] + [vmem] * len(sels)
    scratch = [pltpu.VMEM((n, ho, num_kernels * wo), jnp.float32)
               for (_, ho, wo, _, _) in layer_dims]

    return pl.pallas_call(
        kernel,
        out_shape=jax.ShapeDtypeStruct((n, num_classes), jnp.float32),
        in_specs=in_specs,
        out_specs=vmem,
        scratch_shapes=scratch,
    )(x,
      params["w_conv1"], params["b_conv1"],
      params["w_conv2"], params["b_conv2"],
      w_fc1, params["b_fc1"], params["w_fc2"], params["b_fc2"],
      *sels)


# ---------------------------------------------------------------------------
# Deterministic synthetic parameters (shapes match the PyTorch module).
# Conv weights are flattened from PyTorch's (cout, cin, kh, kw); w_fc1 / w_fc2 are stored
# as (in, out) = PyTorch weight.T; w_fc1 rows follow the NCHW flatten order.
# ---------------------------------------------------------------------------
def init_params(key, *, input_dims, num_kernels, num_neurons, kernel_size,
                num_conv_layers, num_classes=6, in_channels=3):
    fx, fy = input_dims[1], input_dims[0]
    for _ in range(num_conv_layers):
        fx = (fx - kernel_size + 1) // 2
        fy = (fy - kernel_size + 1) // 2
    assert fx > 0 and fy > 0, "Too many conv layers for the input size."
    fc1_in = num_kernels * fx * fy

    ks = jax.random.split(key, 8)
    s = 0.1
    w_conv1 = s * jax.random.normal(
        ks[0], (num_kernels, in_channels, kernel_size, kernel_size), jnp.float32)
    w_conv2 = s * jax.random.normal(
        ks[2], (num_kernels, num_kernels, kernel_size, kernel_size), jnp.float32)
    return {
        "w_conv1": w_conv1.reshape(-1),
        "b_conv1": s * jax.random.normal(ks[1], (num_kernels,), jnp.float32),
        "w_conv2": w_conv2.reshape(-1),
        "b_conv2": s * jax.random.normal(ks[3], (num_kernels,), jnp.float32),
        "w_fc1": s * jax.random.normal(ks[4], (fc1_in, num_neurons), jnp.float32),
        "b_fc1": s * jax.random.normal(ks[5], (1, num_neurons), jnp.float32),
        "w_fc2": s * jax.random.normal(ks[6], (num_neurons, num_classes), jnp.float32),
        "b_fc2": s * jax.random.normal(ks[7], (1, num_classes), jnp.float32),
    }


# ---------------------------------------------------------------------------
# Pure-JAX reference (for correctness check only; uses the PyTorch NCHW flatten)
# ---------------------------------------------------------------------------
def reference_forward(x, params, *, kernel_size, num_conv_layers, num_kernels,
                      in_channels=3):
    def conv(h, w_flat, b, cin, cout):
        w4 = w_flat.reshape(cout, cin, kernel_size, kernel_size)
        y = jax.lax.conv_general_dilated(
            h, w4, window_strides=(1, 1), padding="VALID",
            dimension_numbers=("NCHW", "OIHW", "NCHW"))
        return y + b.reshape(1, cout, 1, 1)

    def pool(h):
        return jax.lax.reduce_window(h, -jnp.inf, jax.lax.max,
                                     (1, 1, 2, 2), (1, 1, 2, 2), "VALID")

    h = pool(jax.nn.relu(conv(x, params["w_conv1"], params["b_conv1"],
                              in_channels, num_kernels)))
    for _ in range(num_conv_layers - 1):
        h = pool(jax.nn.relu(conv(h, params["w_conv2"], params["b_conv2"],
                                  num_kernels, num_kernels)))
    n = h.shape[0]
    flat = h.reshape(n, -1)                                   # NCHW flatten
    h1 = jax.nn.relu(flat @ params["w_fc1"] + params["b_fc1"])
    return h1 @ params["w_fc2"] + params["b_fc2"]


# ---------------------------------------------------------------------------
if __name__ == "__main__":
    INPUT_DIMS = (16, 16)      # (H, W)
    NUM_KERNELS = 4
    NUM_NEURONS = 32
    KERNEL_SIZE = 3
    NUM_CONV_LAYERS = 2
    BATCH = 2

    key = jax.random.PRNGKey(0)
    k_params, k_x = jax.random.split(key)
    params = init_params(
        k_params,
        input_dims=INPUT_DIMS,
        num_kernels=NUM_KERNELS,
        num_neurons=NUM_NEURONS,
        kernel_size=KERNEL_SIZE,
        num_conv_layers=NUM_CONV_LAYERS,
    )

    # PyTorch-style NCHW input (conv1 has 3 input channels), consumed directly.
    x = jax.random.normal(k_x, (BATCH, 3, INPUT_DIMS[0], INPUT_DIMS[1]), jnp.float32)

    fwd = jax.jit(functools.partial(
        cnn_forward, kernel_size=KERNEL_SIZE, num_conv_layers=NUM_CONV_LAYERS))
    out = jax.block_until_ready(fwd(x, params))

    ref = jax.block_until_ready(reference_forward(
        x, params, kernel_size=KERNEL_SIZE, num_conv_layers=NUM_CONV_LAYERS,
        num_kernels=NUM_KERNELS))

    assert out.shape == (BATCH, 6), out.shape
    assert bool(jnp.all(jnp.isfinite(out)))
    max_err = float(jnp.max(jnp.abs(out - ref)))
    assert max_err < 5e-3, f"max abs error vs reference: {max_err}"
    print("KERNEL_OK")
</pallas_src>

<mosaic_0001>
module attributes {stable_mosaic.version = 11 : i64} {
  func.func @kernel(%arg0: memref<2x3x16x16xf32, #tpu.memory_space<vmem>>, %arg1: memref<108xf32, #tpu.memory_space<smem>>, %arg2: memref<4xf32, #tpu.memory_space<smem>>, %arg3: memref<144xf32, #tpu.memory_space<smem>>, %arg4: memref<4xf32, #tpu.memory_space<smem>>, %arg5: memref<16x32xf32, #tpu.memory_space<vmem>>, %arg6: memref<1x32xf32, #tpu.memory_space<vmem>>, %arg7: memref<32x6xf32, #tpu.memory_space<vmem>>, %arg8: memref<1x6xf32, #tpu.memory_space<vmem>>, %arg9: memref<7x13xf32, #tpu.memory_space<vmem>>, %arg10: memref<55x28xf32, #tpu.memory_space<vmem>>, %arg11: memref<2x4xf32, #tpu.memory_space<vmem>>, %arg12: memref<19x8xf32, #tpu.memory_space<vmem>>, %arg13: memref<2x6xf32, #tpu.memory_space<vmem>>, %arg14: memref<2x14x56xf32, #tpu.memory_space<vmem>>, %arg15: memref<2x5x20xf32, #tpu.memory_space<vmem>>) attributes {dimension_semantics = [], scalar_prefetch = 0 : i64, scratch_operands = 2 : i64, tpu.core_type = #tpu.core_type<tc>} {
    %c0 = arith.constant 0 : index
    %c0_0 = arith.constant 0 : index
    %c0_1 = arith.constant 0 : index
    %c0_2 = arith.constant 0 : index
    %0 = vector.load %arg0[%c0, %c0_0, %c0_1, %c0_2] : memref<2x3x16x16xf32, #tpu.memory_space<vmem>>, vector<2x1x14x14xf32>
    %1 = vector.shape_cast %0 : vector<2x1x14x14xf32> to vector<2x14x14xf32>
    %c0_3 = arith.constant 0 : index
    %2 = memref.load %arg1[%c0_3] : memref<108xf32, #tpu.memory_space<smem>>
    %3 = vector.broadcast %2 : f32 to vector<2x14x14xf32>
    %4 = arith.mulf %1, %3 : vector<2x14x14xf32>
    %c27 = arith.constant 27 : index
    %5 = memref.load %arg1[%c27] : memref<108xf32, #tpu.memory_space<smem>>
    %6 = vector.broadcast %5 : f32 to vector<2x14x14xf32>
    %7 = arith.mulf %1, %6 : vector<2x14x14xf32>
    %c54 = arith.constant 54 : index
    %8 = memref.load %arg1[%c54] : memref<108xf32, #tpu.memory_space<smem>>
    %9 = vector.broadcast %8 : f32 to vector<2x14x14xf32>
    %10 = arith.mulf %1, %9 : vector<2x14x14xf32>
    %c81 = arith.constant 81 : index
    %11 = memref.load %arg1[%c81] : memref<108xf32, #tpu.memory_space<smem>>
    %12 = vector.broadcast %11 : f32 to vector<2x14x14xf32>
    %13 = arith.mulf %1, %12 : vector<2x14x14xf32>
    %c0_4 = arith.constant 0 : index
    %c0_5 = arith.constant 0 : index
    %c0_6 = arith.constant 0 : index
    %c1 = arith.constant 1 : index
    %14 = vector.load %arg0[%c0_4, %c0_5, %c0_6, %c1] : memref<2x3x16x16xf32, #tpu.memory_space<vmem>>, vector<2x1x14x14xf32>
    %15 = vector.shape_cast %14 : vector<2x1x14x14xf32> to vector<2x14x14xf32>
    %c1_7 = arith.constant 1 : index
    %16 = memref.load %arg1[%c1_7] : memref<108xf32, #tpu.memory_space<smem>>
    %17 = vector.broadcast %16 : f32 to vector<2x14x14xf32>
    %18 = arith.mulf %15, %17 : vector<2x14x14xf32>
    %19 = arith.addf %4, %18 : vector<2x14x14xf32>
    %c28 = arith.constant 28 : index
    %20 = memref.load %arg1[%c28] : memref<108xf32, #tpu.memory_space<smem>>
    %21 = vector.broadcast %20 : f32 to vector<2x14x14xf32>
    %22 = arith.mulf %15, %21 : vector<2x14x14xf32>
    %23 = arith.addf %7, %22 : vector<2x14x14xf32>
    %c55 = arith.constant 55 : index
    %24 = memref.load %arg1[%c55] : memref<108xf32, #tpu.memory_space<smem>>
    %25 = vector.broadcast %24 : f32 to vector<2x14x14xf32>
    %26 = arith.mulf %15, %25 : vector<2x14x14xf32>
    %27 = arith.addf %10, %26 : vector<2x14x14xf32>
    %c82 = arith.constant 82 : index
    %28 = memref.load %arg1[%c82] : memref<108xf32, #tpu.memory_space<smem>>
    %29 = vector.broadcast %28 : f32 to vector<2x14x14xf32>
    %30 = arith.mulf %15, %29 : vector<2x14x14xf32>
    %31 = arith.addf %13, %30 : vector<2x14x14xf32>
    %c0_8 = arith.constant 0 : index
    %c0_9 = arith.constant 0 : index
    %c0_10 = arith.constant 0 : index
    %c2 = arith.constant 2 : index
    %32 = vector.load %arg0[%c0_8, %c0_9, %c0_10, %c2] : memref<2x3x16x16xf32, #tpu.memory_space<vmem>>, vector<2x1x14x14xf32>
    %33 = vector.shape_cast %32 : vector<2x1x14x14xf32> to vector<2x14x14xf32>
    %c2_11 = arith.constant 2 : index
    %34 = memref.load %arg1[%c2_11] : memref<108xf32, #tpu.memory_space<smem>>
    %35 = vector.broadcast %34 : f32 to vector<2x14x14xf32>
    %36 = arith.mulf %33, %35 : vector<2x14x14xf32>
    %37 = arith.addf %19, %36 : vector<2x14x14xf32>
    %c29 = arith.constant 29 : index
    %38 = memref.load %arg1[%c29] : memref<108xf32, #tpu.memory_space<smem>>
    %39 = vector.broadcast %38 : f32 to vector<2x14x14xf32>
    %40 = arith.mulf %33, %39 : vector<2x14x14xf32>
    %41 = arith.addf %23, %40 : vector<2x14x14xf32>
    %c56 = arith.constant 56 : index
    %42 = memref.load %arg1[%c56] : memref<108xf32, #tpu.memory_space<smem>>
    %43 = vector.broadcast %42 : f32 to vector<2x14x14xf32>
    %44 = arith.mulf %33, %43 : vector<2x14x14xf32>
    %45 = arith.addf %27, %44 : vector<2x14x14xf32>
    %c83 = arith.constant 83 : index
    %46 = memref.load %arg1[%c83] : memref<108xf32, #tpu.memory_space<smem>>
    %47 = vector.broadcast %46 : f32 to vector<2x14x14xf32>
    %48 = arith.mulf %33, %47 : vector<2x14x14xf32>
    %49 = arith.addf %31, %48 : vector<2x14x14xf32>
    %c0_12 = arith.constant 0 : index
    %c0_13 = arith.constant 0 : index
    %c1_14 = arith.constant 1 : index
    %c0_15 = arith.constant 0 : index
    %50 = vector.load %arg0[%c0_12, %c0_13, %c1_14, %c0_15] : memref<2x3x16x16xf32, #tpu.memory_space<vmem>>, vector<2x1x14x14xf32>
    %51 = vector.shape_cast %50 : vector<2x1x14x14xf32> to vector<2x14x14xf32>
    %c3 = arith.constant 3 : index
    %52 = memref.load %arg1[%c3] : memref<108xf32, #tpu.memory_space<smem>>
    %53 = vector.broadcast %52 : f32 to vector<2x14x14xf32>
    %54 = arith.mulf %51, %53 : vector<2x14x14xf32>
    %55 = arith.addf %37, %54 : vector<2x14x14xf32>
    %c30 = arith.constant 30 : index
    %56 = memref.load %arg1[%c30] : memref<108xf32, #tpu.memory_space<smem>>
    %57 = vector.broadcast %56 : f32 to vector<2x14x14xf32>
    %58 = arith.mulf %51, %57 : vector<2x14x14xf32>
    %59 = arith.addf %41, %58 : vector<2x14x14xf32>
    %c57 = arith.constant 57 : index
    %60 = memref.load %arg1[%c57] : memref<108xf32, #tpu.memory_space<smem>>
    %61 = vector.broadcast %60 : f32 to vector<2x14x14xf32>
    %62 = arith.mulf %51, %61 : vector<2x14x14xf32>
    %63 = arith.addf %45, %62 : vector<2x14x14xf32>
    %c84 = arith.constant 84 : index
    %64 = memref.load %arg1[%c84] : memref<108xf32, #tpu.memory_space<smem>>
    %65 = vector.broadcast %64 : f32 to vector<2x14x14xf32>
    %66 = arith.mulf %51, %65 : vector<2x14x14xf32>
    %67 = arith.addf %49, %66 : vector<2x14x14xf32>
    %c0_16 = arith.constant 0 : index
    %c0_17 = arith.constant 0 : index
    %c1_18 = arith.constant 1 : index
    %c1_19 = arith.constant 1 : index
    %68 = vector.load %arg0[%c0_16, %c0_17, %c1_18, %c1_19] : memref<2x3x16x16xf32, #tpu.memory_space<vmem>>, vector<2x1x14x14xf32>
    %69 = vector.shape_cast %68 : vector<2x1x14x14xf32> to vector<2x14x14xf32>
    %c4 = arith.constant 4 : index
    %70 = memref.load %arg1[%c4] : memref<108xf32, #tpu.memory_space<smem>>
    %71 = vector.broadcast %70 : f32 to vector<2x14x14xf32>
    %72 = arith.mulf %69, %71 : vector<2x14x14xf32>
    %73 = arith.addf %55, %72 : vector<2x14x14xf32>
    %c31 = arith.constant 31 : index
    %74 = memref.load %arg1[%c31] : memref<108xf32, #tpu.memory_space<smem>>
    %75 = vector.broadcast %74 : f32 to vector<2x14x14xf32>
    %76 = arith.mulf %69, %75 : vector<2x14x14xf32>
    %77 = arith.addf %59, %76 : vector<2x14x14xf32>
    %c58 = arith.constant 58 : index
    %78 = memref.load %arg1[%c58] : memref<108xf32, #tpu.memory_space<smem>>
    %79 = vector.broadcast %78 : f32 to vector<2x14x14xf32>
    %80 = arith.mulf %69, %79 : vector<2x14x14xf32>
    %81 = arith.addf %63, %80 : vector<2x14x14xf32>
    %c85 = arith.constant 85 : index
    %82 = memref.load %arg1[%c85] : memref<108xf32, #tpu.memory_space<smem>>
    %83 = vector.broadcast %82 : f32 to vector<2x14x14xf32>
    %84 = arith.mulf %69, %83 : vector<2x14x14xf32>
    %85 = arith.addf %67, %84 : vector<2x14x14xf32>
    %c0_20 = arith.constant 0 : index
    %c0_21 = arith.constant 0 : index
    %c1_22 = arith.constant 1 : index
    %c2_23 = arith.constant 2 : index
    %86 = vector.load %arg0[%c0_20, %c0_21, %c1_22, %c2_23] : memref<2x3x16x16xf32, #tpu.memory_space<vmem>>, vector<2x1x14x14xf32>
    %87 = vector.shape_cast %86 : vector<2x1x14x14xf32> to vector<2x14x14xf32>
    %c5 = arith.constant 5 : index
    %88 = memref.load %arg1[%c5] : memref<108xf32, #tpu.memory_space<smem>>
    %89 = vector.broadcast %88 : f32 to vector<2x14x14xf32>
    %90 = arith.mulf %87, %89 : vector<2x14x14xf32>
    %91 = arith.addf %73, %90 : vector<2x14x14xf32>
    %c32 = arith.constant 32 : index
    %92 = memref.load %arg1[%c32] : memref<108xf32, #tpu.memory_space<smem>>
    %93 = vector.broadcast %92 : f32 to vector<2x14x14xf32>
    %94 = arith.mulf %87, %93 : vector<2x14x14xf32>
    %95 = arith.addf %77, %94 : vector<2x14x14xf32>
    %c59 = arith.constant 59 : index
    %96 = memref.load %arg1[%c59] : memref<108xf32, #tpu.memory_space<smem>>
    %97 = vector.broadcast %96 : f32 to vector<2x14x14xf32>
    %98 = arith.mulf %87, %97 : vector<2x14x14xf32>
    %99 = arith.addf %81, %98 : vector<2x14x14xf32>
    %c86 = arith.constant 86 : index
    %100 = memref.load %arg1[%c86] : memref<108xf32, #tpu.memory_space<smem>>
    %101 = vector.broadcast %100 : f32 to vector<2x14x14xf32>
    %102 = arith.mulf %87, %101 : vector<2x14x14xf32>
    %103 = arith.addf %85, %102 : vector<2x14x14xf32>
    %c0_24 = arith.constant 0 : index
    %c0_25 = arith.constant 0 : index
    %c2_26 = arith.constant 2 : index
    %c0_27 = arith.constant 0 : index
    %104 = vector.load %arg0[%c0_24, %c0_25, %c2_26, %c0_27] : memref<2x3x16x16xf32, #tpu.memory_space<vmem>>, vector<2x1x14x14xf32>
    %105 = vector.shape_cast %104 : vector<2x1x14x14xf32> to vector<2x14x14xf32>
    %c6 = arith.constant 6 : index
    %106 = memref.load %arg1[%c6] : memref<108xf32, #tpu.memory_space<smem>>
    %107 = vector.broadcast %106 : f32 to vector<2x14x14xf32>
    %108 = arith.mulf %105, %107 : vector<2x14x14xf32>
    %109 = arith.addf %91, %108 : vector<2x14x14xf32>
    %c33 = arith.constant 33 : index
    %110 = memref.load %arg1[%c33] : memref<108xf32, #tpu.memory_space<smem>>
    %111 = vector.broadcast %110 : f32 to vector<2x14x14xf32>
    %112 = arith.mulf %105, %111 : vector<2x14x14xf32>
    %113 = arith.addf %95, %112 : vector<2x14x14xf32>
    %c60 = arith.constant 60 : index
    %114 = memref.load %arg1[%c60] : memref<108xf32, #tpu.memory_space<smem>>
    %115 = vector.broadcast %114 : f32 to vector<2x14x14xf32>
    %116 = arith.mulf %105, %115 : vector<2x14x14xf32>
    %117 = arith.addf %99, %116 : vector<2x14x14xf32>
    %c87 = arith.constant 87 : index
    %118 = memref.load %arg1[%c87] : memref<108xf32, #tpu.memory_space<smem>>
    %119 = vector.broadcast %118 : f32 to vector<2x14x14xf32>
    %120 = arith.mulf %105, %119 : vector<2x14x14xf32>
    %121 = arith.addf %103, %120 : vector<2x14x14xf32>
    %c0_28 = arith.constant 0 : index
    %c0_29 = arith.constant 0 : index
    %c2_30 = arith.constant 2 : index
    %c1_31 = arith.constant 1 : index
    %122 = vector.load %arg0[%c0_28, %c0_29, %c2_30, %c1_31] : memref<2x3x16x16xf32, #tpu.memory_space<vmem>>, vector<2x1x14x14xf32>
    %123 = vector.shape_cast %122 : vector<2x1x14x14xf32> to vector<2x14x14xf32>
    %c7 = arith.constant 7 : index
    %124 = memref.load %arg1[%c7] : memref<108xf32, #tpu.memory_space<smem>>
    %125 = vector.broadcast %124 : f32 to vector<2x14x14xf32>
    %126 = arith.mulf %123, %125 : vector<2x14x14xf32>
    %127 = arith.addf %109, %126 : vector<2x14x14xf32>
    %c34 = arith.constant 34 : index
    %128 = memref.load %arg1[%c34] : memref<108xf32, #tpu.memory_space<smem>>
    %129 = vector.broadcast %128 : f32 to vector<2x14x14xf32>
    %130 = arith.mulf %123, %129 : vector<2x14x14xf32>
    %131 = arith.addf %113, %130 : vector<2x14x14xf32>
    %c61 = arith.constant 61 : index
    %132 = memref.load %arg1[%c61] : memref<108xf32, #tpu.memory_space<smem>>
    %133 = vector.broadcast %132 : f32 to vector<2x14x14xf32>
    %134 = arith.mulf %123, %133 : vector<2x14x14xf32>
    %135 = arith.addf %117, %134 : vector<2x14x14xf32>
    %c88 = arith.constant 88 : index
    %136 = memref.load %arg1[%c88] : memref<108xf32, #tpu.memory_space<smem>>
    %137 = vector.broadcast %136 : f32 to vector<2x14x14xf32>
    %138 = arith.mulf %123, %137 : vector<2x14x14xf32>
    %139 = arith.addf %121, %138 : vector<2x14x14xf32>
    %c0_32 = arith.constant 0 : index
    %c0_33 = arith.constant 0 : index
    %c2_34 = arith.constant 2 : index
    %c2_35 = arith.constant 2 : index
    %140 = vector.load %arg0[%c0_32, %c0_33, %c2_34, %c2_35] : memref<2x3x16x16xf32, #tpu.memory_space<vmem>>, vector<2x1x14x14xf32>
    %141 = vector.shape_cast %140 : vector<2x1x14x14xf32> to vector<2x14x14xf32>
    %c8 = arith.constant 8 : index
    %142 = memref.load %arg1[%c8] : memref<108xf32, #tpu.memory_space<smem>>
    %143 = vector.broadcast %142 : f32 to vector<2x14x14xf32>
    %144 = arith.mulf %141, %143 : vector<2x14x14xf32>
    %145 = arith.addf %127, %144 : vector<2x14x14xf32>
    %c35 = arith.constant 35 : index
    %146 = memref.load %arg1[%c35] : memref<108xf32, #tpu.memory_space<smem>>
    %147 = vector.broadcast %146 : f32 to vector<2x14x14xf32>
    %148 = arith.mulf %141, %147 : vector<2x14x14xf32>
    %149 = arith.addf %131, %148 : vector<2x14x14xf32>
    %c62 = arith.constant 62 : index
    %150 = memref.load %arg1[%c62] : memref<108xf32, #tpu.memory_space<smem>>
    %151 = vector.broadcast %150 : f32 to vector<2x14x14xf32>
    %152 = arith.mulf %141, %151 : vector<2x14x14xf32>
    %153 = arith.addf %135, %152 : vector<2x14x14xf32>
    %c89 = arith.constant 89 : index
    %154 = memref.load %arg1[%c89] : memref<108xf32, #tpu.memory_space<smem>>
    %155 = vector.broadcast %154 : f32 to vector<2x14x14xf32>
    %156 = arith.mulf %141, %155 : vector<2x14x14xf32>
    %157 = arith.addf %139, %156 : vector<2x14x14xf32>
    %c0_36 = arith.constant 0 : index
    %c1_37 = arith.constant 1 : index
    %c0_38 = arith.constant 0 : index
    %c0_39 = arith.constant 0 : index
    %158 = vector.load %arg0[%c0_36, %c1_37, %c0_38, %c0_39] : memref<2x3x16x16xf32, #tpu.memory_space<vmem>>, vector<2x1x14x14xf32>
    %159 = vector.shape_cast %158 : vector<2x1x14x14xf32> to vector<2x14x14xf32>
    %c9 = arith.constant 9 : index
    %160 = memref.load %arg1[%c9] : memref<108xf32, #tpu.memory_space<smem>>
    %161 = vector.broadcast %160 : f32 to vector<2x14x14xf32>
    %162 = arith.mulf %159, %161 : vector<2x14x14xf32>
    %163 = arith.addf %145, %162 : vector<2x14x14xf32>
    %c36 = arith.constant 36 : index
    %164 = memref.load %arg1[%c36] : memref<108xf32, #tpu.memory_space<smem>>
    %165 = vector.broadcast %164 : f32 to vector<2x14x14xf32>
    %166 = arith.mulf %159, %165 : vector<2x14x14xf32>
    %167 = arith.addf %149, %166 : vector<2x14x14xf32>
    %c63 = arith.constant 63 : index
    %168 = memref.load %arg1[%c63] : memref<108xf32, #tpu.memory_space<smem>>
    %169 = vector.broadcast %168 : f32 to vector<2x14x14xf32>
    %170 = arith.mulf %159, %169 : vector<2x14x14xf32>
    %171 = arith.addf %153, %170 : vector<2x14x14xf32>
    %c90 = arith.constant 90 : index
    %172 = memref.load %arg1[%c90] : memref<108xf32, #tpu.memory_space<smem>>
    %173 = vector.broadcast %172 : f32 to vector<2x14x14xf32>
    %174 = arith.mulf %159, %173 : vector<2x14x14xf32>
    %175 = arith.addf %157, %174 : vector<2x14x14xf32>
    %c0_40 = arith.constant 0 : index
    %c1_41 = arith.constant 1 : index
    %c0_42 = arith.constant 0 : index
    %c1_43 = arith.constant 1 : index
    %176 = vector.load %arg0[%c0_40, %c1_41, %c0_42, %c1_43] : memref<2x3x16x16xf32, #tpu.memory_space<vmem>>, vector<2x1x14x14xf32>
    %177 = vector.shape_cast %176 : vector<2x1x14x14xf32> to vector<2x14x14xf32>
    %c10 = arith.constant 10 : index
    %178 = memref.load %arg1[%c10] : memref<108xf32, #tpu.memory_space<smem>>
    %179 = vector.broadcast %178 : f32 to vector<2x14x14xf32>
    %180 = arith.mulf %177, %179 : vector<2x14x14xf32>
    %181 = arith.addf %163, %180 : vector<2x14x14xf32>
    %c37 = arith.constant 37 : index
    %182 = memref.load %arg1[%c37] : memref<108xf32, #tpu.memory_space<smem>>
    %183 = vector.broadcast %182 : f32 to vector<2x14x14xf32>
    %184 = arith.mulf %177, %183 : vector<2x14x14xf32>
    %185 = arith.addf %167, %184 : vector<2x14x14xf32>
    %c64 = arith.constant 64 : index
    %186 = memref.load %arg1[%c64] : memref<108xf32, #tpu.memory_space<smem>>
    %187 = vector.broadcast %186 : f32 to vector<2x14x14xf32>
    %188 = arith.mulf %177, %187 : vector<2x14x14xf32>
    %189 = arith.addf %171, %188 : vector<2x14x14xf32>
    %c91 = arith.constant 91 : index
    %190 = memref.load %arg1[%c91] : memref<108xf32, #tpu.memory_space<smem>>
    %191 = vector.broadcast %190 : f32 to vector<2x14x14xf32>
    %192 = arith.mulf %177, %191 : vector<2x14x14xf32>
    %193 = arith.addf %175, %192 : vector<2x14x14xf32>
    %c0_44 = arith.constant 0 : index
    %c1_45 = arith.constant 1 : index
    %c0_46 = arith.constant 0 : index
    %c2_47 = arith.constant 2 : index
    %194 = vector.load %arg0[%c0_44, %c1_45, %c0_46, %c2_47] : memref<2x3x16x16xf32, #tpu.memory_space<vmem>>, vector<2x1x14x14xf32>
    %195 = vector.shape_cast %194 : vector<2x1x14x14xf32> to vector<2x14x14xf32>
    %c11 = arith.constant 11 : index
    %196 = memref.load %arg1[%c11] : memref<108xf32, #tpu.memory_space<smem>>
    %197 = vector.broadcast %196 : f32 to vector<2x14x14xf32>
    %198 = arith.mulf %195, %197 : vector<2x14x14xf32>
    %199 = arith.addf %181, %198 : vector<2x14x14xf32>
    %c38 = arith.constant 38 : index
    %200 = memref.load %arg1[%c38] : memref<108xf32, #tpu.memory_space<smem>>
    %201 = vector.broadcast %200 : f32 to vector<2x14x14xf32>
    %202 = arith.mulf %195, %201 : vector<2x14x14xf32>
    %203 = arith.addf %185, %202 : vector<2x14x14xf32>
    %c65 = arith.constant 65 : index
    %204 = memref.load %arg1[%c65] : memref<108xf32, #tpu.memory_space<smem>>
    %205 = vector.broadcast %204 : f32 to vector<2x14x14xf32>
    %206 = arith.mulf %195, %205 : vector<2x14x14xf32>
    %207 = arith.addf %189, %206 : vector<2x14x14xf32>
    %c92 = arith.constant 92 : index
    %208 = memref.load %arg1[%c92] : memref<108xf32, #tpu.memory_space<smem>>
    %209 = vector.broadcast %208 : f32 to vector<2x14x14xf32>
    %210 = arith.mulf %195, %209 : vector<2x14x14xf32>
    %211 = arith.addf %193, %210 : vector<2x14x14xf32>
    %c0_48 = arith.constant 0 : index
    %c1_49 = arith.constant 1 : index
    %c1_50 = arith.constant 1 : index
    %c0_51 = arith.constant 0 : index
    %212 = vector.load %arg0[%c0_48, %c1_49, %c1_50, %c0_51] : memref<2x3x16x16xf32, #tpu.memory_space<vmem>>, vector<2x1x14x14xf32>
    %213 = vector.shape_cast %212 : vector<2x1x14x14xf32> to vector<2x14x14xf32>
    %c12 = arith.constant 12 : index
    %214 = memref.load %arg1[%c12] : memref<108xf32, #tpu.memory_space<smem>>
    %215 = vector.broadcast %214 : f32 to vector<2x14x14xf32>
    %216 = arith.mulf %213, %215 : vector<2x14x14xf32>
    %217 = arith.addf %199, %216 : vector<2x14x14xf32>
    %c39 = arith.constant 39 : index
    %218 = memref.load %arg1[%c39] : memref<108xf32, #tpu.memory_space<smem>>
    %219 = vector.broadcast %218 : f32 to vector<2x14x14xf32>
    %220 = arith.mulf %213, %219 : vector<2x14x14xf32>
    %221 = arith.addf %203, %220 : vector<2x14x14xf32>
    %c66 = arith.constant 66 : index
    %222 = memref.load %arg1[%c66] : memref<108xf32, #tpu.memory_space<smem>>
    %223 = vector.broadcast %222 : f32 to vector<2x14x14xf32>
    %224 = arith.mulf %213, %223 : vector<2x14x14xf32>
    %225 = arith.addf %207, %224 : vector<2x14x14xf32>
    %c93 = arith.constant 93 : index
    %226 = memref.load %arg1[%c93] : memref<108xf32, #tpu.memory_space<smem>>
    %227 = vector.broadcast %226 : f32 to vector<2x14x14xf32>
    %228 = arith.mulf %213, %227 : vector<2x14x14xf32>
    %229 = arith.addf %211, %228 : vector<2x14x14xf32>
    %c0_52 = arith.constant 0 : index
    %c1_53 = arith.constant 1 : index
    %c1_54 = arith.constant 1 : index
    %c1_55 = arith.constant 1 : index
    %230 = vector.load %arg0[%c0_52, %c1_53, %c1_54, %c1_55] : memref<2x3x16x16xf32, #tpu.memory_space<vmem>>, vector<2x1x14x14xf32>
    %231 = vector.shape_cast %230 : vector<2x1x14x14xf32> to vector<2x14x14xf32>
    %c13 = arith.constant 13 : index
    %232 = memref.load %arg1[%c13] : memref<108xf32, #tpu.memory_space<smem>>
    %233 = vector.broadcast %232 : f32 to vector<2x14x14xf32>
    %234 = arith.mulf %231, %233 : vector<2x14x14xf32>
    %235 = arith.addf %217, %234 : vector<2x14x14xf32>
    %c40 = arith.constant 40 : index
    %236 = memref.load %arg1[%c40] : memref<108xf32, #tpu.memory_space<smem>>
    %237 = vector.broadcast %236 : f32 to vector<2x14x14xf32>
    %238 = arith.mulf %231, %237 : vector<2x14x14xf32>
    %239 = arith.addf %221, %238 : vector<2x14x14xf32>
    %c67 = arith.constant 67 : index
    %240 = memref.load %arg1[%c67] : memref<108xf32, #tpu.memory_space<smem>>
    %241 = vector.broadcast %240 : f32 to vector<2x14x14xf32>
    %242 = arith.mulf %231, %241 : vector<2x14x14xf32>
    %243 = arith.addf %225, %242 : vector<2x14x14xf32>
    %c94 = arith.constant 94 : index
    %244 = memref.load %arg1[%c94] : memref<108xf32, #tpu.memory_space<smem>>
    %245 = vector.broadcast %244 : f32 to vector<2x14x14xf32>
    %246 = arith.mulf %231, %245 : vector<2x14x14xf32>
    %247 = arith.addf %229, %246 : vector<2x14x14xf32>
    %c0_56 = arith.constant 0 : index
    %c1_57 = arith.constant 1 : index
    %c1_58 = arith.constant 1 : index
    %c2_59 = arith.constant 2 : index
    %248 = vector.load %arg0[%c0_56, %c1_57, %c1_58, %c2_59] : memref<2x3x16x16xf32, #tpu.memory_space<vmem>>, vector<2x1x14x14xf32>
    %249 = vector.shape_cast %248 : vector<2x1x14x14xf32> to vector<2x14x14xf32>
    %c14 = arith.constant 14 : index
    %250 = memref.load %arg1[%c14] : memref<108xf32, #tpu.memory_space<smem>>
    %251 = vector.broadcast %250 : f32 to vector<2x14x14xf32>
    %252 = arith.mulf %249, %251 : vector<2x14x14xf32>
    %253 = arith.addf %235, %252 : vector<2x14x14xf32>
    %c41 = arith.constant 41 : index
    %254 = memref.load %arg1[%c41] : memref<108xf32, #tpu.memory_space<smem>>
    %255 = vector.broadcast %254 : f32 to vector<2x14x14xf32>
    %256 = arith.mulf %249, %255 : vector<2x14x14xf32>
    %257 = arith.addf %239, %256 : vector<2x14x14xf32>
    %c68 = arith.constant 68 : index
    %258 = memref.load %arg1[%c68] : memref<108xf32, #tpu.memory_space<smem>>
    %259 = vector.broadcast %258 : f32 to vector<2x14x14xf32>
    %260 = arith.mulf %249, %259 : vector<2x14x14xf32>
    %261 = arith.addf %243, %260 : vector<2x14x14xf32>
    %c95 = arith.constant 95 : index
    %262 = memref.load %arg1[%c95] : memref<108xf32, #tpu.memory_space<smem>>
    %263 = vector.broadcast %262 : f32 to vector<2x14x14xf32>
    %264 = arith.mulf %249, %263 : vector<2x14x14xf32>
    %265 = arith.addf %247, %264 : vector<2x14x14xf32>
    %c0_60 = arith.constant 0 : index
    %c1_61 = arith.constant 1 : index
    %c2_62 = arith.constant 2 : index
    %c0_63 = arith.constant 0 : index
    %266 = vector.load %arg0[%c0_60, %c1_61, %c2_62, %c0_63] : memref<2x3x16x16xf32, #tpu.memory_space<vmem>>, vector<2x1x14x14xf32>
    %267 = vector.shape_cast %266 : vector<2x1x14x14xf32> to vector<2x14x14xf32>
    %c15 = arith.constant 15 : index
    %268 = memref.load %arg1[%c15] : memref<108xf32, #tpu.memory_space<smem>>
    %269 = vector.broadcast %268 : f32 to vector<2x14x14xf32>
    %270 = arith.mulf %267, %269 : vector<2x14x14xf32>
    %271 = arith.addf %253, %270 : vector<2x14x14xf32>
    %c42 = arith.constant 42 : index
    %272 = memref.load %arg1[%c42] : memref<108xf32, #tpu.memory_space<smem>>
    %273 = vector.broadcast %272 : f32 to vector<2x14x14xf32>
    %274 = arith.mulf %267, %273 : vector<2x14x14xf32>
    %275 = arith.addf %257, %274 : vector<2x14x14xf32>
    %c69 = arith.constant 69 : index
    %276 = memref.load %arg1[%c69] : memref<108xf32, #tpu.memory_space<smem>>
    %277 = vector.broadcast %276 : f32 to vector<2x14x14xf32>
    %278 = arith.mulf %267, %277 : vector<2x14x14xf32>
    %279 = arith.addf %261, %278 : vector<2x14x14xf32>
    %c96 = arith.constant 96 : index
    %280 = memref.load %arg1[%c96] : memref<108xf32, #tpu.memory_space<smem>>
    %281 = vector.broadcast %280 : f32 to vector<2x14x14xf32>
    %282 = arith.mulf %267, %281 : vector<2x14x14xf32>
    %283 = arith.addf %265, %282 : vector<2x14x14xf32>
    %c0_64 = arith.constant 0 : index
    %c1_65 = arith.constant 1 : index
    %c2_66 = arith.constant 2 : index
    %c1_67 = arith.constant 1 : index
    %284 = vector.load %arg0[%c0_64, %c1_65, %c2_66, %c1_67] : memref<2x3x16x16xf32, #tpu.memory_space<vmem>>, vector<2x1x14x14xf32>
    %285 = vector.shape_cast %284 : vector<2x1x14x14xf32> to vector<2x14x14xf32>
    %c16 = arith.constant 16 : index
    %286 = memref.load %arg1[%c16] : memref<108xf32, #tpu.memory_space<smem>>
    %287 = vector.broadcast %286 : f32 to vector<2x14x14xf32>
    %288 = arith.mulf %285, %287 : vector<2x14x14xf32>
    %289 = arith.addf %271, %288 : vector<2x14x14xf32>
    %c43 = arith.constant 43 : index
    %290 = memref.load %arg1[%c43] : memref<108xf32, #tpu.memory_space<smem>>
    %291 = vector.broadcast %290 : f32 to vector<2x14x14xf32>
    %292 = arith.mulf %285, %291 : vector<2x14x14xf32>
    %293 = arith.addf %275, %292 : vector<2x14x14xf32>
    %c70 = arith.constant 70 : index
    %294 = memref.load %arg1[%c70] : memref<108xf32, #tpu.memory_space<smem>>
    %295 = vector.broadcast %294 : f32 to vector<2x14x14xf32>
    %296 = arith.mulf %285, %295 : vector<2x14x14xf32>
    %297 = arith.addf %279, %296 : vector<2x14x14xf32>
    %c97 = arith.constant 97 : index
    %298 = memref.load %arg1[%c97] : memref<108xf32, #tpu.memory_space<smem>>
    %299 = vector.broadcast %298 : f32 to vector<2x14x14xf32>
    %300 = arith.mulf %285, %299 : vector<2x14x14xf32>
    %301 = arith.addf %283, %300 : vector<2x14x14xf32>
    %c0_68 = arith.constant 0 : index
    %c1_69 = arith.constant 1 : index
    %c2_70 = arith.constant 2 : index
    %c2_71 = arith.constant 2 : index
    %302 = vector.load %arg0[%c0_68, %c1_69, %c2_70, %c2_71] : memref<2x3x16x16xf32, #tpu.memory_space<vmem>>, vector<2x1x14x14xf32>
    %303 = vector.shape_cast %302 : vector<2x1x14x14xf32> to vector<2x14x14xf32>
    %c17 = arith.constant 17 : index
    %304 = memref.load %arg1[%c17] : memref<108xf32, #tpu.memory_space<smem>>
    %305 = vector.broadcast %304 : f32 to vector<2x14x14xf32>
    %306 = arith.mulf %303, %305 : vector<2x14x14xf32>
    %307 = arith.addf %289, %306 : vector<2x14x14xf32>
    %c44 = arith.constant 44 : index
    %308 = memref.load %arg1[%c44] : memref<108xf32, #tpu.memory_space<smem>>
    %309 = vector.broadcast %308 : f32 to vector<2x14x14xf32>
    %310 = arith.mulf %303, %309 : vector<2x14x14xf32>
    %311 = arith.addf %293, %310 : vector<2x14x14xf32>
    %c71 = arith.constant 71 : index
    %312 = memref.load %arg1[%c71] : memref<108xf32, #tpu.memory_space<smem>>
    %313 = vector.broadcast %312 : f32 to vector<2x14x14xf32>
    %314 = arith.mulf %303, %313 : vector<2x14x14xf32>
    %315 = arith.addf %297, %314 : vector<2x14x14xf32>
    %c98 = arith.constant 98 : index
    %316 = memref.load %arg1[%c98] : memref<108xf32, #tpu.memory_space<smem>>
    %317 = vector.broadcast %316 : f32 to vector<2x14x14xf32>
    %318 = arith.mulf %303, %317 : vector<2x14x14xf32>
    %319 = arith.addf %301, %318 : vector<2x14x14xf32>
    %c0_72 = arith.constant 0 : index
    %c2_73 = arith.constant 2 : index
    %c0_74 = arith.constant 0 : index
    %c0_75 = arith.constant 0 : index
    %320 = vector.load %arg0[%c0_72, %c2_73, %c0_74, %c0_75] : memref<2x3x16x16xf32, #tpu.memory_space<vmem>>, vector<2x1x14x14xf32>
    %321 = vector.shape_cast %320 : vector<2x1x14x14xf32> to vector<2x14x14xf32>
    %c18 = arith.constant 18 : index
    %322 = memref.load %arg1[%c18] : memref<108xf32, #tpu.memory_space<smem>>
    %323 = vector.broadcast %322 : f32 to vector<2x14x14xf32>
    %324 = arith.mulf %321, %323 : vector<2x14x14xf32>
    %325 = arith.addf %307, %324 : vector<2x14x14xf32>
    %c45 = arith.constant 45 : index
    %326 = memref.load %arg1[%c45] : memref<108xf32, #tpu.memory_space<smem>>
    %327 = vector.broadcast %326 : f32 to vector<2x14x14xf32>
    %328 = arith.mulf %321, %327 : vector<2x14x14xf32>
    %329 = arith.addf %311, %328 : vector<2x14x14xf32>
    %c72 = arith.constant 72 : index
    %330 = memref.load %arg1[%c72] : memref<108xf32, #tpu.memory_space<smem>>
    %331 = vector.broadcast %330 : f32 to vector<2x14x14xf32>
    %332 = arith.mulf %321, %331 : vector<2x14x14xf32>
    %333 = arith.addf %315, %332 : vector<2x14x14xf32>
    %c99 = arith.constant 99 : index
    %334 = memref.load %arg1[%c99] : memref<108xf32, #tpu.memory_space<smem>>
    %335 = vector.broadcast %334 : f32 to vector<2x14x14xf32>
    %336 = arith.mulf %321, %335 : vector<2x14x14xf32>
    %337 = arith.addf %319, %336 : vector<2x14x14xf32>
    %c0_76 = arith.constant 0 : index
    %c2_77 = arith.constant 2 : index
    %c0_78 = arith.constant 0 : index
    %c1_79 = arith.constant 1 : index
    %338 = vector.load %arg0[%c0_76, %c2_77, %c0_78, %c1_79] : memref<2x3x16x16xf32, #tpu.memory_space<vmem>>, vector<2x1x14x14xf32>
    %339 = vector.shape_cast %338 : vector<2x1x14x14xf32> to vector<2x14x14xf32>
    %c19 = arith.constant 19 : index
    %340 = memref.load %arg1[%c19] : memref<108xf32, #tpu.memory_space<smem>>
    %341 = vector.broadcast %340 : f32 to vector<2x14x14xf32>
    %342 = arith.mulf %339, %341 : vector<2x14x14xf32>
    %343 = arith.addf %325, %342 : vector<2x14x14xf32>
    %c46 = arith.constant 46 : index
    %344 = memref.load %arg1[%c46] : memref<108xf32, #tpu.memory_space<smem>>
    %345 = vector.broadcast %344 : f32 to vector<2x14x14xf32>
    %346 = arith.mulf %339, %345 : vector<2x14x14xf32>
    %347 = arith.addf %329, %346 : vector<2x14x14xf32>
    %c73 = arith.constant 73 : index
    %348 = memref.load %arg1[%c73] : memref<108xf32, #tpu.memory_space<smem>>
    %349 = vector.broadcast %348 : f32 to vector<2x14x14xf32>
    %350 = arith.mulf %339, %349 : vector<2x14x14xf32>
    %351 = arith.addf %333, %350 : vector<2x14x14xf32>
    %c100 = arith.constant 100 : index
    %352 = memref.load %arg1[%c100] : memref<108xf32, #tpu.memory_space<smem>>
    %353 = vector.broadcast %352 : f32 to vector<2x14x14xf32>
    %354 = arith.mulf %339, %353 : vector<2x14x14xf32>
    %355 = arith.addf %337, %354 : vector<2x14x14xf32>
    %c0_80 = arith.constant 0 : index
    %c2_81 = arith.constant 2 : index
    %c0_82 = arith.constant 0 : index
    %c2_83 = arith.constant 2 : index
    %356 = vector.load %arg0[%c0_80, %c2_81, %c0_82, %c2_83] : memref<2x3x16x16xf32, #tpu.memory_space<vmem>>, vector<2x1x14x14xf32>
    %357 = vector.shape_cast %356 : vector<2x1x14x14xf32> to vector<2x14x14xf32>
    %c20 = arith.constant 20 : index
    %358 = memref.load %arg1[%c20] : memref<108xf32, #tpu.memory_space<smem>>
    %359 = vector.broadcast %358 : f32 to vector<2x14x14xf32>
    %360 = arith.mulf %357, %359 : vector<2x14x14xf32>
    %361 = arith.addf %343, %360 : vector<2x14x14xf32>
    %c47 = arith.constant 47 : index
    %362 = memref.load %arg1[%c47] : memref<108xf32, #tpu.memory_space<smem>>
    %363 = vector.broadcast %362 : f32 to vector<2x14x14xf32>
    %364 = arith.mulf %357, %363 : vector<2x14x14xf32>
    %365 = arith.addf %347, %364 : vector<2x14x14xf32>
    %c74 = arith.constant 74 : index
    %366 = memref.load %arg1[%c74] : memref<108xf32, #tpu.memory_space<smem>>
    %367 = vector.broadcast %366 : f32 to vector<2x14x14xf32>
    %368 = arith.mulf %357, %367 : vector<2x14x14xf32>
    %369 = arith.addf %351, %368 : vector<2x14x14xf32>
    %c101 = arith.constant 101 : index
    %370 = memref.load %arg1[%c101] : memref<108xf32, #tpu.memory_space<smem>>
    %371 = vector.broadcast %370 : f32 to vector<2x14x14xf32>
    %372 = arith.mulf %357, %371 : vector<2x14x14xf32>
    %373 = arith.addf %355, %372 : vector<2x14x14xf32>
    %c0_84 = arith.constant 0 : index
    %c2_85 = arith.constant 2 : index
    %c1_86 = arith.constant 1 : index
    %c0_87 = arith.constant 0 : index
    %374 = vector.load %arg0[%c0_84, %c2_85, %c1_86, %c0_87] : memref<2x3x16x16xf32, #tpu.memory_space<vmem>>, vector<2x1x14x14xf32>
    %375 = vector.shape_cast %374 : vector<2x1x14x14xf32> to vector<2x14x14xf32>
    %c21 = arith.constant 21 : index
    %376 = memref.load %arg1[%c21] : memref<108xf32, #tpu.memory_space<smem>>
    %377 = vector.broadcast %376 : f32 to vector<2x14x14xf32>
    %378 = arith.mulf %375, %377 : vector<2x14x14xf32>
    %379 = arith.addf %361, %378 : vector<2x14x14xf32>
    %c48 = arith.constant 48 : index
    %380 = memref.load %arg1[%c48] : memref<108xf32, #tpu.memory_space<smem>>
    %381 = vector.broadcast %380 : f32 to vector<2x14x14xf32>
    %382 = arith.mulf %375, %381 : vector<2x14x14xf32>
    %383 = arith.addf %365, %382 : vector<2x14x14xf32>
    %c75 = arith.constant 75 : index
    %384 = memref.load %arg1[%c75] : memref<108xf32, #tpu.memory_space<smem>>
    %385 = vector.broadcast %384 : f32 to vector<2x14x14xf32>
    %386 = arith.mulf %375, %385 : vector<2x14x14xf32>
    %387 = arith.addf %369, %386 : vector<2x14x14xf32>
    %c102 = arith.constant 102 : index
    %388 = memref.load %arg1[%c102] : memref<108xf32, #tpu.memory_space<smem>>
    %389 = vector.broadcast %388 : f32 to vector<2x14x14xf32>
    %390 = arith.mulf %375, %389 : vector<2x14x14xf32>
    %391 = arith.addf %373, %390 : vector<2x14x14xf32>
    %c0_88 = arith.constant 0 : index
    %c2_89 = arith.constant 2 : index
    %c1_90 = arith.constant 1 : index
    %c1_91 = arith.constant 1 : index
    %392 = vector.load %arg0[%c0_88, %c2_89, %c1_90, %c1_91] : memref<2x3x16x16xf32, #tpu.memory_space<vmem>>, vector<2x1x14x14xf32>
    %393 = vector.shape_cast %392 : vector<2x1x14x14xf32> to vector<2x14x14xf32>
    %c22 = arith.constant 22 : index
    %394 = memref.load %arg1[%c22] : memref<108xf32, #tpu.memory_space<smem>>
    %395 = vector.broadcast %394 : f32 to vector<2x14x14xf32>
    %396 = arith.mulf %393, %395 : vector<2x14x14xf32>
    %397 = arith.addf %379, %396 : vector<2x14x14xf32>
    %c49 = arith.constant 49 : index
    %398 = memref.load %arg1[%c49] : memref<108xf32, #tpu.memory_space<smem>>
    %399 = vector.broadcast %398 : f32 to vector<2x14x14xf32>
    %400 = arith.mulf %393, %399 : vector<2x14x14xf32>
    %401 = arith.addf %383, %400 : vector<2x14x14xf32>
    %c76 = arith.constant 76 : index
    %402 = memref.load %arg1[%c76] : memref<108xf32, #tpu.memory_space<smem>>
    %403 = vector.broadcast %402 : f32 to vector<2x14x14xf32>
    %404 = arith.mulf %393, %403 : vector<2x14x14xf32>
    %405 = arith.addf %387, %404 : vector<2x14x14xf32>
    %c103 = arith.constant 103 : index
    %406 = memref.load %arg1[%c103] : memref<108xf32, #tpu.memory_space<smem>>
    %407 = vector.broadcast %406 : f32 to vector<2x14x14xf32>
    %408 = arith.mulf %393, %407 : vector<2x14x14xf32>
    %409 = arith.addf %391, %408 : vector<2x14x14xf32>
    %c0_92 = arith.constant 0 : index
    %c2_93 = arith.constant 2 : index
    %c1_94 = arith.constant 1 : index
    %c2_95 = arith.constant 2 : index
    %410 = vector.load %arg0[%c0_92, %c2_93, %c1_94, %c2_95] : memref<2x3x16x16xf32, #tpu.memory_space<vmem>>, vector<2x1x14x14xf32>
    %411 = vector.shape_cast %410 : vector<2x1x14x14xf32> to vector<2x14x14xf32>
    %c23 = arith.constant 23 : index
    %412 = memref.load %arg1[%c23] : memref<108xf32, #tpu.memory_space<smem>>
    %413 = vector.broadcast %412 : f32 to vector<2x14x14xf32>
    %414 = arith.mulf %411, %413 : vector<2x14x14xf32>
    %415 = arith.addf %397, %414 : vector<2x14x14xf32>
    %c50 = arith.constant 50 : index
    %416 = memref.load %arg1[%c50] : memref<108xf32, #tpu.memory_space<smem>>
    %417 = vector.broadcast %416 : f32 to vector<2x14x14xf32>
    %418 = arith.mulf %411, %417 : vector<2x14x14xf32>
    %419 = arith.addf %401, %418 : vector<2x14x14xf32>
    %c77 = arith.constant 77 : index
    %420 = memref.load %arg1[%c77] : memref<108xf32, #tpu.memory_space<smem>>
    %421 = vector.broadcast %420 : f32 to vector<2x14x14xf32>
    %422 = arith.mulf %411, %421 : vector<2x14x14xf32>
    %423 = arith.addf %405, %422 : vector<2x14x14xf32>
    %c104 = arith.constant 104 : index
    %424 = memref.load %arg1[%c104] : memref<108xf32, #tpu.memory_space<smem>>
    %425 = vector.broadcast %424 : f32 to vector<2x14x14xf32>
    %426 = arith.mulf %411, %425 : vector<2x14x14xf32>
    %427 = arith.addf %409, %426 : vector<2x14x14xf32>
    %c0_96 = arith.constant 0 : index
    %c2_97 = arith.constant 2 : index
    %c2_98 = arith.constant 2 : index
    %c0_99 = arith.constant 0 : index
    %428 = vector.load %arg0[%c0_96, %c2_97, %c2_98, %c0_99] : memref<2x3x16x16xf32, #tpu.memory_space<vmem>>, vector<2x1x14x14xf32>
    %429 = vector.shape_cast %428 : vector<2x1x14x14xf32> to vector<2x14x14xf32>
    %c24 = arith.constant 24 : index
    %430 = memref.load %arg1[%c24] : memref<108xf32, #tpu.memory_space<smem>>
    %431 = vector.broadcast %430 : f32 to vector<2x14x14xf32>
    %432 = arith.mulf %429, %431 : vector<2x14x14xf32>
    %433 = arith.addf %415, %432 : vector<2x14x14xf32>
    %c51 = arith.constant 51 : index
    %434 = memref.load %arg1[%c51] : memref<108xf32, #tpu.memory_space<smem>>
    %435 = vector.broadcast %434 : f32 to vector<2x14x14xf32>
    %436 = arith.mulf %429, %435 : vector<2x14x14xf32>
    %437 = arith.addf %419, %436 : vector<2x14x14xf32>
    %c78 = arith.constant 78 : index
    %438 = memref.load %arg1[%c78] : memref<108xf32, #tpu.memory_space<smem>>
    %439 = vector.broadcast %438 : f32 to vector<2x14x14xf32>
    %440 = arith.mulf %429, %439 : vector<2x14x14xf32>
    %441 = arith.addf %423, %440 : vector<2x14x14xf32>
    %c105 = arith.constant 105 : index
    %442 = memref.load %arg1[%c105] : memref<108xf32, #tpu.memory_space<smem>>
    %443 = vector.broadcast %442 : f32 to vector<2x14x14xf32>
    %444 = arith.mulf %429, %443 : vector<2x14x14xf32>
    %445 = arith.addf %427, %444 : vector<2x14x14xf32>
    %c0_100 = arith.constant 0 : index
    %c2_101 = arith.constant 2 : index
    %c2_102 = arith.constant 2 : index
    %c1_103 = arith.constant 1 : index
    %446 = vector.load %arg0[%c0_100, %c2_101, %c2_102, %c1_103] : memref<2x3x16x16xf32, #tpu.memory_space<vmem>>, vector<2x1x14x14xf32>
    %447 = vector.shape_cast %446 : vector<2x1x14x14xf32> to vector<2x14x14xf32>
    %c25 = arith.constant 25 : index
    %448 = memref.load %arg1[%c25] : memref<108xf32, #tpu.memory_space<smem>>
    %449 = vector.broadcast %448 : f32 to vector<2x14x14xf32>
    %450 = arith.mulf %447, %449 : vector<2x14x14xf32>
    %451 = arith.addf %433, %450 : vector<2x14x14xf32>
    %c52 = arith.constant 52 : index
    %452 = memref.load %arg1[%c52] : memref<108xf32, #tpu.memory_space<smem>>
    %453 = vector.broadcast %452 : f32 to vector<2x14x14xf32>
    %454 = arith.mulf %447, %453 : vector<2x14x14xf32>
    %455 = arith.addf %437, %454 : vector<2x14x14xf32>
    %c79 = arith.constant 79 : index
    %456 = memref.load %arg1[%c79] : memref<108xf32, #tpu.memory_space<smem>>
    %457 = vector.broadcast %456 : f32 to vector<2x14x14xf32>
    %458 = arith.mulf %447, %457 : vector<2x14x14xf32>
    %459 = arith.addf %441, %458 : vector<2x14x14xf32>
    %c106 = arith.constant 106 : index
    %460 = memref.load %arg1[%c106] : memref<108xf32, #tpu.memory_space<smem>>
    %461 = vector.broadcast %460 : f32 to vector<2x14x14xf32>
    %462 = arith.mulf %447, %461 : vector<2x14x14xf32>
    %463 = arith.addf %445, %462 : vector<2x14x14xf32>
    %c0_104 = arith.constant 0 : index
    %c2_105 = arith.constant 2 : index
    %c2_106 = arith.constant 2 : index
    %c2_107 = arith.constant 2 : index
    %464 = vector.load %arg0[%c0_104, %c2_105, %c2_106, %c2_107] : memref<2x3x16x16xf32, #tpu.memory_space<vmem>>, vector<2x1x14x14xf32>
    %465 = vector.shape_cast %464 : vector<2x1x14x14xf32> to vector<2x14x14xf32>
    %c26 = arith.constant 26 : index
    %466 = memref.load %arg1[%c26] : memref<108xf32, #tpu.memory_space<smem>>
    %467 = vector.broadcast %466 : f32 to vector<2x14x14xf32>
    %468 = arith.mulf %465, %467 : vector<2x14x14xf32>
    %469 = arith.addf %451, %468 : vector<2x14x14xf32>
    %c53 = arith.constant 53 : index
    %470 = memref.load %arg1[%c53] : memref<108xf32, #tpu.memory_space<smem>>
    %471 = vector.broadcast %470 : f32 to vector<2x14x14xf32>
    %472 = arith.mulf %465, %471 : vector<2x14x14xf32>
    %473 = arith.addf %455, %472 : vector<2x14x14xf32>
    %c80 = arith.constant 80 : index
    %474 = memref.load %arg1[%c80] : memref<108xf32, #tpu.memory_space<smem>>
    %475 = vector.broadcast %474 : f32 to vector<2x14x14xf32>
    %476 = arith.mulf %465, %475 : vector<2x14x14xf32>
    %477 = arith.addf %459, %476 : vector<2x14x14xf32>
    %c107 = arith.constant 107 : index
    %478 = memref.load %arg1[%c107] : memref<108xf32, #tpu.memory_space<smem>>
    %479 = vector.broadcast %478 : f32 to vector<2x14x14xf32>
    %480 = arith.mulf %465, %479 : vector<2x14x14xf32>
    %481 = arith.addf %463, %480 : vector<2x14x14xf32>
    %c0_108 = arith.constant 0 : index
    %482 = memref.load %arg2[%c0_108] : memref<4xf32, #tpu.memory_space<smem>>
    %483 = vector.broadcast %482 : f32 to vector<2x14x14xf32>
    %484 = arith.addf %469, %483 : vector<2x14x14xf32>
    %cst = arith.constant 0.000000e+00 : f32
    %485 = vector.broadcast %cst : f32 to vector<2x14x14xf32>
    %486 = arith.maximumf %484, %485 : vector<2x14x14xf32>
    %c1_109 = arith.constant 1 : index
    %487 = memref.load %arg2[%c1_109] : memref<4xf32, #tpu.memory_space<smem>>
    %488 = vector.broadcast %487 : f32 to vector<2x14x14xf32>
    %489 = arith.addf %473, %488 : vector<2x14x14xf32>
    %cst_110 = arith.constant 0.000000e+00 : f32
    %490 = vector.broadcast %cst_110 : f32 to vector<2x14x14xf32>
    %491 = arith.maximumf %489, %490 : vector<2x14x14xf32>
    %c2_111 = arith.constant 2 : index
    %492 = memref.load %arg2[%c2_111] : memref<4xf32, #tpu.memory_space<smem>>
    %493 = vector.broadcast %492 : f32 to vector<2x14x14xf32>
    %494 = arith.addf %477, %493 : vector<2x14x14xf32>
    %cst_112 = arith.constant 0.000000e+00 : f32
    %495 = vector.broadcast %cst_112 : f32 to vector<2x14x14xf32>
    %496 = arith.maximumf %494, %495 : vector<2x14x14xf32>
    %c3_113 = arith.constant 3 : index
    %497 = memref.load %arg2[%c3_113] : memref<4xf32, #tpu.memory_space<smem>>
    %498 = vector.broadcast %497 : f32 to vector<2x14x14xf32>
    %499 = arith.addf %481, %498 : vector<2x14x14xf32>
    %cst_114 = arith.constant 0.000000e+00 : f32
    %500 = vector.broadcast %cst_114 : f32 to vector<2x14x14xf32>
    %501 = arith.maximumf %499, %500 : vector<2x14x14xf32>
    %c0_115 = arith.constant 0 : index
    %c0_116 = arith.constant 0 : index
    %c0_117 = arith.constant 0 : index
    %502 = vector.load %arg14[%c0_115, %c0_116, %c0_117] : memref<2x14x56xf32, #tpu.memory_space<vmem>>, vector<2x14x14xf32>
    tpu.vector_store %arg14[%c0_115, %c0_116, %c0_117], %486 {strides = array<i32>} : memref<2x14x56xf32, #tpu.memory_space<vmem>>, vector<2x14x14xf32>,
    %c0_118 = arith.constant 0 : index
    %c0_119 = arith.constant 0 : index
    %c14_120 = arith.constant 14 : index
    %503 = vector.load %arg14[%c0_118, %c0_119, %c14_120] : memref<2x14x56xf32, #tpu.memory_space<vmem>>, vector<2x14x14xf32>
    tpu.vector_store %arg14[%c0_118, %c0_119, %c14_120], %491 {strides = array<i32>} : memref<2x14x56xf32, #tpu.memory_space<vmem>>, vector<2x14x14xf32>,
    %c0_121 = arith.constant 0 : index
    %c0_122 = arith.constant 0 : index
    %c28_123 = arith.constant 28 : index
    %504 = vector.load %arg14[%c0_121, %c0_122, %c28_123] : memref<2x14x56xf32, #tpu.memory_space<vmem>>, vector<2x14x14xf32>
    tpu.vector_store %arg14[%c0_121, %c0_122, %c28_123], %496 {strides = array<i32>} : memref<2x14x56xf32, #tpu.memory_space<vmem>>, vector<2x14x14xf32>,
    %c0_124 = arith.constant 0 : index
    %c0_125 = arith.constant 0 : index
    %c42_126 = arith.constant 42 : index
    %505 = vector.load %arg14[%c0_124, %c0_125, %c42_126] : memref<2x14x56xf32, #tpu.memory_space<vmem>>, vector<2x14x14xf32>
    tpu.vector_store %arg14[%c0_124, %c0_125, %c42_126], %501 {strides = array<i32>} : memref<2x14x56xf32, #tpu.memory_space<vmem>>, vector<2x14x14xf32>,
    %c0_127 = arith.constant 0 : index
    %c0_128 = arith.constant 0 : index
    %c0_129 = arith.constant 0 : index
    %506 = vector.load %arg14[%c0_127, %c0_128, %c0_129] : memref<2x14x56xf32, #tpu.memory_space<vmem>>, vector<2x14x55xf32>
    %c0_130 = arith.constant 0 : index
    %c0_131 = arith.constant 0 : index
    %c1_132 = arith.constant 1 : index
    %507 = vector.load %arg14[%c0_130, %c0_131, %c1_132] : memref<2x14x56xf32, #tpu.memory_space<vmem>>, vector<2x14x55xf32>
    %508 = arith.maximumf %506, %507 : vector<2x14x55xf32>
    %c0_133 = arith.constant 0 : index
    %c0_134 = arith.constant 0 : index
    %509 = vector.load %arg10[%c0_133, %c0_134] : memref<55x28xf32, #tpu.memory_space<vmem>>, vector<55x28xf32>
    %510 = vector.shape_cast %509 : vector<55x28xf32> to vector<1x55x28xf32>
    %511 = vector.broadcast %510 : vector<1x55x28xf32> to vector<2x55x28xf32>
    "tpu.trace_start"() <{level = 10 : i32, message = "nhw,nwp->nhp"}> : () -> ()
    %cst_135 = arith.constant dense<0.000000e+00> : vector<2x14x28xf32>
    %512 = tpu.matmul %508, %511, %cst_135 {dimension_numbers = #tpu.dot_dimension_numbers<[2], [1], [1], [2], [0, 0, 0, 1, 1, 2], [0], [0]>} : vector<2x14x55xf32>, vector<2x55x28xf32>, vector<2x14x28xf32> -> vector<2x14x28xf32>
    "tpu.trace_stop"() : () -> ()
    %513 = vector.extract_strided_slice %512 {offsets = [0, 0, 0], sizes = [2, 13, 28], strides = [1, 1, 1]} : vector<2x14x28xf32> to vector<2x13x28xf32>
    %514 = vector.extract_strided_slice %512 {offsets = [0, 1, 0], sizes = [2, 13, 28], strides = [1, 1, 1]} : vector<2x14x28xf32> to vector<2x13x28xf32>
    %515 = arith.maximumf %513, %514 : vector<2x13x28xf32>
    %c0_136 = arith.constant 0 : index
    %c0_137 = arith.constant 0 : index
    %516 = vector.load %arg9[%c0_136, %c0_137] : memref<7x13xf32, #tpu.memory_space<vmem>>, vector<7x13xf32>
    %517 = vector.shape_cast %516 : vector<7x13xf32> to vector<1x7x13xf32>
    %518 = vector.broadcast %517 : vector<1x7x13xf32> to vector<2x7x13xf32>
    "tpu.trace_start"() <{level = 10 : i32, message = "nph,nhw->npw"}> : () -> ()
    %cst_138 = arith.constant dense<0.000000e+00> : vector<2x7x28xf32>
    %519 = tpu.matmul %518, %515, %cst_138 {dimension_numbers = #tpu.dot_dimension_numbers<[2], [1], [1], [2], [0, 0, 0, 1, 1, 2], [0], [0]>} : vector<2x7x13xf32>, vector<2x13x28xf32>, vector<2x7x28xf32> -> vector<2x7x28xf32>
    "tpu.trace_stop"() : () -> ()
    %520 = vector.extract_strided_slice %519 {offsets = [0, 0, 0], sizes = [2, 5, 5], strides = [1, 1, 1]} : vector<2x7x28xf32> to vector<2x5x5xf32>
    %c0_139 = arith.constant 0 : index
    %521 = memref.load %arg3[%c0_139] : memref<144xf32, #tpu.memory_space<smem>>
    %522 = vector.broadcast %521 : f32 to vector<2x5x5xf32>
    %523 = arith.mulf %520, %522 : vector<2x5x5xf32>
    %c36_140 = arith.constant 36 : index
    %524 = memref.load %arg3[%c36_140] : memref<144xf32, #tpu.memory_space<smem>>
    %525 = vector.broadcast %524 : f32 to vector<2x5x5xf32>
    %526 = arith.mulf %520, %525 : vector<2x5x5xf32>
    %c72_141 = arith.constant 72 : index
    %527 = memref.load %arg3[%c72_141] : memref<144xf32, #tpu.memory_space<smem>>
    %528 = vector.broadcast %527 : f32 to vector<2x5x5xf32>
    %529 = arith.mulf %520, %528 : vector<2x5x5xf32>
    %c108 = arith.constant 108 : index
    %530 = memref.load %arg3[%c108] : memref<144xf32, #tpu.memory_space<smem>>
    %531 = vector.broadcast %530 : f32 to vector<2x5x5xf32>
    %532 = arith.mulf %520, %531 : vector<2x5x5xf32>
    %533 = vector.extract_strided_slice %519 {offsets = [0, 0, 1], sizes = [2, 5, 5], strides = [1, 1, 1]} : vector<2x7x28xf32> to vector<2x5x5xf32>
    %c1_142 = arith.constant 1 : index
    %534 = memref.load %arg3[%c1_142] : memref<144xf32, #tpu.memory_space<smem>>
    %535 = vector.broadcast %534 : f32 to vector<2x5x5xf32>
    %536 = arith.mulf %533, %535 : vector<2x5x5xf32>
    %537 = arith.addf %523, %536 : vector<2x5x5xf32>
    %c37_143 = arith.constant 37 : index
    %538 = memref.load %arg3[%c37_143] : memref<144xf32, #tpu.memory_space<smem>>
    %539 = vector.broadcast %538 : f32 to vector<2x5x5xf32>
    %540 = arith.mulf %533, %539 : vector<2x5x5xf32>
    %541 = arith.addf %526, %540 : vector<2x5x5xf32>
    %c73_144 = arith.constant 73 : index
    %542 = memref.load %arg3[%c73_144] : memref<144xf32, #tpu.memory_space<smem>>
    %543 = vector.broadcast %542 : f32 to vector<2x5x5xf32>
    %544 = arith.mulf %533, %543 : vector<2x5x5xf32>
    %545 = arith.addf %529, %544 : vector<2x5x5xf32>
    %c109 = arith.constant 109 : index
    %546 = memref.load %arg3[%c109] : memref<144xf32, #tpu.memory_space<smem>>
    %547 = vector.broadcast %546 : f32 to vector<2x5x5xf32>
    %548 = arith.mulf %533, %547 : vector<2x5x5xf32>
    %549 = arith.addf %532, %548 : vector<2x5x5xf32>
    %550 = vector.extract_strided_slice %519 {offsets = [0, 0, 2], sizes = [2, 5, 5], strides = [1, 1, 1]} : vector<2x7x28xf32> to vector<2x5x5xf32>
    %c2_145 = arith.constant 2 : index
    %551 = memref.load %arg3[%c2_145] : memref<144xf32, #tpu.memory_space<smem>>
    %552 = vector.broadcast %551 : f32 to vector<2x5x5xf32>
    %553 = arith.mulf %550, %552 : vector<2x5x5xf32>
    %554 = arith.addf %537, %553 : vector<2x5x5xf32>
    %c38_146 = arith.constant 38 : index
    %555 = memref.load %arg3[%c38_146] : memref<144xf32, #tpu.memory_space<smem>>
    %556 = vector.broadcast %555 : f32 to vector<2x5x5xf32>
    %557 = arith.mulf %550, %556 : vector<2x5x5xf32>
    %558 = arith.addf %541, %557 : vector<2x5x5xf32>
    %c74_147 = arith.constant 74 : index
    %559 = memref.load %arg3[%c74_147] : memref<144xf32, #tpu.memory_space<smem>>
    %560 = vector.broadcast %559 : f32 to vector<2x5x5xf32>
    %561 = arith.mulf %550, %560 : vector<2x5x5xf32>
    %562 = arith.addf %545, %561 : vector<2x5x5xf32>
    %c110 = arith.constant 110 : index
    %563 = memref.load %arg3[%c110] : memref<144xf32, #tpu.memory_space<smem>>
    %564 = vector.broadcast %563 : f32 to vector<2x5x5xf32>
    %565 = arith.mulf %550, %564 : vector<2x5x5xf32>
    %566 = arith.addf %549, %565 : vector<2x5x5xf32>
    %567 = vector.extract_strided_slice %519 {offsets = [0, 1, 0], sizes = [2, 5, 5], strides = [1, 1, 1]} : vector<2x7x28xf32> to vector<2x5x5xf32>
    %c3_148 = arith.constant 3 : index
    %568 = memref.load %arg3[%c3_148] : memref<144xf32, #tpu.memory_space<smem>>
    %569 = vector.broadcast %568 : f32 to vector<2x5x5xf32>
    %570 = arith.mulf %567, %569 : vector<2x5x5xf32>
    %571 = arith.addf %554, %570 : vector<2x5x5xf32>
    %c39_149 = arith.constant 39 : index
    %572 = memref.load %arg3[%c39_149] : memref<144xf32, #tpu.memory_space<smem>>
    %573 = vector.broadcast %572 : f32 to vector<2x5x5xf32>
    %574 = arith.mulf %567, %573 : vector<2x5x5xf32>
    %575 = arith.addf %558, %574 : vector<2x5x5xf32>
    %c75_150 = arith.constant 75 : index
    %576 = memref.load %arg3[%c75_150] : memref<144xf32, #tpu.memory_space<smem>>
    %577 = vector.broadcast %576 : f32 to vector<2x5x5xf32>
    %578 = arith.mulf %567, %577 : vector<2x5x5xf32>
    %579 = arith.addf %562, %578 : vector<2x5x5xf32>
    %c111 = arith.constant 111 : index
    %580 = memref.load %arg3[%c111] : memref<144xf32, #tpu.memory_space<smem>>
    %581 = vector.broadcast %580 : f32 to vector<2x5x5xf32>
    %582 = arith.mulf %567, %581 : vector<2x5x5xf32>
    %583 = arith.addf %566, %582 : vector<2x5x5xf32>
    %584 = vector.extract_strided_slice %519 {offsets = [0, 1, 1], sizes = [2, 5, 5], strides = [1, 1, 1]} : vector<2x7x28xf32> to vector<2x5x5xf32>
    %c4_151 = arith.constant 4 : index
    %585 = memref.load %arg3[%c4_151] : memref<144xf32, #tpu.memory_space<smem>>
    %586 = vector.broadcast %585 : f32 to vector<2x5x5xf32>
    %587 = arith.mulf %584, %586 : vector<2x5x5xf32>
    %588 = arith.addf %571, %587 : vector<2x5x5xf32>
    %c40_152 = arith.constant 40 : index
    %589 = memref.load %arg3[%c40_152] : memref<144xf32, #tpu.memory_space<smem>>
    %590 = vector.broadcast %589 : f32 to vector<2x5x5xf32>
    %591 = arith.mulf %584, %590 : vector<2x5x5xf32>
    %592 = arith.addf %575, %591 : vector<2x5x5xf32>
    %c76_153 = arith.constant 76 : index
    %593 = memref.load %arg3[%c76_153] : memref<144xf32, #tpu.memory_space<smem>>
    %594 = vector.broadcast %593 : f32 to vector<2x5x5xf32>
    %595 = arith.mulf %584, %594 : vector<2x5x5xf32>
    %596 = arith.addf %579, %595 : vector<2x5x5xf32>
    %c112 = arith.constant 112 : index
    %597 = memref.load %arg3[%c112] : memref<144xf32, #tpu.memory_space<smem>>
    %598 = vector.broadcast %597 : f32 to vector<2x5x5xf32>
    %599 = arith.mulf %584, %598 : vector<2x5x5xf32>
    %600 = arith.addf %583, %599 : vector<2x5x5xf32>
    %601 = vector.extract_strided_slice %519 {offsets = [0, 1, 2], sizes = [2, 5, 5], strides = [1, 1, 1]} : vector<2x7x28xf32> to vector<2x5x5xf32>
    %c5_154 = arith.constant 5 : index
    %602 = memref.load %arg3[%c5_154] : memref<144xf32, #tpu.memory_space<smem>>
    %603 = vector.broadcast %602 : f32 to vector<2x5x5xf32>
    %604 = arith.mulf %601, %603 : vector<2x5x5xf32>
    %605 = arith.addf %588, %604 : vector<2x5x5xf32>
    %c41_155 = arith.constant 41 : index
    %606 = memref.load %arg3[%c41_155] : memref<144xf32, #tpu.memory_space<smem>>
    %607 = vector.broadcast %606 : f32 to vector<2x5x5xf32>
    %608 = arith.mulf %601, %607 : vector<2x5x5xf32>
    %609 = arith.addf %592, %608 : vector<2x5x5xf32>
    %c77_156 = arith.constant 77 : index
    %610 = memref.load %arg3[%c77_156] : memref<144xf32, #tpu.memory_space<smem>>
    %611 = vector.broadcast %610 : f32 to vector<2x5x5xf32>
    %612 = arith.mulf %601, %611 : vector<2x5x5xf32>
    %613 = arith.addf %596, %612 : vector<2x5x5xf32>
    %c113 = arith.constant 113 : index
    %614 = memref.load %arg3[%c113] : memref<144xf32, #tpu.memory_space<smem>>
    %615 = vector.broadcast %614 : f32 to vector<2x5x5xf32>
    %616 = arith.mulf %601, %615 : vector<2x5x5xf32>
    %617 = arith.addf %600, %616 : vector<2x5x5xf32>
    %618 = vector.extract_strided_slice %519 {offsets = [0, 2, 0], sizes = [2, 5, 5], strides = [1, 1, 1]} : vector<2x7x28xf32> to vector<2x5x5xf32>
    %c6_157 = arith.constant 6 : index
    %619 = memref.load %arg3[%c6_157] : memref<144xf32, #tpu.memory_space<smem>>
    %620 = vector.broadcast %619 : f32 to vector<2x5x5xf32>
    %621 = arith.mulf %618, %620 : vector<2x5x5xf32>
    %622 = arith.addf %605, %621 : vector<2x5x5xf32>
    %c42_158 = arith.constant 42 : index
    %623 = memref.load %arg3[%c42_158] : memref<144xf32, #tpu.memory_space<smem>>
    %624 = vector.broadcast %623 : f32 to vector<2x5x5xf32>
    %625 = arith.mulf %618, %624 : vector<2x5x5xf32>
    %626 = arith.addf %609, %625 : vector<2x5x5xf32>
    %c78_159 = arith.constant 78 : index
    %627 = memref.load %arg3[%c78_159] : memref<144xf32, #tpu.memory_space<smem>>
    %628 = vector.broadcast %627 : f32 to vector<2x5x5xf32>
    %629 = arith.mulf %618, %628 : vector<2x5x5xf32>
    %630 = arith.addf %613, %629 : vector<2x5x5xf32>
    %c114 = arith.constant 114 : index
    %631 = memref.load %arg3[%c114] : memref<144xf32, #tpu.memory_space<smem>>
    %632 = vector.broadcast %631 : f32 to vector<2x5x5xf32>
    %633 = arith.mulf %618, %632 : vector<2x5x5xf32>
    %634 = arith.addf %617, %633 : vector<2x5x5xf32>
    %635 = vector.extract_strided_slice %519 {offsets = [0, 2, 1], sizes = [2, 5, 5], strides = [1, 1, 1]} : vector<2x7x28xf32> to vector<2x5x5xf32>
    %c7_160 = arith.constant 7 : index
    %636 = memref.load %arg3[%c7_160] : memref<144xf32, #tpu.memory_space<smem>>
    %637 = vector.broadcast %636 : f32 to vector<2x5x5xf32>
    %638 = arith.mulf %635, %637 : vector<2x5x5xf32>
    %639 = arith.addf %622, %638 : vector<2x5x5xf32>
    %c43_161 = arith.constant 43 : index
    %640 = memref.load %arg3[%c43_161] : memref<144xf32, #tpu.memory_space<smem>>
    %641 = vector.broadcast %640 : f32 to vector<2x5x5xf32>
    %642 = arith.mulf %635, %641 : vector<2x5x5xf32>
    %643 = arith.addf %626, %642 : vector<2x5x5xf32>
    %c79_162 = arith.constant 79 : index
    %644 = memref.load %arg3[%c79_162] : memref<144xf32, #tpu.memory_space<smem>>
    %645 = vector.broadcast %644 : f32 to vector<2x5x5xf32>
    %646 = arith.mulf %635, %645 : vector<2x5x5xf32>
    %647 = arith.addf %630, %646 : vector<2x5x5xf32>
    %c115 = arith.constant 115 : index
    %648 = memref.load %arg3[%c115] : memref<144xf32, #tpu.memory_space<smem>>
    %649 = vector.broadcast %648 : f32 to vector<2x5x5xf32>
    %650 = arith.mulf %635, %649 : vector<2x5x5xf32>
    %651 = arith.addf %634, %650 : vector<2x5x5xf32>
    %652 = vector.extract_strided_slice %519 {offsets = [0, 2, 2], sizes = [2, 5, 5], strides = [1, 1, 1]} : vector<2x7x28xf32> to vector<2x5x5xf32>
    %c8_163 = arith.constant 8 : index
    %653 = memref.load %arg3[%c8_163] : memref<144xf32, #tpu.memory_space<smem>>
    %654 = vector.broadcast %653 : f32 to vector<2x5x5xf32>
    %655 = arith.mulf %652, %654 : vector<2x5x5xf32>
    %656 = arith.addf %639, %655 : vector<2x5x5xf32>
    %c44_164 = arith.constant 44 : index
    %657 = memref.load %arg3[%c44_164] : memref<144xf32, #tpu.memory_space<smem>>
    %658 = vector.broadcast %657 : f32 to vector<2x5x5xf32>
    %659 = arith.mulf %652, %658 : vector<2x5x5xf32>
    %660 = arith.addf %643, %659 : vector<2x5x5xf32>
    %c80_165 = arith.constant 80 : index
    %661 = memref.load %arg3[%c80_165] : memref<144xf32, #tpu.memory_space<smem>>
    %662 = vector.broadcast %661 : f32 to vector<2x5x5xf32>
    %663 = arith.mulf %652, %662 : vector<2x5x5xf32>
    %664 = arith.addf %647, %663 : vector<2x5x5xf32>
    %c116 = arith.constant 116 : index
    %665 = memref.load %arg3[%c116] : memref<144xf32, #tpu.memory_space<smem>>
    %666 = vector.broadcast %665 : f32 to vector<2x5x5xf32>
    %667 = arith.mulf %652, %666 : vector<2x5x5xf32>
    %668 = arith.addf %651, %667 : vector<2x5x5xf32>
    %669 = vector.extract_strided_slice %519 {offsets = [0, 0, 7], sizes = [2, 5, 5], strides = [1, 1, 1]} : vector<2x7x28xf32> to vector<2x5x5xf32>
    %c9_166 = arith.constant 9 : index
    %670 = memref.load %arg3[%c9_166] : memref<144xf32, #tpu.memory_space<smem>>
    %671 = vector.broadcast %670 : f32 to vector<2x5x5xf32>
    %672 = arith.mulf %669, %671 : vector<2x5x5xf32>
    %673 = arith.addf %656, %672 : vector<2x5x5xf32>
    %c45_167 = arith.constant 45 : index
    %674 = memref.load %arg3[%c45_167] : memref<144xf32, #tpu.memory_space<smem>>
    %675 = vector.broadcast %674 : f32 to vector<2x5x5xf32>
    %676 = arith.mulf %669, %675 : vector<2x5x5xf32>
    %677 = arith.addf %660, %676 : vector<2x5x5xf32>
    %c81_168 = arith.constant 81 : index
    %678 = memref.load %arg3[%c81_168] : memref<144xf32, #tpu.memory_space<smem>>
    %679 = vector.broadcast %678 : f32 to vector<2x5x5xf32>
    %680 = arith.mulf %669, %679 : vector<2x5x5xf32>
    %681 = arith.addf %664, %680 : vector<2x5x5xf32>
    %c117 = arith.constant 117 : index
    %682 = memref.load %arg3[%c117] : memref<144xf32, #tpu.memory_space<smem>>
    %683 = vector.broadcast %682 : f32 to vector<2x5x5xf32>
    %684 = arith.mulf %669, %683 : vector<2x5x5xf32>
    %685 = arith.addf %668, %684 : vector<2x5x5xf32>
    %686 = vector.extract_strided_slice %519 {offsets = [0, 0, 8], sizes = [2, 5, 5], strides = [1, 1, 1]} : vector<2x7x28xf32> to vector<2x5x5xf32>
    %c10_169 = arith.constant 10 : index
    %687 = memref.load %arg3[%c10_169] : memref<144xf32, #tpu.memory_space<smem>>
    %688 = vector.broadcast %687 : f32 to vector<2x5x5xf32>
    %689 = arith.mulf %686, %688 : vector<2x5x5xf32>
    %690 = arith.addf %673, %689 : vector<2x5x5xf32>
    %c46_170 = arith.constant 46 : index
    %691 = memref.load %arg3[%c46_170] : memref<144xf32, #tpu.memory_space<smem>>
    %692 = vector.broadcast %691 : f32 to vector<2x5x5xf32>
    %693 = arith.mulf %686, %692 : vector<2x5x5xf32>
    %694 = arith.addf %677, %693 : vector<2x5x5xf32>
    %c82_171 = arith.constant 82 : index
    %695 = memref.load %arg3[%c82_171] : memref<144xf32, #tpu.memory_space<smem>>
    %696 = vector.broadcast %695 : f32 to vector<2x5x5xf32>
    %697 = arith.mulf %686, %696 : vector<2x5x5xf32>
    %698 = arith.addf %681, %697 : vector<2x5x5xf32>
    %c118 = arith.constant 118 : index
    %699 = memref.load %arg3[%c118] : memref<144xf32, #tpu.memory_space<smem>>
    %700 = vector.broadcast %699 : f32 to vector<2x5x5xf32>
    %701 = arith.mulf %686, %700 : vector<2x5x5xf32>
    %702 = arith.addf %685, %701 : vector<2x5x5xf32>
    %703 = vector.extract_strided_slice %519 {offsets = [0, 0, 9], sizes = [2, 5, 5], strides = [1, 1, 1]} : vector<2x7x28xf32> to vector<2x5x5xf32>
    %c11_172 = arith.constant 11 : index
    %704 = memref.load %arg3[%c11_172] : memref<144xf32, #tpu.memory_space<smem>>
    %705 = vector.broadcast %704 : f32 to vector<2x5x5xf32>
    %706 = arith.mulf %703, %705 : vector<2x5x5xf32>
    %707 = arith.addf %690, %706 : vector<2x5x5xf32>
    %c47_173 = arith.constant 47 : index
    %708 = memref.load %arg3[%c47_173] : memref<144xf32, #tpu.memory_space<smem>>
    %709 = vector.broadcast %708 : f32 to vector<2x5x5xf32>
    %710 = arith.mulf %703, %709 : vector<2x5x5xf32>
    %711 = arith.addf %694, %710 : vector<2x5x5xf32>
    %c83_174 = arith.constant 83 : index
    %712 = memref.load %arg3[%c83_174] : memref<144xf32, #tpu.memory_space<smem>>
    %713 = vector.broadcast %712 : f32 to vector<2x5x5xf32>
    %714 = arith.mulf %703, %713 : vector<2x5x5xf32>
    %715 = arith.addf %698, %714 : vector<2x5x5xf32>
    %c119 = arith.constant 119 : index
    %716 = memref.load %arg3[%c119] : memref<144xf32, #tpu.memory_space<smem>>
    %717 = vector.broadcast %716 : f32 to vector<2x5x5xf32>
    %718 = arith.mulf %703, %717 : vector<2x5x5xf32>
    %719 = arith.addf %702, %718 : vector<2x5x5xf32>
    %720 = vector.extract_strided_slice %519 {offsets = [0, 1, 7], sizes = [2, 5, 5], strides = [1, 1, 1]} : vector<2x7x28xf32> to vector<2x5x5xf32>
    %c12_175 = arith.constant 12 : index
    %721 = memref.load %arg3[%c12_175] : memref<144xf32, #tpu.memory_space<smem>>
    %722 = vector.broadcast %721 : f32 to vector<2x5x5xf32>
    %723 = arith.mulf %720, %722 : vector<2x5x5xf32>
    %724 = arith.addf %707, %723 : vector<2x5x5xf32>
    %c48_176 = arith.constant 48 : index
    %725 = memref.load %arg3[%c48_176] : memref<144xf32, #tpu.memory_space<smem>>
    %726 = vector.broadcast %725 : f32 to vector<2x5x5xf32>
    %727 = arith.mulf %720, %726 : vector<2x5x5xf32>
    %728 = arith.addf %711, %727 : vector<2x5x5xf32>
    %c84_177 = arith.constant 84 : index
    %729 = memref.load %arg3[%c84_177] : memref<144xf32, #tpu.memory_space<smem>>
    %730 = vector.broadcast %729 : f32 to vector<2x5x5xf32>
    %731 = arith.mulf %720, %730 : vector<2x5x5xf32>
    %732 = arith.addf %715, %731 : vector<2x5x5xf32>
    %c120 = arith.constant 120 : index
    %733 = memref.load %arg3[%c120] : memref<144xf32, #tpu.memory_space<smem>>
    %734 = vector.broadcast %733 : f32 to vector<2x5x5xf32>
    %735 = arith.mulf %720, %734 : vector<2x5x5xf32>
    %736 = arith.addf %719, %735 : vector<2x5x5xf32>
    %737 = vector.extract_strided_slice %519 {offsets = [0, 1, 8], sizes = [2, 5, 5], strides = [1, 1, 1]} : vector<2x7x28xf32> to vector<2x5x5xf32>
    %c13_178 = arith.constant 13 : index
    %738 = memref.load %arg3[%c13_178] : memref<144xf32, #tpu.memory_space<smem>>
    %739 = vector.broadcast %738 : f32 to vector<2x5x5xf32>
    %740 = arith.mulf %737, %739 : vector<2x5x5xf32>
    %741 = arith.addf %724, %740 : vector<2x5x5xf32>
    %c49_179 = arith.constant 49 : index
    %742 = memref.load %arg3[%c49_179] : memref<144xf32, #tpu.memory_space<smem>>
    %743 = vector.broadcast %742 : f32 to vector<2x5x5xf32>
    %744 = arith.mulf %737, %743 : vector<2x5x5xf32>
    %745 = arith.addf %728, %744 : vector<2x5x5xf32>
    %c85_180 = arith.constant 85 : index
    %746 = memref.load %arg3[%c85_180] : memref<144xf32, #tpu.memory_space<smem>>
    %747 = vector.broadcast %746 : f32 to vector<2x5x5xf32>
    %748 = arith.mulf %737, %747 : vector<2x5x5xf32>
    %749 = arith.addf %732, %748 : vector<2x5x5xf32>
    %c121 = arith.constant 121 : index
    %750 = memref.load %arg3[%c121] : memref<144xf32, #tpu.memory_space<smem>>
    %751 = vector.broadcast %750 : f32 to vector<2x5x5xf32>
    %752 = arith.mulf %737, %751 : vector<2x5x5xf32>
    %753 = arith.addf %736, %752 : vector<2x5x5xf32>
    %754 = vector.extract_strided_slice %519 {offsets = [0, 1, 9], sizes = [2, 5, 5], strides = [1, 1, 1]} : vector<2x7x28xf32> to vector<2x5x5xf32>
    %c14_181 = arith.constant 14 : index
    %755 = memref.load %arg3[%c14_181] : memref<144xf32, #tpu.memory_space<smem>>
    %756 = vector.broadcast %755 : f32 to vector<2x5x5xf32>
    %757 = arith.mulf %754, %756 : vector<2x5x5xf32>
    %758 = arith.addf %741, %757 : vector<2x5x5xf32>
    %c50_182 = arith.constant 50 : index
    %759 = memref.load %arg3[%c50_182] : memref<144xf32, #tpu.memory_space<smem>>
    %760 = vector.broadcast %759 : f32 to vector<2x5x5xf32>
    %761 = arith.mulf %754, %760 : vector<2x5x5xf32>
    %762 = arith.addf %745, %761 : vector<2x5x5xf32>
    %c86_183 = arith.constant 86 : index
    %763 = memref.load %arg3[%c86_183] : memref<144xf32, #tpu.memory_space<smem>>
    %764 = vector.broadcast %763 : f32 to vector<2x5x5xf32>
    %765 = arith.mulf %754, %764 : vector<2x5x5xf32>
    %766 = arith.addf %749, %765 : vector<2x5x5xf32>
    %c122 = arith.constant 122 : index
    %767 = memref.load %arg3[%c122] : memref<144xf32, #tpu.memory_space<smem>>
    %768 = vector.broadcast %767 : f32 to vector<2x5x5xf32>
    %769 = arith.mulf %754, %768 : vector<2x5x5xf32>
    %770 = arith.addf %753, %769 : vector<2x5x5xf32>
    %771 = vector.extract_strided_slice %519 {offsets = [0, 2, 7], sizes = [2, 5, 5], strides = [1, 1, 1]} : vector<2x7x28xf32> to vector<2x5x5xf32>
    %c15_184 = arith.constant 15 : index
    %772 = memref.load %arg3[%c15_184] : memref<144xf32, #tpu.memory_space<smem>>
    %773 = vector.broadcast %772 : f32 to vector<2x5x5xf32>
    %774 = arith.mulf %771, %773 : vector<2x5x5xf32>
    %775 = arith.addf %758, %774 : vector<2x5x5xf32>
    %c51_185 = arith.constant 51 : index
    %776 = memref.load %arg3[%c51_185] : memref<144xf32, #tpu.memory_space<smem>>
    %777 = vector.broadcast %776 : f32 to vector<2x5x5xf32>
    %778 = arith.mulf %771, %777 : vector<2x5x5xf32>
    %779 = arith.addf %762, %778 : vector<2x5x5xf32>
    %c87_186 = arith.constant 87 : index
    %780 = memref.load %arg3[%c87_186] : memref<144xf32, #tpu.memory_space<smem>>
    %781 = vector.broadcast %780 : f32 to vector<2x5x5xf32>
    %782 = arith.mulf %771, %781 : vector<2x5x5xf32>
    %783 = arith.addf %766, %782 : vector<2x5x5xf32>
    %c123 = arith.constant 123 : index
    %784 = memref.load %arg3[%c123] : memref<144xf32, #tpu.memory_space<smem>>
    %785 = vector.broadcast %784 : f32 to vector<2x5x5xf32>
    %786 = arith.mulf %771, %785 : vector<2x5x5xf32>
    %787 = arith.addf %770, %786 : vector<2x5x5xf32>
    %788 = vector.extract_strided_slice %519 {offsets = [0, 2, 8], sizes = [2, 5, 5], strides = [1, 1, 1]} : vector<2x7x28xf32> to vector<2x5x5xf32>
    %c16_187 = arith.constant 16 : index
    %789 = memref.load %arg3[%c16_187] : memref<144xf32, #tpu.memory_space<smem>>
    %790 = vector.broadcast %789 : f32 to vector<2x5x5xf32>
    %791 = arith.mulf %788, %790 : vector<2x5x5xf32>
    %792 = arith.addf %775, %791 : vector<2x5x5xf32>
    %c52_188 = arith.constant 52 : index
    %793 = memref.load %arg3[%c52_188] : memref<144xf32, #tpu.memory_space<smem>>
    %794 = vector.broadcast %793 : f32 to vector<2x5x5xf32>
    %795 = arith.mulf %788, %794 : vector<2x5x5xf32>
    %796 = arith.addf %779, %795 : vector<2x5x5xf32>
    %c88_189 = arith.constant 88 : index
    %797 = memref.load %arg3[%c88_189] : memref<144xf32, #tpu.memory_space<smem>>
    %798 = vector.broadcast %797 : f32 to vector<2x5x5xf32>
    %799 = arith.mulf %788, %798 : vector<2x5x5xf32>
    %800 = arith.addf %783, %799 : vector<2x5x5xf32>
    %c124 = arith.constant 124 : index
    %801 = memref.load %arg3[%c124] : memref<144xf32, #tpu.memory_space<smem>>
    %802 = vector.broadcast %801 : f32 to vector<2x5x5xf32>
    %803 = arith.mulf %788, %802 : vector<2x5x5xf32>
    %804 = arith.addf %787, %803 : vector<2x5x5xf32>
    %805 = vector.extract_strided_slice %519 {offsets = [0, 2, 9], sizes = [2, 5, 5], strides = [1, 1, 1]} : vector<2x7x28xf32> to vector<2x5x5xf32>
    %c17_190 = arith.constant 17 : index
    %806 = memref.load %arg3[%c17_190] : memref<144xf32, #tpu.memory_space<smem>>
    %807 = vector.broadcast %806 : f32 to vector<2x5x5xf32>
    %808 = arith.mulf %805, %807 : vector<2x5x5xf32>
    %809 = arith.addf %792, %808 : vector<2x5x5xf32>
    %c53_191 = arith.constant 53 : index
    %810 = memref.load %arg3[%c53_191] : memref<144xf32, #tpu.memory_space<smem>>
    %811 = vector.broadcast %810 : f32 to vector<2x5x5xf32>
    %812 = arith.mulf %805, %811 : vector<2x5x5xf32>
    %813 = arith.addf %796, %812 : vector<2x5x5xf32>
    %c89_192 = arith.constant 89 : index
    %814 = memref.load %arg3[%c89_192] : memref<144xf32, #tpu.memory_space<smem>>
    %815 = vector.broadcast %814 : f32 to vector<2x5x5xf32>
    %816 = arith.mulf %805, %815 : vector<2x5x5xf32>
    %817 = arith.addf %800, %816 : vector<2x5x5xf32>
    %c125 = arith.constant 125 : index
    %818 = memref.load %arg3[%c125] : memref<144xf32, #tpu.memory_space<smem>>
    %819 = vector.broadcast %818 : f32 to vector<2x5x5xf32>
    %820 = arith.mulf %805, %819 : vector<2x5x5xf32>
    %821 = arith.addf %804, %820 : vector<2x5x5xf32>
    %822 = vector.extract_strided_slice %519 {offsets = [0, 0, 14], sizes = [2, 5, 5], strides = [1, 1, 1]} : vector<2x7x28xf32> to vector<2x5x5xf32>
    %c18_193 = arith.constant 18 : index
    %823 = memref.load %arg3[%c18_193] : memref<144xf32, #tpu.memory_space<smem>>
    %824 = vector.broadcast %823 : f32 to vector<2x5x5xf32>
    %825 = arith.mulf %822, %824 : vector<2x5x5xf32>
    %826 = arith.addf %809, %825 : vector<2x5x5xf32>
    %c54_194 = arith.constant 54 : index
    %827 = memref.load %arg3[%c54_194] : memref<144xf32, #tpu.memory_space<smem>>
    %828 = vector.broadcast %827 : f32 to vector<2x5x5xf32>
    %829 = arith.mulf %822, %828 : vector<2x5x5xf32>
    %830 = arith.addf %813, %829 : vector<2x5x5xf32>
    %c90_195 = arith.constant 90 : index
    %831 = memref.load %arg3[%c90_195] : memref<144xf32, #tpu.memory_space<smem>>
    %832 = vector.broadcast %831 : f32 to vector<2x5x5xf32>
    %833 = arith.mulf %822, %832 : vector<2x5x5xf32>
    %834 = arith.addf %817, %833 : vector<2x5x5xf32>
    %c126 = arith.constant 126 : index
    %835 = memref.load %arg3[%c126] : memref<144xf32, #tpu.memory_space<smem>>
    %836 = vector.broadcast %835 : f32 to vector<2x5x5xf32>
    %837 = arith.mulf %822, %836 : vector<2x5x5xf32>
    %838 = arith.addf %821, %837 : vector<2x5x5xf32>
    %839 = vector.extract_strided_slice %519 {offsets = [0, 0, 15], sizes = [2, 5, 5], strides = [1, 1, 1]} : vector<2x7x28xf32> to vector<2x5x5xf32>
    %c19_196 = arith.constant 19 : index
    %840 = memref.load %arg3[%c19_196] : memref<144xf32, #tpu.memory_space<smem>>
    %841 = vector.broadcast %840 : f32 to vector<2x5x5xf32>
    %842 = arith.mulf %839, %841 : vector<2x5x5xf32>
    %843 = arith.addf %826, %842 : vector<2x5x5xf32>
    %c55_197 = arith.constant 55 : index
    %844 = memref.load %arg3[%c55_197] : memref<144xf32, #tpu.memory_space<smem>>
    %845 = vector.broadcast %844 : f32 to vector<2x5x5xf32>
    %846 = arith.mulf %839, %845 : vector<2x5x5xf32>
    %847 = arith.addf %830, %846 : vector<2x5x5xf32>
    %c91_198 = arith.constant 91 : index
    %848 = memref.load %arg3[%c91_198] : memref<144xf32, #tpu.memory_space<smem>>
    %849 = vector.broadcast %848 : f32 to vector<2x5x5xf32>
    %850 = arith.mulf %839, %849 : vector<2x5x5xf32>
    %851 = arith.addf %834, %850 : vector<2x5x5xf32>
    %c127 = arith.constant 127 : index
    %852 = memref.load %arg3[%c127] : memref<144xf32, #tpu.memory_space<smem>>
    %853 = vector.broadcast %852 : f32 to vector<2x5x5xf32>
    %854 = arith.mulf %839, %853 : vector<2x5x5xf32>
    %855 = arith.addf %838, %854 : vector<2x5x5xf32>
    %856 = vector.extract_strided_slice %519 {offsets = [0, 0, 16], sizes = [2, 5, 5], strides = [1, 1, 1]} : vector<2x7x28xf32> to vector<2x5x5xf32>
    %c20_199 = arith.constant 20 : index
    %857 = memref.load %arg3[%c20_199] : memref<144xf32, #tpu.memory_space<smem>>
    %858 = vector.broadcast %857 : f32 to vector<2x5x5xf32>
    %859 = arith.mulf %856, %858 : vector<2x5x5xf32>
    %860 = arith.addf %843, %859 : vector<2x5x5xf32>
    %c56_200 = arith.constant 56 : index
    %861 = memref.load %arg3[%c56_200] : memref<144xf32, #tpu.memory_space<smem>>
    %862 = vector.broadcast %861 : f32 to vector<2x5x5xf32>
    %863 = arith.mulf %856, %862 : vector<2x5x5xf32>
    %864 = arith.addf %847, %863 : vector<2x5x5xf32>
    %c92_201 = arith.constant 92 : index
    %865 = memref.load %arg3[%c92_201] : memref<144xf32, #tpu.memory_space<smem>>
    %866 = vector.broadcast %865 : f32 to vector<2x5x5xf32>
    %867 = arith.mulf %856, %866 : vector<2x5x5xf32>
    %868 = arith.addf %851, %867 : vector<2x5x5xf32>
    %c128 = arith.constant 128 : index
    %869 = memref.load %arg3[%c128] : memref<144xf32, #tpu.memory_space<smem>>
    %870 = vector.broadcast %869 : f32 to vector<2x5x5xf32>
    %871 = arith.mulf %856, %870 : vector<2x5x5xf32>
    %872 = arith.addf %855, %871 : vector<2x5x5xf32>
    %873 = vector.extract_strided_slice %519 {offsets = [0, 1, 14], sizes = [2, 5, 5], strides = [1, 1, 1]} : vector<2x7x28xf32> to vector<2x5x5xf32>
    %c21_202 = arith.constant 21 : index
    %874 = memref.load %arg3[%c21_202] : memref<144xf32, #tpu.memory_space<smem>>
    %875 = vector.broadcast %874 : f32 to vector<2x5x5xf32>
    %876 = arith.mulf %873, %875 : vector<2x5x5xf32>
    %877 = arith.addf %860, %876 : vector<2x5x5xf32>
    %c57_203 = arith.constant 57 : index
    %878 = memref.load %arg3[%c57_203] : memref<144xf32, #tpu.memory_space<smem>>
    %879 = vector.broadcast %878 : f32 to vector<2x5x5xf32>
    %880 = arith.mulf %873, %879 : vector<2x5x5xf32>
    %881 = arith.addf %864, %880 : vector<2x5x5xf32>
    %c93_204 = arith.constant 93 : index
    %882 = memref.load %arg3[%c93_204] : memref<144xf32, #tpu.memory_space<smem>>
    %883 = vector.broadcast %882 : f32 to vector<2x5x5xf32>
    %884 = arith.mulf %873, %883 : vector<2x5x5xf32>
    %885 = arith.addf %868, %884 : vector<2x5x5xf32>
    %c129 = arith.constant 129 : index
    %886 = memref.load %arg3[%c129] : memref<144xf32, #tpu.memory_space<smem>>
    %887 = vector.broadcast %886 : f32 to vector<2x5x5xf32>
    %888 = arith.mulf %873, %887 : vector<2x5x5xf32>
    %889 = arith.addf %872, %888 : vector<2x5x5xf32>
    %890 = vector.extract_strided_slice %519 {offsets = [0, 1, 15], sizes = [2, 5, 5], strides = [1, 1, 1]} : vector<2x7x28xf32> to vector<2x5x5xf32>
    %c22_205 = arith.constant 22 : index
    %891 = memref.load %arg3[%c22_205] : memref<144xf32, #tpu.memory_space<smem>>
    %892 = vector.broadcast %891 : f32 to vector<2x5x5xf32>
    %893 = arith.mulf %890, %892 : vector<2x5x5xf32>
    %894 = arith.addf %877, %893 : vector<2x5x5xf32>
    %c58_206 = arith.constant 58 : index
    %895 = memref.load %arg3[%c58_206] : memref<144xf32, #tpu.memory_space<smem>>
    %896 = vector.broadcast %895 : f32 to vector<2x5x5xf32>
    %897 = arith.mulf %890, %896 : vector<2x5x5xf32>
    %898 = arith.addf %881, %897 : vector<2x5x5xf32>
    %c94_207 = arith.constant 94 : index
    %899 = memref.load %arg3[%c94_207] : memref<144xf32, #tpu.memory_space<smem>>
    %900 = vector.broadcast %899 : f32 to vector<2x5x5xf32>
    %901 = arith.mulf %890, %900 : vector<2x5x5xf32>
    %902 = arith.addf %885, %901 : vector<2x5x5xf32>
    %c130 = arith.constant 130 : index
    %903 = memref.load %arg3[%c130] : memref<144xf32, #tpu.memory_space<smem>>
    %904 = vector.broadcast %903 : f32 to vector<2x5x5xf32>
    %905 = arith.mulf %890, %904 : vector<2x5x5xf32>
    %906 = arith.addf %889, %905 : vector<2x5x5xf32>
    %907 = vector.extract_strided_slice %519 {offsets = [0, 1, 16], sizes = [2, 5, 5], strides = [1, 1, 1]} : vector<2x7x28xf32> to vector<2x5x5xf32>
    %c23_208 = arith.constant 23 : index
    %908 = memref.load %arg3[%c23_208] : memref<144xf32, #tpu.memory_space<smem>>
    %909 = vector.broadcast %908 : f32 to vector<2x5x5xf32>
    %910 = arith.mulf %907, %909 : vector<2x5x5xf32>
    %911 = arith.addf %894, %910 : vector<2x5x5xf32>
    %c59_209 = arith.constant 59 : index
    %912 = memref.load %arg3[%c59_209] : memref<144xf32, #tpu.memory_space<smem>>
    %913 = vector.broadcast %912 : f32 to vector<2x5x5xf32>
    %914 = arith.mulf %907, %913 : vector<2x5x5xf32>
    %915 = arith.addf %898, %914 : vector<2x5x5xf32>
    %c95_210 = arith.constant 95 : index
    %916 = memref.load %arg3[%c95_210] : memref<144xf32, #tpu.memory_space<smem>>
    %917 = vector.broadcast %916 : f32 to vector<2x5x5xf32>
    %918 = arith.mulf %907, %917 : vector<2x5x5xf32>
    %919 = arith.addf %902, %918 : vector<2x5x5xf32>
    %c131 = arith.constant 131 : index
    %920 = memref.load %arg3[%c131] : memref<144xf32, #tpu.memory_space<smem>>
    %921 = vector.broadcast %920 : f32 to vector<2x5x5xf32>
    %922 = arith.mulf %907, %921 : vector<2x5x5xf32>
    %923 = arith.addf %906, %922 : vector<2x5x5xf32>
    %924 = vector.extract_strided_slice %519 {offsets = [0, 2, 14], sizes = [2, 5, 5], strides = [1, 1, 1]} : vector<2x7x28xf32> to vector<2x5x5xf32>
    %c24_211 = arith.constant 24 : index
    %925 = memref.load %arg3[%c24_211] : memref<144xf32, #tpu.memory_space<smem>>
    %926 = vector.broadcast %925 : f32 to vector<2x5x5xf32>
    %927 = arith.mulf %924, %926 : vector<2x5x5xf32>
    %928 = arith.addf %911, %927 : vector<2x5x5xf32>
    %c60_212 = arith.constant 60 : index
    %929 = memref.load %arg3[%c60_212] : memref<144xf32, #tpu.memory_space<smem>>
    %930 = vector.broadcast %929 : f32 to vector<2x5x5xf32>
    %931 = arith.mulf %924, %930 : vector<2x5x5xf32>
    %932 = arith.addf %915, %931 : vector<2x5x5xf32>
    %c96_213 = arith.constant 96 : index
    %933 = memref.load %arg3[%c96_213] : memref<144xf32, #tpu.memory_space<smem>>
    %934 = vector.broadcast %933 : f32 to vector<2x5x5xf32>
    %935 = arith.mulf %924, %934 : vector<2x5x5xf32>
    %936 = arith.addf %919, %935 : vector<2x5x5xf32>
    %c132 = arith.constant 132 : index
    %937 = memref.load %arg3[%c132] : memref<144xf32, #tpu.memory_space<smem>>
    %938 = vector.broadcast %937 : f32 to vector<2x5x5xf32>
    %939 = arith.mulf %924, %938 : vector<2x5x5xf32>
    %940 = arith.addf %923, %939 : vector<2x5x5xf32>
    %941 = vector.extract_strided_slice %519 {offsets = [0, 2, 15], sizes = [2, 5, 5], strides = [1, 1, 1]} : vector<2x7x28xf32> to vector<2x5x5xf32>
    %c25_214 = arith.constant 25 : index
    %942 = memref.load %arg3[%c25_214] : memref<144xf32, #tpu.memory_space<smem>>
    %943 = vector.broadcast %942 : f32 to vector<2x5x5xf32>
    %944 = arith.mulf %941, %943 : vector<2x5x5xf32>
    %945 = arith.addf %928, %944 : vector<2x5x5xf32>
    %c61_215 = arith.constant 61 : index
    %946 = memref.load %arg3[%c61_215] : memref<144xf32, #tpu.memory_space<smem>>
    %947 = vector.broadcast %946 : f32 to vector<2x5x5xf32>
    %948 = arith.mulf %941, %947 : vector<2x5x5xf32>
    %949 = arith.addf %932, %948 : vector<2x5x5xf32>
    %c97_216 = arith.constant 97 : index
    %950 = memref.load %arg3[%c97_216] : memref<144xf32, #tpu.memory_space<smem>>
    %951 = vector.broadcast %950 : f32 to vector<2x5x5xf32>
    %952 = arith.mulf %941, %951 : vector<2x5x5xf32>
    %953 = arith.addf %936, %952 : vector<2x5x5xf32>
    %c133 = arith.constant 133 : index
    %954 = memref.load %arg3[%c133] : memref<144xf32, #tpu.memory_space<smem>>
    %955 = vector.broadcast %954 : f32 to vector<2x5x5xf32>
    %956 = arith.mulf %941, %955 : vector<2x5x5xf32>
    %957 = arith.addf %940, %956 : vector<2x5x5xf32>
    %958 = vector.extract_strided_slice %519 {offsets = [0, 2, 16], sizes = [2, 5, 5], strides = [1, 1, 1]} : vector<2x7x28xf32> to vector<2x5x5xf32>
    %c26_217 = arith.constant 26 : index
    %959 = memref.load %arg3[%c26_217] : memref<144xf32, #tpu.memory_space<smem>>
    %960 = vector.broadcast %959 : f32 to vector<2x5x5xf32>
    %961 = arith.mulf %958, %960 : vector<2x5x5xf32>
    %962 = arith.addf %945, %961 : vector<2x5x5xf32>
    %c62_218 = arith.constant 62 : index
    %963 = memref.load %arg3[%c62_218] : memref<144xf32, #tpu.memory_space<smem>>
    %964 = vector.broadcast %963 : f32 to vector<2x5x5xf32>
    %965 = arith.mulf %958, %964 : vector<2x5x5xf32>
    %966 = arith.addf %949, %965 : vector<2x5x5xf32>
    %c98_219 = arith.constant 98 : index
    %967 = memref.load %arg3[%c98_219] : memref<144xf32, #tpu.memory_space<smem>>
    %968 = vector.broadcast %967 : f32 to vector<2x5x5xf32>
    %969 = arith.mulf %958, %968 : vector<2x5x5xf32>
    %970 = arith.addf %953, %969 : vector<2x5x5xf32>
    %c134 = arith.constant 134 : index
    %971 = memref.load %arg3[%c134] : memref<144xf32, #tpu.memory_space<smem>>
    %972 = vector.broadcast %971 : f32 to vector<2x5x5xf32>
    %973 = arith.mulf %958, %972 : vector<2x5x5xf32>
    %974 = arith.addf %957, %973 : vector<2x5x5xf32>
    %975 = vector.extract_strided_slice %519 {offsets = [0, 0, 21], sizes = [2, 5, 5], strides = [1, 1, 1]} : vector<2x7x28xf32> to vector<2x5x5xf32>
    %c27_220 = arith.constant 27 : index
    %976 = memref.load %arg3[%c27_220] : memref<144xf32, #tpu.memory_space<smem>>
    %977 = vector.broadcast %976 : f32 to vector<2x5x5xf32>
    %978 = arith.mulf %975, %977 : vector<2x5x5xf32>
    %979 = arith.addf %962, %978 : vector<2x5x5xf32>
    %c63_221 = arith.constant 63 : index
    %980 = memref.load %arg3[%c63_221] : memref<144xf32, #tpu.memory_space<smem>>
    %981 = vector.broadcast %980 : f32 to vector<2x5x5xf32>
    %982 = arith.mulf %975, %981 : vector<2x5x5xf32>
    %983 = arith.addf %966, %982 : vector<2x5x5xf32>
    %c99_222 = arith.constant 99 : index
    %984 = memref.load %arg3[%c99_222] : memref<144xf32, #tpu.memory_space<smem>>
    %985 = vector.broadcast %984 : f32 to vector<2x5x5xf32>
    %986 = arith.mulf %975, %985 : vector<2x5x5xf32>
    %987 = arith.addf %970, %986 : vector<2x5x5xf32>
    %c135 = arith.constant 135 : index
    %988 = memref.load %arg3[%c135] : memref<144xf32, #tpu.memory_space<smem>>
    %989 = vector.broadcast %988 : f32 to vector<2x5x5xf32>
    %990 = arith.mulf %975, %989 : vector<2x5x5xf32>
    %991 = arith.addf %974, %990 : vector<2x5x5xf32>
    %992 = vector.extract_strided_slice %519 {offsets = [0, 0, 22], sizes = [2, 5, 5], strides = [1, 1, 1]} : vector<2x7x28xf32> to vector<2x5x5xf32>
    %c28_223 = arith.constant 28 : index
    %993 = memref.load %arg3[%c28_223] : memref<144xf32, #tpu.memory_space<smem>>
    %994 = vector.broadcast %993 : f32 to vector<2x5x5xf32>
    %995 = arith.mulf %992, %994 : vector<2x5x5xf32>
    %996 = arith.addf %979, %995 : vector<2x5x5xf32>
    %c64_224 = arith.constant 64 : index
    %997 = memref.load %arg3[%c64_224] : memref<144xf32, #tpu.memory_space<smem>>
    %998 = vector.broadcast %997 : f32 to vector<2x5x5xf32>
    %999 = arith.mulf %992, %998 : vector<2x5x5xf32>
    %1000 = arith.addf %983, %999 : vector<2x5x5xf32>
    %c100_225 = arith.constant 100 : index
    %1001 = memref.load %arg3[%c100_225] : memref<144xf32, #tpu.memory_space<smem>>
    %1002 = vector.broadcast %1001 : f32 to vector<2x5x5xf32>
    %1003 = arith.mulf %992, %1002 : vector<2x5x5xf32>
    %1004 = arith.addf %987, %1003 : vector<2x5x5xf32>
    %c136 = arith.constant 136 : index
    %1005 = memref.load %arg3[%c136] : memref<144xf32, #tpu.memory_space<smem>>
    %1006 = vector.broadcast %1005 : f32 to vector<2x5x5xf32>
    %1007 = arith.mulf %992, %1006 : vector<2x5x5xf32>
    %1008 = arith.addf %991, %1007 : vector<2x5x5xf32>
    %1009 = vector.extract_strided_slice %519 {offsets = [0, 0, 23], sizes = [2, 5, 5], strides = [1, 1, 1]} : vector<2x7x28xf32> to vector<2x5x5xf32>
    %c29_226 = arith.constant 29 : index
    %1010 = memref.load %arg3[%c29_226] : memref<144xf32, #tpu.memory_space<smem>>
    %1011 = vector.broadcast %1010 : f32 to vector<2x5x5xf32>
    %1012 = arith.mulf %1009, %1011 : vector<2x5x5xf32>
    %1013 = arith.addf %996, %1012 : vector<2x5x5xf32>
    %c65_227 = arith.constant 65 : index
    %1014 = memref.load %arg3[%c65_227] : memref<144xf32, #tpu.memory_space<smem>>
    %1015 = vector.broadcast %1014 : f32 to vector<2x5x5xf32>
    %1016 = arith.mulf %1009, %1015 : vector<2x5x5xf32>
    %1017 = arith.addf %1000, %1016 : vector<2x5x5xf32>
    %c101_228 = arith.constant 101 : index
    %1018 = memref.load %arg3[%c101_228] : memref<144xf32, #tpu.memory_space<smem>>
    %1019 = vector.broadcast %1018 : f32 to vector<2x5x5xf32>
    %1020 = arith.mulf %1009, %1019 : vector<2x5x5xf32>
    %1021 = arith.addf %1004, %1020 : vector<2x5x5xf32>
    %c137 = arith.constant 137 : index
    %1022 = memref.load %arg3[%c137] : memref<144xf32, #tpu.memory_space<smem>>
    %1023 = vector.broadcast %1022 : f32 to vector<2x5x5xf32>
    %1024 = arith.mulf %1009, %1023 : vector<2x5x5xf32>
    %1025 = arith.addf %1008, %1024 : vector<2x5x5xf32>
    %1026 = vector.extract_strided_slice %519 {offsets = [0, 1, 21], sizes = [2, 5, 5], strides = [1, 1, 1]} : vector<2x7x28xf32> to vector<2x5x5xf32>
    %c30_229 = arith.constant 30 : index
    %1027 = memref.load %arg3[%c30_229] : memref<144xf32, #tpu.memory_space<smem>>
    %1028 = vector.broadcast %1027 : f32 to vector<2x5x5xf32>
    %1029 = arith.mulf %1026, %1028 : vector<2x5x5xf32>
    %1030 = arith.addf %1013, %1029 : vector<2x5x5xf32>
    %c66_230 = arith.constant 66 : index
    %1031 = memref.load %arg3[%c66_230] : memref<144xf32, #tpu.memory_space<smem>>
    %1032 = vector.broadcast %1031 : f32 to vector<2x5x5xf32>
    %1033 = arith.mulf %1026, %1032 : vector<2x5x5xf32>
    %1034 = arith.addf %1017, %1033 : vector<2x5x5xf32>
    %c102_231 = arith.constant 102 : index
    %1035 = memref.load %arg3[%c102_231] : memref<144xf32, #tpu.memory_space<smem>>
    %1036 = vector.broadcast %1035 : f32 to vector<2x5x5xf32>
    %1037 = arith.mulf %1026, %1036 : vector<2x5x5xf32>
    %1038 = arith.addf %1021, %1037 : vector<2x5x5xf32>
    %c138 = arith.constant 138 : index
    %1039 = memref.load %arg3[%c138] : memref<144xf32, #tpu.memory_space<smem>>
    %1040 = vector.broadcast %1039 : f32 to vector<2x5x5xf32>
    %1041 = arith.mulf %1026, %1040 : vector<2x5x5xf32>
    %1042 = arith.addf %1025, %1041 : vector<2x5x5xf32>
    %1043 = vector.extract_strided_slice %519 {offsets = [0, 1, 22], sizes = [2, 5, 5], strides = [1, 1, 1]} : vector<2x7x28xf32> to vector<2x5x5xf32>
    %c31_232 = arith.constant 31 : index
    %1044 = memref.load %arg3[%c31_232] : memref<144xf32, #tpu.memory_space<smem>>
    %1045 = vector.broadcast %1044 : f32 to vector<2x5x5xf32>
    %1046 = arith.mulf %1043, %1045 : vector<2x5x5xf32>
    %1047 = arith.addf %1030, %1046 : vector<2x5x5xf32>
    %c67_233 = arith.constant 67 : index
    %1048 = memref.load %arg3[%c67_233] : memref<144xf32, #tpu.memory_space<smem>>
    %1049 = vector.broadcast %1048 : f32 to vector<2x5x5xf32>
    %1050 = arith.mulf %1043, %1049 : vector<2x5x5xf32>
    %1051 = arith.addf %1034, %1050 : vector<2x5x5xf32>
    %c103_234 = arith.constant 103 : index
    %1052 = memref.load %arg3[%c103_234] : memref<144xf32, #tpu.memory_space<smem>>
    %1053 = vector.broadcast %1052 : f32 to vector<2x5x5xf32>
    %1054 = arith.mulf %1043, %1053 : vector<2x5x5xf32>
    %1055 = arith.addf %1038, %1054 : vector<2x5x5xf32>
    %c139 = arith.constant 139 : index
    %1056 = memref.load %arg3[%c139] : memref<144xf32, #tpu.memory_space<smem>>
    %1057 = vector.broadcast %1056 : f32 to vector<2x5x5xf32>
    %1058 = arith.mulf %1043, %1057 : vector<2x5x5xf32>
    %1059 = arith.addf %1042, %1058 : vector<2x5x5xf32>
    %1060 = vector.extract_strided_slice %519 {offsets = [0, 1, 23], sizes = [2, 5, 5], strides = [1, 1, 1]} : vector<2x7x28xf32> to vector<2x5x5xf32>
    %c32_235 = arith.constant 32 : index
    %1061 = memref.load %arg3[%c32_235] : memref<144xf32, #tpu.memory_space<smem>>
    %1062 = vector.broadcast %1061 : f32 to vector<2x5x5xf32>
    %1063 = arith.mulf %1060, %1062 : vector<2x5x5xf32>
    %1064 = arith.addf %1047, %1063 : vector<2x5x5xf32>
    %c68_236 = arith.constant 68 : index
    %1065 = memref.load %arg3[%c68_236] : memref<144xf32, #tpu.memory_space<smem>>
    %1066 = vector.broadcast %1065 : f32 to vector<2x5x5xf32>
    %1067 = arith.mulf %1060, %1066 : vector<2x5x5xf32>
    %1068 = arith.addf %1051, %1067 : vector<2x5x5xf32>
    %c104_237 = arith.constant 104 : index
    %1069 = memref.load %arg3[%c104_237] : memref<144xf32, #tpu.memory_space<smem>>
    %1070 = vector.broadcast %1069 : f32 to vector<2x5x5xf32>
    %1071 = arith.mulf %1060, %1070 : vector<2x5x5xf32>
    %1072 = arith.addf %1055, %1071 : vector<2x5x5xf32>
    %c140 = arith.constant 140 : index
    %1073 = memref.load %arg3[%c140] : memref<144xf32, #tpu.memory_space<smem>>
    %1074 = vector.broadcast %1073 : f32 to vector<2x5x5xf32>
    %1075 = arith.mulf %1060, %1074 : vector<2x5x5xf32>
    %1076 = arith.addf %1059, %1075 : vector<2x5x5xf32>
    %1077 = vector.extract_strided_slice %519 {offsets = [0, 2, 21], sizes = [2, 5, 5], strides = [1, 1, 1]} : vector<2x7x28xf32> to vector<2x5x5xf32>
    %c33_238 = arith.constant 33 : index
    %1078 = memref.load %arg3[%c33_238] : memref<144xf32, #tpu.memory_space<smem>>
    %1079 = vector.broadcast %1078 : f32 to vector<2x5x5xf32>
    %1080 = arith.mulf %1077, %1079 : vector<2x5x5xf32>
    %1081 = arith.addf %1064, %1080 : vector<2x5x5xf32>
    %c69_239 = arith.constant 69 : index
    %1082 = memref.load %arg3[%c69_239] : memref<144xf32, #tpu.memory_space<smem>>
    %1083 = vector.broadcast %1082 : f32 to vector<2x5x5xf32>
    %1084 = arith.mulf %1077, %1083 : vector<2x5x5xf32>
    %1085 = arith.addf %1068, %1084 : vector<2x5x5xf32>
    %c105_240 = arith.constant 105 : index
    %1086 = memref.load %arg3[%c105_240] : memref<144xf32, #tpu.memory_space<smem>>
    %1087 = vector.broadcast %1086 : f32 to vector<2x5x5xf32>
    %1088 = arith.mulf %1077, %1087 : vector<2x5x5xf32>
    %1089 = arith.addf %1072, %1088 : vector<2x5x5xf32>
    %c141 = arith.constant 141 : index
    %1090 = memref.load %arg3[%c141] : memref<144xf32, #tpu.memory_space<smem>>
    %1091 = vector.broadcast %1090 : f32 to vector<2x5x5xf32>
    %1092 = arith.mulf %1077, %1091 : vector<2x5x5xf32>
    %1093 = arith.addf %1076, %1092 : vector<2x5x5xf32>
    %1094 = vector.extract_strided_slice %519 {offsets = [0, 2, 22], sizes = [2, 5, 5], strides = [1, 1, 1]} : vector<2x7x28xf32> to vector<2x5x5xf32>
    %c34_241 = arith.constant 34 : index
    %1095 = memref.load %arg3[%c34_241] : memref<144xf32, #tpu.memory_space<smem>>
    %1096 = vector.broadcast %1095 : f32 to vector<2x5x5xf32>
    %1097 = arith.mulf %1094, %1096 : vector<2x5x5xf32>
    %1098 = arith.addf %1081, %1097 : vector<2x5x5xf32>
    %c70_242 = arith.constant 70 : index
    %1099 = memref.load %arg3[%c70_242] : memref<144xf32, #tpu.memory_space<smem>>
    %1100 = vector.broadcast %1099 : f32 to vector<2x5x5xf32>
    %1101 = arith.mulf %1094, %1100 : vector<2x5x5xf32>
    %1102 = arith.addf %1085, %1101 : vector<2x5x5xf32>
    %c106_243 = arith.constant 106 : index
    %1103 = memref.load %arg3[%c106_243] : memref<144xf32, #tpu.memory_space<smem>>
    %1104 = vector.broadcast %1103 : f32 to vector<2x5x5xf32>
    %1105 = arith.mulf %1094, %1104 : vector<2x5x5xf32>
    %1106 = arith.addf %1089, %1105 : vector<2x5x5xf32>
    %c142 = arith.constant 142 : index
    %1107 = memref.load %arg3[%c142] : memref<144xf32, #tpu.memory_space<smem>>
    %1108 = vector.broadcast %1107 : f32 to vector<2x5x5xf32>
    %1109 = arith.mulf %1094, %1108 : vector<2x5x5xf32>
    %1110 = arith.addf %1093, %1109 : vector<2x5x5xf32>
    %1111 = vector.extract_strided_slice %519 {offsets = [0, 2, 23], sizes = [2, 5, 5], strides = [1, 1, 1]} : vector<2x7x28xf32> to vector<2x5x5xf32>
    %c35_244 = arith.constant 35 : index
    %1112 = memref.load %arg3[%c35_244] : memref<144xf32, #tpu.memory_space<smem>>
    %1113 = vector.broadcast %1112 : f32 to vector<2x5x5xf32>
    %1114 = arith.mulf %1111, %1113 : vector<2x5x5xf32>
    %1115 = arith.addf %1098, %1114 : vector<2x5x5xf32>
    %c71_245 = arith.constant 71 : index
    %1116 = memref.load %arg3[%c71_245] : memref<144xf32, #tpu.memory_space<smem>>
    %1117 = vector.broadcast %1116 : f32 to vector<2x5x5xf32>
    %1118 = arith.mulf %1111, %1117 : vector<2x5x5xf32>
    %1119 = arith.addf %1102, %1118 : vector<2x5x5xf32>
    %c107_246 = arith.constant 107 : index
    %1120 = memref.load %arg3[%c107_246] : memref<144xf32, #tpu.memory_space<smem>>
    %1121 = vector.broadcast %1120 : f32 to vector<2x5x5xf32>
    %1122 = arith.mulf %1111, %1121 : vector<2x5x5xf32>
    %1123 = arith.addf %1106, %1122 : vector<2x5x5xf32>
    %c143 = arith.constant 143 : index
    %1124 = memref.load %arg3[%c143] : memref<144xf32, #tpu.memory_space<smem>>
    %1125 = vector.broadcast %1124 : f32 to vector<2x5x5xf32>
    %1126 = arith.mulf %1111, %1125 : vector<2x5x5xf32>
    %1127 = arith.addf %1110, %1126 : vector<2x5x5xf32>
    %c0_247 = arith.constant 0 : index
    %1128 = memref.load %arg4[%c0_247] : memref<4xf32, #tpu.memory_space<smem>>
    %1129 = vector.broadcast %1128 : f32 to vector<2x5x5xf32>
    %1130 = arith.addf %1115, %1129 : vector<2x5x5xf32>
    %cst_248 = arith.constant 0.000000e+00 : f32
    %1131 = vector.broadcast %cst_248 : f32 to vector<2x5x5xf32>
    %1132 = arith.maximumf %1130, %1131 : vector<2x5x5xf32>
    %c1_249 = arith.constant 1 : index
    %1133 = memref.load %arg4[%c1_249] : memref<4xf32, #tpu.memory_space<smem>>
    %1134 = vector.broadcast %1133 : f32 to vector<2x5x5xf32>
    %1135 = arith.addf %1119, %1134 : vector<2x5x5xf32>
    %cst_250 = arith.constant 0.000000e+00 : f32
    %1136 = vector.broadcast %cst_250 : f32 to vector<2x5x5xf32>
    %1137 = arith.maximumf %1135, %1136 : vector<2x5x5xf32>
    %c2_251 = arith.constant 2 : index
    %1138 = memref.load %arg4[%c2_251] : memref<4xf32, #tpu.memory_space<smem>>
    %1139 = vector.broadcast %1138 : f32 to vector<2x5x5xf32>
    %1140 = arith.addf %1123, %1139 : vector<2x5x5xf32>
    %cst_252 = arith.constant 0.000000e+00 : f32
    %1141 = vector.broadcast %cst_252 : f32 to vector<2x5x5xf32>
    %1142 = arith.maximumf %1140, %1141 : vector<2x5x5xf32>
    %c3_253 = arith.constant 3 : index
    %1143 = memref.load %arg4[%c3_253] : memref<4xf32, #tpu.memory_space<smem>>
    %1144 = vector.broadcast %1143 : f32 to vector<2x5x5xf32>
    %1145 = arith.addf %1127, %1144 : vector<2x5x5xf32>
    %cst_254 = arith.constant 0.000000e+00 : f32
    %1146 = vector.broadcast %cst_254 : f32 to vector<2x5x5xf32>
    %1147 = arith.maximumf %1145, %1146 : vector<2x5x5xf32>
    %c0_255 = arith.constant 0 : index
    %c0_256 = arith.constant 0 : index
    %c0_257 = arith.constant 0 : index
    %1148 = vector.load %arg15[%c0_255, %c0_256, %c0_257] : memref<2x5x20xf32, #tpu.memory_space<vmem>>, vector<2x5x5xf32>
    tpu.vector_store %arg15[%c0_255, %c0_256, %c0_257], %1132 {strides = array<i32>} : memref<2x5x20xf32, #tpu.memory_space<vmem>>, vector<2x5x5xf32>,
    %c0_258 = arith.constant 0 : index
    %c0_259 = arith.constant 0 : index
    %c5_260 = arith.constant 5 : index
    %1149 = vector.load %arg15[%c0_258, %c0_259, %c5_260] : memref<2x5x20xf32, #tpu.memory_space<vmem>>, vector<2x5x5xf32>
    tpu.vector_store %arg15[%c0_258, %c0_259, %c5_260], %1137 {strides = array<i32>} : memref<2x5x20xf32, #tpu.memory_space<vmem>>, vector<2x5x5xf32>,
    %c0_261 = arith.constant 0 : index
    %c0_262 = arith.constant 0 : index
    %c10_263 = arith.constant 10 : index
    %1150 = vector.load %arg15[%c0_261, %c0_262, %c10_263] : memref<2x5x20xf32, #tpu.memory_space<vmem>>, vector<2x5x5xf32>
    tpu.vector_store %arg15[%c0_261, %c0_262, %c10_263], %1142 {strides = array<i32>} : memref<2x5x20xf32, #tpu.memory_space<vmem>>, vector<2x5x5xf32>,
    %c0_264 = arith.constant 0 : index
    %c0_265 = arith.constant 0 : index
    %c15_266 = arith.constant 15 : index
    %1151 = vector.load %arg15[%c0_264, %c0_265, %c15_266] : memref<2x5x20xf32, #tpu.memory_space<vmem>>, vector<2x5x5xf32>
    tpu.vector_store %arg15[%c0_264, %c0_265, %c15_266], %1147 {strides = array<i32>} : memref<2x5x20xf32, #tpu.memory_space<vmem>>, vector<2x5x5xf32>,
    %c0_267 = arith.constant 0 : index
    %c0_268 = arith.constant 0 : index
    %c0_269 = arith.constant 0 : index
    %1152 = vector.load %arg15[%c0_267, %c0_268, %c0_269] : memref<2x5x20xf32, #tpu.memory_space<vmem>>, vector<2x5x19xf32>
    %c0_270 = arith.constant 0 : index
    %c0_271 = arith.constant 0 : index
    %c1_272 = arith.constant 1 : index
    %1153 = vector.load %arg15[%c0_270, %c0_271, %c1_272] : memref<2x5x20xf32, #tpu.memory_space<vmem>>, vector<2x5x19xf32>
    %1154 = arith.maximumf %1152, %1153 : vector<2x5x19xf32>
    %c0_273 = arith.constant 0 : index
    %c0_274 = arith.constant 0 : index
    %1155 = vector.load %arg12[%c0_273, %c0_274] : memref<19x8xf32, #tpu.memory_space<vmem>>, vector<19x8xf32>
    %1156 = vector.shape_cast %1155 : vector<19x8xf32> to vector<1x19x8xf32>
    %1157 = vector.broadcast %1156 : vector<1x19x8xf32> to vector<2x19x8xf32>
    "tpu.trace_start"() <{level = 10 : i32, message = "nhw,nwp->nhp"}> : () -> ()
    %cst_275 = arith.constant dense<0.000000e+00> : vector<2x5x8xf32>
    %1158 = tpu.matmul %1154, %1157, %cst_275 {dimension_numbers = #tpu.dot_dimension_numbers<[2], [1], [1], [2], [0, 0, 0, 1, 1, 2], [0], [0]>} : vector<2x5x19xf32>, vector<2x19x8xf32>, vector<2x5x8xf32> -> vector<2x5x8xf32>
    "tpu.trace_stop"() : () -> ()
    %1159 = vector.extract_strided_slice %1158 {offsets = [0, 0, 0], sizes = [2, 4, 8], strides = [1, 1, 1]} : vector<2x5x8xf32> to vector<2x4x8xf32>
    %1160 = vector.extract_strided_slice %1158 {offsets = [0, 1, 0], sizes = [2, 4, 8], strides = [1, 1, 1]} : vector<2x5x8xf32> to vector<2x4x8xf32>
    %1161 = arith.maximumf %1159, %1160 : vector<2x4x8xf32>
    %c0_276 = arith.constant 0 : index
    %c0_277 = arith.constant 0 : index
    %1162 = vector.load %arg11[%c0_276, %c0_277] : memref<2x4xf32, #tpu.memory_space<vmem>>, vector<2x4xf32>
    %1163 = vector.shape_cast %1162 : vector<2x4xf32> to vector<1x2x4xf32>
    %1164 = vector.broadcast %1163 : vector<1x2x4xf32> to vector<2x2x4xf32>
    "tpu.trace_start"() <{level = 10 : i32, message = "nph,nhw->npw"}> : () -> ()
    %cst_278 = arith.constant dense<0.000000e+00> : vector<2x2x8xf32>
    %1165 = tpu.matmul %1164, %1161, %cst_278 {dimension_numbers = #tpu.dot_dimension_numbers<[2], [1], [1], [2], [0, 0, 0, 1, 1, 2], [0], [0]>} : vector<2x2x4xf32>, vector<2x4x8xf32>, vector<2x2x8xf32> -> vector<2x2x8xf32>
    "tpu.trace_stop"() : () -> ()
    %c0_279 = arith.constant 0 : index
    %c0_280 = arith.constant 0 : index
    %1166 = vector.load %arg6[%c0_279, %c0_280] : memref<1x32xf32, #tpu.memory_space<vmem>>, vector<1x32xf32>
    %1167 = vector.extract_strided_slice %1165 {offsets = [0, 0, 0], sizes = [2, 1, 8], strides = [1, 1, 1]} : vector<2x2x8xf32> to vector<2x1x8xf32>
    %1168 = vector.shape_cast %1167 : vector<2x1x8xf32> to vector<2x8xf32>
    %c0_281 = arith.constant 0 : index
    %c0_282 = arith.constant 0 : index
    %1169 = vector.load %arg5[%c0_281, %c0_282] : memref<16x32xf32, #tpu.memory_space<vmem>>, vector<8x32xf32>
    %cst_283 = arith.constant dense<0.000000e+00> : vector<2x32xf32>
    %1170 = tpu.matmul %1168, %1169, %cst_283 {dimension_numbers = #tpu.dot_dimension_numbers<[1], [0], [0], [1], [0, 0, 1, 1], [], []>} : vector<2x8xf32>, vector<8x32xf32>, vector<2x32xf32> -> vector<2x32xf32>
    %1171 = vector.broadcast %1166 : vector<1x32xf32> to vector<2x32xf32>
    %1172 = arith.addf %1171, %1170 : vector<2x32xf32>
    %1173 = vector.extract_strided_slice %1165 {offsets = [0, 1, 0], sizes = [2, 1, 8], strides = [1, 1, 1]} : vector<2x2x8xf32> to vector<2x1x8xf32>
    %1174 = vector.shape_cast %1173 : vector<2x1x8xf32> to vector<2x8xf32>
    %c8_284 = arith.constant 8 : index
    %c0_285 = arith.constant 0 : index
    %1175 = vector.load %arg5[%c8_284, %c0_285] : memref<16x32xf32, #tpu.memory_space<vmem>>, vector<8x32xf32>
    %cst_286 = arith.constant dense<0.000000e+00> : vector<2x32xf32>
    %1176 = tpu.matmul %1174, %1175, %cst_286 {dimension_numbers = #tpu.dot_dimension_numbers<[1], [0], [0], [1], [0, 0, 1, 1], [], []>} : vector<2x8xf32>, vector<8x32xf32>, vector<2x32xf32> -> vector<2x32xf32>
    %1177 = arith.addf %1172, %1176 : vector<2x32xf32>
    %cst_287 = arith.constant 0.000000e+00 : f32
    %1178 = vector.broadcast %cst_287 : f32 to vector<2x32xf32>
    %1179 = arith.maximumf %1177, %1178 : vector<2x32xf32>
    %c0_288 = arith.constant 0 : index
    %c0_289 = arith.constant 0 : index
    %1180 = vector.load %arg7[%c0_288, %c0_289] : memref<32x6xf32, #tpu.memory_space<vmem>>, vector<32x6xf32>
    %cst_290 = arith.constant dense<0.000000e+00> : vector<2x6xf32>
    %1181 = tpu.matmul %1179, %1180, %cst_290 {dimension_numbers = #tpu.dot_dimension_numbers<[1], [0], [0], [1], [0, 0, 1, 1], [], []>} : vector<2x32xf32>, vector<32x6xf32>, vector<2x6xf32> -> vector<2x6xf32>
    %c0_291 = arith.constant 0 : index
    %c0_292 = arith.constant 0 : index
    %1182 = vector.load %arg8[%c0_291, %c0_292] : memref<1x6xf32, #tpu.memory_space<vmem>>, vector<1x6xf32>
    %1183 = vector.broadcast %1182 : vector<1x6xf32> to vector<2x6xf32>
    %1184 = arith.addf %1181, %1183 : vector<2x6xf32>
    %c0_293 = arith.constant 0 : index
    %c0_294 = arith.constant 0 : index
    %1185 = vector.load %arg13[%c0_293, %c0_294] : memref<2x6xf32, #tpu.memory_space<vmem>>, vector<2x6xf32>
    tpu.vector_store %arg13[%c0_293, %c0_294], %1184 {strides = array<i32>} : memref<2x6xf32, #tpu.memory_space<vmem>>, vector<2x6xf32>,
    return
  }
}

</mosaic_0001>

<bundles_post_ra>
// kernel: cnn_forward.1
= control target key start
LH: loop header
LB: loop body
LE: loop exit
PB: predicated region body
PF: predicated region fallthrough
CT: control target
= control target key end

     0   :  { %s10671_s0 = inlined_call_operand.hbm [shape: f32[2,3,16,16], index: 0, kind: input, shape index: {}]   ;;  %s10672_s1 = inlined_call_operand.vmem [shape: f32[108], index: 1, kind: input, shape index: {}]   ;;  %s10673_s2 = inlined_call_operand.hbm [shape: f32[4], index: 2, kind: input, shape index: {}]   ;;  %s10674_s3 = inlined_call_operand.vmem [shape: f32[144], index: 3, kind: input, shape index: {}]   ;;  %s10675_s4 = inlined_call_operand.hbm [shape: f32[4], index: 4, kind: input, shape index: {}]   ;;  %s10676_s5 = inlined_call_operand.vmem [shape: f32[16,32], index: 5, kind: input, shape index: {}]   ;;  %s10677_s6 = inlined_call_operand.hbm [shape: f32[1,32], index: 6, kind: input, shape index: {}]   ;;  %s10678_s7 = inlined_call_operand.vmem [shape: f32[32,6], index: 7, kind: input, shape index: {}]   ;;  %s10679_s8 = inlined_call_operand.hbm [shape: f32[1,6], index: 8, kind: input, shape index: {}]   ;;  %s10680_s9 = inlined_call_operand.vmem [shape: f32[7,13], index: 9, kind: input, shape index: {}]   ;;  %s10681_s10 = inlined_call_operand.vmem [shape: f32[55,28], index: 10, kind: input, shape index: {}]   ;;  %s10682_s11 = inlined_call_operand.vmem [shape: f32[2,4], index: 11, kind: input, shape index: {}]   ;;  %s10683_s12 = inlined_call_operand.vmem [shape: f32[19,8], index: 12, kind: input, shape index: {}]   ;;  %s10684_s13 = inlined_call_operand.hbm [shape: f32[2,6], index: 13, kind: output, shape index: {}]  }
   0x1   :  { %10735 = sst [smem:[#allocation223_spill]] %s10676_s5 }
   0x2   :  { %10736 = sst [smem:[#allocation224_spill]] %s10678_s7 }
   0x3   :  { %10737 = sst [smem:[#allocation225_spill]] %s10682_s11 }
   0x4   :  { %10738 = sst [smem:[#allocation226_spill]] %s10683_s12 }
   0x5   :  { %10739 = sst [smem:[#allocation227_spill]] %s10684_s13 }
   0x6   :  { %18 = vsyncpa [#allocation5], 0 }
   0x7   :  { %19 = vsyncpa [#allocation8], 0 }
   0x8   :  { %20 = vsyncpa [#allocation7], 0 }
   0x9   :  { %21 = vsyncpa [#allocation12], 0 }
   0xa   :  { %22 = vsyncpa [#allocation14], 0 }
   0xb   :  { %23 = vsyncpa [#allocation16], 0 }
   0xc   :  { %24 = vsyncpa [#allocation6], 0  ;;  %s6305_s25 = smov [#allocation15]   ;;  %s6306_s27 = smov [#allocation4]  }
   0xd   :  { %s81_s26 = sshll.u32 %s6305_s25, 4  ;;  %s30_s28 = sshll.u32 %s6306_s27, 4  ;;  %s82_s26 = int_to_ptr.vmem [resolvable:$true] %s81_s26  ;;  %s31_s28 = int_to_ptr.vmem [resolvable:$true] %s30_s28 }
   0xe   :  { %s6179_s29 = scalar_lea.vmem %s82_s26, 16  ;;  %s6183_s30 = scalar_lea.vmem %s82_s26, 32 }
   0xf   :  { %p6180_p0 = scmp.ne.s32.totalorder %s82_s26, %s6179_s29  ;;  %p6184_p1 = scmp.lt.s32.totalorder %s82_s26, %s82_s26 }
  0x10   :  { %p6185_p2 = scmp.lt.s32.totalorder %s6183_s30, %s6179_s29 }
  0x12   :  { %p6186_p3 = por %p6185_p2, %p6184_p1 }
  0x14   :  { %p6187_p4 = pnand %p6186_p3, %p6180_p0 }
  0x16   :  { %6190 = shalt.err (!%p6187_p4)
}
  0x17   :  { %84 = dma.hbm_to_vmem [thread:$0]  %s10677_s6, 16, %s82_s26, [#allocation16]  }
  0x18   :  { %s6199_s16 = scalar_lea.vmem %s31_s28, 1536  ;;  %p6204_p6 = scmp.lt.s32.totalorder %s31_s28, %s31_s28 }
  0x19   :  { %p6200_p5 = scmp.ne.s32.totalorder %s31_s28, %s6199_s16  ;;  %p6205_p7 = scmp.lt.s32.totalorder %s6199_s16, %s6199_s16 }
  0x1b   :  { %p6206_p8 = por %p6205_p7, %p6204_p6 }
  0x1d   :  { %p6207_p9 = pnand %p6206_p8, %p6200_p5 }
  0x1f   :  { %6210 = shalt.err (!%p6207_p9)
}
  0x20   :  { %s6307_s17 = smov 128   ;;  %s6308_s18 = smov 8  }
  0x21   :  { %36 = dma.hbm_to_vmem [thread:$0]  %s10671_s0, 1536, %s31_s28, [#allocation5], %s6307_s17, %s6307_s17, %s6308_s18  }
  0x22   :  { %s43_s23 = sshll.u32 %s10672_s1, 4  ;;  %s44_s23 = int_to_ptr.vmem [resolvable:$true] %s43_s23 }
  0x23   :  { %s6211_s24 = scalar_lea.vmem %s44_s23, 16  ;;  %p6216_p11 = scmp.lt.s32.totalorder %s44_s23, %s44_s23 }
  0x24   :  { %p6212_p10 = scmp.ne.s32.totalorder %s44_s23, %s6211_s24  ;;  %p6217_p12 = scmp.lt.s32.totalorder %s6211_s24, %s6211_s24 }
  0x26   :  { %p6218_p13 = por %p6217_p12, %p6216_p11 }
  0x28   :  { %p6219_p0 = pnand %p6218_p13, %p6212_p10 }
  0x2a   :  { %6222 = shalt.err (!%p6219_p0)
}
  0x2b   :  { %s6309_s6 = smov [#allocation9]   ;;  %s6310_s25 = smov [#allocation10]  }
  0x2c   :  { %46 = dma.vmem_to_smem %s44_s23, 16, %s6309_s6, [#allocation8]  }
  0x2d   :  { %54 = dma.hbm_to_smem %s10673_s2, 16, %s6310_s25, [#allocation7]  }
  0x2e   :  { %s61_s29 = sshll.u32 %s10674_s3, 4  ;;  %s62_s29 = int_to_ptr.vmem [resolvable:$true] %s61_s29 }
  0x2f   :  { %s6231_s1 = scalar_lea.vmem %s62_s29, 32  ;;  %p6236_p2 = scmp.lt.s32.totalorder %s62_s29, %s62_s29 }
  0x30   :  { %p6232_p1 = scmp.ne.s32.totalorder %s62_s29, %s6231_s1  ;;  %p6237_p3 = scmp.lt.s32.totalorder %s6231_s1, %s6231_s1 }
  0x32   :  { %p6238_p4 = por %p6237_p3, %p6236_p2 }
  0x34   :  { %p6239_p5 = pnand %p6238_p4, %p6232_p1 }
  0x36   :  { %6242 = shalt.err (!%p6239_p5)
}
  0x37   :  { %s6311_s30 = smov [#allocation11]   ;;  %s6312_s14 = smov [#allocation13]  }
  0x38   :  { %64 = dma.vmem_to_smem %s62_s29, 32, %s6311_s30, [#allocation12]  }
  0x39   :  { %72 = dma.hbm_to_smem %s10675_s4, 16, %s6312_s14, [#allocation14]  }
  0x3a   :  { %s6313_s2 = smov [#allocation17]  }
  0x3b   :  { %s93_s17 = sshll.u32 %s6313_s2, 4  ;;  %s94_s17 = int_to_ptr.vmem [resolvable:$true] %s93_s17 }
  0x3c   :  { %s6259_s18 = scalar_lea.vmem %s94_s17, 16  ;;  %s6263_s3 = scalar_lea.vmem %s94_s17, 32 }
  0x3d   :  { %p6260_p6 = scmp.ne.s32.totalorder %s94_s17, %s6259_s18  ;;  %p6264_p7 = scmp.lt.s32.totalorder %s94_s17, %s94_s17 }
  0x3e   :  { %p6265_p8 = scmp.lt.s32.totalorder %s6263_s3, %s6259_s18 }
  0x40   :  { %p6266_p9 = por %p6265_p8, %p6264_p7 }
  0x42   :  { %p6267_p10 = pnand %p6266_p9, %p6260_p6 }
  0x44   :  { %6270 = shalt.err (!%p6267_p10)
}
  0x45   :  { %96 = dma.hbm_to_vmem [thread:$0]  %s10679_s8, 16, %s94_s17, [#allocation16]  }
  0x46   :  { %6291 = dma.done.wait [#allocation5], 1536  }
  0x47   :  { %6292 = vsyncadd [#allocation5], 4294965760 }
  0x48   :  { %6293 = dma.done.wait [#allocation8], 16  }
  0x49   :  { %6294 = vsyncadd [#allocation8], 4294967280 }
  0x4a   :  { %6295 = dma.done.wait [#allocation7], 16  }
  0x4b   :  { %6296 = vsyncadd [#allocation7], 4294967280 }
  0x4c   :  { %6297 = dma.done.wait [#allocation12], 32  }
  0x4d   :  { %6298 = vsyncadd [#allocation12], 4294967264 }
  0x4e   :  { %6299 = dma.done.wait [#allocation14], 16  }
  0x4f   :  { %6300 = vsyncadd [#allocation14], 4294967280 }
  0x50   :  { %6301 = dma.done.wait [#allocation16], 32  }
  0x51   :  { %6302 = vsyncadd [#allocation16], 4294967264 }
  0x52   :  { %126 = sfence }
  0x53   :  { %s5659_s4 = sld [smem:[#allocation9 + $0x37]]  ;;  %v127_v0 = vld [vmem:[#allocation4] sm:$0xff]  ;;  %v128_v2 = vld [vmem:[#allocation4 + $0x8] sm:$0x3f]  ;;  %s10689_s8 = smov 127   ;;  %v129_v14 = vld [vmem:[#allocation4 + $0x30] sm:$0xff] }
  0x54   :  { %s5658_s21 = sld [smem:[#allocation9 + $0x1c]]  ;;  %s10687_s25 = smov 126   ;;  %v130_v21 = vld [vmem:[#allocation4 + $0x38] sm:$0x3f]  ;;  %v363_v28 = vld [vmem:[#allocation4 + $0x1] sm:$0xff]  ;;  %vm2531_vm0 = vcmask 1046528  }
  0x55   :  { %s5662_s22 = sld [smem:[#allocation9 + $0x1d]]  ;;  %v364_v35 = vld [vmem:[#allocation4 + $0x9] sm:$0x3f]  ;;  %v365_v48 = vld [vmem:[#allocation4 + $0x31] sm:$0xff]  ;;  %v366_v55 = vld [vmem:[#allocation4 + $0x39] sm:$0x3f] }
  0x56   :  { %s5660_s23 = sld [smem:[#allocation9 + $0x52]]  ;;  %v615_v62 = vld [vmem:[#allocation4 + $0x2] sm:$0xff]  ;;  %vm2423_vm1 = vcmask 111616   ;;  %vm2421_vm2 = vcmask 113664   ;;  %vm2445_vm3 = vcmask 226416   ;;  %vm2443_vm4 = vcmask 228464  }
  0x57   :  { %s5663_s24 = sld [smem:[#allocation9 + $0x38]]  ;;  %vm2467_vm5 = vcmask 341216   ;;  %vm2465_vm6 = vcmask 343264   ;;  %vm2489_vm7 = vcmask 456016   ;;  %vm2487_vm8 = vcmask 458064   ;;  %s11200_s13 = smov 119  }
  0x58   :  { %s5664_s6 = sld [smem:[#allocation9 + $0x53]]  ;;  %vm2524_vm9 = vcmask 449536   ;;  %vm6320_vm10 = vmmov 0   ;;  %vm2714_vm11 = vcmask 1044480   ;;  %vm2710_vm12 = vcmask 105472   ;;  %s11203_s11 = smov 114  }
  0x59   :  { %v208_v1 = vstv %s5659_s4  ;;  %s5670_s26 = sld [smem:[#allocation9 + $0x1f]]  ;;  %s11204_s12 = smov 127   ;;  %vm5076_vm13 = vcmask 1042432   ;;  %vm5021_vm14 = vcmask 36864   ;;  %vm5032_vm15 = vcmask 77864  }
  0x5a   :  { %v209_v3 = vmul.f32 %v208_v1, %v127_v0  ;;  %v182_v4 = vstv %s5658_s21  ;;  %v210_v6 = vmul.f32 %v208_v1, %v128_v2  ;;  %v211_v22 = vmul.f32 %v208_v1, %v129_v14  ;;  %s5671_s27 = sld [smem:[#allocation9 + $0x3a]] }
  0x5b   :  { %v183_v5 = vmul.f32 %v182_v4, %v127_v0  ;;  %v184_v7 = vmul.f32 %v182_v4, %v128_v2  ;;  %v286_v8 = vstv %s5662_s22  ;;  %v185_v16 = vmul.f32 %v182_v4, %v129_v14  ;;  %s5672_s0 = sld [smem:[#allocation9 + $0x55]] }
  0x5c   :  { %217 = vrot.lane.b32.xlu1 %v209_v3, %s10689_s8  ;;  %v234_v9 = vstv %s5660_s23  ;;  %v287_v10 = vmul.f32 %v286_v8, %v127_v0  ;;  %v288_v12 = vmul.f32 %v286_v8, %v128_v2  ;;  %v186_v23 = vmul.f32 %v182_v4, %v130_v21  ;;  %s5674_s28 = sld [smem:[#allocation9 + $0x20]] }
  0x5d   :  { %191 = vrot.lane.b32.xlu0 %v183_v5, %s10689_s8  ;;  %v235_v11 = vmul.f32 %v234_v9, %v127_v0  ;;  %v236_v13 = vmul.f32 %v234_v9, %v128_v2  ;;  %v312_v15 = vstv %s5663_s24  ;;  %v212_v24 = vmul.f32 %v208_v1, %v130_v21  ;;  %s5675_s29 = sld [smem:[#allocation9 + $0x3b]]  ;;  %v616_v5 = vld [vmem:[#allocation4 + $0xa] sm:$0x3f] }
  0x5e   :  { %v313_v17 = vmul.f32 %v312_v15, %v127_v0  ;;  %v338_v18 = vstv %s5664_s6  ;;  %v314_v20 = vmul.f32 %v312_v15, %v128_v2  ;;  %v289_v26 = vmul.f32 %v286_v8, %v129_v14  ;;  %s5676_s1 = sld [smem:[#allocation9 + $0x56]] }
  0x5f   :  { %v339_v19 = vmul.f32 %v338_v18, %v127_v0  ;;  %v340_v25 = vmul.f32 %v338_v18, %v128_v2  ;;  %v237_v27 = vmul.f32 %v234_v9, %v129_v14  ;;  %v434_v29 = vstv %s5670_s26  ;;  %s5682_s30 = sld [smem:[#allocation9 + $0x22]] }
  0x60   :  { %219 = vrot.lane.b32.xlu1 %v210_v6, %s10689_s8  ;;  %v238_v30 = vmul.f32 %v234_v9, %v130_v21  ;;  %v435_v31 = vmul.f32 %v434_v29, %v363_v28  ;;  %v315_v32 = vmul.f32 %v312_v15, %v129_v14  ;;  %v290_v33 = vmul.f32 %v286_v8, %v130_v21  ;;  %s5683_s14 = sld [smem:[#allocation9 + $0x3d]] }
  0x61   :  { %193 = vrot.lane.b32.xlu0 %v184_v7, %s10689_s8  ;;  %v460_v34 = vstv %s5671_s27  ;;  %v436_v37 = vmul.f32 %v434_v29, %v364_v35  ;;  %v341_v38 = vmul.f32 %v338_v18, %v129_v14  ;;  %v316_v39 = vmul.f32 %v312_v15, %v130_v21  ;;  %s5684_s15 = sld [smem:[#allocation9 + $0x58]] }
  0x62   :  { %v461_v36 = vmul.f32 %v460_v34, %v363_v28  ;;  %v486_v40 = vstv %s5672_s0  ;;  %v462_v42 = vmul.f32 %v460_v34, %v364_v35  ;;  %v538_v43 = vstv %s5674_s28  ;;  %s5686_s16 = sld [smem:[#allocation9 + $0x23]] }
  0x63   :  { %v487_v41 = vmul.f32 %v486_v40, %v363_v28  ;;  %v342_v44 = vmul.f32 %v338_v18, %v130_v21  ;;  %v539_v45 = vmul.f32 %v538_v43, %v363_v28  ;;  %v540_v46 = vmul.f32 %v538_v43, %v364_v35  ;;  %s5687_s2 = sld [smem:[#allocation9 + $0x3e]]  ;;  %v617_v18 = vld [vmem:[#allocation4 + $0x32] sm:$0xff] }
  0x64   :  { %295 = vrot.lane.b32.xlu1 %v287_v10, %s10687_s25  ;;  %v488_v47 = vmul.f32 %v486_v40, %v364_v35  ;;  %v564_v49 = vstv %s5675_s29  ;;  %v437_v50 = vmul.f32 %v434_v29, %v365_v48  ;;  %v590_v52 = vstv %s5676_s1  ;;  %s5688_s17 = sld [smem:[#allocation9 + $0x59]] }
  0x65   :  { %243 = vrot.lane.b32.xlu0 %v235_v11, %s10689_s8  ;;  %v565_v51 = vmul.f32 %v564_v49, %v363_v28  ;;  %v591_v53 = vmul.f32 %v590_v52, %v363_v28  ;;  %v566_v54 = vmul.f32 %v564_v49, %v364_v35  ;;  %v463_v56 = vmul.f32 %v460_v34, %v365_v48  ;;  %s5694_s18 = sld [smem:[#allocation9 + $0x25]] }
  0x66   :  { %v438_v57 = vmul.f32 %v434_v29, %v366_v55  ;;  %v464_v58 = vmul.f32 %v460_v34, %v366_v55  ;;  %v592_v59 = vmul.f32 %v590_v52, %v364_v35  ;;  %v541_v60 = vmul.f32 %v538_v43, %v365_v48  ;;  %s5695_s3 = sld [smem:[#allocation9 + $0x40]] }
  0x67   :  { %v489_v61 = vmul.f32 %v486_v40, %v365_v48  ;;  %v686_v63 = vstv %s5682_s30  ;;  %v490_v0 = vmul.f32 %v486_v40, %v366_v55  ;;  %v567_v2 = vmul.f32 %v564_v49, %v365_v48  ;;  %s5696_s19 = sld [smem:[#allocation9 + $0x5b]] }
  0x68   :  { %297 = vrot.lane.b32.xlu1 %v288_v12, %s10687_s25  ;;  %v687_v1 = vmul.f32 %v686_v63, %v615_v62  ;;  %v542_v3 = vmul.f32 %v538_v43, %v366_v55  ;;  %v712_v4 = vstv %s5683_s14  ;;  %v688_v7 = vmul.f32 %v686_v63, %v616_v5  ;;  %s5698_s20 = sld [smem:[#allocation9 + $0x26]] }
  0x69   :  { %245 = vrot.lane.b32.xlu0 %v236_v13, %s10689_s8  ;;  %v713_v6 = vmul.f32 %v712_v4, %v615_v62  ;;  %v593_v8 = vmul.f32 %v590_v52, %v365_v48  ;;  %v568_v9 = vmul.f32 %v564_v49, %v366_v55  ;;  %v738_v10 = vstv %s5684_s15  ;;  %s5699_s4 = sld [smem:[#allocation9 + $0x41]] }
  0x6a   :  { %v739_v11 = vmul.f32 %v738_v10, %v615_v62  ;;  %v714_v12 = vmul.f32 %v712_v4, %v616_v5  ;;  %v790_v13 = vstv %s5686_s16  ;;  %v594_v14 = vmul.f32 %v590_v52, %v366_v55  ;;  %s5700_s21 = sld [smem:[#allocation9 + $0x5c]] }
  0x6b   :  { %v791_v15 = vmul.f32 %v790_v13, %v615_v62  ;;  %v715_v28 = vmul.f32 %v712_v4, %v617_v18  ;;  %v6509_v40 = vstv %s5694_s18  ;;  %s5706_s22 = sld [smem:[#allocation9 + $0x28]] }
  0x6c   :  { %195 = vrot.lane.b32.xlu1 %v185_v16, %s10689_s8  ;;  %v792_v16 = vmul.f32 %v790_v13, %v616_v5  ;;  %v6523_v48 = vstv %s5695_s3  ;;  %s5707_s23 = sld [smem:[#allocation9 + $0x43]] }
  0x6d   :  { %321 = vrot.lane.b32.xlu0 %v313_v17, %s10687_s25  ;;  %v740_v17 = vmul.f32 %v738_v10, %v616_v5  ;;  %s5708_s24 = sld [smem:[#allocation9 + $0x5e]] }
  0x6e   :  { %s5710_s6 = sld [smem:[#allocation9 + $0x29]] }
  0x6f   :  { %s5711_s26 = sld [smem:[#allocation9 + $0x44]] }
  0x70   :  { %347 = vrot.lane.b32.xlu1 %v339_v19, %s10687_s25  ;;  %v816_v19 = vstv %s5687_s2  ;;  %s5712_s27 = sld [smem:[#allocation9 + $0x5f]] }
  0x71   :  { %323 = vrot.lane.b32.xlu0 %v314_v20, %s10687_s25  ;;  %v689_v20 = vmul.f32 %v686_v63, %v617_v18  ;;  %v817_v21 = vmul.f32 %v816_v19, %v615_v62  ;;  %s5718_s0 = sld [smem:[#allocation9 + $0x2b]] }
  0x72   :  { %s5719_s28 = sld [smem:[#allocation9 + $0x46]] }
  0x73   :  { %s5720_s29 = sld [smem:[#allocation9 + $0x61]] }
  0x74   :  { %221 = vrot.lane.b32.xlu1 %v211_v22, %s10689_s8  ;;  %v6481_v22 = vstv %s5688_s17  ;;  %s5722_s1 = sld [smem:[#allocation9 + $0x2c]] }
  0x75   :  { %197 = vrot.lane.b32.xlu0 %v186_v23, %s10689_s8  ;;  %v843_v23 = vmul.f32 %v6481_v22, %v615_v62  ;;  %s5723_s30 = sld [smem:[#allocation9 + $0x47]] }
  0x76   :  { %s5724_s14 = sld [smem:[#allocation9 + $0x62]] }
  0x77   :  { %s5730_s15 = sld [smem:[#allocation9 + $0x2e]] }
  0x78   :  { %223 = vrot.lane.b32.xlu1 %v212_v24, %s10689_s8  ;;  %v818_v24 = vmul.f32 %v816_v19, %v616_v5  ;;  %s5731_s16 = sld [smem:[#allocation9 + $0x49]] }
  0x79   :  { %349 = vrot.lane.b32.xlu0 %v340_v25, %s10687_s25  ;;  %s5732_s2 = sld [smem:[#allocation9 + $0x64]] }
  0x7a   :  { %s5734_s17 = sld [smem:[#allocation9 + $0x2f]] }
  0x7b   :  { %s5735_s18 = sld [smem:[#allocation9 + $0x4a]] }
  0x7c   :  { %299 = vrot.lane.b32.xlu1 %v289_v26, %s10687_s25  ;;  %v618_v26 = vld [vmem:[#allocation4 + $0x3a] sm:$0x3f]  ;;  %s5736_s3 = sld [smem:[#allocation9 + $0x65]] }
  0x7d   :  { %247 = vrot.lane.b32.xlu0 %v237_v27, %s10689_s8  ;;  %v690_v29 = vmul.f32 %v686_v63, %v618_v26  ;;  %s8893_s7 = sld [smem:[#allocation11 + $0x7f]] }
  0x7e   :  { %s8897_s5 = sld [smem:[#allocation11 + $0x2c]] }
  0x80   :  { %249 = vrot.lane.b32.xlu1 %v238_v30, %s10689_s8 }
  0x81   :  { %443 = vrot.lane.b32.xlu0 %v435_v31, %s10689_s8 }
  0x83   :  { %11201 = sst [smem:[#allocation210_spill]] %s8893_s7 }
  0x84   :  { %325 = vrot.lane.b32.xlu1 %v315_v32, %s10687_s25  ;;  %v716_v32 = vmul.f32 %v712_v4, %v618_v26  ;;  %11202 = sst [smem:[#allocation211_spill]] %s8897_s5 }
  0x85   :  { %301 = vrot.lane.b32.xlu0 %v290_v33, %s10687_s25  ;;  %v844_v33 = vmul.f32 %v6481_v22, %v616_v5 }
  0x88   :  { %469 = vrot.lane.b32.xlu1 %v461_v36, %s10689_s8  ;;  %v793_v36 = vmul.f32 %v790_v13, %v617_v18 }
  0x89   :  { %445 = vrot.lane.b32.xlu0 %v436_v37, %s10689_s8  ;;  %v741_v37 = vmul.f32 %v738_v10, %v617_v18 }
  0x8c   :  { %351 = vrot.lane.b32.xlu1 %v341_v38, %s10687_s25 }
  0x8d   :  { %327 = vrot.lane.b32.xlu0 %v316_v39, %s10687_s25  ;;  %v6507_v39 = vld [vmem:[#allocation4 + $0x10] sm:$0xff] }
  0x8e   :  { %v940_v43 = vmul.f32 %v6509_v40, %v6507_v39  ;;  %v966_v52 = vmul.f32 %v6523_v48, %v6507_v39 }
  0x90   :  { %495 = vrot.lane.b32.xlu1 %v487_v41, %s10689_s8 }
  0x91   :  { %471 = vrot.lane.b32.xlu0 %v462_v42, %s10689_s8  ;;  %v742_v42 = vmul.f32 %v738_v10, %v618_v26  ;;  %v6581_v10 = vstv %s5699_s4  ;;  %s5744_s4 = sld [smem:[#allocation9 + $0x67]] }
  0x94   :  { %353 = vrot.lane.b32.xlu1 %v342_v44, %s10687_s25 }
  0x95   :  { %547 = vrot.lane.b32.xlu0 %v539_v45, %s10687_s25 }
  0x98   :  { %549 = vrot.lane.b32.xlu1 %v540_v46, %s10687_s25  ;;  %v819_v46 = vmul.f32 %v816_v19, %v617_v18 }
  0x99   :  { %497 = vrot.lane.b32.xlu0 %v488_v47, %s10689_s8  ;;  %v794_v47 = vmul.f32 %v790_v13, %v618_v26  ;;  %v1070_v13 = vmul.f32 %v6581_v10, %v6507_v39 }
  0x9c   :  { %447 = vrot.lane.b32.xlu1 %v437_v50, %s10689_s8  ;;  %v6527_v50 = vld [vmem:[#allocation4 + $0x18] sm:$0x3f] }
  0x9d   :  { %573 = vrot.lane.b32.xlu0 %v565_v51, %s10687_s25  ;;  %v967_v62 = vmul.f32 %v6523_v48, %v6527_v50 }
  0xa0   :  { %599 = vrot.lane.b32.xlu1 %v591_v53, %s10687_s25  ;;  %v941_v53 = vmul.f32 %v6509_v40, %v6527_v50 }
  0xa1   :  { %575 = vrot.lane.b32.xlu0 %v566_v54, %s10687_s25 }
  0xa4   :  { %473 = vrot.lane.b32.xlu1 %v463_v56, %s10689_s8  ;;  %v845_v56 = vmul.f32 %v6481_v22, %v617_v18  ;;  %v1071_v18 = vmul.f32 %v6581_v10, %v6527_v50 }
  0xa5   :  { %449 = vrot.lane.b32.xlu0 %v438_v57, %s10689_s8  ;;  %v820_v57 = vmul.f32 %v816_v19, %v618_v26 }
  0xa8   :  { %475 = vrot.lane.b32.xlu1 %v464_v58, %s10689_s8  ;;  %v6544_v58 = vstv %s5696_s19  ;;  %s5742_s19 = sld [smem:[#allocation9 + $0x31]] }
  0xa9   :  { %601 = vrot.lane.b32.xlu0 %v592_v59, %s10687_s25 }
  0xac   :  { %551 = vrot.lane.b32.xlu1 %v541_v60, %s10687_s25 }
  0xad   :  { %499 = vrot.lane.b32.xlu0 %v489_v61, %s10689_s8  ;;  %v992_v61 = vmul.f32 %v6544_v58, %v6507_v39 }
  0xb0   :  { %501 = vrot.lane.b32.xlu1 %v490_v0, %s10689_s8  ;;  %v6558_v0 = vstv %s5698_s20  ;;  %s5743_s20 = sld [smem:[#allocation9 + $0x4c]] }
  0xb1   :  { %695 = vrot.lane.b32.xlu0 %v687_v1, %s10689_s8 }
  0xb4   :  { %577 = vrot.lane.b32.xlu1 %v567_v2, %s10687_s25  ;;  %v846_v2 = vmul.f32 %v6481_v22, %v618_v26 }
  0xb5   :  { %553 = vrot.lane.b32.xlu0 %v542_v3, %s10687_s25  ;;  %v1044_v3 = vmul.f32 %v6558_v0, %v6507_v39 }
  0xb8   :  { %721 = vrot.lane.b32.xlu1 %v713_v6, %s10689_s8  ;;  %v1045_v6 = vmul.f32 %v6558_v0, %v6527_v50 }
  0xb9   :  { %697 = vrot.lane.b32.xlu0 %v688_v7, %s10689_s8  ;;  %v993_v7 = vmul.f32 %v6544_v58, %v6527_v50 }
  0xbc   :  { %603 = vrot.lane.b32.xlu1 %v593_v8, %s10687_s25  ;;  %v6577_v8 = vld [vmem:[#allocation4 + $0x40] sm:$0xff] }
  0xbd   :  { %579 = vrot.lane.b32.xlu0 %v568_v9, %s10687_s25  ;;  %v968_v22 = vmul.f32 %v6523_v48, %v6577_v8 }
  0xc0   :  { %747 = vrot.lane.b32.xlu1 %v739_v11, %s10689_s8 }
  0xc1   :  { %723 = vrot.lane.b32.xlu0 %v714_v12, %s10689_s8  ;;  %v942_v12 = vmul.f32 %v6509_v40, %v6577_v8 }
  0xc4   :  { %605 = vrot.lane.b32.xlu1 %v594_v14, %s10687_s25  ;;  %v6591_v14 = vstv %s5700_s21  ;;  %s5746_s21 = sld [smem:[#allocation9 + $0x32]] }
  0xc5   :  { %799 = vrot.lane.b32.xlu0 %v791_v15, %s10687_s25 }
  0xc8   :  { %801 = vrot.lane.b32.xlu1 %v792_v16, %s10687_s25 }
  0xc9   :  { %749 = vrot.lane.b32.xlu0 %v740_v17, %s10689_s8  ;;  %v1096_v17 = vmul.f32 %v6591_v14, %v6507_v39 }
  0xcc   :  { %699 = vrot.lane.b32.xlu1 %v689_v20, %s10689_s8  ;;  %v871_v20 = vld [vmem:[#allocation4 + $0x48] sm:$0x3f] }
  0xcd   :  { %825 = vrot.lane.b32.xlu0 %v817_v21, %s10687_s25 }
  0xce   :  { %v6486_v25 = vpop.permute.xlu1 %217 }
  0xcf   :  { %v6488_v27 = vpop.permute.xlu0 %191 }
  0xd0   :  { %851 = vrot.lane.b32.xlu1 %v843_v23, %s10687_s25  ;;  %v943_v23 = vmul.f32 %v6509_v40, %v871_v20  ;;  %v6633_v40 = vld [vmem:[#allocation4 + $0x11] sm:$0xff] }
  0xd1   :  { %827 = vrot.lane.b32.xlu0 %v818_v24, %s10687_s25 }
  0xd2   :  { %v6492_v30 = vpop.permute.xlu1 %219 }
  0xd3   :  { %v6494_v31 = vpop.permute.xlu0 %193 }
  0xd4   :  { %725 = vrot.lane.b32.xlu1 %v715_v28, %s10689_s8  ;;  %v969_v28 = vmul.f32 %v6523_v48, %v871_v20 }
  0xd5   :  { %701 = vrot.lane.b32.xlu0 %v690_v29, %s10689_s8  ;;  %v1097_v29 = vmul.f32 %v6591_v14, %v6527_v50 }
  0xd6   :  { %v6499_v34 = vpop.permute.xlu1 %295 }
  0xd7   :  { %v6501_v35 = vpop.permute.xlu0 %243 }
  0xd8   :  { %727 = vrot.lane.b32.xlu1 %v716_v32, %s10689_s8 }
  0xd9   :  { %853 = vrot.lane.b32.xlu0 %v844_v33, %s10687_s25 }
  0xda   :  { %v6505_v38 = vpop.permute.xlu1 %297 }
  0xdb   :  { %v6511_v41 = vpop.permute.xlu0 %245 }
  0xdc   :  { %803 = vrot.lane.b32.xlu1 %v793_v36, %s10687_s25  ;;  %v1046_v36 = vmul.f32 %v6558_v0, %v6577_v8 }
  0xdd   :  { %751 = vrot.lane.b32.xlu0 %v741_v37, %s10689_s8  ;;  %v994_v37 = vmul.f32 %v6544_v58, %v6577_v8 }
  0xde   :  { %v6517_v44 = vpop.permute.xlu1 %195 }
  0xdf   :  { %v6519_v45 = vpop.permute.xlu0 %321 }
  0xe0   :  { %753 = vrot.lane.b32.xlu1 %v742_v42, %s10689_s8  ;;  %v6635_v42 = vstv %s5706_s22  ;;  %s5747_s22 = sld [smem:[#allocation9 + $0x4d]] }
  0xe1   :  { %948 = vrot.lane.b32.xlu0 %v940_v43, %s10689_s8 }
  0xe2   :  { %v6525_v49 = vpop.permute.xlu1 %347 }
  0xe3   :  { %v6529_v51 = vpop.permute.xlu0 %323 }
  0xe4   :  { %829 = vrot.lane.b32.xlu1 %v819_v46, %s10687_s25  ;;  %v995_v46 = vmul.f32 %v6544_v58, %v871_v20  ;;  %v6657_v58 = vld [vmem:[#allocation4 + $0x19] sm:$0x3f] }
  0xe5   :  { %805 = vrot.lane.b32.xlu0 %v794_v47, %s10687_s25  ;;  %v1192_v47 = vmul.f32 %v6635_v42, %v6633_v40 }
  0xe6   :  { %v6537_v54 = vpop.permute.xlu1 %221 }
  0xe7   :  { %v6539_v55 = vpop.permute.xlu0 %197 }
  0xe8   :  { %974 = vrot.lane.b32.xlu1 %v966_v52, %s10689_s8  ;;  %v1072_v52 = vmul.f32 %v6581_v10, %v6577_v8 }
  0xe9   :  { %950 = vrot.lane.b32.xlu0 %v941_v53, %s10689_s8  ;;  %v1047_v53 = vmul.f32 %v6558_v0, %v871_v20 }
  0xea   :  { %v6546_v59 = vpop.permute.xlu1 %223 }
  0xeb   :  { %v6548_v60 = vpop.permute.xlu0 %349 }
  0xec   :  { %855 = vrot.lane.b32.xlu1 %v845_v56, %s10687_s25  ;;  %v6653_v56 = vstv %s5707_s23  ;;  %s5748_s23 = sld [smem:[#allocation9 + $0x68]] }
  0xed   :  { %831 = vrot.lane.b32.xlu0 %v820_v57, %s10687_s25 }
  0xee   :  { %v6556_v63 = vpop.permute.xlu1 %299 }
  0xef   :  { %v6560_v1 = vpop.permute.xlu0 %247 }
  0xf0   :  { %1000 = vrot.lane.b32.xlu1 %v992_v61, %s10689_s8 }
  0xf1   :  { %976 = vrot.lane.b32.xlu0 %v967_v62, %s10689_s8  ;;  %v1218_v62 = vmul.f32 %v6653_v56, %v6633_v40 }
  0xf2   :  { %v6567_v4 = vpop.permute.xlu1 %249 }
  0xf3   :  { %v6569_v5 = vpop.permute.xlu0 %443 }
  0xf4   :  { %857 = vrot.lane.b32.xlu1 %v846_v2, %s10687_s25  ;;  %v1193_v2 = vmul.f32 %v6635_v42, %v6657_v58 }
  0xf5   :  { %1052 = vrot.lane.b32.xlu0 %v1044_v3, %s10687_s25 }
  0xf6   :  { %v6579_v9 = vpop.permute.xlu1 %325 }
  0xf7   :  { %v6583_v11 = vpop.permute.xlu0 %301 }
  0xf8   :  { %1054 = vrot.lane.b32.xlu1 %v1045_v6, %s10687_s25  ;;  %v1098_v6 = vmul.f32 %v6591_v14, %v6577_v8  ;;  %v1219_v8 = vmul.f32 %v6653_v56, %v6657_v58 }
  0xf9   :  { %1002 = vrot.lane.b32.xlu0 %v993_v7, %s10689_s8  ;;  %v1073_v7 = vmul.f32 %v6581_v10, %v871_v20 }
  0xfa   :  { %v6593_v15 = vpop.permute.xlu1 %469 }
  0xfb   :  { %10740 = vst [vmem:[#allocation26_spill] sm:$0xff] %v6593_v15  ;;  %v6595_v16 = vpop.permute.xlu0 %445 }
  0xfc   :  { %10741 = vst [vmem:[#allocation27_spill] sm:$0xff] %v6595_v16  ;;  %952 = vrot.lane.b32.xlu1 %v942_v12, %s10689_s8  ;;  %v6676_v12 = vstv %s5708_s24  ;;  %s5754_s24 = sld [smem:[#allocation9 + $0x34]] }
  0xfd   :  { %1078 = vrot.lane.b32.xlu0 %v1070_v13, %s10687_s25 }
  0xfe   :  { %v6603_v19 = vpop.permute.xlu1 %351 }
  0xff   :  { %v6605_v21 = vpop.permute.xlu0 %327 }
 0x100   :  { %10742 = vst [vmem:[#allocation28_spill] sm:$0xff] %v6605_v21  ;;  %1104 = vrot.lane.b32.xlu1 %v1096_v17, %s10687_s25 }
 0x101   :  { %1080 = vrot.lane.b32.xlu0 %v1071_v18, %s10687_s25  ;;  %v1244_v18 = vmul.f32 %v6676_v12, %v6633_v40 }
 0x102   :  { %v6612_v24 = vpop.permute.xlu1 %495 }
 0x103   :  { %10743 = vst [vmem:[#allocation29_spill] sm:$0xff] %v6612_v24  ;;  %v6614_v26 = vpop.permute.xlu0 %471  ;;  %v6112_v24 = vld [vmem:[#allocation4 + $0x2] sm:$0xff] }
 0x104   :  { %10744 = vst [vmem:[#allocation30_spill] sm:$0xff] %v6614_v26  ;;  %978 = vrot.lane.b32.xlu1 %v968_v22, %s10689_s8 }
 0x105   :  { %954 = vrot.lane.b32.xlu0 %v943_v23, %s10689_s8  ;;  %v6690_v23 = vstv %s5710_s6  ;;  %s5755_s6 = sld [smem:[#allocation9 + $0x4f]] }
 0x106   :  { %v6621_v32 = vpop.permute.xlu1 %353 }
 0x107   :  { %10745 = vst [vmem:[#allocation31_spill] sm:$0xff] %v6621_v32  ;;  %v6623_v33 = vpop.permute.xlu0 %547 }
 0x108   :  { %10746 = vst [vmem:[#allocation32_spill] sm:$0xff] %v6623_v33  ;;  %980 = vrot.lane.b32.xlu1 %v969_v28, %s10689_s8  ;;  %v1099_v28 = vmul.f32 %v6591_v14, %v871_v20  ;;  %v1245_v14 = vmul.f32 %v6676_v12, %v6657_v58  ;;  %v6709_v20 = vld [vmem:[#allocation4 + $0x41] sm:$0xff] }
 0x109   :  { %1106 = vrot.lane.b32.xlu0 %v1097_v29, %s10687_s25  ;;  %v1296_v29 = vmul.f32 %v6690_v23, %v6633_v40 }
 0x10a   :  { %v6631_v39 = vpop.permute.xlu1 %549 }
 0x10b   :  { %10747 = vst [vmem:[#allocation33_spill] sm:$0xff] %v6631_v39  ;;  %v6637_v43 = vpop.permute.xlu0 %497 }
 0x10c   :  { %10748 = vst [vmem:[#allocation34_spill] sm:$0xff] %v6637_v43  ;;  %1056 = vrot.lane.b32.xlu1 %v1046_v36, %s10687_s25 }
 0x10d   :  { %1004 = vrot.lane.b32.xlu0 %v994_v37, %s10689_s8 }
 0x10e   :  { %v6644_v48 = vpop.permute.xlu1 %447 }
 0x10f   :  { %10749 = vst [vmem:[#allocation35_spill] sm:$0xff] %v6644_v48  ;;  %v6646_v50 = vpop.permute.xlu0 %573 }
 0x110   :  { %10750 = vst [vmem:[#allocation36_spill] sm:$0xff] %v6646_v50  ;;  %1006 = vrot.lane.b32.xlu1 %v995_v46, %s10689_s8  ;;  %v1297_v46 = vmul.f32 %v6690_v23, %v6657_v58 }
 0x111   :  { %1200 = vrot.lane.b32.xlu0 %v1192_v47, %s10689_s8 }
 0x112   :  { %v6655_v57 = vpop.permute.xlu1 %599 }
 0x113   :  { %10751 = vst [vmem:[#allocation37_spill] sm:$0xff] %v6655_v57  ;;  %v6659_v61 = vpop.permute.xlu0 %575 }
 0x114   :  { %10752 = vst [vmem:[#allocation38_spill] sm:$0xff] %v6659_v61  ;;  %1082 = vrot.lane.b32.xlu1 %v1072_v52, %s10687_s25  ;;  %v6713_v52 = vstv %s5711_s26  ;;  %s5756_s26 = sld [smem:[#allocation9 + $0x6a]] }
 0x115   :  { %1058 = vrot.lane.b32.xlu0 %v1047_v53, %s10687_s25 }
 0x116   :  { %v6667_v0 = vpop.permute.xlu1 %473 }
 0x117   :  { %10753 = vst [vmem:[#allocation39_spill] sm:$0xff] %v6667_v0  ;;  %v6669_v3 = vpop.permute.xlu0 %449 }
 0x118   :  { %10754 = vst [vmem:[#allocation40_spill] sm:$0xff] %v6669_v3  ;;  %1226 = vrot.lane.b32.xlu1 %v1218_v62, %s10689_s8  ;;  %v1194_v62 = vmul.f32 %v6635_v42, %v6709_v20 }
 0x119   :  { %1202 = vrot.lane.b32.xlu0 %v1193_v2, %s10689_s8  ;;  %v1322_v2 = vmul.f32 %v6713_v52, %v6633_v40 }
 0x11a   :  { %v6678_v13 = vpop.permute.xlu1 %475 }
 0x11b   :  { %10755 = vst [vmem:[#allocation41_spill] sm:$0xff] %v6678_v13  ;;  %v6680_v17 = vpop.permute.xlu0 %601 }
 0x11c   :  { %10756 = vst [vmem:[#allocation42_spill] sm:$0xff] %v6680_v17  ;;  %1108 = vrot.lane.b32.xlu1 %v1098_v6, %s10687_s25  ;;  %v6723_v6 = vstv %s5712_s27  ;;  %s5758_s27 = sld [smem:[#allocation9 + $0x35]] }
 0x11d   :  { %1084 = vrot.lane.b32.xlu0 %v1073_v7, %s10687_s25 }
 0x11e   :  { %v6688_v22 = vpop.permute.xlu1 %551 }
 0x11f   :  { %10757 = vst [vmem:[#allocation43_spill] sm:$0xff] %v6688_v22  ;;  %v6692_v10 = vpop.permute.xlu0 %499 }
 0x120   :  { %10758 = vst [vmem:[#allocation44_spill] sm:$0xff] %v6692_v10  ;;  %1252 = vrot.lane.b32.xlu1 %v1244_v18, %s10689_s8 }
 0x121   :  { %1228 = vrot.lane.b32.xlu0 %v1219_v8, %s10689_s8  ;;  %v1348_v8 = vmul.f32 %v6723_v6, %v6633_v40 }
 0x122   :  { %v6699_v36 = vpop.permute.xlu1 %501 }
 0x123   :  { %10759 = vst [vmem:[#allocation45_spill] sm:$0xff] %v6699_v36  ;;  %v6701_v37 = vpop.permute.xlu0 %695 }
 0x124   :  { %10760 = vst [vmem:[#allocation46_spill] sm:$0xff] %v6701_v37  ;;  %1110 = vrot.lane.b32.xlu1 %v1099_v28, %s10687_s25  ;;  %v1323_v28 = vmul.f32 %v6713_v52, %v6657_v58 }
 0x125   :  { %1304 = vrot.lane.b32.xlu0 %v1296_v29, %s10687_s25 }
 0x126   :  { %v6711_v47 = vpop.permute.xlu1 %577 }
 0x127   :  { %10761 = vst [vmem:[#allocation47_spill] sm:$0xff] %v6711_v47  ;;  %v6715_v53 = vpop.permute.xlu0 %553 }
 0x128   :  { %10762 = vst [vmem:[#allocation48_spill] sm:$0xff] %v6715_v53  ;;  %1306 = vrot.lane.b32.xlu1 %v1297_v46, %s10687_s25  ;;  %v1123_v46 = vld [vmem:[#allocation4 + $0x49] sm:$0x3f] }
 0x129   :  { %1254 = vrot.lane.b32.xlu0 %v1245_v14, %s10689_s8 }
 0x12a   :  { %v6725_v7 = vpop.permute.xlu1 %721 }
 0x12b   :  { %10763 = vst [vmem:[#allocation49_spill] sm:$0xff] %v6725_v7  ;;  %v6727_v18 = vpop.permute.xlu0 %697  ;;  %v1220_v7 = vmul.f32 %v6653_v56, %v6709_v20 }
 0x12c   :  { %10764 = vst [vmem:[#allocation50_spill] sm:$0xff] %v6727_v18  ;;  %1204 = vrot.lane.b32.xlu1 %v1194_v62, %s10689_s8  ;;  %v1195_v62 = vmul.f32 %v6635_v42, %v1123_v46  ;;  %v1221_v18 = vmul.f32 %v6653_v56, %v1123_v46  ;;  %v1298_v42 = vmul.f32 %v6690_v23, %v6709_v20 }
 0x12d   :  { %1330 = vrot.lane.b32.xlu0 %v1322_v2, %s10687_s25 }
 0x12e   :  { %v6735_v29 = vpop.permute.xlu1 %603 }
 0x12f   :  { %10765 = vst [vmem:[#allocation51_spill] sm:$0xff] %v6735_v29  ;;  %v6737_v14 = vpop.permute.xlu0 %579 }
 0x130   :  { %10766 = vst [vmem:[#allocation52_spill] sm:$0xff] %v6737_v14  ;;  %1356 = vrot.lane.b32.xlu1 %v1348_v8, %s10687_s25  ;;  %v1349_v8 = vmul.f32 %v6723_v6, %v6657_v58  ;;  %v6767_v58 = vstv %s5718_s0  ;;  %s5759_s0 = sld [smem:[#allocation9 + $0x50]] }
 0x131   :  { %1332 = vrot.lane.b32.xlu0 %v1323_v28, %s10687_s25  ;;  %v6765_v28 = vld [vmem:[#allocation4 + $0x12] sm:$0xff] }
 0x132   :  { %v6744_v40 = vpop.permute.xlu1 %747 }
 0x133   :  { %10767 = vst [vmem:[#allocation53_spill] sm:$0xff] %v6744_v40  ;;  %v6746_v2 = vpop.permute.xlu0 %723 }
 0x134   :  { %10768 = vst [vmem:[#allocation54_spill] sm:$0xff] %v6746_v2  ;;  %1230 = vrot.lane.b32.xlu1 %v1220_v7, %s10689_s8  ;;  %v1246_v7 = vmul.f32 %v6676_v12, %v6709_v20 }
 0x135   :  { %1206 = vrot.lane.b32.xlu0 %v1195_v62, %s10689_s8 }
 0x136   :  { %v6753_v14 = vpop.permute.xlu1 %605 }
 0x137   :  { %10769 = vst [vmem:[#allocation55_spill] sm:$0xff] %v6753_v14  ;;  %v6755_v29 = vpop.permute.xlu0 %799 }
 0x138   :  { %10770 = vst [vmem:[#allocation56_spill] sm:$0xff] %v6755_v29  ;;  %1232 = vrot.lane.b32.xlu1 %v1221_v18, %s10689_s8  ;;  %v1247_v18 = vmul.f32 %v6676_v12, %v1123_v46 }
 0x139   :  { %1358 = vrot.lane.b32.xlu0 %v1349_v8, %s10687_s25  ;;  %v1444_v8 = vmul.f32 %v6767_v58, %v6765_v28 }
 0x13a   :  { %v6763_v56 = vpop.permute.xlu1 %801 }
 0x13b   :  { %10771 = vst [vmem:[#allocation57_spill] sm:$0xff] %v6763_v56  ;;  %v6769_v62 = vpop.permute.xlu0 %749  ;;  %v1324_v56 = vmul.f32 %v6713_v52, %v6709_v20 }
 0x13c   :  { %10772 = vst [vmem:[#allocation58_spill] sm:$0xff] %v6769_v62  ;;  %1308 = vrot.lane.b32.xlu1 %v1298_v42, %s10687_s25  ;;  %v1299_v42 = vmul.f32 %v6690_v23, %v1123_v46  ;;  %v6785_v62 = vstv %s5719_s28  ;;  %s5760_s28 = sld [smem:[#allocation9 + $0x6b]] }
 0x13d   :  { %1256 = vrot.lane.b32.xlu0 %v1246_v7, %s10689_s8  ;;  %v6789_v7 = vld [vmem:[#allocation4 + $0x1a] sm:$0x3f] }
 0x13e   :  { %v6776_v2 = vpop.permute.xlu1 %699 }
 0x13f   :  { %10773 = vst [vmem:[#allocation59_spill] sm:$0xff] %v6776_v2  ;;  %v6778_v40 = vpop.permute.xlu0 %825 }
 0x140   :  { %10774 = vst [vmem:[#allocation60_spill] sm:$0xff] %v6778_v40  ;;  %1258 = vrot.lane.b32.xlu1 %v1247_v18, %s10689_s8  ;;  %v1470_v18 = vmul.f32 %v6785_v62, %v6765_v28 }
 0x141   :  { %1452 = vrot.lane.b32.xlu0 %v1444_v8, %s10689_s8  ;;  %v1445_v8 = vmul.f32 %v6767_v58, %v6789_v7 }
 0x142   :  { %v6787_v12 = vpop.permute.xlu1 %851 }
 0x143   :  { %10775 = vst [vmem:[#allocation61_spill] sm:$0xff] %v6787_v12  ;;  %v6791_v29 = vpop.permute.xlu0 %827  ;;  %v6808_v12 = vstv %s5720_s29  ;;  %s5657_s29 = sld [smem:[#allocation9 + $0x1]] }
 0x144   :  { %10776 = vst [vmem:[#allocation62_spill] sm:$0xff] %v6791_v29  ;;  %1334 = vrot.lane.b32.xlu1 %v1324_v56, %s10687_s25  ;;  %v1350_v29 = vmul.f32 %v6723_v6, %v6709_v20  ;;  %v1325_v56 = vmul.f32 %v6713_v52, %v1123_v46  ;;  %v1471_v20 = vmul.f32 %v6785_v62, %v6789_v7 }
 0x145   :  { %1310 = vrot.lane.b32.xlu0 %v1299_v42, %s10687_s25 }
 0x146   :  { %v6799_v23 = vpop.permute.xlu1 %725 }
 0x147   :  { %10777 = vst [vmem:[#allocation63_spill] sm:$0xff] %v6799_v23  ;;  %v6801_v2 = vpop.permute.xlu0 %701 }
 0x148   :  { %10778 = vst [vmem:[#allocation64_spill] sm:$0xff] %v6801_v2  ;;  %1478 = vrot.lane.b32.xlu1 %v1470_v18, %s10689_s8  ;;  %v1496_v2 = vmul.f32 %v6808_v12, %v6765_v28 }
 0x149   :  { %1454 = vrot.lane.b32.xlu0 %v1445_v8, %s10689_s8  ;;  %v6822_v8 = vstv %s5722_s1  ;;  %s5661_s1 = sld [smem:[#allocation9 + $0x2]] }
 0x14a   :  { %v6810_v42 = vpop.permute.xlu1 %727 }
 0x14b   :  { %10779 = vst [vmem:[#allocation65_spill] sm:$0xff] %v6810_v42  ;;  %v6812_v40 = vpop.permute.xlu0 %853  ;;  %v1351_v42 = vmul.f32 %v6723_v6, %v1123_v46  ;;  %v1497_v6 = vmul.f32 %v6808_v12, %v6789_v7  ;;  %v6841_v46 = vld [vmem:[#allocation4 + $0x42] sm:$0xff] }
 0x14c   :  { %10780 = vst [vmem:[#allocation66_spill] sm:$0xff] %v6812_v40  ;;  %1360 = vrot.lane.b32.xlu1 %v1350_v29, %s10687_s25  ;;  %v1548_v29 = vmul.f32 %v6822_v8, %v6765_v28 }
 0x14d   :  { %1336 = vrot.lane.b32.xlu0 %v1325_v56, %s10687_s25 }
 0x14e   :  { %v6820_v18 = vpop.permute.xlu1 %803 }
 0x14f   :  { %10781 = vst [vmem:[#allocation67_spill] sm:$0xff] %v6820_v18  ;;  %v6824_v52 = vpop.permute.xlu0 %751  ;;  %v1549_v18 = vmul.f32 %v6822_v8, %v6789_v7 }
 0x150   :  { %10782 = vst [vmem:[#allocation68_spill] sm:$0xff] %v6824_v52  ;;  %1504 = vrot.lane.b32.xlu1 %v1496_v2, %s10689_s8 }
 0x151   :  { %1480 = vrot.lane.b32.xlu0 %v1471_v20, %s10689_s8  ;;  %v6845_v20 = vstv %s5723_s30  ;;  %s5669_s30 = sld [smem:[#allocation9 + $0x4]] }
 0x152   :  { %v6831_v56 = vpop.permute.xlu1 %753 }
 0x153   :  { %10783 = vst [vmem:[#allocation69_spill] sm:$0xff] %v6831_v56  ;;  %v6833_v23 = vpop.permute.xlu0 %948 }
 0x154   :  { %10784 = vst [vmem:[#allocation70_spill] sm:$0xff] %v6833_v23  ;;  %1362 = vrot.lane.b32.xlu1 %v1351_v42, %s10687_s25  ;;  %v1446_v42 = vmul.f32 %v6767_v58, %v6841_v46  ;;  %v6855_v23 = vstv %s5724_s14  ;;  %s5655_s14 = sld [smem:[#allocation9 + $0x36]] }
 0x155   :  { %1556 = vrot.lane.b32.xlu0 %v1548_v29, %s10687_s25  ;;  %v1574_v29 = vmul.f32 %v6845_v20, %v6765_v28 }
 0x156   :  { %v6843_v2 = vpop.permute.xlu1 %829 }
 0x157   :  { %10785 = vst [vmem:[#allocation71_spill] sm:$0xff] %v6843_v2  ;;  %v6847_v52 = vpop.permute.xlu0 %805  ;;  %v1375_v2 = vld [vmem:[#allocation4 + $0x4a] sm:$0x3f] }
 0x158   :  { %10786 = vst [vmem:[#allocation72_spill] sm:$0xff] %v6847_v52  ;;  %1558 = vrot.lane.b32.xlu1 %v1549_v18, %s10687_s25  ;;  %v1600_v52 = vmul.f32 %v6855_v23, %v6765_v28  ;;  %v1575_v18 = vmul.f32 %v6845_v20, %v6789_v7 }
 0x159   :  { %1506 = vrot.lane.b32.xlu0 %v1497_v6, %s10689_s8 }
 0x15a   :  { %v6857_v56 = vpop.permute.xlu1 %974 }
 0x15b   :  { %10787 = vst [vmem:[#allocation73_spill] sm:$0xff] %v6857_v56  ;;  %v6859_v40 = vpop.permute.xlu0 %950 }
 0x15c   :  { %10788 = vst [vmem:[#allocation74_spill] sm:$0xff] %v6859_v40  ;;  %1456 = vrot.lane.b32.xlu1 %v1446_v42, %s10689_s8  ;;  %v1472_v40 = vmul.f32 %v6785_v62, %v6841_v46  ;;  %v1447_v42 = vmul.f32 %v6767_v58, %v1375_v2  ;;  %v1550_v58 = vmul.f32 %v6822_v8, %v6841_v46 }
 0x15d   :  { %1582 = vrot.lane.b32.xlu0 %v1574_v29, %s10687_s25 }
 0x15e   :  { %v6867_v6 = vpop.permute.xlu1 %855 }
 0x15f   :  { %10789 = vst [vmem:[#allocation75_spill] sm:$0xff] %v6867_v6  ;;  %v6869_v14 = vpop.permute.xlu0 %831  ;;  %v1473_v6 = vmul.f32 %v6785_v62, %v1375_v2 }
 0x160   :  { %10790 = vst [vmem:[#allocation76_spill] sm:$0xff] %v6869_v14  ;;  %1608 = vrot.lane.b32.xlu1 %v1600_v52, %s10687_s25  ;;  %v1601_v52 = vmul.f32 %v6855_v23, %v6789_v7  ;;  %v6899_v7 = vstv %s5730_s15  ;;  %s5673_s15 = sld [smem:[#allocation9 + $0x5]] }
 0x161   :  { %1584 = vrot.lane.b32.xlu0 %v1575_v18, %s10687_s25  ;;  %v6897_v18 = vld [vmem:[#allocation4 + $0x20] sm:$0xff] }
 0x162   :  { %v6876_v28 = vpop.permute.xlu1 %1000 }
 0x163   :  { %10791 = vst [vmem:[#allocation77_spill] sm:$0xff] %v6876_v28  ;;  %v6878_v29 = vpop.permute.xlu0 %976 }
 0x164   :  { %10792 = vst [vmem:[#allocation78_spill] sm:$0xff] %v6878_v29  ;;  %1482 = vrot.lane.b32.xlu1 %v1472_v40, %s10689_s8  ;;  %v1498_v40 = vmul.f32 %v6808_v12, %v6841_v46 }
 0x165   :  { %1458 = vrot.lane.b32.xlu0 %v1447_v42, %s10689_s8 }
 0x166   :  { %v6885_v14 = vpop.permute.xlu1 %857 }
 0x167   :  { %10793 = vst [vmem:[#allocation79_spill] sm:$0xff] %v6885_v14  ;;  %v6887_v56 = vpop.permute.xlu0 %1052 }
 0x168   :  { %10794 = vst [vmem:[#allocation80_spill] sm:$0xff] %v6887_v56  ;;  %1484 = vrot.lane.b32.xlu1 %v1473_v6, %s10689_s8  ;;  %v1499_v6 = vmul.f32 %v6808_v12, %v1375_v2 }
 0x169   :  { %1610 = vrot.lane.b32.xlu0 %v1601_v52, %s10687_s25  ;;  %v1697_v52 = vmul.f32 %v6899_v7, %v6897_v18 }
 0x16a   :  { %v6895_v62 = vpop.permute.xlu1 %1054 }
 0x16b   :  { %10795 = vst [vmem:[#allocation81_spill] sm:$0xff] %v6895_v62  ;;  %v6901_v42 = vpop.permute.xlu0 %1002  ;;  %v1576_v62 = vmul.f32 %v6845_v20, %v6841_v46 }
 0x16c   :  { %10796 = vst [vmem:[#allocation82_spill] sm:$0xff] %v6901_v42  ;;  %1560 = vrot.lane.b32.xlu1 %v1550_v58, %s10687_s25  ;;  %v1551_v58 = vmul.f32 %v6822_v8, %v1375_v2  ;;  %v6917_v42 = vstv %s5731_s16  ;;  %s5654_s16 = sld [smem:[#allocation9 + $0x1b]] }
 0x16d   :  { %1508 = vrot.lane.b32.xlu0 %v1498_v40, %s10689_s8  ;;  %v6921_v40 = vld [vmem:[#allocation4 + $0x28] sm:$0x3f] }
 0x16e   :  { %v6908_v29 = vpop.permute.xlu1 %952 }
 0x16f   :  { %10797 = vst [vmem:[#allocation83_spill] sm:$0xff] %v6908_v29  ;;  %v6910_v56 = vpop.permute.xlu0 %1078 }
 0x170   :  { %10798 = vst [vmem:[#allocation84_spill] sm:$0xff] %v6910_v56  ;;  %1510 = vrot.lane.b32.xlu1 %v1499_v6, %s10689_s8  ;;  %v1723_v6 = vmul.f32 %v6917_v42, %v6897_v18 }
 0x171   :  { %1705 = vrot.lane.b32.xlu0 %v1697_v52, %s10689_s8  ;;  %v1698_v52 = vmul.f32 %v6899_v7, %v6921_v40 }
 0x172   :  { %v6919_v12 = vpop.permute.xlu1 %1104 }
 0x173   :  { %10799 = vst [vmem:[#allocation85_spill] sm:$0xff] %v6919_v12  ;;  %v6923_v14 = vpop.permute.xlu0 %1080  ;;  %v6940_v12 = vstv %s5732_s2  ;;  %s5656_s2 = sld [smem:[#allocation9 + $0x51]] }
 0x174   :  { %10800 = vst [vmem:[#allocation86_spill] sm:$0xff] %v6923_v14  ;;  %1586 = vrot.lane.b32.xlu1 %v1576_v62, %s10687_s25  ;;  %v1602_v14 = vmul.f32 %v6855_v23, %v6841_v46  ;;  %v1577_v62 = vmul.f32 %v6845_v20, %v1375_v2  ;;  %v1724_v46 = vmul.f32 %v6917_v42, %v6921_v40 }
 0x175   :  { %1562 = vrot.lane.b32.xlu0 %v1551_v58, %s10687_s25 }
 0x176   :  { %v6931_v8 = vpop.permute.xlu1 %978 }
 0x177   :  { %10801 = vst [vmem:[#allocation87_spill] sm:$0xff] %v6931_v8  ;;  %v6933_v29 = vpop.permute.xlu0 %954 }
 0x178   :  { %10802 = vst [vmem:[#allocation88_spill] sm:$0xff] %v6933_v29  ;;  %1731 = vrot.lane.b32.xlu1 %v1723_v6, %s10689_s8  ;;  %v1749_v29 = vmul.f32 %v6940_v12, %v6897_v18 }
 0x179   :  { %1707 = vrot.lane.b32.xlu0 %v1698_v52, %s10689_s8  ;;  %v6954_v52 = vstv %s5734_s17  ;;  %s7308_s17 = sld [smem:[#allocation9 + $0x1e]] }
 0x17a   :  { %v6942_v58 = vpop.permute.xlu1 %980 }
 0x17b   :  { %10803 = vst [vmem:[#allocation89_spill] sm:$0xff] %v6942_v58  ;;  %v6944_v56 = vpop.permute.xlu0 %1106  ;;  %v1603_v58 = vmul.f32 %v6855_v23, %v1375_v2  ;;  %v1750_v23 = vmul.f32 %v6940_v12, %v6921_v40  ;;  %v6973_v2 = vld [vmem:[#allocation4 + $0x50] sm:$0xff] }
 0x17c   :  { %10804 = vst [vmem:[#allocation90_spill] sm:$0xff] %v6944_v56  ;;  %1612 = vrot.lane.b32.xlu1 %v1602_v14, %s10687_s25  ;;  %v1801_v14 = vmul.f32 %v6954_v52, %v6897_v18 }
 0x17d   :  { %1588 = vrot.lane.b32.xlu0 %v1577_v62, %s10687_s25 }
 0x17e   :  { %v6952_v6 = vpop.permute.xlu1 %1056 }
 0x17f   :  { %10805 = vst [vmem:[#allocation91_spill] sm:$0xff] %v6952_v6  ;;  %v6956_v20 = vpop.permute.xlu0 %1004  ;;  %v1802_v6 = vmul.f32 %v6954_v52, %v6921_v40  ;;  %v378_v10 = vstv %s7308_s17  ;;  %s7807_s17 = sld [smem:[#allocation9 + $0x10]] }
 0x180   :  { %10806 = vst [vmem:[#allocation92_spill] sm:$0xff] %v6956_v20  ;;  %1757 = vrot.lane.b32.xlu1 %v1749_v29, %s10689_s8 }
 0x181   :  { %1733 = vrot.lane.b32.xlu0 %v1724_v46, %s10689_s8  ;;  %v6977_v46 = vstv %s5735_s18  ;;  %s7312_s18 = sld [smem:[#allocation9 + $0x39]] }
 0x182   :  { %v6963_v62 = vpop.permute.xlu1 %1006 }
 0x183   :  { %10807 = vst [vmem:[#allocation93_spill] sm:$0xff] %v6963_v62  ;;  %v6965_v56 = vpop.permute.xlu0 %1200 }
 0x184   :  { %10808 = vst [vmem:[#allocation94_spill] sm:$0xff] %v6965_v56  ;;  %1614 = vrot.lane.b32.xlu1 %v1603_v58, %s10687_s25  ;;  %v1699_v58 = vmul.f32 %v6899_v7, %v6973_v2  ;;  %v6987_v56 = vstv %s5736_s3  ;;  %s7316_s3 = sld [smem:[#allocation9 + $0x54]] }
 0x185   :  { %1809 = vrot.lane.b32.xlu0 %v1801_v14, %s10687_s25  ;;  %v1827_v14 = vmul.f32 %v6977_v46, %v6897_v18 }
 0x186   :  { %v6975_v29 = vpop.permute.xlu1 %1082 }
 0x187   :  { %10809 = vst [vmem:[#allocation95_spill] sm:$0xff] %v6975_v29  ;;  %v6979_v20 = vpop.permute.xlu0 %1058  ;;  %v1628_v29 = vld [vmem:[#allocation4 + $0x58] sm:$0x3f] }
 0x188   :  { %10810 = vst [vmem:[#allocation96_spill] sm:$0xff] %v6979_v20  ;;  %1811 = vrot.lane.b32.xlu1 %v1802_v6, %s10687_s25  ;;  %v1853_v20 = vmul.f32 %v6987_v56, %v6897_v18  ;;  %v1828_v6 = vmul.f32 %v6977_v46, %v6921_v40 }
 0x189   :  { %1759 = vrot.lane.b32.xlu0 %v1750_v23, %s10689_s8 }
 0x18a   :  { %v6989_v62 = vpop.permute.xlu1 %1226 }
 0x18b   :  { %10811 = vst [vmem:[#allocation97_spill] sm:$0xff] %v6989_v62  ;;  %v6991_v8 = vpop.permute.xlu0 %1202 }
 0x18c   :  { %10812 = vst [vmem:[#allocation98_spill] sm:$0xff] %v6991_v8  ;;  %1709 = vrot.lane.b32.xlu1 %v1699_v58, %s10689_s8  ;;  %v1725_v8 = vmul.f32 %v6917_v42, %v6973_v2  ;;  %v1700_v58 = vmul.f32 %v6899_v7, %v1628_v29  ;;  %v1803_v7 = vmul.f32 %v6954_v52, %v6973_v2 }
 0x18d   :  { %1835 = vrot.lane.b32.xlu0 %v1827_v14, %s10687_s25 }
 0x18e   :  { %v6999_v23 = vpop.permute.xlu1 %1108 }
 0x18f   :  { %10813 = vst [vmem:[#allocation99_spill] sm:$0xff] %v6999_v23  ;;  %v7001_v28 = vpop.permute.xlu0 %1084  ;;  %v1726_v23 = vmul.f32 %v6917_v42, %v1628_v29 }
 0x190   :  { %10814 = vst [vmem:[#allocation100_spill] sm:$0xff] %v7001_v28  ;;  %1861 = vrot.lane.b32.xlu1 %v1853_v20, %s10687_s25  ;;  %v1854_v20 = vmul.f32 %v6987_v56, %v6921_v40  ;;  %v7031_v40 = vstv %s5742_s19  ;;  %s7323_s19 = sld [smem:[#allocation9 + $0x7]] }
 0x191   :  { %1837 = vrot.lane.b32.xlu0 %v1828_v6, %s10687_s25  ;;  %v7029_v6 = vld [vmem:[#allocation4 + $0x21] sm:$0xff] }
 0x192   :  { %v7008_v18 = vpop.permute.xlu1 %1252 }
 0x193   :  { %10815 = vst [vmem:[#allocation101_spill] sm:$0xff] %v7008_v18  ;;  %v7010_v14 = vpop.permute.xlu0 %1228 }
 0x194   :  { %10816 = vst [vmem:[#allocation102_spill] sm:$0xff] %v7010_v14  ;;  %1735 = vrot.lane.b32.xlu1 %v1725_v8, %s10689_s8  ;;  %v1751_v8 = vmul.f32 %v6940_v12, %v6973_v2 }
 0x195   :  { %1711 = vrot.lane.b32.xlu0 %v1700_v58, %s10689_s8 }
 0x196   :  { %v7017_v28 = vpop.permute.xlu1 %1110 }
 0x197   :  { %10817 = vst [vmem:[#allocation103_spill] sm:$0xff] %v7017_v28  ;;  %v7019_v62 = vpop.permute.xlu0 %1304 }
 0x198   :  { %10818 = vst [vmem:[#allocation104_spill] sm:$0xff] %v7019_v62  ;;  %1737 = vrot.lane.b32.xlu1 %v1726_v23, %s10689_s8  ;;  %v1752_v23 = vmul.f32 %v6940_v12, %v1628_v29 }
 0x199   :  { %1863 = vrot.lane.b32.xlu0 %v1854_v20, %s10687_s25  ;;  %v1949_v20 = vmul.f32 %v7031_v40, %v7029_v6 }
 0x19a   :  { %v7027_v42 = vpop.permute.xlu1 %1306 }
 0x19b   :  { %10819 = vst [vmem:[#allocation105_spill] sm:$0xff] %v7027_v42  ;;  %v7033_v58 = vpop.permute.xlu0 %1254  ;;  %v1829_v42 = vmul.f32 %v6977_v46, %v6973_v2 }
 0x19c   :  { %10820 = vst [vmem:[#allocation106_spill] sm:$0xff] %v7033_v58  ;;  %1813 = vrot.lane.b32.xlu1 %v1803_v7, %s10687_s25  ;;  %v1804_v7 = vmul.f32 %v6954_v52, %v1628_v29  ;;  %v7049_v58 = vstv %s5743_s20  ;;  %s7325_s20 = sld [smem:[#allocation9 + $0x21]] }
 0x19d   :  { %1761 = vrot.lane.b32.xlu0 %v1751_v8, %s10689_s8  ;;  %v7053_v8 = vld [vmem:[#allocation4 + $0x29] sm:$0x3f] }
 0x19e   :  { %v7040_v62 = vpop.permute.xlu1 %1204 }
 0x19f   :  { %10821 = vst [vmem:[#allocation107_spill] sm:$0xff] %v7040_v62  ;;  %v7042_v28 = vpop.permute.xlu0 %1330 }
 0x1a0   :  { %10822 = vst [vmem:[#allocation108_spill] sm:$0xff] %v7042_v28  ;;  %1763 = vrot.lane.b32.xlu1 %v1752_v23, %s10689_s8  ;;  %v1975_v23 = vmul.f32 %v7049_v58, %v7029_v6 }
 0x1a1   :  { %1957 = vrot.lane.b32.xlu0 %v1949_v20, %s10689_s8  ;;  %v1950_v20 = vmul.f32 %v7031_v40, %v7053_v8 }
 0x1a2   :  { %v7051_v12 = vpop.permute.xlu1 %1356  ;;  %v630_v50 = vstv %s7325_s20  ;;  %s7949_s20 = sld [smem:[#allocation9 + $0x30]] }
 0x1a3   :  { %10823 = vst [vmem:[#allocation109_spill] sm:$0xff] %v7051_v12  ;;  %v7055_v14 = vpop.permute.xlu0 %1332  ;;  %v7072_v12 = vstv %s5744_s4  ;;  %s7329_s4 = sld [smem:[#allocation9 + $0x3c]]  ;;  %v7424_v16 = vmul.f32 %v6112_v24, %v630_v50 }
 0x1a4   :  { %10824 = vst [vmem:[#allocation110_spill] sm:$0xff] %v7055_v14  ;;  %1839 = vrot.lane.b32.xlu1 %v1829_v42, %s10687_s25  ;;  %v1855_v14 = vmul.f32 %v6987_v56, %v6973_v2  ;;  %v1830_v42 = vmul.f32 %v6977_v46, %v1628_v29  ;;  %v1976_v2 = vmul.f32 %v7049_v58, %v7053_v8 }
 0x1a5   :  { %1815 = vrot.lane.b32.xlu0 %v1804_v7, %s10687_s25  ;;  %10892 = vst [vmem:[#allocation178_spill] sm:$0xff] %v7424_v16 }
 0x1a6   :  { %v7063_v52 = vpop.permute.xlu1 %1230 }
 0x1a7   :  { %10825 = vst [vmem:[#allocation111_spill] sm:$0xff] %v7063_v52  ;;  %v7065_v62 = vpop.permute.xlu0 %1206 }
 0x1a8   :  { %10826 = vst [vmem:[#allocation112_spill] sm:$0xff] %v7065_v62  ;;  %1983 = vrot.lane.b32.xlu1 %v1975_v23, %s10689_s8  ;;  %v2001_v62 = vmul.f32 %v7072_v12, %v7029_v6 }
 0x1a9   :  { %1959 = vrot.lane.b32.xlu0 %v1950_v20, %s10689_s8  ;;  %v7086_v20 = vstv %s5746_s21  ;;  %s7333_s21 = sld [smem:[#allocation9 + $0x57]] }
 0x1aa   :  { %v7074_v7 = vpop.permute.xlu1 %1232 }
 0x1ab   :  { %10827 = vst [vmem:[#allocation113_spill] sm:$0xff] %v7074_v7  ;;  %v7076_v28 = vpop.permute.xlu0 %1358  ;;  %v1856_v7 = vmul.f32 %v6987_v56, %v1628_v29  ;;  %v2002_v56 = vmul.f32 %v7072_v12, %v7053_v8 }
 0x1ac   :  { %10828 = vst [vmem:[#allocation114_spill] sm:$0xff] %v7076_v28  ;;  %1865 = vrot.lane.b32.xlu1 %v1855_v14, %s10687_s25  ;;  %v2053_v14 = vmul.f32 %v7086_v20, %v7029_v6 }
 0x1ad   :  { %1841 = vrot.lane.b32.xlu0 %v1830_v42, %s10687_s25 }
 0x1ae   :  { %v7084_v23 = vpop.permute.xlu1 %1308 }
 0x1af   :  { %10829 = vst [vmem:[#allocation115_spill] sm:$0xff] %v7084_v23  ;;  %v7088_v46 = vpop.permute.xlu0 %1256  ;;  %v2054_v23 = vmul.f32 %v7086_v20, %v7053_v8  ;;  %v650_v26 = vstv %s7333_s21  ;;  %s7969_s21 = sld [smem:[#allocation9 + $0x13]] }
 0x1b0   :  { %10830 = vst [vmem:[#allocation116_spill] sm:$0xff] %v7088_v46  ;;  %2009 = vrot.lane.b32.xlu1 %v2001_v62, %s10689_s8  ;;  %v7105_v62 = vld [vmem:[#allocation4 + $0x51] sm:$0xff] }
 0x1b1   :  { %1985 = vrot.lane.b32.xlu0 %v1976_v2, %s10689_s8  ;;  %v7109_v2 = vstv %s5747_s22  ;;  %s7360_s22 = sld [smem:[#allocation9 + $0x24]] }
 0x1b2   :  { %v7095_v42 = vpop.permute.xlu1 %1258 }
 0x1b3   :  { %10831 = vst [vmem:[#allocation117_spill] sm:$0xff] %v7095_v42  ;;  %v7097_v52 = vpop.permute.xlu0 %1452 }
 0x1b4   :  { %10832 = vst [vmem:[#allocation118_spill] sm:$0xff] %v7097_v52  ;;  %1867 = vrot.lane.b32.xlu1 %v1856_v7, %s10687_s25  ;;  %v1951_v7 = vmul.f32 %v7031_v40, %v7105_v62  ;;  %v7119_v52 = vstv %s5748_s23  ;;  %s7370_s23 = sld [smem:[#allocation9 + $0x3f]] }
 0x1b5   :  { %2061 = vrot.lane.b32.xlu0 %v2053_v14, %s10687_s25  ;;  %v2079_v14 = vmul.f32 %v7109_v2, %v7029_v6 }
 0x1b6   :  { %v7107_v29 = vpop.permute.xlu1 %1334 }
 0x1b7   :  { %10833 = vst [vmem:[#allocation119_spill] sm:$0xff] %v7107_v29  ;;  %v7111_v46 = vpop.permute.xlu0 %1310  ;;  %v1880_v29 = vld [vmem:[#allocation4 + $0x59] sm:$0x3f] }
 0x1b8   :  { %10834 = vst [vmem:[#allocation120_spill] sm:$0xff] %v7111_v46  ;;  %2063 = vrot.lane.b32.xlu1 %v2054_v23, %s10687_s25  ;;  %v2105_v46 = vmul.f32 %v7119_v52, %v7029_v6  ;;  %v2080_v23 = vmul.f32 %v7109_v2, %v7053_v8 }
 0x1b9   :  { %2011 = vrot.lane.b32.xlu0 %v2002_v56, %s10689_s8 }
 0x1ba   :  { %v7121_v42 = vpop.permute.xlu1 %1478 }
 0x1bb   :  { %10835 = vst [vmem:[#allocation121_spill] sm:$0xff] %v7121_v42  ;;  %v7123_v28 = vpop.permute.xlu0 %1454 }
 0x1bc   :  { %10836 = vst [vmem:[#allocation122_spill] sm:$0xff] %v7123_v28  ;;  %1961 = vrot.lane.b32.xlu1 %v1951_v7, %s10689_s8  ;;  %v1977_v28 = vmul.f32 %v7049_v58, %v7105_v62  ;;  %v1952_v7 = vmul.f32 %v7031_v40, %v1880_v29  ;;  %v2055_v40 = vmul.f32 %v7086_v20, %v7105_v62 }
 0x1bd   :  { %2087 = vrot.lane.b32.xlu0 %v2079_v14, %s10687_s25 }
 0x1be   :  { %v7131_v56 = vpop.permute.xlu1 %1360 }
 0x1bf   :  { %10837 = vst [vmem:[#allocation123_spill] sm:$0xff] %v7131_v56  ;;  %v7133_v18 = vpop.permute.xlu0 %1336  ;;  %v1978_v56 = vmul.f32 %v7049_v58, %v1880_v29 }
 0x1c0   :  { %10838 = vst [vmem:[#allocation124_spill] sm:$0xff] %v7133_v18  ;;  %2113 = vrot.lane.b32.xlu1 %v2105_v46, %s10687_s25  ;;  %v2106_v46 = vmul.f32 %v7119_v52, %v7053_v8  ;;  %v7163_v8 = vstv %s5754_s24  ;;  %s7382_s24 = sld [smem:[#allocation9 + $0x8]] }
 0x1c1   :  { %2089 = vrot.lane.b32.xlu0 %v2080_v23, %s10687_s25  ;;  %v7161_v23 = vld [vmem:[#allocation4 + $0x22] sm:$0xff] }
 0x1c2   :  { %v7140_v6 = vpop.permute.xlu1 %1504 }
 0x1c3   :  { %10839 = vst [vmem:[#allocation125_spill] sm:$0xff] %v7140_v6  ;;  %v7142_v14 = vpop.permute.xlu0 %1480 }
 0x1c4   :  { %10840 = vst [vmem:[#allocation126_spill] sm:$0xff] %v7142_v14  ;;  %1987 = vrot.lane.b32.xlu1 %v1977_v28, %s10689_s8  ;;  %v2003_v28 = vmul.f32 %v7072_v12, %v7105_v62 }
 0x1c5   :  { %1963 = vrot.lane.b32.xlu0 %v1952_v7, %s10689_s8 }
 0x1c6   :  { %v7149_v18 = vpop.permute.xlu1 %1362 }
 0x1c7   :  { %10841 = vst [vmem:[#allocation127_spill] sm:$0xff] %v7149_v18  ;;  %v7151_v42 = vpop.permute.xlu0 %1556 }
 0x1c8   :  { %10842 = vst [vmem:[#allocation128_spill] sm:$0xff] %v7151_v42  ;;  %1989 = vrot.lane.b32.xlu1 %v1978_v56, %s10689_s8  ;;  %v2004_v56 = vmul.f32 %v7072_v12, %v1880_v29 }
 0x1c9   :  { %2115 = vrot.lane.b32.xlu0 %v2106_v46, %s10687_s25  ;;  %v2201_v46 = vmul.f32 %v7163_v8, %v7161_v23 }
 0x1ca   :  { %v7159_v58 = vpop.permute.xlu1 %1558 }
 0x1cb   :  { %10843 = vst [vmem:[#allocation129_spill] sm:$0xff] %v7159_v58  ;;  %v7165_v7 = vpop.permute.xlu0 %1506  ;;  %v2081_v58 = vmul.f32 %v7109_v2, %v7105_v62 }
 0x1cc   :  { %10844 = vst [vmem:[#allocation130_spill] sm:$0xff] %v7165_v7  ;;  %2065 = vrot.lane.b32.xlu1 %v2055_v40, %s10687_s25  ;;  %v2056_v40 = vmul.f32 %v7086_v20, %v1880_v29  ;;  %v7181_v7 = vstv %s5755_s6  ;;  %s7402_s6 = sld [smem:[#allocation9 + $0x5a]] }
 0x1cd   :  { %2013 = vrot.lane.b32.xlu0 %v2003_v28, %s10689_s8  ;;  %v2130_v28 = vld [vmem:[#allocation4 + $0x2a] sm:$0x3f] }
 0x1ce   :  { %v7172_v42 = vpop.permute.xlu1 %1456 }
 0x1cf   :  { %10845 = vst [vmem:[#allocation131_spill] sm:$0xff] %v7172_v42  ;;  %v7174_v14 = vpop.permute.xlu0 %1582  ;;  %v2202_v42 = vmul.f32 %v7163_v8, %v2130_v28 }
 0x1d0   :  { %10846 = vst [vmem:[#allocation132_spill] sm:$0xff] %v7174_v14  ;;  %2015 = vrot.lane.b32.xlu1 %v2004_v56, %s10689_s8  ;;  %v2227_v56 = vmul.f32 %v7181_v7, %v7161_v23 }
 0x1d1   :  { %2209 = vrot.lane.b32.xlu0 %v2201_v46, %s10689_s8 }
 0x1d2   :  { %v7183_v12 = vpop.permute.xlu1 %1608 }
 0x1d3   :  { %10847 = vst [vmem:[#allocation133_spill] sm:$0xff] %v7183_v12  ;;  %v7185_v6 = vpop.permute.xlu0 %1584  ;;  %v2107_v12 = vmul.f32 %v7119_v52, %v7105_v62  ;;  %v2304_v62 = vstv %s5758_s27  ;;  %s7475_s27 = sld [smem:[#allocation9 + $0x27]] }
 0x1d4   :  { %10848 = vst [vmem:[#allocation134_spill] sm:$0xff] %v7185_v6  ;;  %2091 = vrot.lane.b32.xlu1 %v2081_v58, %s10687_s25  ;;  %v2082_v58 = vmul.f32 %v7109_v2, %v1880_v29  ;;  %v2252_v6 = vstv %s5756_s26  ;;  %v2108_v2 = vmul.f32 %v7119_v52, %v1880_v29  ;;  %s7462_s26 = sld [smem:[#allocation9 + $0xa]] }
 0x1d5   :  { %2067 = vrot.lane.b32.xlu0 %v2056_v40, %s10687_s25 }
 0x1d6   :  { %v7192_v46 = vpop.permute.xlu1 %1482 }
 0x1d7   :  { %10849 = vst [vmem:[#allocation135_spill] sm:$0xff] %v7192_v46  ;;  %v7194_v20 = vpop.permute.xlu0 %1458  ;;  %v2253_v46 = vmul.f32 %v2252_v6, %v7161_v23 }
 0x1d8   :  { %10850 = vst [vmem:[#allocation136_spill] sm:$0xff] %v7194_v20  ;;  %2235 = vrot.lane.b32.xlu1 %v2227_v56, %s10689_s8  ;;  %v2228_v56 = vmul.f32 %v7181_v7, %v2130_v28 }
 0x1d9   :  { %2211 = vrot.lane.b32.xlu0 %v2202_v42, %s10689_s8 }
 0x1da   :  { %v7201_v14 = vpop.permute.xlu1 %1484 }
 0x1db   :  { %10851 = vst [vmem:[#allocation137_spill] sm:$0xff] %v7201_v14  ;;  %v7203_v40 = vpop.permute.xlu0 %1610 }
 0x1dc   :  { %10852 = vst [vmem:[#allocation138_spill] sm:$0xff] %v7203_v40  ;;  %2117 = vrot.lane.b32.xlu1 %v2107_v12, %s10687_s25  ;;  %v2305_v12 = vmul.f32 %v2304_v62, %v7161_v23  ;;  %v2254_v40 = vmul.f32 %v2252_v6, %v2130_v28 }
 0x1dd   :  { %2093 = vrot.lane.b32.xlu0 %v2082_v58, %s10687_s25 }
 0x1de   :  { %v7209_v20 = vpop.permute.xlu1 %1560 }
 0x1df   :  { %10853 = vst [vmem:[#allocation139_spill] sm:$0xff] %v7209_v20  ;;  %v7211_v42 = vpop.permute.xlu0 %1508  ;;  %v2306_v20 = vmul.f32 %v2304_v62, %v2130_v28 }
 0x1e0   :  { %10854 = vst [vmem:[#allocation140_spill] sm:$0xff] %v7211_v42  ;;  %2261 = vrot.lane.b32.xlu1 %v2253_v46, %s10689_s8  ;;  %v2131_v42 = vld [vmem:[#allocation4 + $0x52] sm:$0xff]  ;;  %v2330_v46 = vstv %s5759_s0  ;;  %s7500_s0 = sld [smem:[#allocation9 + $0x42]] }
 0x1e1   :  { %2237 = vrot.lane.b32.xlu0 %v2228_v56, %s10689_s8  ;;  %v2203_v29 = vmul.f32 %v7163_v8, %v2131_v42  ;;  %v2331_v56 = vmul.f32 %v2330_v46, %v7161_v23 }
 0x1e2   :  { %v7217_v14 = vpop.permute.xlu1 %1510 }
 0x1e3   :  { %10855 = vst [vmem:[#allocation141_spill] sm:$0xff] %v7217_v14  ;;  %v7219_v58 = vpop.permute.xlu0 %1705  ;;  %v2356_v14 = vstv %s5760_s28  ;;  %s7509_s28 = sld [smem:[#allocation9 + $0x5d]] }
 0x1e4   :  { %10856 = vst [vmem:[#allocation142_spill] sm:$0xff] %v7219_v58  ;;  %2119 = vrot.lane.b32.xlu1 %v2108_v2, %s10687_s25 }
 0x1e5   :  { %2313 = vrot.lane.b32.xlu0 %v2305_v12, %s10687_s25  ;;  %v2357_v12 = vmul.f32 %v2356_v14, %v7161_v23 }
 0x1e6   :  { %v7223_v18 = vpop.permute.xlu1 %1586 }
 0x1e7   :  { %10857 = vst [vmem:[#allocation143_spill] sm:$0xff] %v7223_v18  ;;  %v7225_v52 = vpop.permute.xlu0 %1562 }
 0x1e8   :  { %10858 = vst [vmem:[#allocation144_spill] sm:$0xff] %v7225_v52  ;;  %2315 = vrot.lane.b32.xlu1 %v2306_v20, %s10687_s25  ;;  %v2332_v52 = vmul.f32 %v2330_v46, %v2130_v28  ;;  %v2132_v20 = vld [vmem:[#allocation4 + $0x5a] sm:$0x3f] }
 0x1e9   :  { %2263 = vrot.lane.b32.xlu0 %v2254_v40, %s10689_s8  ;;  %v2229_v40 = vmul.f32 %v7181_v7, %v2131_v42  ;;  %v2230_v23 = vmul.f32 %v7181_v7, %v2132_v20  ;;  %v2308_v7 = vmul.f32 %v2304_v62, %v2132_v20 }
 0x1ea   :  { %v7231_v2 = vpop.permute.xlu1 %1731 }
 0x1eb   :  { %10859 = vst [vmem:[#allocation145_spill] sm:$0xff] %v7231_v2  ;;  %v7233_v58 = vpop.permute.xlu0 %1707  ;;  %v2204_v2 = vmul.f32 %v7163_v8, %v2132_v20  ;;  %v2255_v8 = vmul.f32 %v2252_v6, %v2131_v42 }
 0x1ec   :  { %10860 = vst [vmem:[#allocation146_spill] sm:$0xff] %v7233_v58  ;;  %2213 = vrot.lane.b32.xlu1 %v2203_v29, %s10689_s8 }
 0x1ed   :  { %2339 = vrot.lane.b32.xlu0 %v2331_v56, %s10687_s25  ;;  %v2358_v56 = vmul.f32 %v2356_v14, %v2130_v28  ;;  %v2256_v28 = vmul.f32 %v2252_v6, %v2132_v20 }
 0x1ee   :  { %v7238_v18 = vpop.permute.xlu1 %1612 }
 0x1ef   :  { %10861 = vst [vmem:[#allocation147_spill] sm:$0xff] %v7238_v18  ;;  %v7240_v37 = vpop.permute.xlu0 %1588 }
 0x1f0   :  { %10862 = vst [vmem:[#allocation148_spill] sm:$0xff] %v7240_v37  ;;  %2365 = vrot.lane.b32.xlu1 %v2357_v12, %s10687_s25 }
 0x1f1   :  { %2341 = vrot.lane.b32.xlu0 %v2332_v52, %s10687_s25  ;;  %v2307_v52 = vmul.f32 %v2304_v62, %v2131_v42  ;;  %v7276_v62 = vld [vmem:[#allocation4] sm:$0xff] }
 0x1f2   :  { %v7246_v58 = vpop.permute.xlu1 %1757 }
 0x1f3   :  { %10863 = vst [vmem:[#allocation149_spill] sm:$0xff] %v7246_v58  ;;  %v7248_v29 = vpop.permute.xlu0 %1733 }
 0x1f4   :  { %10864 = vst [vmem:[#allocation150_spill] sm:$0xff] %v7248_v29  ;;  %2239 = vrot.lane.b32.xlu1 %v2229_v40, %s10689_s8 }
 0x1f5   :  { %2215 = vrot.lane.b32.xlu0 %v2204_v2, %s10689_s8 }
 0x1f6   :  { %v7253_v37 = vpop.permute.xlu1 %1614 }
 0x1f7   :  { %10865 = vst [vmem:[#allocation151_spill] sm:$0xff] %v7253_v37  ;;  %v7255_v12 = vpop.permute.xlu0 %1809  ;;  %v156_v37 = vstv %s5657_s29  ;;  %s7557_s29 = sld [smem:[#allocation9 + $0xb]] }
 0x1f8   :  { %10866 = vst [vmem:[#allocation152_spill] sm:$0xff] %v7255_v12  ;;  %2241 = vrot.lane.b32.xlu1 %v2230_v23, %s10689_s8  ;;  %v2334_v23 = vmul.f32 %v2330_v46, %v2132_v20  ;;  %v157_v6 = vmul.f32 %v7276_v62, %v156_v37 }
 0x1f9   :  { %2367 = vrot.lane.b32.xlu0 %v2358_v56, %s10687_s25  ;;  %v2333_v56 = vmul.f32 %v2330_v46, %v2131_v42  ;;  %v6105_v46 = vld [vmem:[#allocation4 + $0x8] sm:$0x3f] }
 0x1fa   :  { %v7259_v58 = vpop.permute.xlu1 %1811 }
 0x1fb   :  { %10867 = vst [vmem:[#allocation153_spill] sm:$0xff] %v7259_v58  ;;  %v7261_v29 = vpop.permute.xlu0 %1759 }
 0x1fc   :  { %10868 = vst [vmem:[#allocation154_spill] sm:$0xff] %v7261_v29  ;;  %2317 = vrot.lane.b32.xlu1 %v2307_v52, %s10687_s25  ;;  %v2359_v52 = vmul.f32 %v2356_v14, %v2131_v42 }
 0x1fd   :  { %2265 = vrot.lane.b32.xlu0 %v2255_v8, %s10689_s8 }
 0x1fe   :  { %v7265_v2 = vpop.permute.xlu1 %1709 }
 0x1ff   :  { %10869 = vst [vmem:[#allocation155_spill] sm:$0xff] %v7265_v2  ;;  %v7267_v40 = vpop.permute.xlu0 %1835  ;;  %v2360_v2 = vmul.f32 %v2356_v14, %v2132_v20  ;;  %v7298_v14 = vld [vmem:[#allocation4 + $0x38] sm:$0x3f] }
 0x200   :  { %10870 = vst [vmem:[#allocation156_spill] sm:$0xff] %v7267_v40  ;;  %2319 = vrot.lane.b32.xlu1 %v2308_v7, %s10687_s25  ;;  %v160_v20 = vmul.f32 %v7298_v14, %v156_v37  ;;  %v150_v40 = vstv %s5656_s2  ;;  %s7794_s2 = sld [smem:[#allocation9 + $0x2d]] }
 0x201   :  { %2267 = vrot.lane.b32.xlu0 %v2256_v28, %s10689_s8  ;;  %v158_v28 = vmul.f32 %v6105_v46, %v156_v37  ;;  %v7350_v36 = vmul.f32 %v7276_v62, %v150_v40  ;;  %v7354_v53 = vmul.f32 %v6105_v46, %v150_v40 }
 0x202   :  { %v7271_v12 = vpop.permute.xlu1 %1861 }
 0x203   :  { %10871 = vst [vmem:[#allocation157_spill] sm:$0xff] %v7271_v12  ;;  %v7273_v29 = vpop.permute.xlu0 %1837 }
 0x204   :  { %10872 = vst [vmem:[#allocation158_spill] sm:$0xff] %v7273_v29  ;;  %2345 = vrot.lane.b32.xlu1 %v2334_v23, %s10687_s25  ;;  %v260_v29 = vstv %s5661_s1  ;;  %s7631_s1 = sld [smem:[#allocation9 + $0x2a]] }
 0x205   :  { %2343 = vrot.lane.b32.xlu0 %v2333_v56, %s10687_s25  ;;  %v262_v42 = vmul.f32 %v6105_v46, %v260_v29  ;;  %v261_v56 = vmul.f32 %v7276_v62, %v260_v29 }
 0x206   :  { %v7280_v8 = vpop.permute.xlu1 %1735 }
 0x207   :  { %10873 = vst [vmem:[#allocation159_spill] sm:$0xff] %v7280_v8  ;;  %v7282_v7 = vpop.permute.xlu0 %1711 }
 0x208   :  { %10874 = vst [vmem:[#allocation160_spill] sm:$0xff] %v7282_v7  ;;  %165 = vrot.lane.b32.xlu1 %v157_v6, %s10689_s8 }
 0x209   :  { %2369 = vrot.lane.b32.xlu0 %v2359_v52, %s10687_s25  ;;  %v6107_v52 = vld [vmem:[#allocation4 + $0x30] sm:$0xff] }
 0x20a   :  { %v7286_v23 = vpop.permute.xlu1 %1737  ;;  %v7376_v17 = vmul.f32 %v6107_v52, %v150_v40 }
 0x20b   :  { %10875 = vst [vmem:[#allocation161_spill] sm:$0xff] %v7286_v23  ;;  %v7288_v12 = vpop.permute.xlu0 %1863  ;;  %v408_v23 = vstv %s5669_s30  ;;  %s7644_s30 = sld [smem:[#allocation9 + $0xd]] }
 0x20c   :  { %10876 = vst [vmem:[#allocation162_spill] sm:$0xff] %v7288_v12  ;;  %167 = vrot.lane.b32.xlu1 %v158_v28, %s10689_s8  ;;  %v159_v28 = vmul.f32 %v6107_v52, %v156_v37  ;;  %v144_v12 = vstv %s5655_s14  ;;  %s7662_s14 = sld [smem:[#allocation9 + $0x45]] }
 0x20d   :  { %2371 = vrot.lane.b32.xlu0 %v2360_v2, %s10687_s25  ;;  %v7345_v58 = vmul.f32 %v6105_v46, %v144_v12  ;;  %v7364_v22 = vmul.f32 %v6107_v52, %v144_v12  ;;  %v7374_v0 = vmul.f32 %v7298_v14, %v144_v12 }
 0x20e   :  { %v7293_v7 = vpop.permute.xlu1 %1813 }
 0x20f   :  { %10877 = vst [vmem:[#allocation163_spill] sm:$0xff] %v7293_v7  ;;  %v7295_v6 = vpop.permute.xlu0 %1761  ;;  %v263_v7 = vmul.f32 %v6107_v52, %v260_v29 }
 0x210   :  { %10878 = vst [vmem:[#allocation164_spill] sm:$0xff] %v7295_v6  ;;  %271 = vrot.lane.b32.xlu1 %v262_v42, %s10687_s25  ;;  %v6108_v6 = vld [vmem:[#allocation4 + $0x1] sm:$0xff] }
 0x211   :  { %269 = vrot.lane.b32.xlu0 %v261_v56, %s10687_s25  ;;  %v409_v42 = vmul.f32 %v6108_v6, %v408_v23  ;;  %v7387_v43 = vmul.f32 %v6108_v6, %v378_v10 }
 0x212   :  { %v7302_v2 = vpop.permute.xlu1 %1763 }
 0x213   :  { %10879 = vst [vmem:[#allocation165_spill] sm:$0xff] %v7302_v2  ;;  %v7304_v8 = vpop.permute.xlu0 %1957  ;;  %v6109_v2 = vld [vmem:[#allocation4 + $0x9] sm:$0x3f] }
 0x214   :  { %10880 = vst [vmem:[#allocation166_spill] sm:$0xff] %v7304_v8  ;;  %171 = vrot.lane.b32.xlu1 %v160_v20, %s10689_s8  ;;  %v410_v8 = vmul.f32 %v6109_v2, %v408_v23  ;;  %v264_v20 = vmul.f32 %v7298_v14, %v260_v29 }
 0x215   :  { %169 = vrot.lane.b32.xlu0 %v159_v28, %s10689_s8  ;;  %v7321_v28 = vstv %s5673_s15  ;;  %s7680_s15 = sld [smem:[#allocation9 + $0x60]] }
 0x216   :  { %v7310_v56 = vpop.permute.xlu1 %1839  ;;  %v514_v29 = vmul.f32 %v6109_v2, %v7321_v28 }
 0x217   :  { %10881 = vst [vmem:[#allocation167_spill] sm:$0xff] %v7310_v56  ;;  %v7314_v37 = vpop.permute.xlu0 %1815 }
 0x218   :  { %10882 = vst [vmem:[#allocation168_spill] sm:$0xff] %v7314_v37  ;;  %417 = vrot.lane.b32.xlu1 %v409_v42, %s10689_s8  ;;  %v138_v37 = vstv %s5654_s16  ;;  %s7727_s16 = sld [smem:[#allocation9 + $0xe]] }
 0x219   :  { %273 = vrot.lane.b32.xlu0 %v263_v7, %s10687_s25  ;;  %v7338_v7 = vmul.f32 %v7276_v62, %v144_v12  ;;  %v7343_v18 = vmul.f32 %v7276_v62, %v138_v37  ;;  %v7356_v47 = vmul.f32 %v6107_v52, %v138_v37  ;;  %v7367_v3 = vmul.f32 %v7298_v14, %v138_v37 }
 0x21a   :  { %v7327_v56 = vpop.permute.xlu1 %1983  ;;  %v398_v62 = vstv %s7316_s3  ;;  %v7391_v12 = vmul.f32 %v6109_v2, %v378_v10  ;;  %s7834_s3 = sld [smem:[#allocation9 + $0x63]] }
 0x21b   :  { %10883 = vst [vmem:[#allocation169_spill] sm:$0xff] %v7327_v56  ;;  %v7331_v42 = vpop.permute.xlu0 %1959  ;;  %v513_v56 = vmul.f32 %v6108_v6, %v7321_v28 }
 0x21c   :  { %10884 = vst [vmem:[#allocation170_spill] sm:$0xff] %v7331_v42  ;;  %419 = vrot.lane.b32.xlu1 %v410_v8, %s10689_s8  ;;  %v7347_v42 = vmul.f32 %v6105_v46, %v138_v37  ;;  %v6110_v46 = vld [vmem:[#allocation4 + $0x39] sm:$0x3f]  ;;  %v7380_v37 = vstv %s7323_s19  ;;  %s7887_s19 = sld [smem:[#allocation9 + $0x11]] }
 0x21d   :  { %275 = vrot.lane.b32.xlu0 %v264_v20, %s10687_s25  ;;  %v388_v20 = vstv %s7312_s18  ;;  %v7414_v33 = vmul.f32 %v6110_v46, %v378_v10  ;;  %v7422_v15 = vmul.f32 %v6110_v46, %v398_v62  ;;  %s7816_s18 = sld [smem:[#allocation9 + $0x48]] }
 0x21e   :  { %v7352_v8 = vpop.permute.xlu1 %1865  ;;  %v7389_v61 = vmul.f32 %v6108_v6, %v388_v20  ;;  %v7397_v57 = vmul.f32 %v6109_v2, %v388_v20  ;;  %v7416_v32 = vmul.f32 %v6110_v46, %v388_v20 }
 0x21f   :  { %10885 = vst [vmem:[#allocation171_spill] sm:$0xff] %v7352_v8  ;;  %v7362_v13 = vpop.permute.xlu0 %1841  ;;  %v412_v8 = vmul.f32 %v6110_v46, %v408_v23  ;;  %10891 = vst [vmem:[#allocation177_spill] sm:$0xff] %v7422_v15 }
 0x220   :  { %10886 = vst [vmem:[#allocation172_spill] sm:$0xff] %v7362_v13  ;;  %523 = vrot.lane.b32.xlu1 %v514_v29, %s10687_s25  ;;  %v6111_v13 = vld [vmem:[#allocation4 + $0x31] sm:$0xff]  ;;  %v7385_v29 = vmul.f32 %v7298_v14, %v150_v40  ;;  %v7406_v40 = vmul.f32 %v6109_v2, %v398_v62  ;;  %v640_v14 = vstv %s7329_s4  ;;  %10890 = vst [vmem:[#allocation176_spill] sm:$0xff] %v7416_v32  ;;  %s7956_s4 = sld [smem:[#allocation9 + $0x4b]] }
 0x221   :  { %521 = vrot.lane.b32.xlu0 %v513_v56, %s10687_s25  ;;  %v411_v48 = vmul.f32 %v6111_v13, %v408_v23  ;;  %v7395_v56 = vmul.f32 %v6108_v6, %v398_v62  ;;  %v7399_v23 = vmul.f32 %v6111_v13, %v378_v10  ;;  %v7412_v6 = vmul.f32 %v6111_v13, %v388_v20 }
 0x222   :  { %v7393_v52 = vpop.permute.xlu1 %2009  ;;  %v7420_v2 = vmul.f32 %v6111_v13, %v398_v62  ;;  %v7430_v10 = vmul.f32 %v6112_v24, %v640_v14  ;;  %v7432_v20 = vmul.f32 %v6112_v24, %v650_v26  ;;  %v7440_v62 = vld [vmem:[#allocation4 + $0x32] sm:$0xff] }
 0x223   :  { %10887 = vst [vmem:[#allocation173_spill] sm:$0xff] %v7393_v52  ;;  %v7404_v39 = vpop.permute.xlu0 %1985  ;;  %v661_v52 = vmul.f32 %v6112_v24, %v7380_v37  ;;  %10889 = vst [vmem:[#allocation175_spill] sm:$0xff] %v7412_v6  ;;  %v7443_v16 = vmul.f32 %v7440_v62, %v630_v50  ;;  %v7470_v15 = vmul.f32 %v7440_v62, %v650_v26 }
 0x224   :  { %10888 = vst [vmem:[#allocation174_spill] sm:$0xff] %v7404_v39  ;;  %423 = vrot.lane.b32.xlu1 %v412_v8, %s10689_s8  ;;  %v515_v39 = vmul.f32 %v6111_v13, %v7321_v28  ;;  %v6113_v8 = vld [vmem:[#allocation4 + $0xa] sm:$0x3f]  ;;  %10895 = vst [vmem:[#allocation181_spill] sm:$0xff] %v7430_v10 }
 0x225   :  { %421 = vrot.lane.b32.xlu0 %v411_v48, %s10689_s8  ;;  %v7426_v21 = vmul.f32 %v6113_v8, %v630_v50  ;;  %10896 = vst [vmem:[#allocation182_spill] sm:$0xff] %v7432_v20  ;;  %v7434_v48 = vmul.f32 %v6113_v8, %v640_v14  ;;  %v7436_v32 = vmul.f32 %v6113_v8, %v650_v26  ;;  %10900 = vst [vmem:[#allocation186_spill] sm:$0xff] %v7443_v16  ;;  %v7451_v20 = vld [vmem:[#allocation4 + $0x3a] sm:$0x3f] }
 0x226   :  { %v7428_v6 = vpop.permute.xlu1 %1867  ;;  %v662_v10 = vmul.f32 %v6113_v8, %v7380_v37  ;;  %v7460_v16 = vstv %s7382_s24  ;;  %s8109_s24 = sld [smem:[#allocation9 + $0x33]] }
 0x227   :  { %10893 = vst [vmem:[#allocation179_spill] sm:$0xff] %v7426_v21  ;;  %10894 = vst [vmem:[#allocation180_spill] sm:$0xff] %v7428_v6  ;;  %v7438_v13 = vpop.permute.xlu0 %2061  ;;  %v7446_v21 = vmul.f32 %v7440_v62, %v640_v14  ;;  %v883_v6 = vstv %s7360_s22  ;;  %s7989_s22 = sld [smem:[#allocation9 + $0x66]] }
 0x228   :  { %10897 = vst [vmem:[#allocation183_spill] sm:$0xff] %v7434_v48  ;;  %10898 = vst [vmem:[#allocation184_spill] sm:$0xff] %v7436_v32  ;;  %669 = vrot.lane.b32.xlu1 %v661_v52, %s10689_s8  ;;  %v7454_v48 = vmul.f32 %v7451_v20, %v630_v50  ;;  %v893_v32 = vstv %s7370_s23  ;;  %v203_v52 = vadd.f32 %v6488_v27, %v7343_v18  ;;  %v7486_v18 = vld [vmem:[#allocation4 + $0x18] sm:$0x3f]  ;;  %s8049_s23 = sld [smem:[#allocation9 + $0x14]] }
 0x229   :  { %10899 = vst [vmem:[#allocation185_spill] sm:$0xff] %v7438_v13  ;;  %10901 = vst [vmem:[#allocation187_spill] sm:$0xff] %v7446_v21  ;;  %525 = vrot.lane.b32.xlu0 %v515_v39, %s10687_s25  ;;  %v516_v13 = vmul.f32 %v6110_v46, %v7321_v28  ;;  %v7467_v21 = vmul.f32 %v7451_v20, %v640_v14  ;;  %v7473_v50 = vmul.f32 %v7451_v20, %v650_v26  ;;  %v7481_v46 = vld [vmem:[#allocation4 + $0x10] sm:$0xff] }
 0x22a   :  { %v7477_v39 = vpop.permute.xlu1 %2063  ;;  %v204_v28 = vadd.f32 %v6494_v31, %v7347_v42  ;;  %v7484_v27 = vmul.f32 %v7481_v46, %v883_v6  ;;  %v7489_v14 = vmul.f32 %v7486_v18, %v883_v6  ;;  %v7498_v31 = vmul.f32 %v7481_v46, %v893_v32 }
 0x22b   :  { %10902 = vst [vmem:[#allocation188_spill] sm:$0xff] %v7467_v21  ;;  %10903 = vst [vmem:[#allocation189_spill] sm:$0xff] %v7473_v50  ;;  %v903_v21 = vstv %s7402_s6  ;;  %v7492_v26 = vpop.permute.xlu0 %2011  ;;  %v229_v50 = vadd.f32 %v6486_v25, %v7338_v7  ;;  %v766_v42 = vmul.f32 %v6113_v8, %v7460_v16  ;;  %v765_v25 = vmul.f32 %v6112_v24, %v7460_v16  ;;  %s8116_s6 = sld [smem:[#allocation9 + $0x4e]] }
 0x22c   :  { %10904 = vst [vmem:[#allocation190_spill] sm:$0xff] %v7477_v39  ;;  %10905 = vst [vmem:[#allocation191_spill] sm:$0xff] %v7484_v27  ;;  %v307_v39 = vadd.f32 %v6499_v34, %v203_v52  ;;  %671 = vrot.lane.b32.xlu1 %v662_v10, %s10689_s8  ;;  %v308_v27 = vadd.f32 %v6505_v38, %v204_v28  ;;  %v7515_v7 = vmul.f32 %v7481_v46, %v903_v21 }
 0x22d   :  { %10906 = vst [vmem:[#allocation192_spill] sm:$0xff] %v7489_v14  ;;  %10907 = vst [vmem:[#allocation193_spill] sm:$0xff] %v7492_v26  ;;  %v230_v14 = vadd.f32 %v6492_v30, %v7345_v58  ;;  %v255_v26 = vadd.f32 %v6501_v35, %v7350_v36  ;;  %527 = vrot.lane.b32.xlu0 %v516_v13, %s10687_s25  ;;  %v333_v34 = vadd.f32 %v6519_v45, %v229_v50  ;;  %v7527_v58 = vld [vmem:[#allocation4 + $0x40] sm:$0xff] }
 0x22e   :  { %v7518_v8 = vmul.f32 %v7486_v18, %v893_v32  ;;  %v7521_v30 = vmul.f32 %v7486_v18, %v903_v21  ;;  %v7523_v35 = vpop.permute.xlu1 %1961  ;;  %v7530_v45 = vmul.f32 %v7527_v58, %v883_v6  ;;  %v7533_v24 = vmul.f32 %v7527_v58, %v893_v32 }
 0x22f   :  { %10908 = vst [vmem:[#allocation194_spill] sm:$0xff] %v7523_v35  ;;  %v359_v38 = vadd.f32 %v6525_v49, %v255_v26  ;;  %v334_v36 = vadd.f32 %v6529_v51, %v230_v14  ;;  %v7535_v10 = vpop.permute.xlu0 %2087  ;;  %v256_v13 = vadd.f32 %v6511_v41, %v7354_v53  ;;  %v383_v52 = vadd.f32 %v7387_v43, %v307_v39  ;;  %v7540_v49 = vld [vmem:[#allocation4 + $0x48] sm:$0x3f]  ;;  %v10941_v35 = vld [vmem:[#allocation39_spill] sm:$0xff] }
 0x230   :  { %10909 = vst [vmem:[#allocation195_spill] sm:$0xff] %v7535_v10  ;;  %v7543_v51 = vmul.f32 %v7540_v49, %v883_v6  ;;  %775 = vrot.lane.b32.xlu1 %v766_v42, %s10687_s25  ;;  %v664_v50 = vmul.f32 %v7451_v20, %v7380_v37  ;;  %v205_v28 = vadd.f32 %v6517_v44, %v7356_v47  ;;  %v7555_v43 = vstv %s7462_s26  ;;  %s8129_s26 = sld [smem:[#allocation9 + $0x16]] }
 0x231   :  { %v384_v14 = vadd.f32 %v7391_v12, %v308_v27  ;;  %773 = vrot.lane.b32.xlu0 %v765_v25, %s10687_s25  ;;  %v663_v41 = vmul.f32 %v7440_v62, %v7380_v37  ;;  %v393_v53 = vadd.f32 %v7389_v61, %v333_v34  ;;  %v7561_v6 = vmul.f32 %v7540_v49, %v893_v32  ;;  %v7606_v34 = vld [vmem:[#allocation4 + $0x19] sm:$0x3f] }
 0x232   :  { %v7564_v39 = vmul.f32 %v7527_v58, %v903_v21  ;;  %v7567_v44 = vstv %s7475_s27  ;;  %v7569_v47 = vpop.permute.xlu1 %2113  ;;  %v360_v12 = vadd.f32 %v6548_v60, %v256_v13  ;;  %v309_v37 = vadd.f32 %v6556_v63, %v205_v28  ;;  %s8143_s27 = sld [smem:[#allocation9 + $0x69]] }
 0x233   :  { %10910 = vst [vmem:[#allocation196_spill] sm:$0xff] %v7569_v47  ;;  %v403_v27 = vadd.f32 %v7395_v56, %v359_v38  ;;  %v394_v26 = vadd.f32 %v7397_v57, %v334_v36  ;;  %v7575_v61 = vpop.permute.xlu0 %2089  ;;  %v231_v32 = vadd.f32 %v6537_v54, %v7364_v22  ;;  %v206_v42 = vadd.f32 %v6539_v55, %v7367_v3  ;;  %v7590_v56 = vld [vmem:[#allocation4 + $0x11] sm:$0xff] }
 0x234   :  { %10911 = vst [vmem:[#allocation197_spill] sm:$0xff] %v7575_v61  ;;  %v7582_v25 = vstv %s7500_s0  ;;  %675 = vrot.lane.b32.xlu1 %v664_v50, %s10689_s8  ;;  %v914_v60 = vmul.f32 %v7481_v46, %v7555_v43  ;;  %v7588_v63 = vmul.f32 %v7540_v49, %v903_v21  ;;  %v7594_v57 = vmul.f32 %v7590_v56, %v7567_v44  ;;  %s8212_s0 = sld [smem:[#allocation9 + $0x17]] }
 0x235   :  { %v7597_v54 = vstv %s7509_s28  ;;  %673 = vrot.lane.b32.xlu0 %v663_v41, %s10689_s8  ;;  %v767_v55 = vmul.f32 %v7440_v62, %v7460_v16  ;;  %v232_v3 = vadd.f32 %v6546_v59, %v7374_v0  ;;  %v335_v22 = vadd.f32 %v6579_v9, %v231_v32  ;;  %v10916_v41 = vld [vmem:[#allocation175_spill] sm:$0xff]  ;;  %s8268_s28 = sld [smem:[#allocation10 + $0x1]] }
 0x236   :  { %v310_v21 = vadd.f32 %v6583_v11, %v206_v42  ;;  %v7610_v38 = vmul.f32 %v7606_v34, %v7567_v44  ;;  %v7612_v36 = vpop.permute.xlu1 %1987  ;;  %v257_v13 = vadd.f32 %v6560_v1, %v7376_v17  ;;  %v404_v62 = vadd.f32 %v7406_v40, %v360_v12  ;;  %v10918_v42 = vld [vmem:[#allocation26_spill] sm:$0xff] }
 0x237   :  { %10912 = vst [vmem:[#allocation198_spill] sm:$0xff] %v7612_v36  ;;  %v385_v59 = vadd.f32 %v7399_v23, %v309_v37  ;;  %v7620_v9 = vmul.f32 %v7590_v56, %v7582_v25  ;;  %v7622_v11 = vpop.permute.xlu0 %1963  ;;  %v258_v0 = vadd.f32 %v6567_v4, %v7385_v29  ;;  %v455_v50 = vadd.f32 %v6569_v5, %v383_v52  ;;  %v10914_v23 = vld [vmem:[#allocation28_spill] sm:$0xff]  ;;  %v10915_v29 = vld [vmem:[#allocation27_spill] sm:$0xff] }
 0x238   :  { %10913 = vst [vmem:[#allocation199_spill] sm:$0xff] %v7622_v11  ;;  %v7629_v28 = vmul.f32 %v7590_v56, %v7597_v54  ;;  %922 = vrot.lane.b32.xlu1 %v914_v60, %s10689_s8  ;;  %v915_v1 = vmul.f32 %v7486_v18, %v7555_v43  ;;  %v361_v17 = vadd.f32 %v6603_v19, %v257_v13  ;;  %v7642_v5 = vstv %s7557_s29  ;;  %v7697_v36 = vld [vmem:[#allocation4 + $0x49] sm:$0x3f]  ;;  %v10942_v11 = vld [vmem:[#allocation40_spill] sm:$0xff]  ;;  %s8290_s29 = sld [smem:[#allocation9 + $0x19]] }
 0x239   :  { %v336_v40 = vadd.f32 %v10914_v23, %v232_v3  ;;  %777 = vrot.lane.b32.xlu0 %v767_v55, %s10687_s25  ;;  %v768_v4 = vmul.f32 %v7451_v20, %v7460_v16  ;;  %v456_v52 = vadd.f32 %v10915_v29, %v384_v14  ;;  %v395_v12 = vadd.f32 %v10916_v41, %v335_v22  ;;  %v10919_v55 = vld [vmem:[#allocation31_spill] sm:$0xff]  ;;  %v10920_v20 = vld [vmem:[#allocation32_spill] sm:$0xff]  ;;  %v10924_v29 = vld [vmem:[#allocation33_spill] sm:$0xff] }
 0x23a   :  { %v386_v37 = vadd.f32 %v7414_v33, %v310_v21  ;;  %v7651_v19 = vmul.f32 %v7606_v34, %v7582_v25  ;;  %v7653_v32 = vpop.permute.xlu1 %1989  ;;  %v481_v60 = vadd.f32 %v10918_v42, %v393_v53  ;;  %v362_v16 = vadd.f32 %v10919_v55, %v258_v0  ;;  %v10922_v33 = vld [vmem:[#allocation29_spill] sm:$0xff]  ;;  %v10923_v21 = vld [vmem:[#allocation30_spill] sm:$0xff]  ;;  %v10925_v0 = vld [vmem:[#allocation176_spill] sm:$0xff] }
 0x23b   :  { %10917 = vst [vmem:[#allocation28_spill] sm:$0xff] %v7653_v32  ;;  %v559_v3 = vadd.f32 %v10920_v20, %v455_v50  ;;  %v7660_v13 = vmul.f32 %v7606_v34, %v7597_v54  ;;  %v7664_v14 = vpop.permute.xlu0 %2115  ;;  %v507_v22 = vadd.f32 %v10922_v33, %v403_v27  ;;  %v482_v23 = vadd.f32 %v10923_v21, %v394_v26  ;;  %v7674_v55 = vld [vmem:[#allocation4 + $0x41] sm:$0xff]  ;;  %v10926_v26 = vld [vmem:[#allocation36_spill] sm:$0xff] }
 0x23c   :  { %10921 = vst [vmem:[#allocation27_spill] sm:$0xff] %v7664_v14  ;;  %v560_v41 = vadd.f32 %v10924_v29, %v456_v52  ;;  %924 = vrot.lane.b32.xlu1 %v915_v1, %s10689_s8  ;;  %v1019_v53 = vmul.f32 %v7486_v18, %v7642_v5  ;;  %v396_v50 = vadd.f32 %v10925_v0, %v336_v40  ;;  %v10927_v18 = vld [vmem:[#allocation37_spill] sm:$0xff]  ;;  %v10928_v40 = vld [vmem:[#allocation38_spill] sm:$0xff]  ;;  %v7739_v10 = vstv %s7662_s14  ;;  %s8474_s14 = sld [smem:[#allocation10 + $0x3]] }
 0x23d   :  { %v405_v42 = vadd.f32 %v7420_v2, %v361_v17  ;;  %v7678_v20 = vmul.f32 %v7674_v55, %v7567_v44  ;;  %779 = vrot.lane.b32.xlu0 %v768_v4, %s10687_s25  ;;  %v1018_v27 = vmul.f32 %v7481_v46, %v7642_v5  ;;  %v585_v1 = vadd.f32 %v10926_v26, %v481_v60  ;;  %v10930_v21 = vld [vmem:[#allocation34_spill] sm:$0xff]  ;;  %v10931_v4 = vld [vmem:[#allocation177_spill] sm:$0xff] }
 0x23e   :  { %v611_v52 = vadd.f32 %v10927_v18, %v507_v22  ;;  %v586_v2 = vadd.f32 %v10928_v40, %v482_v23  ;;  %v7690_v17 = vmul.f32 %v7674_v55, %v7582_v25  ;;  %v7692_v33 = vpop.permute.xlu1 %2065  ;;  %v508_v29 = vadd.f32 %v10930_v21, %v404_v62  ;;  %v10932_v32 = vld [vmem:[#allocation178_spill] sm:$0xff]  ;;  %v10934_v23 = vld [vmem:[#allocation35_spill] sm:$0xff] }
 0x23f   :  { %10929 = vst [vmem:[#allocation175_spill] sm:$0xff] %v7692_v33  ;;  %v406_v0 = vadd.f32 %v10931_v4, %v362_v16  ;;  %v635_v46 = vadd.f32 %v10932_v32, %v559_v3  ;;  %v7701_v60 = vmul.f32 %v7697_v36, %v7567_v44  ;;  %v7703_v22 = vpop.permute.xlu0 %2013  ;;  %v457_v26 = vadd.f32 %v10934_v23, %v385_v59  ;;  %v10935_v18 = vld [vmem:[#allocation179_spill] sm:$0xff]  ;;  %v10938_v21 = vld [vmem:[#allocation182_spill] sm:$0xff] }
 0x240   :  { %10933 = vst [vmem:[#allocation26_spill] sm:$0xff] %v7703_v22  ;;  %v636_v40 = vadd.f32 %v10935_v18, %v560_v41  ;;  %v7709_v33 = vmul.f32 %v7697_v36, %v7582_v25  ;;  %1028 = vrot.lane.b32.xlu1 %v1019_v53, %s10687_s25  ;;  %v917_v62 = vmul.f32 %v7540_v49, %v7555_v43  ;;  %v7719_v32 = vstv %s7631_s1  ;;  %v10936_v25 = vld [vmem:[#allocation42_spill] sm:$0xff]  ;;  %v10937_v41 = vld [vmem:[#allocation181_spill] sm:$0xff]  ;;  %v10939_v23 = vld [vmem:[#allocation183_spill] sm:$0xff]  ;;  %s8360_s1 = sld [smem:[#allocation9 + $0x1a]] }
 0x241   :  { %v7716_v44 = vmul.f32 %v7674_v55, %v7597_v54  ;;  %1026 = vrot.lane.b32.xlu0 %v1018_v27, %s10687_s25  ;;  %v916_v59 = vmul.f32 %v7527_v58, %v7555_v43  ;;  %v7725_v16 = vstv %s7644_s30  ;;  %v612_v3 = vadd.f32 %v10936_v25, %v508_v29  ;;  %v10943_v43 = vld [vmem:[#allocation43_spill] sm:$0xff]  ;;  %v10945_v29 = vld [vmem:[#allocation41_spill] sm:$0xff]  ;;  %s8448_s30 = sld [smem:[#allocation10 + $0x2]] }
 0x242   :  { %v645_v53 = vadd.f32 %v10937_v41, %v585_v1  ;;  %v655_v4 = vadd.f32 %v10938_v21, %v611_v52  ;;  %v646_v18 = vadd.f32 %v10939_v23, %v586_v2  ;;  %v7733_v22 = vpop.permute.xlu1 %2015  ;;  %v483_v27 = vadd.f32 %v10941_v35, %v395_v12  ;;  %v7748_v52 = vld [vmem:[#allocation4 + $0x12] sm:$0xff] }
 0x243   :  { %10940 = vst [vmem:[#allocation31_spill] sm:$0xff] %v7733_v22  ;;  %v458_v14 = vadd.f32 %v10942_v11, %v386_v37  ;;  %v561_v47 = vadd.f32 %v10943_v43, %v457_v26  ;;  %v7741_v61 = vpop.permute.xlu0 %2209  ;;  %v484_v25 = vadd.f32 %v10945_v29, %v396_v50  ;;  %v7746_v1 = vmul.f32 %v7697_v36, %v7597_v54  ;;  %v10947_v11 = vld [vmem:[#allocation44_spill] sm:$0xff]  ;;  %v10948_v37 = vld [vmem:[#allocation47_spill] sm:$0xff] }
 0x244   :  { %10944 = vst [vmem:[#allocation32_spill] sm:$0xff] %v7741_v61  ;;  %v7752_v2 = vmul.f32 %v7748_v52, %v7719_v32  ;;  %928 = vrot.lane.b32.xlu1 %v917_v62, %s10689_s8  ;;  %v1166_v35 = vmul.f32 %v7590_v56, %v7725_v16  ;;  %v509_v12 = vadd.f32 %v10947_v11, %v405_v42  ;;  %v7760_v50 = vstv %s7680_s15  ;;  %v10949_v41 = vld [vmem:[#allocation48_spill] sm:$0xff]  ;;  %s6316_s15 = smov 14  }
 0x245   :  { %v587_v26 = vadd.f32 %v10948_v37, %v483_v27  ;;  %926 = vrot.lane.b32.xlu0 %v916_v59, %s10689_s8  ;;  %v1020_v54 = vmul.f32 %v7527_v58, %v7642_v5  ;;  %v562_v21 = vadd.f32 %v10949_v41, %v458_v14  ;;  %v10950_v23 = vld [vmem:[#allocation184_spill] sm:$0xff]  ;;  %v7769_v62 = vmul.f32 %v7748_v52, %v7739_v10  ;;  %v10953_v59 = vld [vmem:[#allocation45_spill] sm:$0xff]  ;;  %v10954_v58 = vld [vmem:[#allocation46_spill] sm:$0xff] }
 0x246   :  { %10946 = vst [vmem:[#allocation29_spill] sm:$0xff] %v7752_v2  ;;  %v656_v43 = vadd.f32 %v10950_v23, %v612_v3  ;;  %v7771_v29 = vld [vmem:[#allocation4 + $0x1a] sm:$0x3f]  ;;  %v7777_v27 = vpop.permute.xlu1 %2091  ;;  %v510_v11 = vadd.f32 %v10953_v59, %v406_v0  ;;  %v707_v37 = vadd.f32 %v10954_v58, %v635_v46  ;;  %v10955_v14 = vld [vmem:[#allocation51_spill] sm:$0xff]  ;;  %v10956_v3 = vld [vmem:[#allocation186_spill] sm:$0xff]  ;;  %v7788_v2 = vmul.f32 %v7748_v52, %v7760_v50 }
 0x247   :  { %10951 = vst [vmem:[#allocation30_spill] sm:$0xff] %v7769_v62  ;;  %v7775_v42 = vmul.f32 %v7771_v29, %v7719_v32  ;;  %10952 = vst [vmem:[#allocation33_spill] sm:$0xff] %v7777_v27  ;;  %v613_v41 = vadd.f32 %v10955_v14, %v509_v12  ;;  %v637_v23 = vadd.f32 %v10956_v3, %v561_v47  ;;  %v7783_v22 = vpop.permute.xlu0 %2067  ;;  %v10958_v61 = vld [vmem:[#allocation52_spill] sm:$0xff]  ;;  %v10960_v47 = vld [vmem:[#allocation50_spill] sm:$0xff] }
 0x248   :  { %10957 = vst [vmem:[#allocation176_spill] sm:$0xff] %v7783_v22  ;;  %v588_v62 = vadd.f32 %v10958_v61, %v484_v25  ;;  %v7792_v27 = vmul.f32 %v7771_v29, %v7739_v10  ;;  %1174 = vrot.lane.b32.xlu1 %v1166_v35, %s10689_s8  ;;  %v1167_v0 = vmul.f32 %v7606_v34, %v7725_v16  ;;  %v10961_v12 = vld [vmem:[#allocation187_spill] sm:$0xff]  ;;  %v7805_v25 = vstv %s7727_s16  ;;  %v10962_v58 = vld [vmem:[#allocation49_spill] sm:$0xff]  ;;  %s6317_s16 = smov 28  }
 0x249   :  { %v708_v46 = vadd.f32 %v10960_v47, %v636_v40  ;;  %v647_v59 = vadd.f32 %v10961_v12, %v587_v26  ;;  %1030 = vrot.lane.b32.xlu0 %v1020_v54, %s10687_s25  ;;  %v1021_v61 = vmul.f32 %v7540_v49, %v7642_v5  ;;  %v733_v14 = vadd.f32 %v10962_v58, %v645_v53  ;;  %v10963_v3 = vld [vmem:[#allocation55_spill] sm:$0xff]  ;;  %v10966_v54 = vld [vmem:[#allocation56_spill] sm:$0xff]  ;;  %v10967_v5 = vld [vmem:[#allocation57_spill] sm:$0xff] }
 0x24a   :  { %10959 = vst [vmem:[#allocation36_spill] sm:$0xff] %v7792_v27  ;;  %v614_v35 = vadd.f32 %v10963_v3, %v510_v11  ;;  %v638_v22 = vadd.f32 %v7454_v48, %v562_v21  ;;  %v7814_v40 = vmul.f32 %v7771_v29, %v7760_v50  ;;  %v7818_v26 = vpop.permute.xlu1 %2235  ;;  %v811_v49 = vadd.f32 %v10966_v54, %v707_v37  ;;  %v7823_v27 = vld [vmem:[#allocation4 + $0x42] sm:$0xff]  ;;  %v10973_v37 = vld [vmem:[#allocation60_spill] sm:$0xff]  ;;  %v7844_v54 = vld [vmem:[#allocation4 + $0x4a] sm:$0x3f] }
 0x24b   :  { %10965 = vst [vmem:[#allocation38_spill] sm:$0xff] %v7818_v26  ;;  %v812_v47 = vadd.f32 %v10967_v5, %v708_v46  ;;  %v657_v12 = vadd.f32 %v7470_v15, %v613_v41  ;;  %v7827_v53 = vmul.f32 %v7823_v27, %v7719_v32  ;;  %v7829_v48 = vpop.permute.xlu0 %2211  ;;  %v10970_v21 = vld [vmem:[#allocation53_spill] sm:$0xff]  ;;  %v10971_v58 = vld [vmem:[#allocation54_spill] sm:$0xff]  ;;  %v1271_v15 = vmul.f32 %v7606_v34, %v7805_v25 }
 0x24c   :  { %10964 = vst [vmem:[#allocation37_spill] sm:$0xff] %v7814_v40  ;;  %10969 = vst [vmem:[#allocation177_spill] sm:$0xff] %v7829_v48  ;;  %v759_v11 = vadd.f32 %v10970_v21, %v655_v4  ;;  %v734_v3 = vadd.f32 %v10971_v58, %v646_v18  ;;  %v10972_v40 = vld [vmem:[#allocation188_spill] sm:$0xff]  ;;  %1176 = vrot.lane.b32.xlu1 %v1167_v0, %s10689_s8  ;;  %v837_v41 = vadd.f32 %v10973_v37, %v733_v14  ;;  %v10977_v0 = vld [vmem:[#allocation61_spill] sm:$0xff] }
 0x24d   :  { %10968 = vst [vmem:[#allocation34_spill] sm:$0xff] %v7827_v53  ;;  %v648_v26 = vadd.f32 %v10972_v40, %v588_v62  ;;  %v7842_v46 = vmul.f32 %v7823_v27, %v7739_v10  ;;  %v7848_v4 = vmul.f32 %v7844_v54, %v7719_v32  ;;  %1032 = vrot.lane.b32.xlu0 %v1021_v61, %s10687_s25  ;;  %v10976_v62 = vld [vmem:[#allocation58_spill] sm:$0xff]  ;;  %v10979_v21 = vld [vmem:[#allocation189_spill] sm:$0xff]  ;;  %v10981_v48 = vld [vmem:[#allocation59_spill] sm:$0xff] }
 0x24e   :  { %v1270_v18 = vmul.f32 %v7590_v56, %v7805_v25  ;;  %v760_v34 = vadd.f32 %v10976_v62, %v656_v43  ;;  %v863_v14 = vadd.f32 %v10977_v0, %v759_v11  ;;  %v10978_v40 = vld [vmem:[#allocation62_spill] sm:$0xff]  ;;  %v658_v58 = vadd.f32 %v10979_v21, %v614_v35  ;;  %v7857_v37 = vpop.permute.xlu1 %2117  ;;  %v10982_v32 = vld [vmem:[#allocation191_spill] sm:$0xff]  ;;  %v10983_v53 = vld [vmem:[#allocation192_spill] sm:$0xff] }
 0x24f   :  { %10974 = vst [vmem:[#allocation178_spill] sm:$0xff] %v7842_v46  ;;  %10975 = vst [vmem:[#allocation35_spill] sm:$0xff] %v7848_v4  ;;  %v838_v5 = vadd.f32 %v10978_v40, %v734_v3  ;;  %v709_v46 = vadd.f32 %v10981_v48, %v637_v23  ;;  %v888_v4 = vadd.f32 %v10982_v32, %v811_v49  ;;  %v7866_v43 = vpop.permute.xlu0 %2093  ;;  %v10985_v11 = vld [vmem:[#allocation66_spill] sm:$0xff]  ;;  %v7874_v62 = vstv %s7794_s2  ;;  %v10986_v49 = vld [vmem:[#allocation67_spill] sm:$0xff]  ;;  %s6318_s2 = smov 42  }
 0x250   :  { %10980 = vst [vmem:[#allocation179_spill] sm:$0xff] %v7857_v37  ;;  %v889_v61 = vadd.f32 %v10983_v53, %v812_v47  ;;  %v7864_v56 = vmul.f32 %v7844_v54, %v7739_v10  ;;  %10984 = vst [vmem:[#allocation42_spill] sm:$0xff] %v7866_v43  ;;  %v864_v3 = vadd.f32 %v10985_v11, %v760_v34  ;;  %1280 = vrot.lane.b32.xlu1 %v1271_v15, %s10687_s25  ;;  %v10987_v34 = vld [vmem:[#allocation63_spill] sm:$0xff]  ;;  %v7903_v11 = vld [vmem:[#allocation4 + $0x20] sm:$0xff] }
 0x251   :  { %v7871_v35 = vmul.f32 %v7823_v27, %v7760_v50  ;;  %v1169_v23 = vmul.f32 %v7697_v36, %v7725_v16  ;;  %v813_v47 = vadd.f32 %v10986_v49, %v709_v46  ;;  %v898_v10 = vadd.f32 %v7498_v31, %v837_v41  ;;  %1278 = vrot.lane.b32.xlu0 %v1270_v18, %s10687_s25  ;;  %v10989_v31 = vld [vmem:[#allocation64_spill] sm:$0xff]  ;;  %v10990_v18 = vld [vmem:[#allocation65_spill] sm:$0xff]  ;;  %v10996_v37 = vld [vmem:[#allocation70_spill] sm:$0xff] }
 0x252   :  { %v1168_v53 = vmul.f32 %v7674_v55, %v7725_v16  ;;  %v7885_v48 = vstv %s7807_s17  ;;  %v735_v0 = vadd.f32 %v10987_v34, %v647_v59  ;;  %v908_v15 = vadd.f32 %v7515_v7, %v863_v14  ;;  %v7895_v46 = vpop.permute.xlu1 %2261  ;;  %v7912_v14 = vld [vmem:[#allocation4 + $0x28] sm:$0x3f]  ;;  %s8837_s17 = sld [smem:[#allocation11 + $0x28]] }
 0x253   :  { %v899_v40 = vadd.f32 %v7518_v8, %v838_v5  ;;  %v7893_v21 = vstv %s7816_s18  ;;  %10988 = vst [vmem:[#allocation181_spill] sm:$0xff] %v7895_v46  ;;  %v710_v41 = vadd.f32 %v10989_v31, %v638_v22  ;;  %v736_v32 = vadd.f32 %v10990_v18, %v648_v26  ;;  %v7909_v7 = vpop.permute.xlu0 %2237  ;;  %v10993_v5 = vld [vmem:[#allocation68_spill] sm:$0xff]  ;;  %v10995_v31 = vld [vmem:[#allocation69_spill] sm:$0xff]  ;;  %v10997_v46 = vld [vmem:[#allocation71_spill] sm:$0xff]  ;;  %s10695_s18 = smov 119  }
 0x254   :  { %v7901_v16 = vmul.f32 %v7844_v54, %v7760_v50  ;;  %v7907_v59 = vmul.f32 %v7903_v11, %v7874_v62  ;;  %10991 = vst [vmem:[#allocation182_spill] sm:$0xff] %v7909_v7  ;;  %v909_v8 = vadd.f32 %v7521_v30, %v864_v3  ;;  %v7916_v22 = vmul.f32 %v7912_v14, %v7874_v62  ;;  %v10998_v7 = vld [vmem:[#allocation72_spill] sm:$0xff] }
 0x255   :  { %v7919_v26 = vstv %s7834_s3  ;;  %1180 = vrot.lane.b32.xlu1 %v1169_v23, %s10689_s8  ;;  %v1418_v50 = vmul.f32 %v7748_v52, %v7885_v48  ;;  %v761_v49 = vadd.f32 %v10993_v5, %v657_v12  ;;  %v890_v34 = vadd.f32 %v7530_v45, %v813_v47  ;;  %1178 = vrot.lane.b32.xlu0 %v1168_v53, %s10689_s8  ;;  %v11000_v45 = vld [vmem:[#allocation73_spill] sm:$0xff]  ;;  %v11001_v5 = vld [vmem:[#allocation75_spill] sm:$0xff]  ;;  %s8851_s3 = sld [smem:[#allocation11 + $0x29]] }
 0x256   :  { %10992 = vst [vmem:[#allocation183_spill] sm:$0xff] %v7916_v22  ;;  %v7928_v30 = vmul.f32 %v7903_v11, %v7893_v21  ;;  %v1272_v3 = vmul.f32 %v7674_v55, %v7805_v25  ;;  %v762_v18 = vadd.f32 %v10995_v31, %v658_v58  ;;  %v960_v23 = vadd.f32 %v10996_v37, %v888_v4  ;;  %v7937_v12 = vpop.permute.xlu1 %2119  ;;  %v11003_v58 = vld [vmem:[#allocation74_spill] sm:$0xff] }
 0x257   :  { %v839_v43 = vadd.f32 %v10997_v46, %v735_v0  ;;  %v814_v22 = vadd.f32 %v10998_v7, %v710_v41  ;;  %10999 = vst [vmem:[#allocation40_spill] sm:$0xff] %v7937_v12  ;;  %v986_v47 = vadd.f32 %v11000_v45, %v898_v10  ;;  %v7943_v53 = vmul.f32 %v7903_v11, %v7919_v26  ;;  %v7951_v4 = vpop.permute.xlu0 %2313  ;;  %v11004_v0 = vld [vmem:[#allocation76_spill] sm:$0xff]  ;;  %v11005_v10 = vld [vmem:[#allocation77_spill] sm:$0xff]  ;;  %v8067_v12 = vld [vmem:[#allocation4 + $0x29] sm:$0x3f] }
 0x258   :  { %10994 = vst [vmem:[#allocation39_spill] sm:$0xff] %v7928_v30  ;;  %v865_v30 = vadd.f32 %v11001_v5, %v761_v49  ;;  %v7947_v55 = vmul.f32 %v7912_v14, %v7893_v21  ;;  %11002 = vst [vmem:[#allocation43_spill] sm:$0xff] %v7951_v4  ;;  %v961_v37 = vadd.f32 %v11003_v58, %v889_v61  ;;  %v11006_v49 = vld [vmem:[#allocation79_spill] sm:$0xff]  ;;  %v11007_v45 = vld [vmem:[#allocation80_spill] sm:$0xff]  ;;  %v7967_v58 = vstv %s7887_s19  ;;  %s8739_s19 = sld [smem:[#allocation11 + $0x25]] }
 0x259   :  { %v840_v46 = vadd.f32 %v11004_v0, %v736_v32  ;;  %v1012_v41 = vadd.f32 %v11005_v10, %v908_v15  ;;  %1426 = vrot.lane.b32.xlu1 %v1418_v50, %s10689_s8  ;;  %v1419_v7 = vmul.f32 %v7771_v29, %v7885_v48  ;;  %v866_v31 = vadd.f32 %v11006_v49, %v762_v18  ;;  %v11008_v15 = vld [vmem:[#allocation81_spill] sm:$0xff]  ;;  %v11040_v4 = vld [vmem:[#allocation102_spill] sm:$0xff]  ;;  %11195 = sst [smem:[#allocation205_spill]] %s8837_s17 }
 0x25a   :  { %v1064_v5 = vadd.f32 %v11007_v45, %v960_v23  ;;  %1282 = vrot.lane.b32.xlu0 %v1272_v3, %s10687_s25  ;;  %v1273_v61 = vmul.f32 %v7697_v36, %v7805_v25  ;;  %v1065_v32 = vadd.f32 %v11008_v15, %v961_v37  ;;  %v900_v50 = vadd.f32 %v7533_v24, %v839_v43  ;;  %v7978_v23 = vpop.permute.xlu1 %2315  ;;  %v11010_v3 = vld [vmem:[#allocation84_spill] sm:$0xff]  ;;  %v11011_v49 = vld [vmem:[#allocation85_spill] sm:$0xff] }
 0x25b   :  { %v891_v0 = vadd.f32 %v7543_v51, %v814_v22  ;;  %v7976_v18 = vmul.f32 %v7912_v14, %v7919_v26  ;;  %11009 = vst [vmem:[#allocation41_spill] sm:$0xff] %v7978_v23  ;;  %v1090_v10 = vadd.f32 %v11010_v3, %v986_v47  ;;  %v1116_v36 = vadd.f32 %v11011_v49, %v1012_v41  ;;  %v7983_v45 = vld [vmem:[#allocation4 + $0x50] sm:$0xff]  ;;  %v7991_v24 = vpop.permute.xlu0 %2263  ;;  %v11013_v51 = vld [vmem:[#allocation78_spill] sm:$0xff]  ;;  %v8004_v15 = vld [vmem:[#allocation4 + $0x58] sm:$0x3f]  ;;  %11196 = sst [smem:[#allocation206_spill]] %s8851_s3 }
 0x25c   :  { %v910_v25 = vadd.f32 %v7564_v39, %v865_v30  ;;  %v7987_v37 = vmul.f32 %v7983_v45, %v7874_v62  ;;  %11012 = vst [vmem:[#allocation44_spill] sm:$0xff] %v7991_v24  ;;  %v987_v43 = vadd.f32 %v11013_v51, %v899_v40  ;;  %v901_v22 = vadd.f32 %v7561_v6, %v840_v46  ;;  %v11014_v46 = vld [vmem:[#allocation82_spill] sm:$0xff]  ;;  %v11015_v3 = vld [vmem:[#allocation83_spill] sm:$0xff] }
 0x25d   :  { %v7997_v47 = vmul.f32 %v7983_v45, %v7893_v21  ;;  %1428 = vrot.lane.b32.xlu1 %v1419_v7, %s10689_s8  ;;  %v1523_v39 = vmul.f32 %v7771_v29, %v7967_v58  ;;  %v911_v30 = vadd.f32 %v7588_v63, %v866_v31  ;;  %v1140_v41 = vadd.f32 %v7594_v57, %v1064_v5  ;;  %v11016_v63 = vld [vmem:[#allocation86_spill] sm:$0xff] }
 0x25e   :  { %v8008_v40 = vmul.f32 %v8004_v15, %v7874_v62  ;;  %1284 = vrot.lane.b32.xlu0 %v1273_v61, %s10687_s25  ;;  %v1522_v6 = vmul.f32 %v7748_v52, %v7967_v58  ;;  %v1013_v7 = vadd.f32 %v11014_v46, %v909_v8  ;;  %v962_v29 = vadd.f32 %v11015_v3, %v890_v34  ;;  %v8017_v5 = vpop.permute.xlu1 %2213  ;;  %v11019_v34 = vld [vmem:[#allocation87_spill] sm:$0xff]  ;;  %v11022_v46 = vld [vmem:[#allocation88_spill] sm:$0xff] }
 0x25f   :  { %v1091_v31 = vadd.f32 %v11016_v63, %v987_v43  ;;  %v1141_v57 = vadd.f32 %v7610_v38, %v1065_v32  ;;  %11017 = vst [vmem:[#allocation47_spill] sm:$0xff] %v8017_v5  ;;  %v1150_v62 = vadd.f32 %v7620_v9, %v1090_v10  ;;  %v1160_v49 = vadd.f32 %v7629_v28, %v1116_v36  ;;  %v8029_v8 = vpop.permute.xlu0 %2339  ;;  %v11020_v38 = vld [vmem:[#allocation90_spill] sm:$0xff]  ;;  %v11021_v28 = vld [vmem:[#allocation91_spill] sm:$0xff] }
 0x260   :  { %v8023_v61 = vmul.f32 %v8004_v15, %v7893_v21  ;;  %v8027_v52 = vmul.f32 %v7983_v45, %v7919_v26  ;;  %11018 = vst [vmem:[#allocation48_spill] sm:$0xff] %v8029_v8  ;;  %v988_v51 = vadd.f32 %v11019_v34, %v900_v50  ;;  %v1117_v32 = vadd.f32 %v11020_v38, %v1013_v7 }
 0x261   :  { %v8034_v43 = vstv %s7949_s20  ;;  %1532 = vrot.lane.b32.xlu1 %v1523_v39, %s10687_s25  ;;  %v1421_v9 = vmul.f32 %v7844_v54, %v7885_v48  ;;  %v1066_v21 = vadd.f32 %v11021_v28, %v962_v29  ;;  %v8041_v10 = vstv %s7956_s4  ;;  %v11023_v39 = vld [vmem:[#allocation95_spill] sm:$0xff]  ;;  %v8061_v28 = vld [vmem:[#allocation4 + $0x21] sm:$0xff]  ;;  %s8741_s20 = sld [smem:[#allocation11 + $0x6d]] }
 0x262   :  { %1530 = vrot.lane.b32.xlu0 %v1522_v6, %s10687_s25  ;;  %v1420_v36 = vmul.f32 %v7823_v27, %v7885_v48  ;;  %v8047_v50 = vstv %s7969_s21  ;;  %v963_v7 = vadd.f32 %v11022_v46, %v891_v0  ;;  %v1092_v3 = vadd.f32 %v11023_v39, %v988_v51  ;;  %v8058_v34 = vpop.permute.xlu1 %2365  ;;  %v11025_v6 = vld [vmem:[#allocation89_spill] sm:$0xff]  ;;  %s8743_s4 = sld [smem:[#allocation11 + $0x26]] }
 0x263   :  { %v1151_v63 = vadd.f32 %v7651_v19, %v1091_v31  ;;  %v8056_v29 = vmul.f32 %v8004_v15, %v7919_v26  ;;  %11024 = vst [vmem:[#allocation184_spill] sm:$0xff] %v8058_v34  ;;  %v989_v38 = vadd.f32 %v11025_v6, %v901_v22  ;;  %v8065_v48 = vmul.f32 %v8061_v28, %v8034_v43  ;;  %v8076_v26 = vpop.permute.xlu0 %2341  ;;  %v11027_v31 = vld [vmem:[#allocation92_spill] sm:$0xff]  ;;  %v11028_v6 = vld [vmem:[#allocation93_spill] sm:$0xff]  ;;  %v11029_v34 = vld [vmem:[#allocation94_spill] sm:$0xff]  ;;  %s8745_s21 = sld [smem:[#allocation11 + $0x6e]] }
 0x264   :  { %v8071_v0 = vmul.f32 %v8067_v12, %v8034_v43  ;;  %v8074_v19 = vstv %s7989_s22  ;;  %11026 = vst [vmem:[#allocation45_spill] sm:$0xff] %v8076_v26  ;;  %v1014_v51 = vadd.f32 %v11027_v31, %v910_v25  ;;  %v1161_v22 = vadd.f32 %v7660_v13, %v1117_v32  ;;  %v11030_v25 = vld [vmem:[#allocation96_spill] sm:$0xff]  ;;  %s8749_s22 = sld [smem:[#allocation11 + $0x4a]] }
 0x265   :  { %v8082_v46 = vmul.f32 %v8061_v28, %v8041_v10  ;;  %1432 = vrot.lane.b32.xlu1 %v1421_v9, %s10689_s8  ;;  %v1671_v39 = vmul.f32 %v7903_v11, %v8047_v50  ;;  %v1015_v5 = vadd.f32 %v11028_v6, %v911_v30  ;;  %v1212_v24 = vadd.f32 %v11029_v34, %v1140_v41 }
 0x266   :  { %v1142_v8 = vadd.f32 %v7678_v20, %v1066_v21  ;;  %1430 = vrot.lane.b32.xlu0 %v1420_v36, %s10689_s8  ;;  %v1524_v13 = vmul.f32 %v7823_v27, %v7967_v58  ;;  %v1067_v32 = vadd.f32 %v11030_v25, %v963_v7  ;;  %v1152_v31 = vadd.f32 %v7690_v17, %v1092_v3  ;;  %v8103_v41 = vpop.permute.xlu1 %2239  ;;  %v11034_v20 = vld [vmem:[#allocation97_spill] sm:$0xff]  ;;  %v11035_v36 = vld [vmem:[#allocation98_spill] sm:$0xff]  ;;  %v11036_v27 = vld [vmem:[#allocation99_spill] sm:$0xff] }
 0x267   :  { %v8097_v9 = vmul.f32 %v8061_v28, %v8074_v19  ;;  %v8101_v30 = vmul.f32 %v8067_v12, %v8041_v10  ;;  %11033 = vst [vmem:[#allocation186_spill] sm:$0xff] %v8103_v41  ;;  %v1238_v21 = vadd.f32 %v11034_v20, %v1150_v62  ;;  %v1213_v34 = vadd.f32 %v11035_v36, %v1141_v57  ;;  %v11037_v7 = vld [vmem:[#allocation100_spill] sm:$0xff]  ;;  %v8111_v17 = vpop.permute.xlu0 %2215  ;;  %v11039_v3 = vld [vmem:[#allocation101_spill] sm:$0xff]  ;;  %11190 = sst [smem:[#allocation200_spill]] %s8741_s20 }
 0x268   :  { %v1118_v6 = vadd.f32 %v11036_v27, %v1014_v51  ;;  %v1093_v25 = vadd.f32 %v11037_v7, %v989_v38  ;;  %11038 = vst [vmem:[#allocation52_spill] sm:$0xff] %v8111_v17  ;;  %v1264_v26 = vadd.f32 %v11039_v3, %v1160_v49  ;;  %v1239_v23 = vadd.f32 %v11040_v4, %v1151_v63  ;;  %v11042_v62 = vld [vmem:[#allocation104_spill] sm:$0xff]  ;;  %v11043_v38 = vld [vmem:[#allocation105_spill] sm:$0xff]  ;;  %v11072_v17 = vld [vmem:[#allocation34_spill] sm:$0xff] }
 0x269   :  { %11031 = vst [vmem:[#allocation46_spill] sm:$0xff] %v8097_v9  ;;  %11032 = vst [vmem:[#allocation51_spill] sm:$0xff] %v8101_v30  ;;  %v11041_v30 = vld [vmem:[#allocation103_spill] sm:$0xff]  ;;  %1679 = vrot.lane.b32.xlu1 %v1671_v39, %s10689_s8  ;;  %v1672_v57 = vmul.f32 %v7912_v14, %v8047_v50  ;;  %v1316_v51 = vadd.f32 %v11042_v62, %v1212_v24  ;;  %v1317_v20 = vadd.f32 %v11043_v38, %v1213_v34  ;;  %v11044_v4 = vld [vmem:[#allocation108_spill] sm:$0xff]  ;;  %11191 = sst [smem:[#allocation201_spill]] %s8745_s21 }
 0x26a   :  { %v1119_v9 = vadd.f32 %v11041_v30, %v1015_v5  ;;  %1534 = vrot.lane.b32.xlu0 %v1524_v13, %s10687_s25  ;;  %v1525_v49 = vmul.f32 %v7844_v54, %v7967_v58  ;;  %v8127_v36 = vstv %s8049_s23  ;;  %v1342_v5 = vadd.f32 %v11044_v4, %v1238_v21  ;;  %v8137_v24 = vld [vmem:[#allocation4 + $0x51] sm:$0xff]  ;;  %v8145_v54 = vpop.permute.xlu1 %2241  ;;  %v11046_v58 = vld [vmem:[#allocation109_spill] sm:$0xff]  ;;  %v11047_v34 = vld [vmem:[#allocation110_spill] sm:$0xff]  ;;  %s131_s23 = sld [smem:[#allocation9]] }
 0x26b   :  { %v1143_v63 = vadd.f32 %v7701_v60, %v1067_v32  ;;  %v8135_v39 = vmul.f32 %v8067_v12, %v8074_v19  ;;  %v8141_v13 = vmul.f32 %v8137_v24, %v8034_v43  ;;  %11045 = vst [vmem:[#allocation50_spill] sm:$0xff] %v8145_v54  ;;  %v1368_v30 = vadd.f32 %v11046_v58, %v1264_v26  ;;  %v8151_v27 = vpop.permute.xlu0 %2367  ;;  %v8158_v62 = vld [vmem:[#allocation4 + $0x59] sm:$0x3f]  ;;  %v11053_v4 = vld [vmem:[#allocation30_spill] sm:$0xff] }
 0x26c   :  { %v1343_v21 = vadd.f32 %v11047_v34, %v1239_v23  ;;  %v1153_v60 = vadd.f32 %v7709_v33, %v1093_v25  ;;  %v1162_v32 = vadd.f32 %v7716_v44, %v1118_v6  ;;  %11048 = vst [vmem:[#allocation187_spill] sm:$0xff] %v8151_v27  ;;  %v1163_v7 = vadd.f32 %v7746_v1, %v1119_v9  ;;  %v11050_v44 = vld [vmem:[#allocation106_spill] sm:$0xff]  ;;  %v11051_v26 = vld [vmem:[#allocation29_spill] sm:$0xff]  ;;  %v11052_v25 = vld [vmem:[#allocation107_spill] sm:$0xff] }
 0x26d   :  { %v8156_v3 = vmul.f32 %v8137_v24, %v8041_v10  ;;  %v8162_v38 = vmul.f32 %v8158_v62, %v8034_v43  ;;  %1681 = vrot.lane.b32.xlu1 %v1672_v57, %s10689_s8  ;;  %v1776_v33 = vmul.f32 %v7912_v14, %v8127_v36  ;;  %v1265_v23 = vadd.f32 %v11050_v44, %v1161_v22  ;;  %v11057_v22 = vld [vmem:[#allocation114_spill] sm:$0xff]  ;;  %v11060_v34 = vld [vmem:[#allocation111_spill] sm:$0xff]  ;;  %v11061_v44 = vld [vmem:[#allocation112_spill] sm:$0xff] }
 0x26e   :  { %v1392_v1 = vadd.f32 %v11051_v26, %v1316_v51  ;;  %v1393_v9 = vadd.f32 %v7775_v42, %v1317_v20  ;;  %1536 = vrot.lane.b32.xlu0 %v1525_v49, %s10687_s25  ;;  %v1775_v6 = vmul.f32 %v7903_v11, %v8127_v36  ;;  %v1214_v43 = vadd.f32 %v11052_v25, %v1142_v8  ;;  %v8183_v42 = vpop.permute.xlu1 %2317  ;;  %v11058_v20 = vld [vmem:[#allocation36_spill] sm:$0xff]  ;;  %v11062_v25 = vld [vmem:[#allocation115_spill] sm:$0xff]  ;;  %v11069_v41 = vld [vmem:[#allocation37_spill] sm:$0xff] }
 0x26f   :  { %11049 = vst [vmem:[#allocation49_spill] sm:$0xff] %v8156_v3  ;;  %v1402_v58 = vadd.f32 %v11053_v4, %v1342_v5  ;;  %v8177_v57 = vmul.f32 %v8158_v62, %v8041_v10  ;;  %v8181_v14 = vmul.f32 %v8137_v24, %v8074_v19  ;;  %11056 = vst [vmem:[#allocation57_spill] sm:$0xff] %v8183_v42  ;;  %v8189_v49 = vstv %s8109_s24  ;;  %v8191_v5 = vpop.permute.xlu0 %2265  ;;  %v8230_v42 = vld [vmem:[#allocation4 + $0x2a] sm:$0x3f]  ;;  %s8763_s24 = sld [smem:[#allocation11 + $0x2d]] }
 0x270   :  { %v1369_v51 = vadd.f32 %v11057_v22, %v1265_v23  ;;  %v1412_v11 = vadd.f32 %v7788_v2, %v1368_v30  ;;  %v1403_v8 = vadd.f32 %v11058_v20, %v1343_v21  ;;  %11059 = vst [vmem:[#allocation53_spill] sm:$0xff] %v8191_v5  ;;  %v1240_v10 = vadd.f32 %v11060_v34, %v1152_v31  ;;  %v8216_v20 = vld [vmem:[#allocation4 + $0x22] sm:$0xff]  ;;  %v11082_v3 = vld [vmem:[#allocation127_spill] sm:$0xff] }
 0x271   :  { %11054 = vst [vmem:[#allocation55_spill] sm:$0xff] %v8177_v57  ;;  %11055 = vst [vmem:[#allocation56_spill] sm:$0xff] %v8181_v14  ;;  %v1215_v26 = vadd.f32 %v11061_v44, %v1143_v63  ;;  %v1318_v4 = vadd.f32 %v11062_v25, %v1214_v43  ;;  %1785 = vrot.lane.b32.xlu1 %v1776_v33, %s10687_s25  ;;  %v1674_v23 = vmul.f32 %v8004_v15, %v8047_v50  ;;  %v11064_v63 = vld [vmem:[#allocation119_spill] sm:$0xff]  ;;  %v11065_v43 = vld [vmem:[#allocation120_spill] sm:$0xff] }
 0x272   :  { %v8201_v2 = vmul.f32 %v8158_v62, %v8074_v19  ;;  %v8204_v30 = vstv %s8116_s6  ;;  %1783 = vrot.lane.b32.xlu0 %v1775_v6, %s10687_s25  ;;  %v1673_v31 = vmul.f32 %v7983_v45, %v8047_v50  ;;  %v8210_v21 = vstv %s8129_s26  ;;  %v8225_v6 = vpop.permute.xlu1 %2319  ;;  %v11067_v44 = vld [vmem:[#allocation113_spill] sm:$0xff]  ;;  %v11068_v25 = vld [vmem:[#allocation116_spill] sm:$0xff]  ;;  %v11080_v14 = vld [vmem:[#allocation122_spill] sm:$0xff]  ;;  %s8773_s6 = sld [smem:[#allocation11 + $0x75]] }
 0x273   :  { %v1344_v33 = vadd.f32 %v11064_v63, %v1240_v10  ;;  %v1319_v22 = vadd.f32 %v11065_v43, %v1215_v26  ;;  %v8220_v19 = vmul.f32 %v8216_v20, %v8189_v49  ;;  %v8223_v34 = vstv %s8143_s27  ;;  %11066 = vst [vmem:[#allocation188_spill] sm:$0xff] %v8225_v6  ;;  %v8236_v26 = vpop.permute.xlu0 %2267  ;;  %v11071_v63 = vld [vmem:[#allocation117_spill] sm:$0xff]  ;;  %v11081_v57 = vld [vmem:[#allocation124_spill] sm:$0xff]  ;;  %s8777_s26 = sld [smem:[#allocation11 + $0x2e]] }
 0x274   :  { %11063 = vst [vmem:[#allocation54_spill] sm:$0xff] %v8201_v2  ;;  %v1241_v50 = vadd.f32 %v11067_v44, %v1153_v60  ;;  %v1266_v5 = vadd.f32 %v11068_v25, %v1162_v32  ;;  %v1413_v54 = vadd.f32 %v11069_v41, %v1369_v51  ;;  %v8234_v10 = vmul.f32 %v8230_v42, %v8189_v49  ;;  %v11074_v60 = vld [vmem:[#allocation118_spill] sm:$0xff]  ;;  %v11077_v44 = vld [vmem:[#allocation123_spill] sm:$0xff]  ;;  %s8787_s27 = sld [smem:[#allocation11 + $0x52]] }
 0x275   :  { %11070 = vst [vmem:[#allocation60_spill] sm:$0xff] %v8236_v26  ;;  %v1267_v43 = vadd.f32 %v11071_v63, %v1163_v7  ;;  %v1394_v27 = vadd.f32 %v11072_v17, %v1318_v4  ;;  %v8242_v6 = vmul.f32 %v8216_v20, %v8204_v30  ;;  %1685 = vrot.lane.b32.xlu1 %v1674_v23, %s10689_s8  ;;  %v11076_v4 = vld [vmem:[#allocation121_spill] sm:$0xff]  ;;  %v11078_v63 = vld [vmem:[#allocation178_spill] sm:$0xff] }
 0x276   :  { %v1923_v41 = vmul.f32 %v8061_v28, %v8210_v21  ;;  %v1464_v32 = vadd.f32 %v11074_v60, %v1392_v1  ;;  %v8250_v51 = vmul.f32 %v8216_v20, %v8223_v34  ;;  %v8254_v7 = vmul.f32 %v8230_v42, %v8204_v30  ;;  %1683 = vrot.lane.b32.xlu0 %v1673_v31, %s10689_s8  ;;  %v11079_v1 = vld [vmem:[#allocation35_spill] sm:$0xff]  ;;  %v8263_v2 = vpop.permute.xlu1 %2345 }
 0x277   :  { %11073 = vst [vmem:[#allocation58_spill] sm:$0xff] %v8242_v6  ;;  %v1777_v17 = vmul.f32 %v7983_v45, %v8127_v36  ;;  %v1490_v23 = vadd.f32 %v11076_v4, %v1402_v58  ;;  %v1370_v25 = vadd.f32 %v11077_v44, %v1266_v5  ;;  %v1404_v26 = vadd.f32 %v11078_v63, %v1344_v33  ;;  %v8274_v58 = vpop.permute.xlu0 %2343  ;;  %v11083_v5 = vld [vmem:[#allocation125_spill] sm:$0xff]  ;;  %v11085_v44 = vld [vmem:[#allocation128_spill] sm:$0xff] }
 0x278   :  { %11075 = vst [vmem:[#allocation61_spill] sm:$0xff] %v8250_v51  ;;  %v1395_v60 = vadd.f32 %v11079_v1, %v1319_v22  ;;  %v1465_v51 = vadd.f32 %v11080_v14, %v1393_v9  ;;  %v1345_v6 = vadd.f32 %v11081_v57, %v1241_v50  ;;  %v1371_v31 = vadd.f32 %v11082_v3, %v1267_v43  ;;  %v11084_v22 = vld [vmem:[#allocation126_spill] sm:$0xff]  ;;  %v11086_v3 = vld [vmem:[#allocation129_spill] sm:$0xff]  ;;  %v11087_v14 = vld [vmem:[#allocation132_spill] sm:$0xff]  ;;  %11192 = sst [smem:[#allocation202_spill]] %s8773_s6 }
 0x279   :  { %v8272_v45 = vmul.f32 %v8230_v42, %v8223_v34  ;;  %v1516_v33 = vadd.f32 %v11083_v5, %v1412_v11  ;;  %v1491_v4 = vadd.f32 %v11084_v22, %v1403_v8  ;;  %v1568_v63 = vadd.f32 %v11085_v44, %v1464_v32  ;;  %1931 = vrot.lane.b32.xlu1 %v1923_v41, %s10689_s8  ;;  %v11088_v11 = vld [vmem:[#allocation133_spill] sm:$0xff]  ;;  %v11089_v32 = vld [vmem:[#allocation134_spill] sm:$0xff]  ;;  %v8295_v22 = vld [vmem:[#allocation4 + $0x52] sm:$0xff] }
 0x27a   :  { %v1924_v9 = vmul.f32 %v8067_v12, %v8210_v21  ;;  %v1569_v57 = vadd.f32 %v11086_v3, %v1465_v51  ;;  %v1594_v50 = vadd.f32 %v11087_v14, %v1490_v23  ;;  %1787 = vrot.lane.b32.xlu0 %v1777_v17, %s10687_s25  ;;  %v1778_v43 = vmul.f32 %v8004_v15, %v8127_v36  ;;  %v8301_v17 = vpop.permute.xlu1 %165  ;;  %v11093_v3 = vld [vmem:[#allocation131_spill] sm:$0xff] }
 0x27b   :  { %v8288_v1 = vstv %s8212_s0  ;;  %v1620_v8 = vadd.f32 %v11088_v11, %v1516_v33  ;;  %v1595_v41 = vadd.f32 %v11089_v32, %v1491_v4  ;;  %v1414_v5 = vadd.f32 %v7871_v35, %v1370_v25  ;;  %11090 = vst [vmem:[#allocation62_spill] sm:$0xff] %v8301_v17  ;;  %v8309_v33 = vld [vmem:[#allocation4 + $0x5a] sm:$0x3f]  ;;  %v8315_v25 = vpop.permute.xlu0 %2369  ;;  %v11092_v4 = vld [vmem:[#allocation130_spill] sm:$0xff]  ;;  %v11095_v11 = vld [vmem:[#allocation183_spill] sm:$0xff]  ;;  %s5665_s0 = sld [smem:[#allocation9 + $0x3]] }
 0x27c   :  { %v8299_v51 = vmul.f32 %v8295_v22, %v8189_v49  ;;  %v1405_v15 = vadd.f32 %v7864_v56, %v1345_v6  ;;  %v1415_v36 = vadd.f32 %v7901_v16, %v1371_v31  ;;  %v8307_v23 = vmul.f32 %v8295_v22, %v8204_v30  ;;  %11091 = vst [vmem:[#allocation189_spill] sm:$0xff] %v8315_v25  ;;  %v11094_v6 = vld [vmem:[#allocation39_spill] sm:$0xff] }
 0x27d   :  { %v8313_v35 = vmul.f32 %v8309_v33, %v8189_v49  ;;  %v1517_v44 = vadd.f32 %v11092_v4, %v1413_v54  ;;  %v1466_v14 = vadd.f32 %v11093_v3, %v1394_v27  ;;  %v1645_v56 = vadd.f32 %v7907_v59, %v1568_v63  ;;  %1933 = vrot.lane.b32.xlu1 %v1924_v9, %s10689_s8  ;;  %v11096_v59 = vld [vmem:[#allocation138_spill] sm:$0xff]  ;;  %v11097_v63 = vld [vmem:[#allocation139_spill] sm:$0xff] }
 0x27e   :  { %v2028_v16 = vmul.f32 %v8067_v12, %v8288_v1  ;;  %v1655_v31 = vadd.f32 %v11094_v6, %v1594_v50  ;;  %v1646_v32 = vadd.f32 %v11095_v11, %v1569_v57  ;;  %v8327_v49 = vmul.f32 %v8309_v33, %v8204_v30  ;;  %1789 = vrot.lane.b32.xlu0 %v1778_v43, %s10687_s25  ;;  %v8336_v50 = vpop.permute.xlu1 %167  ;;  %v11099_v57 = vld [vmem:[#allocation135_spill] sm:$0xff]  ;;  %v11100_v30 = vld [vmem:[#allocation136_spill] sm:$0xff]  ;;  %v11101_v11 = vld [vmem:[#allocation137_spill] sm:$0xff] }
 0x27f   :  { %v2027_v54 = vmul.f32 %v8061_v28, %v8288_v1  ;;  %v1621_v27 = vadd.f32 %v11096_v59, %v1517_v44  ;;  %v1570_v9 = vadd.f32 %v11097_v63, %v1466_v14  ;;  %v1665_v4 = vadd.f32 %v7943_v53, %v1620_v8  ;;  %11098 = vst [vmem:[#allocation59_spill] sm:$0xff] %v8336_v50  ;;  %v8344_v28 = vpop.permute.xlu0 %2371  ;;  %v11103_v44 = vld [vmem:[#allocation140_spill] sm:$0xff]  ;;  %v11104_v14 = vld [vmem:[#allocation142_spill] sm:$0xff] }
 0x280   :  { %v1656_v12 = vadd.f32 %v7947_v55, %v1595_v41  ;;  %v1492_v3 = vadd.f32 %v11099_v57, %v1404_v26  ;;  %v1467_v6 = vadd.f32 %v11100_v30, %v1395_v60  ;;  %v1493_v43 = vadd.f32 %v11101_v11, %v1405_v15  ;;  %11102 = vst [vmem:[#allocation191_spill] sm:$0xff] %v8344_v28  ;;  %v11105_v53 = vld [vmem:[#allocation146_spill] sm:$0xff]  ;;  %v11106_v26 = vld [vmem:[#allocation143_spill] sm:$0xff]  ;;  %v11107_v60 = vld [vmem:[#allocation144_spill] sm:$0xff] }
 0x281   :  { %v8342_v17 = vstv %s8268_s28  ;;  %v1518_v59 = vadd.f32 %v11103_v44, %v1414_v5  ;;  %v1717_v63 = vadd.f32 %v11104_v14, %v1645_v56  ;;  %v1718_v8 = vadd.f32 %v11105_v53, %v1646_v32  ;;  %2037 = vrot.lane.b32.xlu1 %v2028_v16, %s10687_s25  ;;  %v11108_v5 = vld [vmem:[#allocation141_spill] sm:$0xff]  ;;  %s5677_s28 = sld [smem:[#allocation9 + $0x6]] }
 0x282   :  { %v1926_v55 = vmul.f32 %v8158_v62, %v8210_v21  ;;  %v1596_v41 = vadd.f32 %v11106_v26, %v1492_v3  ;;  %v1571_v57 = vadd.f32 %v11107_v60, %v1467_v6  ;;  %2035 = vrot.lane.b32.xlu0 %v2027_v54, %s10687_s25  ;;  %v1925_v15 = vmul.f32 %v8137_v24, %v8210_v21  ;;  %v11109_v32 = vld [vmem:[#allocation153_spill] sm:$0xff]  ;;  %v8366_v3 = vpop.permute.xlu1 %271  ;;  %v11111_v54 = vld [vmem:[#allocation147_spill] sm:$0xff]  ;;  %v11112_v26 = vld [vmem:[#allocation148_spill] sm:$0xff] }
 0x283   :  { %v8358_v30 = vstv %s8290_s29  ;;  %v1519_v56 = vadd.f32 %v11108_v5, %v1415_v36  ;;  %v1822_v16 = vadd.f32 %v11109_v32, %v1718_v8  ;;  %v1666_v11 = vadd.f32 %v7976_v18, %v1621_v27  ;;  %v11110_v6 = vld [vmem:[#allocation145_spill] sm:$0xff]  ;;  %v11113_v60 = vld [vmem:[#allocation152_spill] sm:$0xff]  ;;  %v8372_v25 = vpop.permute.xlu0 %269  ;;  %v11115_v5 = vld [vmem:[#allocation150_spill] sm:$0xff]  ;;  %s5689_s29 = sld [smem:[#allocation9 + $0x9]] }
 0x284   :  { %v1647_v44 = vadd.f32 %v7987_v37, %v1570_v9  ;;  %v1743_v14 = vadd.f32 %v11110_v6, %v1655_v31  ;;  %v1622_v53 = vadd.f32 %v11111_v54, %v1518_v59  ;;  %v1597_v21 = vadd.f32 %v11112_v26, %v1493_v43  ;;  %v11114_v28 = vld [vmem:[#allocation149_spill] sm:$0xff]  ;;  %v11116_v32 = vld [vmem:[#allocation151_spill] sm:$0xff]  ;;  %v11117_v31 = vld [vmem:[#allocation154_spill] sm:$0xff] }
 0x285   :  { %v1821_v50 = vadd.f32 %v11113_v60, %v1717_v63  ;;  %v1769_v36 = vadd.f32 %v11114_v28, %v1665_v4  ;;  %v1744_v8 = vadd.f32 %v11115_v5, %v1656_v12  ;;  %v1623_v18 = vadd.f32 %v11116_v32, %v1519_v56  ;;  %1937 = vrot.lane.b32.xlu1 %v1926_v55, %s10689_s8  ;;  %v11118_v28 = vld [vmem:[#allocation156_spill] sm:$0xff]  ;;  %v11119_v59 = vld [vmem:[#allocation157_spill] sm:$0xff]  ;;  %v11120_v56 = vld [vmem:[#allocation158_spill] sm:$0xff] }
 0x286   :  { %v2175_v37 = vmul.f32 %v8216_v20, %v8358_v30  ;;  %v1770_v27 = vadd.f32 %v11117_v31, %v1666_v11  ;;  %v1657_v9 = vadd.f32 %v7997_v47, %v1596_v41  ;;  %v1648_v43 = vadd.f32 %v8008_v40, %v1571_v57  ;;  %1935 = vrot.lane.b32.xlu0 %v1925_v15, %s10689_s8  ;;  %v8390_v54 = vpop.permute.xlu1 %171  ;;  %v11121_v11 = vld [vmem:[#allocation155_spill] sm:$0xff]  ;;  %v11122_v15 = vld [vmem:[#allocation162_spill] sm:$0xff] }
 0x287   :  { %v2029_v4 = vmul.f32 %v8137_v24, %v8288_v1  ;;  %v1847_v12 = vadd.f32 %v11118_v28, %v1743_v14  ;;  %v1873_v63 = vadd.f32 %v11119_v59, %v1769_v36  ;;  %v1848_v55 = vadd.f32 %v11120_v56, %v1744_v8  ;;  %v8396_v24 = vpop.permute.xlu0 %169  ;;  %v11123_v60 = vld [vmem:[#allocation170_spill] sm:$0xff]  ;;  %v11127_v5 = vld [vmem:[#allocation51_spill] sm:$0xff]  ;;  %v11130_v28 = vld [vmem:[#allocation160_spill] sm:$0xff] }
 0x288   :  { %v1898_v6 = vadd.f32 %v8071_v0, %v1822_v16  ;;  %v1719_v47 = vadd.f32 %v11121_v11, %v1647_v44  ;;  %v1658_v40 = vadd.f32 %v8023_v61, %v1597_v21  ;;  %v1667_v41 = vadd.f32 %v8027_v52, %v1622_v53  ;;  %v11124_v16 = vld [vmem:[#allocation163_spill] sm:$0xff]  ;;  %v11125_v61 = vld [vmem:[#allocation166_spill] sm:$0xff]  ;;  %v11131_v56 = vld [vmem:[#allocation161_spill] sm:$0xff] }
 0x289   :  { %v1897_v57 = vadd.f32 %v8065_v48, %v1821_v50  ;;  %v1874_v14 = vadd.f32 %v11122_v15, %v1770_v27  ;;  %v1668_v26 = vadd.f32 %v8056_v29, %v1623_v18  ;;  %2183 = vrot.lane.b32.xlu1 %v2175_v37, %s10689_s8  ;;  %v2176_v0 = vmul.f32 %v8230_v42, %v8358_v30  ;;  %v11126_v29 = vld [vmem:[#allocation46_spill] sm:$0xff]  ;;  %v11129_v31 = vld [vmem:[#allocation159_spill] sm:$0xff]  ;;  %v11135_v15 = vld [vmem:[#allocation165_spill] sm:$0xff] }
 0x28a   :  { %v1970_v36 = vadd.f32 %v11123_v60, %v1898_v6  ;;  %v1823_v44 = vadd.f32 %v11124_v16, %v1719_v47  ;;  %2039 = vrot.lane.b32.xlu0 %v2029_v4, %s10687_s25  ;;  %v2030_v52 = vmul.f32 %v8158_v62, %v8288_v1  ;;  %v2278_v48 = vstv %s8360_s1  ;;  %v11128_v32 = vld [vmem:[#allocation190_spill] sm:$0xff]  ;;  %v8414_v37 = vpop.permute.xlu1 %417  ;;  %v11132_v6 = vld [vmem:[#allocation185_spill] sm:$0xff]  ;;  %v11137_v16 = vld [vmem:[#allocation168_spill] sm:$0xff]  ;;  %s5701_s1 = sld [smem:[#allocation9 + $0xc]] }
 0x28b   :  { %v1969_v21 = vadd.f32 %v11125_v61, %v1897_v57  ;;  %v1907_v50 = vadd.f32 %v8082_v46, %v1847_v12  ;;  %v1917_v53 = vadd.f32 %v11126_v29, %v1873_v63  ;;  %v1908_v8 = vadd.f32 %v11127_v5, %v1848_v55  ;;  %v8420_v1 = vpop.permute.xlu0 %273  ;;  %v11133_v47 = vld [vmem:[#allocation174_spill] sm:$0xff]  ;;  %v11134_v57 = vld [vmem:[#allocation164_spill] sm:$0xff]  ;;  %v11136_v60 = vld [vmem:[#allocation169_spill] sm:$0xff] }
 0x28c   :  { %v2074_v18 = vadd.f32 %v11128_v32, %v1970_v36  ;;  %v1745_v27 = vadd.f32 %v11129_v31, %v1657_v9  ;;  %v1720_v59 = vadd.f32 %v11130_v28, %v1648_v43  ;;  %v1746_v4 = vadd.f32 %v11131_v56, %v1658_v40  ;;  %v11143_v28 = vld [vmem:[#allocation193_spill] sm:$0xff] }
 0x28d   :  { %v2073_v11 = vadd.f32 %v11132_v6, %v1969_v21  ;;  %v1996_v46 = vadd.f32 %v11133_v47, %v1908_v8  ;;  %v1918_v12 = vadd.f32 %v8135_v39, %v1874_v14  ;;  %2185 = vrot.lane.b32.xlu1 %v2176_v0, %s10689_s8  ;;  %v2279_v63 = vmul.f32 %v8216_v20, %v2278_v48  ;;  %v11138_v21 = vld [vmem:[#allocation197_spill] sm:$0xff]  ;;  %v11146_v6 = vld [vmem:[#allocation32_spill] sm:$0xff] }
 0x28e   :  { %v2280_v55 = vmul.f32 %v8230_v42, %v2278_v48  ;;  %v1771_v9 = vadd.f32 %v11134_v57, %v1667_v41  ;;  %v1772_v43 = vadd.f32 %v11135_v15, %v1668_v26  ;;  %v1995_v40 = vadd.f32 %v11136_v60, %v1907_v50  ;;  %2041 = vrot.lane.b32.xlu0 %v2030_v52, %s10687_s25  ;;  %v8435_v0 = vpop.permute.xlu1 %419  ;;  %v11139_v41 = vld [vmem:[#allocation167_spill] sm:$0xff]  ;;  %v11140_v26 = vld [vmem:[#allocation173_spill] sm:$0xff]  ;;  %v11142_v52 = vld [vmem:[#allocation172_spill] sm:$0xff] }
 0x28f   :  { %v1899_v36 = vadd.f32 %v8141_v13, %v1823_v44  ;;  %v1824_v61 = vadd.f32 %v11137_v16, %v1720_v59  ;;  %v2100_v39 = vadd.f32 %v11138_v21, %v1996_v46  ;;  %v2150_v14 = vadd.f32 %v8234_v10, %v2074_v18  ;;  %v11141_v50 = vld [vmem:[#allocation195_spill] sm:$0xff]  ;;  %v8443_v44 = vpop.permute.xlu0 %275  ;;  %v11144_v10 = vld [vmem:[#allocation177_spill] sm:$0xff] }
 0x290   :  { %v2177_v29 = vmul.f32 %v8295_v22, %v8358_v30  ;;  %v1849_v5 = vadd.f32 %v11139_v41, %v1745_v27  ;;  %v2021_v8 = vadd.f32 %v11140_v26, %v1917_v53  ;;  %v2099_v32 = vadd.f32 %v11141_v50, %v1995_v40  ;;  %v11145_v53 = vld [vmem:[#allocation196_spill] sm:$0xff]  ;;  %v11147_v46 = vld [vmem:[#allocation27_spill] sm:$0xff]  ;;  %v11150_v16 = vld [vmem:[#allocation49_spill] sm:$0xff] }
 0x291   :  { %v2149_v13 = vadd.f32 %v8220_v19, %v2073_v11  ;;  %v1850_v31 = vadd.f32 %v11142_v52, %v1746_v4  ;;  %v2022_v59 = vadd.f32 %v11143_v28, %v1918_v12  ;;  %v2222_v18 = vadd.f32 %v11144_v10, %v2150_v14  ;;  %2289 = vrot.lane.b32.xlu1 %v2280_v55, %s10687_s25  ;;  %v11148_v55 = vld [vmem:[#allocation41_spill] sm:$0xff]  ;;  %v11151_v14 = vld [vmem:[#allocation58_spill] sm:$0xff]  ;;  %v11152_v41 = vld [vmem:[#allocation43_spill] sm:$0xff] }
 0x292   :  { %v2178_v27 = vmul.f32 %v8309_v33, %v8358_v30  ;;  %v2125_v56 = vadd.f32 %v11145_v53, %v2021_v8  ;;  %2287 = vrot.lane.b32.xlu0 %v2279_v63, %s10687_s25  ;;  %v2281_v19 = vmul.f32 %v8295_v22, %v2278_v48  ;;  %v2282_v4 = vmul.f32 %v8309_v33, %v2278_v48  ;;  %v8462_v60 = vpop.permute.xlu1 %523  ;;  %v11149_v30 = vld [vmem:[#allocation171_spill] sm:$0xff]  ;;  %v11153_v48 = vld [vmem:[#allocation180_spill] sm:$0xff]  ;;  %v11158_v28 = vld [vmem:[#allocation198_spill] sm:$0xff] }
 0x293   :  { %v2221_v47 = vadd.f32 %v11146_v6, %v2149_v13  ;;  %v1900_v11 = vadd.f32 %v8162_v38, %v1824_v61  ;;  %v2126_v12 = vadd.f32 %v11147_v46, %v2022_v59  ;;  %v2160_v57 = vadd.f32 %v8254_v7, %v2100_v39  ;;  %v8468_v8 = vpop.permute.xlu0 %521  ;;  %v11154_v61 = vld [vmem:[#allocation199_spill] sm:$0xff]  ;;  %v11156_v39 = vld [vmem:[#allocation182_spill] sm:$0xff] }
 0x294   :  { %v2326_v15 = vadd.f32 %v11148_v55, %v2222_v18  ;;  %v1875_v40 = vadd.f32 %v11149_v30, %v1771_v9  ;;  %v1909_v21 = vadd.f32 %v11150_v16, %v1849_v5  ;;  %v2159_v63 = vadd.f32 %v11151_v14, %v2099_v32  ;;  %v11155_v13 = vld [vmem:[#allocation55_spill] sm:$0xff]  ;;  %v11157_v9 = vld [vmem:[#allocation194_spill] sm:$0xff]  ;;  %v11160_v18 = vld [vmem:[#allocation61_spill] sm:$0xff] }
 0x295   :  { %v2325_v26 = vadd.f32 %v11152_v41, %v2221_v47  ;;  %v1876_v38 = vadd.f32 %v11153_v48, %v1772_v43  ;;  %v1972_v50 = vadd.f32 %v11154_v61, %v1900_v11  ;;  %v1910_v7 = vadd.f32 %v11155_v13, %v1850_v31  ;;  %2189 = vrot.lane.b32.xlu1 %v2178_v27, %s10689_s8  ;;  %v11159_v59 = vld [vmem:[#allocation38_spill] sm:$0xff]  ;;  %v11161_v43 = vld [vmem:[#allocation176_spill] sm:$0xff]  ;;  %v11162_v11 = vld [vmem:[#allocation45_spill] sm:$0xff] }
 0x296   :  { %v2248_v52 = vadd.f32 %v11156_v39, %v2160_v57  ;;  %v1971_v5 = vadd.f32 %v11157_v9, %v1899_v36  ;;  %v1997_v32 = vadd.f32 %v11158_v28, %v1909_v21  ;;  %v2247_v10 = vadd.f32 %v11159_v59, %v2159_v63  ;;  %2187 = vrot.lane.b32.xlu0 %v2177_v29, %s10689_s8  ;;  %v8486_v27 = vpop.permute.xlu1 %423  ;;  %v11163_v36 = vld [vmem:[#allocation28_spill] sm:$0xff]  ;;  %v11164_v55 = vld [vmem:[#allocation175_spill] sm:$0xff]  ;;  %v11170_v13 = vld [vmem:[#allocation42_spill] sm:$0xff] }
 0x297   :  { %v2169_v53 = vadd.f32 %v11160_v18, %v2125_v56  ;;  %v2076_v6 = vadd.f32 %v11161_v43, %v1972_v50  ;;  %v2394_v31 = vadd.f32 %v8342_v17, %v2326_v15  ;;  %v2170_v47 = vadd.f32 %v8272_v45, %v2126_v12  ;;  %v11165_v21 = vld [vmem:[#allocation48_spill] sm:$0xff]  ;;  %v8492_v14 = vpop.permute.xlu0 %421  ;;  %v11168_v12 = vld [vmem:[#allocation54_spill] sm:$0xff]  ;;  %v11169_v50 = vld [vmem:[#allocation33_spill] sm:$0xff] }
 0x298   :  { %v2352_v46 = vadd.f32 %v11162_v11, %v2248_v52  ;;  %v1998_v57 = vadd.f32 %v11163_v36, %v1910_v7  ;;  %v2075_v30 = vadd.f32 %v11164_v55, %v1971_v5  ;;  %v2393_v16 = vadd.f32 %v8342_v17, %v2325_v26  ;;  %v11166_v29 = vld [vmem:[#allocation56_spill] sm:$0xff]  ;;  %v11171_v39 = vld [vmem:[#allocation181_spill] sm:$0xff]  ;;  %v11172_v28 = vld [vmem:[#allocation187_spill] sm:$0xff] }
 0x299   :  { %v2351_v56 = vadd.f32 %v11165_v21, %v2247_v10  ;;  %v1919_v63 = vadd.f32 %v11166_v29, %v1875_v40  ;;  %v11167_v41 = vld [vmem:[#allocation44_spill] sm:$0xff]  ;;  %v8497_v48 = vstv %s8448_s30  ;;  %v2167_v45 = vmul.f32 %v8295_v22, %v8223_v34  ;;  %2293 = vrot.lane.b32.xlu1 %v2282_v4, %s10687_s25  ;;  %s5713_s30 = sld [smem:[#allocation9 + $0xf]] }
 0x29a   :  { %v2274_v15 = vadd.f32 %v11167_v41, %v2170_v47  ;;  %v1920_v61 = vadd.f32 %v11168_v12, %v1876_v38  ;;  %v2101_v26 = vadd.f32 %v11169_v50, %v1997_v32  ;;  %v2102_v7 = vadd.f32 %v11170_v13, %v1998_v57  ;;  %2291 = vrot.lane.b32.xlu0 %v2281_v19, %s10687_s25  ;;  %v8510_v10 = vpop.permute.xlu1 %669  ;;  %v11173_v18 = vld [vmem:[#allocation184_spill] sm:$0xff]  ;;  %v11180_v12 = vld [vmem:[#allocation179_spill] sm:$0xff]  ;;  %v11181_v13 = vld [vmem:[#allocation57_spill] sm:$0xff] }
 0x29b   :  { %v2273_v52 = vadd.f32 %v11171_v39, %v2169_v53  ;;  %v2398_v40 = vmax.f32 %v2394_v31, 0.0  ;;  %v2404_v9 = vadd.f32 %v8497_v48, %v2352_v46  ;;  %v2152_v5 = vadd.f32 %v8313_v35, %v2076_v6  ;;  %v8515_v47 = vpop.permute.xlu0 %525  ;;  %v11174_v53 = vld [vmem:[#allocation31_spill] sm:$0xff]  ;;  %v11175_v11 = vld [vmem:[#allocation52_spill] sm:$0xff]  ;;  %v11176_v6 = vld [vmem:[#allocation26_spill] sm:$0xff] }
 0x29c   :  { %v2378_v59 = vadd.f32 %v11172_v28, %v2274_v15  ;;  %v2397_v4 = vmax.f32 %v2393_v16, 0.0  ;;  %v2151_v38 = vadd.f32 %v8299_v51, %v2075_v30  ;;  %v2403_v32 = vadd.f32 %v8497_v48, %v2351_v56  ;;  %v11177_v51 = vld [vmem:[#allocation47_spill] sm:$0xff]  ;;  %v11178_v16 = vld [vmem:[#allocation40_spill] sm:$0xff] }
 0x29d   :  { %v2377_v43 = vadd.f32 %v11173_v18, %v2273_v52  ;;  %v2024_v19 = vadd.f32 %v11174_v53, %v1920_v61  ;;  %v2412_v31 = vstv %s8474_s14  ;;  %v2224_v46 = vadd.f32 %v11175_v11, %v2152_v5  ;;  %2433 = vrot.lane.b32.xlu1 %v2398_v40, %s6316_s15  ;;  %v11179_v41 = vld [vmem:[#allocation188_spill] sm:$0xff]  ;;  %v11185_v11 = vld [vmem:[#allocation53_spill] sm:$0xff]  ;;  %s5725_s14 = sld [smem:[#allocation9 + $0x12]] }
 0x29e   :  { %v2168_v35 = vmul.f32 %v8309_v33, %v8223_v34  ;;  %v2023_v36 = vadd.f32 %v11176_v6, %v1919_v63  ;;  %v2223_v57 = vadd.f32 %v11177_v51, %v2151_v38  ;;  %v2161_v55 = vadd.f32 %v8307_v23, %v2101_v26  ;;  %2431 = vrot.lane.b32.xlu0 %v2397_v4, %s6316_s15  ;;  %v8530_v34 = vpop.permute.xlu1 %671  ;;  %v11182_v23 = vld [vmem:[#allocation50_spill] sm:$0xff]  ;;  %v11184_v53 = vld [vmem:[#allocation60_spill] sm:$0xff]  ;;  %v11186_v6 = vld [vmem:[#allocation191_spill] sm:$0xff] }
 0x29f   :  { %v2162_v30 = vadd.f32 %v8327_v49, %v2102_v7  ;;  %v2128_v21 = vadd.f32 %v11178_v16, %v2024_v19  ;;  %v2408_v56 = vmax.f32 %v2404_v9, 0.0  ;;  %v2414_v29 = vadd.f32 %v2412_v31, %v2378_v59  ;;  %v8534_v52 = vpop.permute.xlu0 %527  ;;  %v11183_v26 = vld [vmem:[#allocation186_spill] sm:$0xff]  ;;  %v11187_v51 = vld [vmem:[#allocation189_spill] sm:$0xff] }
 0x2a0   :  { %v2328_v15 = vadd.f32 %v11179_v41, %v2224_v46  ;;  %v2127_v61 = vadd.f32 %v11180_v12, %v2023_v36  ;;  %v2407_v50 = vmax.f32 %v2403_v32, 0.0  ;;  %v2413_v63 = vadd.f32 %v2412_v31, %v2377_v43 }
 0x2a1   :  { %v2327_v39 = vadd.f32 %v11181_v13, %v2223_v57  ;;  %v2250_v49 = vadd.f32 %v11182_v23, %v2162_v30  ;;  %2455 = vrot.lane.b32.xlu1 %v2408_v56, %s6317_s16  ;;  %v2249_v7 = vadd.f32 %v11183_v26, %v2161_v55  ;;  %v2418_v40 = vmax.f32 %v2414_v29, 0.0  ;;  %v2520_v13 = vld [vmem:[%s10681_s10 + $0x18] sm:$0xff]  ;;  %v2519_v23 = vld [vmem:[%s10681_s10 + $0x10] sm:$0xff]  ;;  %v2518_v26 = vld [vmem:[%s10681_s10 + $0x8] sm:$0xff] }
 0x2a2   :  { %2453 = vrot.lane.b32.xlu0 %v2407_v50, %s6317_s16  ;;  %v2396_v9 = vadd.f32 %v8342_v17, %v2328_v15  ;;  %v2172_v5 = vadd.f32 %v2168_v35, %v2128_v21  ;;  %v8542_v59 = vpop.permute.xlu1 %775  ;;  %v2417_v4 = vmax.f32 %v2413_v63, 0.0  ;;  %v2171_v32 = vadd.f32 %v2167_v45, %v2127_v61  ;;  %v2522_v15 = vld [vmem:[%s10681_s10 + $0x28] sm:$0xff] }
 0x2a3   :  { %v2354_v28 = vadd.f32 %v8263_v2, %v2250_v49  ;;  %v2395_v38 = vadd.f32 %v8342_v17, %v2327_v39  ;;  %v2353_v18 = vadd.f32 %v8274_v58, %v2249_v7  ;;  %v8546_v43 = vpop.permute.xlu0 %773 }
 0x2a4   :  { %v2276_v19 = vadd.f32 %v11184_v53, %v2172_v5  ;;  %v2275_v46 = vadd.f32 %v11185_v11, %v2171_v32  ;;  %v2400_v2 = vmax.f32 %v2396_v9, 0.0  ;;  %v132_v9 = vstv %s131_s23  ;;  %v6141_v32 = vld [vmem:[#allocation4] sm:$0xff]  ;;  %s8759_s23 = sld [smem:[#allocation11 + $0x51]] }
 0x2a5   :  { %2477 = vrot.lane.b32.xlu1 %v2418_v40, %s6318_s2  ;;  %v2406_v35 = vadd.f32 %v8497_v48, %v2354_v28  ;;  %v2399_v45 = vmax.f32 %v2395_v38, 0.0  ;;  %v2405_v58 = vadd.f32 %v8497_v48, %v2353_v18  ;;  %v2523_v48 = vld [vmem:[%s10681_s10 + $0x30] sm:$0x7f]  ;;  %v6140_v28 = vld [vmem:[#allocation4 + $0x8] sm:$0x3f]  ;;  %v133_v18 = vmul.f32 %v6141_v32, %v132_v9 }
 0x2a6   :  { %2475 = vrot.lane.b32.xlu0 %v2417_v4, %s6318_s2  ;;  %v2380_v36 = vadd.f32 %v11186_v6, %v2276_v19  ;;  %v8554_v17 = vpop.permute.xlu1 %675  ;;  %v2379_v57 = vadd.f32 %v11187_v51, %v2275_v46  ;;  %5978 = vmatprep.subr.msk.mxu0 %vm2531_vm0, %v2523_v48  ;;  %v134_v4 = vmul.f32 %v6140_v28, %v132_v9  ;;  %v11188_v19 = vld [vmem:[#allocation59_spill] sm:$0xff] }
 0x2a7   :  { %v8558_v55 = vpop.permute.xlu0 %673  ;;  %v2410_v30 = vmax.f32 %v2406_v35, 0.0  ;;  %v2409_v56 = vmax.f32 %v2405_v58, 0.0  ;;  %5979 = vmatpush3.msk.msra.mxu0 %vm2531_vm0, %v2523_v48  ;;  %5995 = vmatprep.subr.msk.mxu1 %vm2531_vm0, %v2523_v48  ;;  %v11189_v35 = vld [vmem:[#allocation62_spill] sm:$0xff] }
 0x2a8   :  { %v2416_v16 = vadd.f32 %v2412_v31, %v2380_v36  ;;  %v2415_v29 = vadd.f32 %v2412_v31, %v2379_v57  ;;  %v2521_v31 = vld [vmem:[%s10681_s10 + $0x20] sm:$0xff]  ;;  %5980 = vmatprep.subr.mxu0 %v2522_v15  ;;  %5996 = vmatpush3.msk.msra.mxu1 %vm2531_vm0, %v2523_v48  ;;  %v178_v11 = vadd.f32 %v11188_v19, %v134_v4  ;;  %v6142_v58 = vld [vmem:[#allocation4 + $0x9] sm:$0x3f]  ;;  %v6146_v19 = vld [vmem:[#allocation4 + $0x39] sm:$0x3f] }
 0x2a9   :  { %2437 = vrot.lane.b32.xlu1 %v2400_v2, %s6316_s15  ;;  %5981 = vmatpush3.msra.mxu0 %v2522_v15  ;;  %v368_v2 = vstv %s5665_s0  ;;  %v177_v6 = vadd.f32 %v11189_v35, %v133_v18  ;;  %v6147_v35 = vld [vmem:[#allocation4 + $0xa] sm:$0x3f]  ;;  %s8791_s0 = sld [smem:[#allocation11 + $0x2f]] }
 0x2aa   :  { %2435 = vrot.lane.b32.xlu0 %v2399_v45, %s6316_s15  ;;  %v8562_v21 = vpop.permute.xlu1 %922  ;;  %v2420_v12 = vmax.f32 %v2416_v16, 0.0  ;;  %v2419_v50 = vmax.f32 %v2415_v29, 0.0  ;;  %5982 = vmatprep.subr.mxu0 %v2521_v31  ;;  %v282_v45 = vadd.f32 %v8366_v3, %v178_v11  ;;  %v370_v51 = vmul.f32 %v6142_v58, %v368_v2  ;;  %v6143_v16 = vld [vmem:[#allocation4 + $0x1] sm:$0xff]  ;;  %v6144_v29 = vld [vmem:[#allocation4 + $0x38] sm:$0x3f]  ;;  %s5737_s15 = sld [smem:[#allocation9 + $0x15]] }
 0x2ab   :  { %v8564_v41 = vpop.permute.xlu0 %777  ;;  %5983 = vmatpush3.msra.mxu0 %v2521_v31  ;;  %5997 = vmatprep.subr.mxu1 %v2522_v15  ;;  %v136_v48 = vmul.f32 %v6144_v29, %v132_v9  ;;  %v372_v11 = vmul.f32 %v6146_v19, %v368_v2  ;;  %v6148_v58 = vld [vmem:[#allocation4 + $0x31] sm:$0xff] }
 0x2ac   :  { %5984 = vmatprep.subr.mxu0 %v2520_v13  ;;  %5998 = vmatpush3.msra.mxu1 %v2522_v15  ;;  %v6145_v15 = vld [vmem:[#allocation4 + $0x30] sm:$0xff] }
 0x2ad   :  { %2459 = vrot.lane.b32.xlu1 %v2410_v30, %s6317_s16  ;;  %5985 = vmatpush3.msra.mxu0 %v2520_v13  ;;  %v281_v30 = vadd.f32 %v8372_v25, %v177_v6  ;;  %v180_v3 = vadd.f32 %v8390_v54, %v136_v48  ;;  %v873_v48 = vstv %s5689_s29  ;;  %v6153_v19 = vld [vmem:[#allocation4 + $0x10] sm:$0xff]  ;;  %s8807_s29 = sld [smem:[#allocation11 + $0x36]] }
 0x2ae   :  { %2457 = vrot.lane.b32.xlu0 %v2409_v56, %s6317_s16  ;;  %v8575_v61 = vpop.permute.xlu1 %924  ;;  %5999 = vmatprep.subr.mxu1 %v2521_v31  ;;  %v369_v56 = vmul.f32 %v6143_v16, %v368_v2  ;;  %s5749_s16 = sld [smem:[#allocation9 + $0x18]] }
 0x2af   :  { %v8582_v63 = vpop.permute.xlu0 %779  ;;  %5986 = vmatprep.subr.mxu0 %v2519_v23  ;;  %6000 = vmatpush3.msra.mxu1 %v2521_v31 }
 0x2b0   :  { %5987 = vmatpush3.msra.mxu0 %v2519_v23  ;;  %6001 = vmatprep.subr.mxu1 %v2520_v13 }
 0x2b1   :  { %2481 = vrot.lane.b32.xlu1 %v2420_v12, %s6318_s2  ;;  %5988 = vmatprep.subr.mxu0 %v2518_v26  ;;  %v135_v12 = vmul.f32 %v6145_v15, %v132_v9  ;;  %v284_v9 = vadd.f32 %v8443_v44, %v180_v3  ;;  %v6150_v3 = vld [vmem:[#allocation4 + $0x3a] sm:$0x3f] }
 0x2b2   :  { %2479 = vrot.lane.b32.xlu0 %v2419_v50, %s6318_s2  ;;  %v8590_v39 = vpop.permute.xlu1 %1028  ;;  %6002 = vmatpush3.msra.mxu1 %v2520_v13  ;;  %v374_v50 = vadd.f32 %v370_v51, %v282_v45  ;;  %v6149_v51 = vld [vmem:[#allocation4 + $0x2] sm:$0xff]  ;;  %s2381_s2 = sld [smem:[#allocation10]] }
 0x2b3   :  { %v8595_v49 = vpop.permute.xlu0 %1026  ;;  %5989 = vmatpush3.msra.mxu0 %v2518_v26  ;;  %6003 = vmatprep.subr.mxu1 %v2519_v23  ;;  %v179_v25 = vadd.f32 %v8396_v24, %v135_v12  ;;  %v371_v24 = vmul.f32 %v6148_v58, %v368_v2  ;;  %v376_v16 = vadd.f32 %v372_v11, %v284_v9 }
 0x2b4   :  { %6004 = vmatpush3.msra.mxu1 %v2519_v23  ;;  %v373_v23 = vadd.f32 %v369_v56, %v281_v30  ;;  %v430_v28 = vadd.f32 %v8435_v0, %v374_v50 }
 0x2b5   :  { %6005 = vmatprep.subr.mxu1 %v2518_v26  ;;  %v283_v54 = vadd.f32 %v8420_v1, %v179_v25  ;;  %v432_v15 = vadd.f32 %v8486_v27, %v376_v16  ;;  %v6151_v25 = vld [vmem:[#allocation4 + $0x18] sm:$0x3f]  ;;  %v6154_v16 = vld [vmem:[#allocation4 + $0x48] sm:$0x3f] }
 0x2b6   :  { %v8600_v7 = vpop.permute.xlu1 %928  ;;  %6006 = vmatpush3.msra.mxu1 %v2518_v26  ;;  %v620_v26 = vstv %s5677_s28  ;;  %v429_v4 = vadd.f32 %v8414_v37, %v373_v23  ;;  %v534_v18 = vadd.f32 %v8462_v60, %v430_v28  ;;  %s8803_s28 = sld [smem:[#allocation11 + $0x76]] }
 0x2b7   :  { %v8602_v40 = vpop.permute.xlu0 %926  ;;  %v622_v6 = vmul.f32 %v6147_v35, %v620_v26  ;;  %v621_v37 = vmul.f32 %v6149_v51, %v620_v26  ;;  %v375_v60 = vadd.f32 %v371_v24, %v283_v54  ;;  %v536_v50 = vadd.f32 %v8534_v52, %v432_v15 }
 0x2b8   :  { %v533_v0 = vadd.f32 %v8468_v8, %v429_v4  ;;  %v624_v28 = vmul.f32 %v6150_v3, %v620_v26  ;;  %v875_v4 = vmul.f32 %v6151_v25, %v873_v48 }
 0x2b9   :  { %v626_v44 = vadd.f32 %v622_v6, %v534_v18  ;;  %v431_v8 = vadd.f32 %v8492_v14, %v375_v60  ;;  %v6152_v18 = vld [vmem:[#allocation4 + $0x32] sm:$0xff] }
 0x2ba   :  { %v8604_v5 = vpop.permute.xlu1 %1174  ;;  %v625_v29 = vadd.f32 %v621_v37, %v533_v0  ;;  %v623_v14 = vmul.f32 %v6152_v18, %v620_v26  ;;  %v628_v35 = vadd.f32 %v624_v28, %v536_v50  ;;  %v1125_v0 = vstv %s5701_s1  ;;  %v6155_v60 = vld [vmem:[#allocation4 + $0x19] sm:$0x3f]  ;;  %v6158_v18 = vld [vmem:[#allocation4 + $0x49] sm:$0x3f]  ;;  %s10685_s1 = smov 121  }
 0x2bb   :  { %v8606_v38 = vpop.permute.xlu0 %1030  ;;  %v682_v1 = vadd.f32 %v8530_v34, %v626_v44  ;;  %v535_v27 = vadd.f32 %v8515_v47, %v431_v8  ;;  %v877_v44 = vmul.f32 %v6154_v16, %v873_v48  ;;  %v6157_v8 = vld [vmem:[#allocation4 + $0x11] sm:$0xff]  ;;  %v1377_v28 = vstv %s5713_s30  ;;  %s8817_s30 = sld [smem:[#allocation11 + $0x53]] }
 0x2bc   :  { %v681_v2 = vadd.f32 %v8510_v10, %v625_v29  ;;  %v874_v10 = vmul.f32 %v6153_v19, %v873_v48  ;;  %v684_v58 = vadd.f32 %v8554_v17, %v628_v35  ;;  %v1127_v29 = vmul.f32 %v6155_v60, %v1125_v0  ;;  %v6159_v19 = vld [vmem:[#allocation4 + $0x1a] sm:$0x3f]  ;;  %v6162_v60 = vld [vmem:[#allocation4 + $0x4a] sm:$0x3f]  ;;  %11193 = sst [smem:[#allocation203_spill]] %s8803_s28 }
 0x2bd   :  { %v786_v23 = vadd.f32 %v8542_v59, %v682_v1  ;;  %v627_v59 = vadd.f32 %v623_v14, %v535_v27  ;;  %v6156_v1 = vld [vmem:[#allocation4 + $0x40] sm:$0xff]  ;;  %v1129_v14 = vmul.f32 %v6158_v18, %v1125_v0  ;;  %v6167_v18 = vld [vmem:[#allocation4 + $0x29] sm:$0x3f] }
 0x2be   :  { %v8608_v53 = vpop.permute.xlu1 %1176  ;;  %v785_v34 = vadd.f32 %v8546_v43, %v681_v2  ;;  %v788_v51 = vadd.f32 %v8582_v63, %v684_v58 }
 0x2bf   :  { %v8611_v46 = vpop.permute.xlu0 %1032  ;;  %v879_v52 = vadd.f32 %v875_v4, %v786_v23  ;;  %v683_v43 = vadd.f32 %v8558_v55, %v627_v59  ;;  %v876_v55 = vmul.f32 %v6156_v1, %v873_v48  ;;  %v6160_v59 = vld [vmem:[#allocation4 + $0x41] sm:$0xff] }
 0x2c0   :  { %v878_v54 = vadd.f32 %v874_v10, %v785_v34  ;;  %v881_v50 = vadd.f32 %v877_v44, %v788_v51  ;;  %v1379_v10 = vmul.f32 %v6159_v19, %v1377_v28 }
 0x2c1   :  { %v935_v47 = vadd.f32 %v8575_v61, %v879_v52  ;;  %v787_v17 = vadd.f32 %v8564_v41, %v683_v43 }
 0x2c2   :  { %v8614_v36 = vpop.permute.xlu1 %1280  ;;  %v934_v26 = vadd.f32 %v8562_v21, %v878_v54  ;;  %v1126_v21 = vmul.f32 %v6157_v8, %v1125_v0  ;;  %v937_v25 = vadd.f32 %v8600_v7, %v881_v50  ;;  %v6161_v54 = vld [vmem:[#allocation4 + $0x12] sm:$0xff]  ;;  %v6164_v8 = vld [vmem:[#allocation4 + $0x42] sm:$0xff] }
 0x2c3   :  { %v8617_v57 = vpop.permute.xlu0 %1278  ;;  %v1039_v37 = vadd.f32 %v8590_v39, %v935_v47  ;;  %v880_v3 = vadd.f32 %v876_v55, %v787_v17  ;;  %v6163_v17 = vld [vmem:[#allocation4 + $0x28] sm:$0x3f] }
 0x2c4   :  { %v1038_v61 = vadd.f32 %v8595_v49, %v934_v26  ;;  %v1041_v48 = vadd.f32 %v8611_v46, %v937_v25 }
 0x2c5   :  { %v1131_v23 = vadd.f32 %v1127_v29, %v1039_v37  ;;  %v936_v41 = vadd.f32 %v8602_v40, %v880_v3  ;;  %v1378_v40 = vmul.f32 %v6161_v54, %v1377_v28  ;;  %v1381_v29 = vmul.f32 %v6162_v60, %v1377_v28 }
 0x2c6   :  { %v1130_v39 = vadd.f32 %v1126_v21, %v1038_v61  ;;  %v6165_v21 = vld [vmem:[#allocation4 + $0x20] sm:$0xff] }
 0x2c7   :  { %v8620_v31 = vpop.permute.xlu1 %1180  ;;  %v8622_v13 = vpop.permute.xlu0 %1178  ;;  %v1187_v4 = vadd.f32 %v8608_v53, %v1131_v23  ;;  %v1040_v52 = vadd.f32 %v8606_v38, %v936_v41  ;;  %v1128_v53 = vmul.f32 %v6160_v59, %v1125_v0 }
 0x2c8   :  { %v1186_v49 = vadd.f32 %v8604_v5, %v1130_v39  ;;  %v1133_v5 = vadd.f32 %v1129_v14, %v1041_v48  ;;  %v6166_v48 = vld [vmem:[#allocation4 + $0x58] sm:$0x3f] }
 0x2c9   :  { %v1291_v34 = vadd.f32 %v8614_v36, %v1187_v4  ;;  %v1132_v46 = vadd.f32 %v1128_v53, %v1040_v52  ;;  %v1630_v36 = vstv %s5725_s14  ;;  %v6169_v53 = vld [vmem:[#allocation4 + $0x21] sm:$0xff]  ;;  %s8821_s14 = sld [smem:[#allocation11 + $0x37]] }
 0x2ca   :  { %v1290_v7 = vadd.f32 %v8617_v57, %v1186_v49  ;;  %v1189_v51 = vadd.f32 %v8620_v31, %v1133_v5  ;;  %v1632_v61 = vmul.f32 %v6163_v17, %v1630_v36 }
 0x2cb   :  { %v8628_v32 = vpop.permute.xlu1 %1426  ;;  %v1383_v47 = vadd.f32 %v1379_v10, %v1291_v34  ;;  %v1188_v38 = vadd.f32 %v8622_v13, %v1132_v46  ;;  %v1631_v13 = vmul.f32 %v6165_v21, %v1630_v36  ;;  %v1634_v34 = vmul.f32 %v6166_v48, %v1630_v36 }
 0x2cc   :  { %v8632_v45 = vpop.permute.xlu0 %1282  ;;  %v1382_v26 = vadd.f32 %v1378_v40, %v1290_v7  ;;  %v6168_v7 = vld [vmem:[#allocation4 + $0x50] sm:$0xff] }
 0x2cd   :  { %v1292_v55 = vadd.f32 %v8632_v45, %v1188_v38  ;;  %v1633_v59 = vmul.f32 %v6168_v7, %v1630_v36 }
 0x2ce   :  { %v1438_v57 = vadd.f32 %v8628_v32, %v1382_v26 }
 0x2cf   :  { %v8636_v30 = vpop.permute.xlu1 %1428 }
 0x2d0   :  { %v8638_v56 = vpop.permute.xlu0 %1284  ;;  %v1439_v37 = vadd.f32 %v8636_v30, %v1383_v47  ;;  %v1380_v30 = vmul.f32 %v6164_v8, %v1377_v28 }
 0x2d1   :  { %v1293_v0 = vadd.f32 %v8638_v56, %v1189_v51 }
 0x2d2   :  { %v1384_v56 = vadd.f32 %v1380_v30, %v1292_v55 }
 0x2d3   :  { %v8644_v12 = vpop.permute.xlu1 %1532  ;;  %v1385_v32 = vadd.f32 %v1381_v29, %v1293_v0 }
 0x2d4   :  { %v8648_v9 = vpop.permute.xlu0 %1530  ;;  %v1543_v44 = vadd.f32 %v8644_v12, %v1439_v37  ;;  %v1882_v12 = vstv %s5737_s15  ;;  %s10691_s15 = smov 120  }
 0x2d5   :  { %v1542_v31 = vadd.f32 %v8648_v9, %v1438_v57  ;;  %v1884_v14 = vmul.f32 %v6167_v18, %v1882_v12 }
 0x2d6   :  { %v1636_v23 = vadd.f32 %v1632_v61, %v1543_v44  ;;  %v6170_v44 = vld [vmem:[#allocation4 + $0x51] sm:$0xff] }
 0x2d7   :  { %v8652_v11 = vpop.permute.xlu1 %1432  ;;  %v1635_v39 = vadd.f32 %v1631_v13, %v1542_v31  ;;  %v1885_v60 = vmul.f32 %v6170_v44, %v1882_v12 }
 0x2d8   :  { %v8654_v6 = vpop.permute.xlu0 %1430  ;;  %v1441_v25 = vadd.f32 %v8652_v11, %v1385_v32  ;;  %v1883_v11 = vmul.f32 %v6169_v53, %v1882_v12  ;;  %v2517_v53 = vld [vmem:[%s10681_s10] sm:$0xff]  ;;  %s8847_s10 = sld [smem:[#allocation11 + $0x5a]] }
 0x2d9   :  { %v1440_v41 = vadd.f32 %v8654_v6, %v1384_v56  ;;  %5990 = vmatprep.subr.mxu0 %v2517_v53  ;;  %6007 = vmatprep.subr.mxu1 %v2517_v53 }
 0x2da   :  { %5991 = vmatpush3.msra.mxu0 %v2517_v53  ;;  %6008 = vmatpush3.msra.mxu1 %v2517_v53 }
 0x2db   :  { %v8660_v24 = vpop.permute.xlu1 %1679 }
 0x2dc   :  { %v8664_v15 = vpop.permute.xlu0 %1534  ;;  %v1691_v45 = vadd.f32 %v8660_v24, %v1635_v39 }
 0x2dd   :  { %v1544_v10 = vadd.f32 %v8664_v15, %v1440_v41 }
 0x2df   :  { %v1682_v2 = vpop.permute.xlu1 %1681  ;;  %v1637_v24 = vadd.f32 %v1633_v59, %v1544_v10 }
 0x2e0   :  { %v1537_v63 = vpop.permute.xlu0 %1536  ;;  %v1692_v4 = vadd.f32 %v1682_v2, %v1636_v23 }
 0x2e1   :  { %v1545_v49 = vadd.f32 %v1537_v63, %v1441_v25  ;;  %v2134_v63 = vstv %s5749_s16  ;;  %s8825_s16 = sld [smem:[#allocation11 + $0x77]] }
 0x2e2   :  { %v2136_v38 = vmul.f32 %v8230_v42, %v2134_v63  ;;  %v2135_v29 = vmul.f32 %v8216_v20, %v2134_v63  ;;  %v2138_v32 = vmul.f32 %v8309_v33, %v2134_v63  ;;  %v2137_v20 = vmul.f32 %v8295_v22, %v2134_v63 }
 0x2e3   :  { %v1786_v27 = vpop.permute.xlu1 %1785  ;;  %v1638_v54 = vadd.f32 %v1634_v34, %v1545_v49 }
 0x2e4   :  { %v1784_v35 = vpop.permute.xlu0 %1783  ;;  %v1796_v28 = vadd.f32 %v1786_v27, %v1692_v4 }
 0x2e5   :  { %v1795_v52 = vadd.f32 %v1784_v35, %v1691_v45  ;;  %v1886_v35 = vmul.f32 %v8158_v62, %v1882_v12  ;;  %v2382_v62 = vstv %s2381_s2  ;;  %s8833_s2 = sld [smem:[#allocation11 + $0x38]] }
 0x2e6   :  { %v1888_v6 = vadd.f32 %v1884_v14, %v1796_v28 }
 0x2e7   :  { %v1686_v58 = vpop.permute.xlu1 %1685  ;;  %v1887_v5 = vadd.f32 %v1883_v11, %v1795_v52  ;;  %11194 = sst [smem:[#allocation204_spill]] %s8825_s16 }
 0x2e8   :  { %v1684_v43 = vpop.permute.xlu0 %1683  ;;  %v1694_v27 = vadd.f32 %v1686_v58, %v1638_v54 }
 0x2e9   :  { %v1693_v46 = vadd.f32 %v1684_v43, %v1637_v24 }
 0x2eb   :  { %v1932_v16 = vpop.permute.xlu1 %1931 }
 0x2ec   :  { %v1788_v1 = vpop.permute.xlu0 %1787  ;;  %v1943_v26 = vadd.f32 %v1932_v16, %v1887_v5 }
 0x2ed   :  { %v1797_v57 = vadd.f32 %v1788_v1, %v1693_v46 }
 0x2ef   :  { %v1934_v50 = vpop.permute.xlu1 %1933  ;;  %v1889_v16 = vadd.f32 %v1885_v60, %v1797_v57  ;;  %v10728_v60 = vmov 0.0  }
 0x2f0   :  { %v1790_v3 = vpop.permute.xlu0 %1789  ;;  %v1944_v47 = vadd.f32 %v1934_v50, %v1888_v6  ;;  %6012 = vmatprep.subr.mxu1 %v10728_v60  ;;  %6026 = vmatprep.subr.mxu0 %v10728_v60 }
 0x2f1   :  { %v1798_v37 = vadd.f32 %v1790_v3, %v1694_v27 }
 0x2f3   :  { %v2038_v9 = vpop.permute.xlu1 %2037  ;;  %v1890_v58 = vadd.f32 %v1886_v35, %v1798_v37 }
 0x2f4   :  { %v2036_v19 = vpop.permute.xlu0 %2035  ;;  %v2048_v15 = vadd.f32 %v2038_v9, %v1944_v47 }
 0x2f5   :  { %v2047_v0 = vadd.f32 %v2036_v19, %v1943_v26 }
 0x2f6   :  { %v2140_v43 = vadd.f32 %v2136_v38, %v2048_v15 }
 0x2f7   :  { %v1938_v2 = vpop.permute.xlu1 %1937  ;;  %v2139_v55 = vadd.f32 %v2135_v29, %v2047_v0 }
 0x2f8   :  { %v1936_v40 = vpop.permute.xlu0 %1935  ;;  %v1946_v31 = vadd.f32 %v1938_v2, %v1890_v58 }
 0x2f9   :  { %v1945_v30 = vadd.f32 %v1936_v40, %v1889_v16 }
 0x2fb   :  { %v2184_v51 = vpop.permute.xlu1 %2183 }
 0x2fc   :  { %v2040_v36 = vpop.permute.xlu0 %2039  ;;  %v2195_v21 = vadd.f32 %v2184_v51, %v2139_v55 }
 0x2fd   :  { %v2049_v23 = vadd.f32 %v2040_v36, %v1945_v30 }
 0x2ff   :  { %v2186_v17 = vpop.permute.xlu1 %2185  ;;  %v2141_v9 = vadd.f32 %v2137_v20, %v2049_v23 }
 0x300   :  { %v2042_v61 = vpop.permute.xlu0 %2041  ;;  %v2196_v8 = vadd.f32 %v2186_v17, %v2140_v43 }
 0x301   :  { %v2050_v50 = vadd.f32 %v2042_v61, %v1946_v31  ;;  %v2709_v31 = vld [vmem:[%s10680_s9] sm:$0x7f]  ;;  %s8737_s9 = sld [smem:[#allocation11 + $0x49]] }
 0x303   :  { %v2290_v13 = vpop.permute.xlu1 %2289  ;;  %v2142_v41 = vadd.f32 %v2138_v32, %v2050_v50  ;;  %v2892_v32 = vstv %s8739_s19  ;;  %s9052_s19 = sld [smem:[#allocation11 + $0x79]] }
 0x304   :  { %v2288_v42 = vpop.permute.xlu0 %2287  ;;  %v2300_v1 = vadd.f32 %v2290_v13, %v2196_v8 }
 0x305   :  { %v2299_v3 = vadd.f32 %v2288_v42, %v2195_v21 }
 0x306   :  { %v2384_v56 = vadd.f32 %v2382_v62, %v2300_v1 }
 0x307   :  { %v2383_v39 = vadd.f32 %v2382_v62, %v2299_v3  ;;  %v2190_v12 = vpop.permute.xlu1 %2189  ;;  %v2906_v1 = vstv %s8737_s9  ;;  %s9558_s9 = sld [smem:[#allocation11 + $0x85]] }
 0x308   :  { %v2388_v25 = vmax.f32 %v2384_v56, 0.0  ;;  %v2188_v4 = vpop.permute.xlu0 %2187  ;;  %v2198_v49 = vadd.f32 %v2190_v12, %v2142_v41  ;;  %v2948_v12 = vstv %s8743_s4  ;;  %v2976_v41 = vstv %s8745_s21  ;;  %s11210_s21 = smov 113   ;;  %s9063_s4 = sld [smem:[#allocation11 + $0x56]] }
 0x309   :  { %v2387_v45 = vmax.f32 %v2383_v39, 0.0  ;;  %v2197_v28 = vadd.f32 %v2188_v4, %v2141_v9  ;;  %v2920_v39 = vstv %s8741_s20  ;;  %s11213_s20 = smov 112  }
 0x30a   :  { %2424 = vst.msk [vmem:[#allocation2 + $0x8] sm:$0x3f] %vm2423_vm1, %v2388_v25 }
 0x30b   :  { %v2294_v48 = vpop.permute.xlu1 %2293  ;;  %2422 = vst.msk [vmem:[#allocation2] sm:$0xff] %vm2421_vm2, %v2387_v45  ;;  %v2962_v45 = vstv %s8749_s22  ;;  %s9074_s22 = sld [smem:[#allocation11 + $0x7a]] }
 0x30c   :  { %v2292_v33 = vpop.permute.xlu0 %2291  ;;  %v2302_v34 = vadd.f32 %v2294_v48, %v2198_v49  ;;  %v3356_v48 = vstv %s8763_s24  ;;  %s9085_s24 = sld [smem:[#allocation11 + $0x57]] }
 0x30d   :  { %v2301_v22 = vadd.f32 %v2292_v33, %v2197_v28  ;;  %v3370_v28 = vstv %s8759_s23  ;;  %s9096_s23 = sld [smem:[#allocation11 + $0x7b]] }
 0x30e   :  { %v2386_v18 = vadd.f32 %v2382_v62, %v2302_v34 }
 0x30f   :  { %v2385_v14 = vadd.f32 %v2382_v62, %v2301_v22  ;;  %v2434_v19 = vpop.permute.xlu1 %2433 }
 0x310   :  { %v2390_v10 = vmax.f32 %v2386_v18, 0.0  ;;  %2446 = vst.msk [vmem:[#allocation2 + $0x8] sm:$0x3f] %vm2445_vm3, %v2434_v19  ;;  %v2432_v52 = vpop.permute.xlu0 %2431  ;;  %v3384_v18 = vstv %s8773_s6  ;;  %s8923_s6 = sld [smem:[#allocation11 + $0x4c]] }
 0x311   :  { %v2389_v7 = vmax.f32 %v2385_v14, 0.0  ;;  %2444 = vst.msk [vmem:[#allocation2] sm:$0xff] %vm2443_vm4, %v2432_v52  ;;  %v3412_v14 = vstv %s8777_s26  ;;  %s9107_s26 = sld [smem:[#allocation11 + $0x58]] }
 0x312   :  { %2426 = vst.msk [vmem:[#allocation2 + $0x18] sm:$0x3f] %vm2423_vm1, %v2390_v10  ;;  %vm5054_vm1 = vcmask 159864  }
 0x313   :  { %2425 = vst.msk [vmem:[#allocation2 + $0x10] sm:$0xff] %vm2421_vm2, %v2389_v7  ;;  %v2456_v59 = vpop.permute.xlu1 %2455  ;;  %v3426_v7 = vstv %s8787_s27  ;;  %s9118_s27 = sld [smem:[#allocation11 + $0x7c]]  ;;  %vm5072_vm2 = vcmask 154624  }
 0x314   :  { %2468 = vst.msk [vmem:[#allocation2 + $0x8] sm:$0x3f] %vm2467_vm5, %v2456_v59  ;;  %v2454_v11 = vpop.permute.xlu0 %2453  ;;  %v3468_v59 = vstv %s8791_s0  ;;  %s9129_s0 = sld [smem:[#allocation11 + $0x59]] }
 0x315   :  { %2466 = vst.msk [vmem:[#allocation2] sm:$0xff] %vm2465_vm6, %v2454_v11 }
 0x316   :  { %11208 = sst [smem:[#allocation214_spill]] %s8923_s6 }
 0x317   :  { %v2478_v2 = vpop.permute.xlu1 %2477 }
 0x318   :  { %2490 = vst.msk [vmem:[#allocation2 + $0x8] sm:$0x3f] %vm2489_vm7, %v2478_v2  ;;  %v2476_v54 = vpop.permute.xlu0 %2475  ;;  %v3440_v2 = vstv %s8803_s28  ;;  %s11206_s28 = smov 126  }
 0x319   :  { %2488 = vst.msk [vmem:[#allocation2] sm:$0xff] %vm2487_vm8, %v2476_v54  ;;  %v3908_v54 = vstv %s8807_s29  ;;  %11219 = sst [smem:[#allocation221_spill]] %s9118_s27 }
 0x31a   :  { %s9492_s29 = sld [smem:[#allocation11 + $0x83]] }
 0x31b   :  { %v2438_v6 = vpop.permute.xlu1 %2437 }
 0x31c   :  { %2448 = vst.msk [vmem:[#allocation2 + $0x18] sm:$0x3f] %vm2445_vm3, %v2438_v6  ;;  %v2436_v40 = vpop.permute.xlu0 %2435  ;;  %vm5236_vm3 = vcmask 1043456  }
 0x31d   :  { %2447 = vst.msk [vmem:[#allocation2 + $0x10] sm:$0xff] %vm2443_vm4, %v2436_v40  ;;  %vm5232_vm4 = vcmask 31744  }
 0x31f   :  { %v2460_v24 = vpop.permute.xlu1 %2459  ;;  %v2494_v5 = vld [vmem:[#allocation2 + $0x8] sm:$0x3f] }
 0x320   :  { %2470 = vst.msk [vmem:[#allocation2 + $0x18] sm:$0x3f] %vm2467_vm5, %v2460_v24  ;;  %v2458_v63 = vpop.permute.xlu0 %2457  ;;  %2503 = vrot.lane.b32.xlu1 %v2494_v5, %s10689_s8  ;;  %v2493_v27 = vld [vmem:[#allocation2] sm:$0xff]  ;;  %v3482_v24 = vstv %s8817_s30  ;;  %s9144_s30 = sld [smem:[#allocation11 + $0x7d]]  ;;  %vm5388_vm5 = vcmask 1041409  }
 0x321   :  { %2469 = vst.msk [vmem:[#allocation2 + $0x10] sm:$0xff] %vm2465_vm6, %v2458_v63  ;;  %2501 = vrot.lane.b32.xlu0 %v2493_v27, %s10689_s8  ;;  %vm5390_vm6 = vcmask 64512  }
 0x323   :  { %v2482_v47 = vpop.permute.xlu1 %2481 }
 0x324   :  { %2492 = vst.msk [vmem:[#allocation2 + $0x18] sm:$0x3f] %vm2489_vm7, %v2482_v47  ;;  %v2480_v46 = vpop.permute.xlu0 %2479  ;;  %v3496_v47 = vstv %s8825_s16  ;;  %s8911_s16 = sld [smem:[#allocation11 + $0x30]]  ;;  %vm5558_vm7 = vcmask 261120  }
 0x325   :  { %2491 = vst.msk [vmem:[#allocation2 + $0x10] sm:$0xff] %vm2487_vm8, %v2480_v46  ;;  %v4020_v46 = vstv %s8833_s2  ;;  %s9547_s2 = sld [smem:[#allocation11 + $0x61]]  ;;  %vm5632_vm8 = vcmask 41984  }
 0x326   :  { %11220 = sst [smem:[#allocation222_spill]] %s9144_s30 }
 0x32a   :  { %11205 = sst [smem:[#allocation212_spill]] %s8911_s16 }
 0x32b   :  { %v2496_v26 = vld [vmem:[#allocation2 + $0x18] sm:$0x3f] }
 0x32c   :  { %2507 = vrot.lane.b32.xlu1 %v2496_v26, %s10689_s8  ;;  %v2495_v51 = vld [vmem:[#allocation2 + $0x10] sm:$0xff] }
 0x32d   :  { %2505 = vrot.lane.b32.xlu0 %v2495_v51, %s10689_s8 }
 0x392   :  { %v2504_v37 = vpop.permute.xlu1 %2503 }
 0x393   :  { %v2514_v15 = vmax.f32 %v2494_v5, %v2504_v37  ;;  %v2502_v35 = vpop.permute.xlu0 %2501  ;;  %v3964_v5 = vstv %s8821_s14  ;;  %s9503_s14 = sld [smem:[#allocation11 + $0x3c]] }
 0x394   :  { %v2513_v36 = vmax.f32 %v2493_v27, %v2502_v35  ;;  %v3922_v35 = vstv %s8847_s10  ;;  %s9536_s10 = sld [smem:[#allocation11 + $0x3d]] }
 0x396   :  { %5992 = vmatprep.mubr.msk.f32.mxu0 %vm2524_vm9, %v2513_v36  ;;  %v3118_v36 = vstv %s8851_s3  ;;  %s8941_s3 = sld [smem:[#allocation11 + $0x32]] }
 0x397   :  { %5993 = vmatmul.mubr.msk.f32.vlgmr.msra.gmra.mxu0 %vm2524_vm9, %v2514_v15 }
 0x398   :  { %6032 = vmatprep.mubr.msk.f32.mxu0 %vm6320_vm10, %v10728_v60 }
 0x39c   :  { %11211 = sst [smem:[#allocation216_spill]] %s8941_s3 }
 0x39e   :  { %v2508_v38 = vpop.permute.xlu1 %2507 }
 0x39f   :  { %v2516_v57 = vmax.f32 %v2496_v26, %v2508_v38  ;;  %v2506_v0 = vpop.permute.xlu0 %2505  ;;  %v3054_v26 = vstv %s8837_s17  ;;  %s8973_s17 = sld [smem:[#allocation11 + $0x34]] }
 0x3a0   :  { %v2515_v44 = vmax.f32 %v2495_v51, %v2506_v0 }
 0x3a2   :  { %6009 = vmatprep.mubr.msk.f32.mxu1 %vm2524_vm9, %v2515_v44 }
 0x3a3   :  { %6010 = vmatmul.mubr.msk.f32.vlgmr.msra.gmra.mxu1 %vm2524_vm9, %v2516_v57 }
 0x3a4   :  { %6016 = vmatprep.mubr.msk.f32.mxu1 %vm6320_vm10, %v10728_v60 }
 0x3a5   :  { %11214 = sst [smem:[#allocation218_spill]] %s8973_s17 }
 0x457   :  { %v5994_v29 = vpop.f32.mrf.mxu0 }
 0x458   :  { %v2696_v17 = vrot.slane %v5994_v29, 1 }
 0x459   :  { %v2601_v58 = vpop.f32.mrf.mxu0 }
 0x45a   :  { %v2706_v61 = vmax.f32 %v5994_v29, %v2696_v17  ;;  %v2695_v43 = vrot.slane %v2601_v58, 1 }
 0x45c   :  { %v2697_v16 = vsel %vm2531_vm0, %v2695_v43, %v2696_v17  ;;  %6013 = vmatpush3.msk.msra.mxu1 %vm2714_vm11, %v2706_v61 }
 0x45d   :  { %v2705_v55 = vmax.f32 %v2601_v58, %v2697_v16  ;;  %6014 = vmatprep.subr.mxu1 %v10728_v60 }
 0x45f   :  { %6015 = vmatpush3.msra.mxu1 %v2705_v55 }
 0x460   :  { %6017 = vmatmul.mubr.msk.f32.vlgmr.msra.gmra.mxu1 %vm2710_vm12, %v2709_v31  ;;  %6019 = vmatprep.subr.mxu1 %v10728_v60 }
 0x461   :  { %6023 = vmatprep.mubr.msk.f32.mxu1 %vm6320_vm10, %v10728_v60 }
 0x463   :  { %v6011_v8 = vpop.f32.mrf.mxu1 }
 0x464   :  { %v2699_v30 = vrot.slane %v6011_v8, 1 }
 0x465   :  { %v2682_v21 = vpop.f32.mrf.mxu1 }
 0x466   :  { %v2708_v62 = vmax.f32 %v6011_v8, %v2699_v30  ;;  %v2698_v13 = vrot.slane %v2682_v21, 1 }
 0x468   :  { %v2700_v50 = vsel %vm2531_vm0, %v2698_v13, %v2699_v30  ;;  %6020 = vmatpush3.msk.msra.mxu1 %vm2714_vm11, %v2708_v62  ;;  %v3992_v30 = vstv %s8893_s7  ;;  %s8951_s7 = sld [smem:[#allocation11 + $0x71]]  ;;  %vm5043_vm0 = vcmask 118864  }
 0x469   :  { %v2707_v42 = vmax.f32 %v2682_v21, %v2700_v50  ;;  %6021 = vmatprep.subr.mxu1 %v10728_v60  ;;  %v3294_v21 = vstv %s8897_s5  ;;  %s8956_s5 = sld [smem:[#allocation11 + $0x33]] }
 0x46b   :  { %6022 = vmatpush3.msra.mxu1 %v2707_v42 }
 0x46c   :  { %6024 = vmatmul.mubr.msk.f32.vlgmr.msra.gmra.mxu1 %vm2710_vm12, %v2709_v31  ;;  %6035 = vmatprep.subr.mxu1 %v10728_v60 }
 0x46d   :  { %6041 = vmatprep.mubr.msk.f32.mxu1 %vm6320_vm10, %v10728_v60 }
 0x46f   :  { %11212 = sst [smem:[#allocation217_spill]] %s8956_s5 }
 0x520   :  { %v8751_v23 = vpop.f32.mrf.mxu1 }
 0x521   :  { %v2907_v3 = vmul.f32 %v2906_v1, %v8751_v23  ;;  %v2893_v20 = vmul.f32 %v2892_v32, %v8751_v23  ;;  %v2921_v25 = vmul.f32 %v2920_v39, %v8751_v23  ;;  %v2949_v4 = vmul.f32 %v2948_v12, %v8751_v23 }
 0x522   :  { %v6018_v56 = vpop.f32.mrf.mxu1  ;;  %v2977_v9 = vmul.f32 %v2976_v41, %v8751_v23  ;;  %v2963_v49 = vmul.f32 %v2962_v45, %v8751_v23  ;;  %v3371_v34 = vmul.f32 %v3370_v28, %v8751_v23  ;;  %v3357_v22 = vmul.f32 %v3356_v48, %v8751_v23 }
 0x523   :  { %2911 = vrot.lane.b32.xlu1 %v2907_v3, %s10689_s8  ;;  %2897 = vrot.lane.b32.xlu0 %v2893_v20, %s10689_s8  ;;  %v3385_v10 = vmul.f32 %v3384_v18, %v8751_v23  ;;  %v3413_v52 = vmul.f32 %v3412_v14, %v8751_v23  ;;  %v3427_v53 = vmul.f32 %v3426_v7, %v8751_v23  ;;  %v3526_v3 = vstv %s8911_s16  ;;  %s8969_s16 = sld [smem:[#allocation11 + $0x4f]] }
 0x524   :  { %v3469_v11 = vmul.f32 %v3468_v59, %v8751_v23  ;;  %v3441_v6 = vmul.f32 %v3440_v2, %v8751_v23  ;;  %v3909_v40 = vmul.f32 %v3908_v54, %v8751_v23  ;;  %v3483_v63 = vmul.f32 %v3482_v24, %v8751_v23 }
 0x525   :  { %v3965_v27 = vmul.f32 %v3964_v5, %v8751_v23  ;;  %v3497_v51 = vmul.f32 %v3496_v47, %v8751_v23  ;;  %v4021_v37 = vmul.f32 %v4020_v46, %v8751_v23  ;;  %v3055_v15 = vmul.f32 %v3054_v26, %v8751_v23 }
 0x526   :  { %v3923_v38 = vmul.f32 %v3922_v35, %v8751_v23  ;;  %v3119_v0 = vmul.f32 %v3118_v36, %v8751_v23  ;;  %v3993_v62 = vmul.f32 %v3992_v30, %v8751_v23  ;;  %v3295_v50 = vmul.f32 %v3294_v21, %v8751_v23 }
 0x527   :  { %2925 = vrot.lane.b32.xlu1 %v2921_v25, %s10689_s8  ;;  %2953 = vrot.lane.b32.xlu0 %v2949_v4, %s10687_s25  ;;  %s8866_s8 = sld [smem:[#allocation11 + $0x4d]]  ;;  %v3059_v57 = vrot.slane %v3055_v15, 1  ;;  %v3527_v25 = vmul.f32 %v3526_v3, %v8751_v23 }
 0x528   :  { %v3123_v58 = vrot.slane %v3119_v0, 1  ;;  %v3299_v56 = vrot.slane %v3295_v50, 2 }
 0x529   :  { %v3246_v0 = vstv %s8969_s16  ;;  %s9642_s16 = sld [smem:[#allocation11 + $0x40]] }
 0x52b   :  { %2981 = vrot.lane.b32.xlu1 %v2977_v9, %s10687_s25  ;;  %2967 = vrot.lane.b32.xlu0 %v2963_v49, %s10687_s25  ;;  %s8861_s25 = sld [smem:[#allocation11 + $0x7e]]  ;;  %v3070_v9 = vstv %s8923_s6 }
 0x52c   :  { %v8795_v33 = vpop.f32.mrf.mxu1  ;;  %s8987_s6 = sld [smem:[#allocation11 + $0x35]] }
 0x52d   :  { %11198 = sst [smem:[#allocation208_spill]] %s8866_s8  ;;  %v3134_v29 = vstv %s8866_s8 }
 0x52e   :  { %v6025_v19 = vpop.f32.mrf.mxu1  ;;  %v3135_v61 = vmul.f32 %v3134_v29, %v8751_v23  ;;  %s8927_s8 = sld [smem:[#allocation11 + $0x31]] }
 0x52f   :  { %3375 = vrot.lane.b32.xlu1 %v3371_v34, %s10685_s1  ;;  %3361 = vrot.lane.b32.xlu0 %v3357_v22, %s10685_s1  ;;  %v3531_v22 = vrot.slane %v3527_v25, 1  ;;  %v3071_v19 = vmul.f32 %v3070_v9, %v8751_v23 }
 0x530   :  { %v3139_v31 = vrot.slane %v3135_v61, 1 }
 0x531   :  { %11197 = sst [smem:[#allocation207_spill]] %s8861_s25  ;;  %v3936_v44 = vstv %s8861_s25 }
 0x532   :  { %v3937_v17 = vmul.f32 %v3936_v44, %v8751_v23  ;;  %s8915_s25 = sld [smem:[#allocation11 + $0x80]] }
 0x533   :  { %3389 = vrot.lane.b32.xlu1 %v3385_v10, %s10685_s1  ;;  %3417 = vrot.lane.b32.xlu0 %v3413_v52, %s10691_s15  ;;  %s10693_s1 = smov 114   ;;  %11217 = sst [smem:[#allocation220_spill]] %s8987_s6 }
 0x534   :  { %11209 = sst [smem:[#allocation215_spill]] %s8927_s8  ;;  %v3590_v49 = vstv %s8927_s8 }
 0x535   :  { %v3591_v10 = vmul.f32 %v3590_v49, %v8751_v23  ;;  %s8983_s8 = sld [smem:[#allocation11 + $0x73]] }
 0x537   :  { %3431 = vrot.lane.b32.xlu1 %v3427_v53, %s10691_s15  ;;  %3473 = vrot.lane.b32.xlu0 %v3469_v11, %s10695_s18  ;;  %v3654_v53 = vstv %s8941_s3  ;;  %v3075_v11 = vrot.slane %v3071_v19, 1  ;;  %s8999_s3 = sld [smem:[#allocation11 + $0x50]] }
 0x538   :  { %11207 = sst [smem:[#allocation213_spill]] %s8915_s25  ;;  %v4048_v4 = vstv %s8915_s25  ;;  %s11215_s25 = smov 121  }
 0x539   :  { %v4049_v34 = vmul.f32 %v4048_v4, %v8751_v23 }
 0x53b   :  { %3445 = vrot.lane.b32.xlu1 %v3441_v6, %s10691_s15  ;;  %3913 = vrot.lane.b32.xlu0 %v3909_v40, %s10693_s1  ;;  %s10697_s15 = smov 113   ;;  %s8879_s1 = sld [smem:[#allocation11 + $0x5b]]  ;;  %v3595_v6 = vrot.slane %v3591_v10, 1 }
 0x53c   :  { %11216 = sst [smem:[#allocation219_spill]] %s8983_s8 }
 0x53d   :  { %v3310_v25 = vstv %s8999_s3  ;;  %s9407_s3 = sld [smem:[#allocation11 + $0x5d]] }
 0x53e   :  { %v3311_v19 = vmul.f32 %v3310_v25, %v8751_v23 }
 0x53f   :  { %3487 = vrot.lane.b32.xlu1 %v3483_v63, %s10695_s18  ;;  %3969 = vrot.lane.b32.xlu0 %v3965_v27, %s10697_s15  ;;  %s8883_s18 = sld [smem:[#allocation11 + $0x2b]]  ;;  %s10702_s15 = smov 112   ;;  %v3655_v63 = vmul.f32 %v3654_v53, %v8751_v23  ;;  %v3150_v27 = vstv %s8951_s7 }
 0x540   :  { %s9621_s7 = sld [smem:[#allocation11 + $0x63]] }
 0x541   :  { %v3978_v43 = vstv %s8879_s1  ;;  %v3659_v15 = vrot.slane %v3655_v63, 1  ;;  %s11227_s1 = smov 112  }
 0x542   :  { %v3979_v55 = vmul.f32 %v3978_v43, %v8751_v23 }
 0x543   :  { %3501 = vrot.lane.b32.xlu1 %v3497_v51, %s11200_s13  ;;  %4025 = vrot.lane.b32.xlu0 %v4021_v37, %s10702_s15  ;;  %s8907_s15 = sld [smem:[#allocation11 + $0x5c]]  ;;  %v3718_v51 = vstv %s8956_s5 }
 0x544   :  { %s9011_s5 = sld [smem:[#allocation11 + $0x74]] }
 0x545   :  { %11199 = sst [smem:[#allocation209_spill]] %s8883_s18  ;;  %v3230_v16 = vstv %s8883_s18 }
 0x546   :  { %v3231_v8 = vmul.f32 %v3230_v16, %v8751_v23  ;;  %s8937_s18 = sld [smem:[#allocation11 + $0x70]] }
 0x547   :  { %3927 = vrot.lane.b32.xlu1 %v3923_v38, %s11203_s11  ;;  %3061 = vrot.lane.b32.xlu0 %v3059_v57, %s11204_s12  ;;  %v3151_v38 = vmul.f32 %v3150_v27, %v8751_v23  ;;  %v3719_v57 = vmul.f32 %v3718_v51, %v8751_v23 }
 0x548   :  { %v3235_v13 = vrot.slane %v3231_v8, 2  ;;  %v3262_v8 = vstv %s8983_s8  ;;  %s9030_s8 = sld [smem:[#allocation11 + $0x78]] }
 0x549   :  { %v4034_v42 = vstv %s8907_s15  ;;  %v3723_v61 = vrot.slane %v3719_v57, 2  ;;  %s9569_s15 = sld [smem:[#allocation11 + $0x3e]] }
 0x54a   :  { %v4035_v20 = vmul.f32 %v4034_v42, %v8751_v23  ;;  %v3326_v10 = vstv %s9011_s5  ;;  %s9631_s5 = sld [smem:[#allocation11 + $0x87]] }
 0x54b   :  { %3941 = vrot.lane.b32.xlu1 %v3937_v17, %s11203_s11  ;;  %3125 = vrot.lane.b32.xlu0 %v3123_v58, %s11206_s28  ;;  %v3782_v17 = vstv %s8973_s17  ;;  %v3155_v58 = vrot.slane %v3151_v38, 1  ;;  %s9022_s17 = sld [smem:[#allocation11 + $0x54]] }
 0x54c   :  { %v3086_v52 = vstv %s8937_s18  ;;  %s9591_s18 = sld [smem:[#allocation11 + $0x86]] }
 0x54d   :  { %v3087_v40 = vmul.f32 %v3086_v52, %v8751_v23 }
 0x54e   :  { %v3558_v38 = vstv %s9030_s8  ;;  %s9393_s8 = sld [smem:[#allocation11 + $0x39]] }
 0x54f   :  { %3983 = vrot.lane.b32.xlu1 %v3979_v55, %s11210_s21  ;;  %3141 = vrot.lane.b32.xlu0 %v3139_v31, %s11206_s28  ;;  %v3091_v37 = vrot.slane %v3087_v40, 1  ;;  %v3247_v55 = vmul.f32 %v3246_v0, %v8751_v23  ;;  %v3783_v31 = vmul.f32 %v3782_v17, %v8751_v23  ;;  %v3327_v40 = vmul.f32 %v3326_v10, %v8751_v23 }
 0x551   :  { %v3787_v50 = vrot.slane %v3783_v31, 2  ;;  %v3542_v63 = vstv %s9022_s17  ;;  %v3358_v31 = vmul.f32 %v3356_v48, %v8795_v33  ;;  %s9580_s17 = sld [smem:[#allocation11 + $0x62]] }
 0x553   :  { %3997 = vrot.lane.b32.xlu1 %v3993_v62, %s11210_s21  ;;  %3237 = vrot.lane.b32.xlu0 %v3235_v13, %s11204_s12  ;;  %v3846_v62 = vstv %s8987_s6  ;;  %v3251_v13 = vrot.slane %v3247_v55, 2  ;;  %s9041_s6 = sld [smem:[#allocation11 + $0x55]] }
 0x557   :  { %4039 = vrot.lane.b32.xlu1 %v4035_v20, %s11213_s20  ;;  %3301 = vrot.lane.b32.xlu0 %v3299_v56, %s11206_s28  ;;  %v3263_v20 = vmul.f32 %v3262_v8, %v8751_v23  ;;  %v3847_v56 = vmul.f32 %v3846_v62, %v8751_v23 }
 0x55b   :  { %4053 = vrot.lane.b32.xlu1 %v4049_v34, %s11213_s20  ;;  %3533 = vrot.lane.b32.xlu0 %v3531_v22, %s11215_s25  ;;  %s11218_s20 = smov 120   ;;  %v3267_v34 = vrot.slane %v3263_v20, 2  ;;  %v3851_v22 = vrot.slane %v3847_v56, 2  ;;  %v3372_v20 = vmul.f32 %v3370_v28, %v8795_v33  ;;  %v3670_v56 = vstv %s9063_s4  ;;  %s9422_s4 = sld [smem:[#allocation11 + $0x81]] }
 0x55c   :  { %v3671_v28 = vmul.f32 %v3670_v56, %v8751_v23 }
 0x55f   :  { %3077 = vrot.lane.b32.xlu1 %v3075_v11, %s11204_s12  ;;  %3597 = vrot.lane.b32.xlu0 %v3595_v6, %s11218_s20  ;;  %v2894_v11 = vmul.f32 %v2892_v32, %v8795_v33  ;;  %v3315_v6 = vrot.slane %v3311_v19, 2  ;;  %v3543_v32 = vmul.f32 %v3542_v63, %v8751_v23  ;;  %v3686_v19 = vstv %s9074_s22  ;;  %s9435_s22 = sld [smem:[#allocation11 + $0x3a]] }
 0x561   :  { %v3547_v57 = vrot.slane %v3543_v32, 1 }
 0x563   :  { %3093 = vrot.lane.b32.xlu1 %v3091_v37, %s11204_s12  ;;  %3661 = vrot.lane.b32.xlu0 %v3659_v15, %s11200_s13  ;;  %v3331_v37 = vrot.slane %v3327_v40, 2  ;;  %v2950_v15 = vmul.f32 %v2948_v12, %v8795_v33  ;;  %v3559_v12 = vmul.f32 %v3558_v38, %v8751_v23  ;;  %v3734_v40 = vstv %s9085_s24  ;;  %s9448_s24 = sld [smem:[#allocation11 + $0x5e]] }
 0x564   :  { %v3735_v32 = vmul.f32 %v3734_v40, %v8751_v23 }
 0x565   :  { %v3563_v55 = vrot.slane %v3559_v12, 1  ;;  %v3798_v12 = vstv %s9107_s26  ;;  %s9470_s26 = sld [smem:[#allocation11 + $0x3b]] }
 0x567   :  { %3157 = vrot.lane.b32.xlu1 %v3155_v58, %s11206_s28  ;;  %3725 = vrot.lane.b32.xlu0 %v3723_v61, %s11215_s25  ;;  %v2964_v58 = vmul.f32 %v2962_v45, %v8795_v33  ;;  %v3606_v61 = vstv %s9041_s6  ;;  %s9611_s6 = sld [smem:[#allocation11 + $0x3f]] }
 0x568   :  { %v3607_v45 = vmul.f32 %v3606_v61, %v8751_v23 }
 0x56b   :  { %3253 = vrot.lane.b32.xlu1 %v3251_v13, %s11204_s12  ;;  %3789 = vrot.lane.b32.xlu0 %v3787_v50, %s11218_s20  ;;  %v3622_v13 = vstv %s9052_s19  ;;  %v3611_v50 = vrot.slane %v3607_v45, 1  ;;  %s9663_s19 = sld [smem:[#allocation11 + $0x88]] }
 0x56c   :  { %v3623_v48 = vmul.f32 %v3622_v13, %v8751_v23 }
 0x56f   :  { %3269 = vrot.lane.b32.xlu1 %v3267_v34, %s11204_s12  ;;  %3853 = vrot.lane.b32.xlu0 %v3851_v22, %s11200_s13  ;;  %v3627_v34 = vrot.slane %v3623_v48, 1  ;;  %v3414_v22 = vmul.f32 %v3412_v14, %v8795_v33  ;;  %v3687_v14 = vmul.f32 %v3686_v19, %v8751_v23 }
 0x573   :  { %3317 = vrot.lane.b32.xlu1 %v3315_v6, %s11206_s28  ;;  %2899 = vrot.lane.b32.xlu0 %v2894_v11, %s11204_s12  ;;  %v3675_v11 = vrot.slane %v3671_v28, 1  ;;  %v3428_v6 = vmul.f32 %v3426_v7, %v8795_v33  ;;  %v3750_v7 = vstv %s9096_s23  ;;  %s9459_s23 = sld [smem:[#allocation11 + $0x82]] }
 0x577   :  { %3333 = vrot.lane.b32.xlu1 %v3331_v37, %s11206_s28  ;;  %2955 = vrot.lane.b32.xlu0 %v2950_v15, %s11206_s28  ;;  %v3691_v37 = vrot.slane %v3687_v14, 1  ;;  %v3470_v15 = vmul.f32 %v3468_v59, %v8795_v33  ;;  %v3751_v59 = vmul.f32 %v3750_v7, %v8751_v23 }
 0x579   :  { %v3755_v45 = vrot.slane %v3751_v59, 2 }
 0x57b   :  { %3549 = vrot.lane.b32.xlu1 %v3547_v57, %s11215_s25  ;;  %2969 = vrot.lane.b32.xlu0 %v2964_v58, %s11206_s28  ;;  %v3739_v57 = vrot.slane %v3735_v32, 2  ;;  %v3484_v58 = vmul.f32 %v3482_v24, %v8795_v33  ;;  %v3910_v24 = vmul.f32 %v3908_v54, %v8795_v33  ;;  %v3924_v54 = vmul.f32 %v3922_v35, %v8795_v33 }
 0x57c   :  { %v3878_v32 = vstv %s9144_s30  ;;  %s9525_s30 = sld [smem:[#allocation11 + $0x84]] }
 0x57f   :  { %3565 = vrot.lane.b32.xlu1 %v3563_v55, %s11215_s25  ;;  %3363 = vrot.lane.b32.xlu0 %v3358_v31, %s11215_s25 }
 0x583   :  { %3613 = vrot.lane.b32.xlu1 %v3611_v50, %s11218_s20  ;;  %3377 = vrot.lane.b32.xlu0 %v3372_v20, %s11215_s25  ;;  %v3799_v50 = vmul.f32 %v3798_v12, %v8751_v23  ;;  %v3814_v20 = vstv %s9118_s27  ;;  %s9514_s27 = sld [smem:[#allocation11 + $0x60]] }
 0x584   :  { %v3815_v28 = vmul.f32 %v3814_v20, %v8751_v23 }
 0x587   :  { %3629 = vrot.lane.b32.xlu1 %v3627_v34, %s11218_s20  ;;  %3419 = vrot.lane.b32.xlu0 %v3414_v22, %s11218_s20  ;;  %v3803_v22 = vrot.slane %v3799_v50, 2 }
 0x58b   :  { %3677 = vrot.lane.b32.xlu1 %v3675_v11, %s11200_s13  ;;  %3433 = vrot.lane.b32.xlu0 %v3428_v6, %s11218_s20  ;;  %v3862_v11 = vstv %s9129_s0  ;;  %s9481_s0 = sld [smem:[#allocation11 + $0x5f]] }
 0x58c   :  { %v3863_v35 = vmul.f32 %v3862_v11, %v8751_v23 }
 0x58e   :  { %v3867_v59 = vrot.slane %v3863_v35, 2  ;;  %v3056_v35 = vmul.f32 %v3054_v26, %v8795_v33 }
 0x58f   :  { %3693 = vrot.lane.b32.xlu1 %v3691_v37, %s11200_s13  ;;  %3475 = vrot.lane.b32.xlu0 %v3470_v15, %s11200_s13  ;;  %v3819_v37 = vrot.slane %v3815_v28, 2  ;;  %v3966_v15 = vmul.f32 %v3964_v5, %v8795_v33  ;;  %v3879_v5 = vmul.f32 %v3878_v32, %v8751_v23 }
 0x593   :  { %3741 = vrot.lane.b32.xlu1 %v3739_v57, %s11215_s25  ;;  %3489 = vrot.lane.b32.xlu0 %v3484_v58, %s11200_s13 }
 0x595   :  { %v9133_v55 = vpop.permute.xlu1 %2911  ;;  %v9135_v31 = vpop.permute.xlu0 %2897 }
 0x597   :  { %3757 = vrot.lane.b32.xlu1 %v3755_v45, %s11215_s25  ;;  %3915 = vrot.lane.b32.xlu0 %v3910_v24, %s11203_s11  ;;  %v3980_v45 = vmul.f32 %v3978_v43, %v8795_v33 }
 0x599   :  { %v9148_v48 = vpop.permute.xlu1 %2925  ;;  %v9150_v34 = vpop.permute.xlu0 %2953 }
 0x59b   :  { %3805 = vrot.lane.b32.xlu1 %v3803_v22, %s11218_s20  ;;  %3929 = vrot.lane.b32.xlu0 %v3924_v54, %s11203_s11  ;;  %v3883_v22 = vrot.slane %v3879_v5, 2  ;;  %v4022_v54 = vmul.f32 %v4020_v46, %v8795_v33 }
 0x59d   :  { %v9161_v6 = vpop.permute.xlu1 %2981  ;;  %v9163_v14 = vpop.permute.xlu0 %2967 }
 0x59f   :  { %3821 = vrot.lane.b32.xlu1 %v3819_v37, %s11218_s20  ;;  %3971 = vrot.lane.b32.xlu0 %v3966_v15, %s11210_s21  ;;  %v2908_v37 = vmul.f32 %v2906_v1, %v8795_v33  ;;  %v4036_v15 = vmul.f32 %v4034_v42, %v8795_v33  ;;  %v3060_v1 = vrot.slane %v3056_v35, 1  ;;  %v3120_v42 = vmul.f32 %v3118_v36, %v8795_v33 }
 0x5a1   :  { %v9174_v57 = vpop.permute.xlu1 %3375  ;;  %v9176_v58 = vpop.permute.xlu0 %3361 }
 0x5a2   :  { %11221 = vst [vmem:[#allocation192_spill] sm:$0xff] %v9174_v57 }
 0x5a3   :  { %3869 = vrot.lane.b32.xlu1 %v3867_v59, %s11200_s13  ;;  %3985 = vrot.lane.b32.xlu0 %v3980_v45, %s11210_s21  ;;  %v2922_v45 = vmul.f32 %v2920_v39, %v8795_v33  ;;  %v3136_v39 = vmul.f32 %v3134_v29, %v8795_v33 }
 0x5a5   :  { %v9186_v24 = vpop.permute.xlu1 %3389  ;;  %v9188_v50 = vpop.permute.xlu0 %3417  ;;  %v3140_v35 = vrot.slane %v3136_v39, 1 }
 0x5a6   :  { %11224 = vst [vmem:[#allocation66_spill] sm:$0xff] %v9186_v24  ;;  %11225 = vst [vmem:[#allocation67_spill] sm:$0xff] %v9188_v50 }
 0x5a7   :  { %3885 = vrot.lane.b32.xlu1 %v3883_v22, %s11200_s13  ;;  %4027 = vrot.lane.b32.xlu0 %v4022_v54, %s11227_s1  ;;  %v2978_v22 = vmul.f32 %v2976_v41, %v8795_v33  ;;  %v3124_v54 = vrot.slane %v3120_v42, 1  ;;  %v3232_v41 = vmul.f32 %v3230_v16, %v8795_v33 }
 0x5a9   :  { %v9195_v43 = vpop.permute.xlu1 %3431  ;;  %v9197_v28 = vpop.permute.xlu0 %3473  ;;  %v3236_v42 = vrot.slane %v3232_v41, 2 }
 0x5aa   :  { %11228 = vst [vmem:[#allocation63_spill] sm:$0xff] %v9195_v43  ;;  %11230 = vst [vmem:[#allocation64_spill] sm:$0xff] %v9197_v28 }
 0x5ab   :  { %2913 = vrot.lane.b32.xlu1 %v2908_v37, %s11204_s12  ;;  %4041 = vrot.lane.b32.xlu0 %v4036_v15, %s11227_s1  ;;  %v3386_v15 = vmul.f32 %v3384_v18, %v8795_v33  ;;  %v3296_v18 = vmul.f32 %v3294_v21, %v8795_v33 }
 0x5ad   :  { %v9210_v46 = vpop.permute.xlu1 %3445  ;;  %v9212_v59 = vpop.permute.xlu0 %3913  ;;  %v3300_v39 = vrot.slane %v3296_v18, 2 }
 0x5ae   :  { %11232 = vst [vmem:[#allocation65_spill] sm:$0xff] %v9210_v46  ;;  %11234 = vst [vmem:[#allocation68_spill] sm:$0xff] %v9212_v59 }
 0x5af   :  { %2927 = vrot.lane.b32.xlu1 %v2922_v45, %s11204_s12  ;;  %3063 = vrot.lane.b32.xlu0 %v3060_v1, %s11204_s12  ;;  %v3442_v1 = vmul.f32 %v3440_v2, %v8795_v33  ;;  %v3312_v2 = vmul.f32 %v3310_v25, %v8795_v33 }
 0x5b1   :  { %v9222_v26 = vpop.permute.xlu1 %3487  ;;  %v9224_v5 = vpop.permute.xlu0 %3969  ;;  %v3316_v41 = vrot.slane %v3312_v2, 2 }
 0x5b2   :  { %11236 = vst [vmem:[#allocation69_spill] sm:$0xff] %v9222_v26  ;;  %11238 = vst [vmem:[#allocation70_spill] sm:$0xff] %v9224_v5 }
 0x5b3   :  { %2983 = vrot.lane.b32.xlu1 %v2978_v22, %s11206_s28  ;;  %3127 = vrot.lane.b32.xlu0 %v3124_v54, %s11206_s28  ;;  %v3498_v54 = vmul.f32 %v3496_v47, %v8795_v33  ;;  %v3528_v47 = vmul.f32 %v3526_v3, %v8795_v33 }
 0x5b5   :  { %v9234_v36 = vpop.permute.xlu1 %3501  ;;  %v9236_v37 = vpop.permute.xlu0 %4025  ;;  %v3532_v18 = vrot.slane %v3528_v47, 1 }
 0x5b6   :  { %11240 = vst [vmem:[#allocation71_spill] sm:$0xff] %v9234_v36  ;;  %11242 = vst [vmem:[#allocation72_spill] sm:$0xff] %v9236_v37 }
 0x5b7   :  { %3391 = vrot.lane.b32.xlu1 %v3386_v15, %s11215_s25  ;;  %3143 = vrot.lane.b32.xlu0 %v3140_v35, %s11206_s28  ;;  %v3938_v35 = vmul.f32 %v3936_v44, %v8795_v33  ;;  %v3544_v44 = vmul.f32 %v3542_v63, %v8795_v33  ;;  %v3592_v63 = vmul.f32 %v3590_v49, %v8795_v33 }
 0x5b9   :  { %v9246_v29 = vpop.permute.xlu1 %3927  ;;  %v9248_v45 = vpop.permute.xlu0 %3061  ;;  %v3548_v2 = vrot.slane %v3544_v44, 1 }
 0x5ba   :  { %11243 = vst [vmem:[#allocation73_spill] sm:$0xff] %v9246_v29 }
 0x5bb   :  { %3447 = vrot.lane.b32.xlu1 %v3442_v1, %s11218_s20  ;;  %3239 = vrot.lane.b32.xlu0 %v3236_v42, %s11204_s12  ;;  %v3994_v42 = vmul.f32 %v3992_v30, %v8795_v33  ;;  %v3072_v30 = vmul.f32 %v3070_v9, %v8795_v33  ;;  %v3608_v9 = vmul.f32 %v3606_v61, %v8795_v33 }
 0x5bd   :  { %v9258_v16 = vpop.permute.xlu1 %3941  ;;  %v9260_v22 = vpop.permute.xlu0 %3125  ;;  %v3076_v47 = vrot.slane %v3072_v30, 1 }
 0x5be   :  { %11246 = vst [vmem:[#allocation75_spill] sm:$0xff] %v9258_v16 }
 0x5bf   :  { %3503 = vrot.lane.b32.xlu1 %v3498_v54, %s11200_s13  ;;  %3303 = vrot.lane.b32.xlu0 %v3300_v39, %s11206_s28  ;;  %v4050_v39 = vmul.f32 %v4048_v4, %v8795_v33  ;;  %v3088_v4 = vmul.f32 %v3086_v52, %v8795_v33  ;;  %v3656_v52 = vmul.f32 %v3654_v53, %v8795_v33 }
 0x5c1   :  { %v9270_v21 = vpop.permute.xlu1 %3983  ;;  %v9272_v15 = vpop.permute.xlu0 %3141  ;;  %v3092_v44 = vrot.slane %v3088_v4, 1 }
 0x5c2   :  { %11248 = vst [vmem:[#allocation74_spill] sm:$0xff] %v9270_v21 }
 0x5c3   :  { %3943 = vrot.lane.b32.xlu1 %v3938_v35, %s11203_s11  ;;  %3319 = vrot.lane.b32.xlu0 %v3316_v41, %s11206_s28 }
 0x5c5   :  { %v9282_v25 = vpop.permute.xlu1 %3997  ;;  %v9284_v1 = vpop.permute.xlu0 %3237 }
 0x5c6   :  { %11252 = vst [vmem:[#allocation76_spill] sm:$0xff] %v9282_v25 }
 0x5c7   :  { %3999 = vrot.lane.b32.xlu1 %v3994_v42, %s11210_s21  ;;  %3535 = vrot.lane.b32.xlu0 %v3532_v18, %s11215_s25  ;;  %v3596_v42 = vrot.slane %v3592_v63, 1 }
 0x5c9   :  { %v9294_v3 = vpop.permute.xlu1 %4039  ;;  %v9296_v54 = vpop.permute.xlu0 %3301 }
 0x5ca   :  { %11253 = vst [vmem:[#allocation77_spill] sm:$0xff] %v9294_v3 }
 0x5cb   :  { %4055 = vrot.lane.b32.xlu1 %v4050_v39, %s11227_s1  ;;  %3551 = vrot.lane.b32.xlu0 %v3548_v2, %s11215_s25  ;;  %v3612_v39 = vrot.slane %v3608_v9, 1  ;;  %v3152_v2 = vmul.f32 %v3150_v27, %v8795_v33  ;;  %v3672_v27 = vmul.f32 %v3670_v56, %v8795_v33 }
 0x5cd   :  { %v9309_v35 = vpop.permute.xlu1 %4053  ;;  %v9311_v41 = vpop.permute.xlu0 %3533  ;;  %v3156_v63 = vrot.slane %v3152_v2, 1 }
 0x5ce   :  { %11255 = vst [vmem:[#allocation79_spill] sm:$0xff] %v9309_v35  ;;  %11256 = vst [vmem:[#allocation80_spill] sm:$0xff] %v9311_v41 }
 0x5cf   :  { %3079 = vrot.lane.b32.xlu1 %v3076_v47, %s11204_s12  ;;  %3599 = vrot.lane.b32.xlu0 %v3596_v42, %s11218_s20  ;;  %v3660_v47 = vrot.slane %v3656_v52, 1  ;;  %v3248_v42 = vmul.f32 %v3246_v0, %v8795_v33  ;;  %v3720_v0 = vmul.f32 %v3718_v51, %v8795_v33 }
 0x5d1   :  { %v9321_v49 = vpop.permute.xlu1 %3077  ;;  %v9323_v18 = vpop.permute.xlu0 %3597  ;;  %v3252_v9 = vrot.slane %v3248_v42, 2 }
 0x5d2   :  { %11257 = vst [vmem:[#allocation81_spill] sm:$0xff] %v9323_v18 }
 0x5d3   :  { %3095 = vrot.lane.b32.xlu1 %v3092_v44, %s11204_s12  ;;  %3615 = vrot.lane.b32.xlu0 %v3612_v39, %s11218_s20  ;;  %v3676_v44 = vrot.slane %v3672_v27, 1  ;;  %v3264_v39 = vmul.f32 %v3262_v8, %v8795_v33  ;;  %v3736_v8 = vmul.f32 %v3734_v40, %v8795_v33 }
 0x5d5   :  { %v9333_v61 = vpop.permute.xlu1 %3093  ;;  %v9335_v30 = vpop.permute.xlu0 %3661  ;;  %v3268_v52 = vrot.slane %v3264_v39, 2 }
 0x5d6   :  { %11260 = vst [vmem:[#allocation84_spill] sm:$0xff] %v9335_v30 }
 0x5d7   :  { %3159 = vrot.lane.b32.xlu1 %v3156_v63, %s11206_s28  ;;  %3663 = vrot.lane.b32.xlu0 %v3660_v47, %s11200_s13  ;;  %v3724_v63 = vrot.slane %v3720_v0, 2  ;;  %v3328_v47 = vmul.f32 %v3326_v10, %v8795_v33  ;;  %v3784_v10 = vmul.f32 %v3782_v17, %v8795_v33 }
 0x5d9   :  { %v9345_v53 = vpop.permute.xlu1 %3157  ;;  %v9347_v4 = vpop.permute.xlu0 %3725  ;;  %v3332_v27 = vrot.slane %v3328_v47, 2 }
 0x5da   :  { %11261 = vst [vmem:[#allocation85_spill] sm:$0xff] %v9347_v4 }
 0x5db   :  { %3255 = vrot.lane.b32.xlu1 %v3252_v9, %s11204_s12  ;;  %3679 = vrot.lane.b32.xlu0 %v3676_v44, %s11200_s13  ;;  %v3740_v9 = vrot.slane %v3736_v8, 2  ;;  %v3560_v44 = vmul.f32 %v3558_v38, %v8795_v33  ;;  %v3800_v38 = vmul.f32 %v3798_v12, %v8795_v33  ;;  %v3848_v12 = vmul.f32 %v3846_v62, %v8795_v33 }
 0x5dc   :  { %v3864_v62 = vmul.f32 %v3862_v11, %v8795_v33 }
 0x5dd   :  { %v9357_v56 = vpop.permute.xlu1 %3253  ;;  %v9359_v2 = vpop.permute.xlu0 %3789  ;;  %v3564_v0 = vrot.slane %v3560_v44, 1 }
 0x5de   :  { %11263 = vst [vmem:[#allocation78_spill] sm:$0xff] %v9357_v56  ;;  %11264 = vst [vmem:[#allocation82_spill] sm:$0xff] %v9359_v2 }
 0x5df   :  { %3271 = vrot.lane.b32.xlu1 %v3268_v52, %s11204_s12  ;;  %3727 = vrot.lane.b32.xlu0 %v3724_v63, %s11215_s25  ;;  %v3788_v52 = vrot.slane %v3784_v10, 2  ;;  %v3624_v63 = vmul.f32 %v3622_v13, %v8795_v33  ;;  %v3688_v13 = vmul.f32 %v3686_v19, %v8795_v33  ;;  %v3752_v19 = vmul.f32 %v3750_v7, %v8795_v33 }
 0x5e0   :  { %v3816_v7 = vmul.f32 %v3814_v20, %v8795_v33 }
 0x5e1   :  { %v9369_v51 = vpop.permute.xlu1 %3269  ;;  %v9371_v42 = vpop.permute.xlu0 %3853  ;;  %v3628_v8 = vrot.slane %v3624_v63, 1  ;;  %v3692_v10 = vrot.slane %v3688_v13, 1  ;;  %v4094_v13 = vstv %s9407_s3  ;;  %s9652_s3 = sld [smem:[#allocation11 + $0x64]] }
 0x5e2   :  { %11265 = vst [vmem:[#allocation83_spill] sm:$0xff] %v9369_v51  ;;  %11266 = vst [vmem:[#allocation86_spill] sm:$0xff] %v9371_v42  ;;  %v4096_v20 = vmul.f32 %v4094_v13, %v8795_v33 }
 0x5e3   :  { %3335 = vrot.lane.b32.xlu1 %v3332_v27, %s11206_s28  ;;  %3743 = vrot.lane.b32.xlu0 %v3740_v9, %s11215_s25  ;;  %v3804_v27 = vrot.slane %v3800_v38, 2 }
 0x5e5   :  { %v9381_v40 = vpop.permute.xlu1 %3317  ;;  %v9383_v39 = vpop.permute.xlu0 %2899 }
 0x5e6   :  { %11268 = vst [vmem:[#allocation87_spill] sm:$0xff] %v9381_v40 }
 0x5e7   :  { %3567 = vrot.lane.b32.xlu1 %v3564_v0, %s11215_s25  ;;  %3791 = vrot.lane.b32.xlu0 %v3788_v52, %s11218_s20  ;;  %v3852_v0 = vrot.slane %v3848_v12, 2  ;;  %v4078_v52 = vstv %s9393_s8  ;;  %s6327_s8 = smov 107  }
 0x5e8   :  { %v4080_v11 = vmul.f32 %v4078_v52, %v8795_v33 }
 0x5e9   :  { %v9395_v17 = vpop.permute.xlu1 %3333  ;;  %v9397_v47 = vpop.permute.xlu0 %2955 }
 0x5ea   :  { %11269 = vst [vmem:[#allocation90_spill] sm:$0xff] %v9395_v17 }
 0x5eb   :  { %3631 = vrot.lane.b32.xlu1 %v3628_v8, %s11218_s20  ;;  %3807 = vrot.lane.b32.xlu0 %v3804_v27, %s11218_s20  ;;  %v3756_v8 = vrot.slane %v3752_v19, 2  ;;  %v3868_v27 = vrot.slane %v3864_v62, 2  ;;  %v4084_v19 = vrot.slane %v4080_v11, 1  ;;  %v3880_v62 = vmul.f32 %v3878_v32, %v8795_v33 }
 0x5ec   :  { %v4079_v32 = vmul.f32 %v4078_v52, %v8751_v23 }
 0x5ed   :  { %v9409_v9 = vpop.permute.xlu1 %3549  ;;  %v9411_v44 = vpop.permute.xlu0 %2969  ;;  %v3884_v35 = vrot.slane %v3880_v62, 2 }
 0x5ee   :  { %11271 = vst [vmem:[#allocation91_spill] sm:$0xff] %v9409_v9  ;;  %v4083_v62 = vrot.slane %v4079_v32, 1 }
 0x5ef   :  { %3695 = vrot.lane.b32.xlu1 %v3692_v10, %s11200_s13  ;;  %3855 = vrot.lane.b32.xlu0 %v3852_v0, %s11200_s13  ;;  %v3820_v0 = vrot.slane %v3816_v7, 2  ;;  %v4100_v7 = vrot.slane %v4096_v20, 1  ;;  %v4095_v20 = vmul.f32 %v4094_v13, %v8751_v23 }
 0x5f1   :  { %v9424_v63 = vpop.permute.xlu1 %3565  ;;  %v9426_v38 = vpop.permute.xlu0 %3363  ;;  %v4099_v16 = vrot.slane %v4095_v20, 1 }
 0x5f2   :  { %11273 = vst [vmem:[#allocation88_spill] sm:$0xff] %v9424_v63 }
 0x5f3   :  { %3759 = vrot.lane.b32.xlu1 %v3756_v8, %s11215_s25  ;;  %3871 = vrot.lane.b32.xlu0 %v3868_v27, %s11200_s13  ;;  %v4110_v8 = vstv %s9422_s4  ;;  %s6328_s4 = smov 106  }
 0x5f4   :  { %v4112_v11 = vmul.f32 %v4110_v8, %v8795_v33  ;;  %v4111_v32 = vmul.f32 %v4110_v8, %v8751_v23 }
 0x5f5   :  { %v9437_v12 = vpop.permute.xlu1 %3613  ;;  %v9439_v10 = vpop.permute.xlu0 %3377 }
 0x5f6   :  { %11274 = vst [vmem:[#allocation95_spill] sm:$0xff] %v9437_v12  ;;  %v4116_v3 = vrot.slane %v4112_v11, 1  ;;  %v4115_v29 = vrot.slane %v4111_v32, 1 }
 0x5f7   :  { %3823 = vrot.lane.b32.xlu1 %v3820_v0, %s11218_s20  ;;  %4087 = vrot.lane.b32.xlu0 %v4084_v19, %s11203_s11  ;;  %v4142_v0 = vstv %s9435_s22  ;;  %s9673_s22 = sld [smem:[#allocation11 + $0x41]] }
 0x5f8   :  { %v4144_v21 = vmul.f32 %v4142_v0, %v8795_v33  ;;  %v4143_v8 = vmul.f32 %v4142_v0, %v8751_v23 }
 0x5f9   :  { %v9450_v27 = vpop.permute.xlu1 %3629  ;;  %v9452_v60 = vpop.permute.xlu0 %3419 }
 0x5fa   :  { %11275 = vst [vmem:[#allocation89_spill] sm:$0xff] %v9450_v27  ;;  %v4148_v11 = vrot.slane %v4144_v21, 1  ;;  %v4147_v32 = vrot.slane %v4143_v8, 1 }
 0x5fb   :  { %3887 = vrot.lane.b32.xlu1 %v3884_v35, %s11200_s13  ;;  %4103 = vrot.lane.b32.xlu0 %v4100_v7, %s11203_s11  ;;  %v4158_v35 = vstv %s9448_s24  ;;  %s9676_s24 = sld [smem:[#allocation11 + $0x1]] }
 0x5fc   :  { %v4160_v13 = vmul.f32 %v4158_v35, %v8795_v33 }
 0x5fd   :  { %v9461_v19 = vpop.permute.xlu1 %3677  ;;  %v9463_v25 = vpop.permute.xlu0 %3433 }
 0x5fe   :  { %11276 = vst [vmem:[#allocation92_spill] sm:$0xff] %v9461_v19  ;;  %v4164_v20 = vrot.slane %v4160_v13, 1  ;;  %v4159_v13 = vmul.f32 %v4158_v35, %v8751_v23 }
 0x5ff   :  { %4119 = vrot.lane.b32.xlu1 %v4116_v3, %s11203_s11  ;;  %4085 = vrot.lane.b32.xlu0 %v4083_v62, %s11203_s11  ;;  %v4174_v3 = vstv %s9459_s23  ;;  %s9687_s23 = sld [smem:[#allocation11 + $0x65]] }
 0x600   :  { %v4176_v21 = vmul.f32 %v4174_v3, %v8795_v33  ;;  %v4175_v8 = vmul.f32 %v4174_v3, %v8751_v23 }
 0x601   :  { %v9472_v52 = vpop.permute.xlu1 %3693  ;;  %v9474_v7 = vpop.permute.xlu0 %3475 }
 0x602   :  { %11277 = vst [vmem:[#allocation93_spill] sm:$0xff] %v9472_v52  ;;  %11278 = vst [vmem:[#allocation94_spill] sm:$0xff] %v9474_v7  ;;  %v4180_v59 = vrot.slane %v4176_v21, 1 }
 0x603   :  { %4101 = vrot.lane.b32.xlu1 %v4099_v16, %s11203_s11  ;;  %4151 = vrot.lane.b32.xlu0 %v4148_v11, %s11210_s21  ;;  %v4206_v16 = vstv %s9470_s26  ;;  %s9699_s26 = sld [smem:[#allocation11 + $0x42]] }
 0x604   :  { %v4208_v52 = vmul.f32 %v4206_v16, %v8795_v33  ;;  %v4207_v3 = vmul.f32 %v4206_v16, %v8751_v23  ;;  %v4286_v16 = vstv %s9514_s27  ;;  %s9723_s27 = sld [smem:[#allocation11 + $0x66]] }
 0x605   :  { %v9483_v62 = vpop.permute.xlu1 %3741  ;;  %v9485_v37 = vpop.permute.xlu0 %3489 }
 0x606   :  { %11279 = vst [vmem:[#allocation96_spill] sm:$0xff] %v9483_v62  ;;  %v4212_v21 = vrot.slane %v4208_v52, 1 }
 0x607   :  { %4117 = vrot.lane.b32.xlu1 %v4115_v29, %s11203_s11  ;;  %4167 = vrot.lane.b32.xlu0 %v4164_v20, %s11210_s21  ;;  %v4222_v29 = vstv %s9481_s0  ;;  %s6329_s0 = smov 105  }
 0x608   :  { %v4224_v35 = vmul.f32 %v4222_v29, %v8795_v33 }
 0x609   :  { %v9494_v11 = vpop.permute.xlu1 %3757  ;;  %v9496_v5 = vpop.permute.xlu0 %3915 }
 0x60a   :  { %11280 = vst [vmem:[#allocation97_spill] sm:$0xff] %v9494_v11  ;;  %11281 = vst [vmem:[#allocation98_spill] sm:$0xff] %v9496_v5  ;;  %v4163_v11 = vrot.slane %v4159_v13, 1  ;;  %v4228_v13 = vrot.slane %v4224_v35, 1  ;;  %v4223_v35 = vmul.f32 %v4222_v29, %v8751_v23  ;;  %v4288_v29 = vmul.f32 %v4286_v16, %v8795_v33 }
 0x60b   :  { %4183 = vrot.lane.b32.xlu1 %v4180_v59, %s11210_s21  ;;  %4149 = vrot.lane.b32.xlu0 %v4147_v32, %s11210_s21  ;;  %v4238_v59 = vstv %s9492_s29  ;;  %s9710_s29 = sld [smem:[#allocation11 + $0x89]] }
 0x60c   :  { %v4240_v52 = vmul.f32 %v4238_v59, %v8795_v33 }
 0x60d   :  { %v9505_v0 = vpop.permute.xlu1 %3805  ;;  %v9507_v20 = vpop.permute.xlu0 %3929 }
 0x60e   :  { %11282 = vst [vmem:[#allocation99_spill] sm:$0xff] %v9505_v0  ;;  %11283 = vst [vmem:[#allocation100_spill] sm:$0xff] %v9507_v20  ;;  %v4179_v0 = vrot.slane %v4175_v8, 1  ;;  %v4211_v8 = vrot.slane %v4207_v3, 1  ;;  %v4239_v3 = vmul.f32 %v4238_v59, %v8751_v23 }
 0x60f   :  { %4165 = vrot.lane.b32.xlu1 %v4163_v11, %s11210_s21  ;;  %4215 = vrot.lane.b32.xlu0 %v4212_v21, %s11227_s1  ;;  %v4270_v11 = vstv %s9503_s14  ;;  %s9720_s14 = sld [smem:[#allocation11 + $0x2]] }
 0x610   :  { %v4271_v59 = vmul.f32 %v4270_v11, %v8751_v23 }
 0x611   :  { %v9516_v32 = vpop.permute.xlu1 %3821  ;;  %v9518_v62 = vpop.permute.xlu0 %3971 }
 0x612   :  { %11284 = vst [vmem:[#allocation101_spill] sm:$0xff] %v9516_v32  ;;  %11285 = vst [vmem:[#allocation102_spill] sm:$0xff] %v9518_v62  ;;  %v4244_v32 = vrot.slane %v4240_v52, 1  ;;  %v4272_v62 = vmul.f32 %v4270_v11, %v8795_v33  ;;  %v4350_v11 = vstv %s9547_s2  ;;  %s9767_s2 = sld [smem:[#allocation11 + $0x67]] }
 0x613   :  { %4181 = vrot.lane.b32.xlu1 %v4179_v0, %s11210_s21  ;;  %4231 = vrot.lane.b32.xlu0 %v4228_v13, %s11227_s1 }
 0x614   :  { %v4276_v52 = vrot.slane %v4272_v62, 2 }
 0x615   :  { %v9527_v21 = vpop.permute.xlu1 %3869  ;;  %v9529_v27 = vpop.permute.xlu0 %3985 }
 0x616   :  { %11286 = vst [vmem:[#allocation103_spill] sm:$0xff] %v9527_v21  ;;  %11287 = vst [vmem:[#allocation104_spill] sm:$0xff] %v9529_v27  ;;  %v4227_v21 = vrot.slane %v4223_v35, 1  ;;  %v4292_v35 = vrot.slane %v4288_v29, 2  ;;  %v4287_v29 = vmul.f32 %v4286_v16, %v8751_v23  ;;  %v4352_v16 = vmul.f32 %v4350_v11, %v8795_v33 }
 0x617   :  { %4247 = vrot.lane.b32.xlu1 %v4244_v32, %s11227_s1  ;;  %4213 = vrot.lane.b32.xlu0 %v4211_v8, %s11227_s1  ;;  %v4302_v32 = vstv %s9525_s30  ;;  %s9742_s30 = sld [smem:[#allocation11 + $0x8a]] }
 0x618   :  { %v4304_v62 = vmul.f32 %v4302_v32, %v8795_v33  ;;  %v4291_v19 = vrot.slane %v4287_v29, 2  ;;  %v4356_v29 = vrot.slane %v4352_v16, 2  ;;  %v4351_v16 = vmul.f32 %v4350_v11, %v8751_v23 }
 0x619   :  { %v9538_v0 = vpop.permute.xlu1 %3885  ;;  %v9540_v13 = vpop.permute.xlu0 %4027  ;;  %v4430_v11 = vstv %s9591_s18  ;;  %s9802_s18 = sld [smem:[#allocation11 + $0x68]] }
 0x61a   :  { %11288 = vst [vmem:[#allocation105_spill] sm:$0xff] %v9538_v0  ;;  %11289 = vst [vmem:[#allocation108_spill] sm:$0xff] %v9540_v13  ;;  %v4243_v0 = vrot.slane %v4239_v3, 1  ;;  %v4308_v42 = vrot.slane %v4304_v62, 2  ;;  %v4275_v3 = vrot.slane %v4271_v59, 2  ;;  %v4303_v59 = vmul.f32 %v4302_v32, %v8751_v23 }
 0x61b   :  { %4229 = vrot.lane.b32.xlu1 %v4227_v21, %s11227_s1  ;;  %4279 = vrot.lane.b32.xlu0 %v4276_v52, %s11203_s11  ;;  %v4334_v21 = vstv %s9536_s10  ;;  %v4355_v4 = vrot.slane %v4351_v16, 2  ;;  %s9746_s10 = sld [smem:[#allocation11 + $0x43]] }
 0x61c   :  { %v4307_v20 = vrot.slane %v4303_v59, 2  ;;  %v4335_v32 = vmul.f32 %v4334_v21, %v8751_v23 }
 0x61d   :  { %v9549_v8 = vpop.permute.xlu1 %2913  ;;  %v9551_v27 = vpop.permute.xlu0 %4041 }
 0x61e   :  { %11290 = vst [vmem:[#allocation109_spill] sm:$0xff] %v9551_v27  ;;  %v4336_v27 = vmul.f32 %v4334_v21, %v8795_v33  ;;  %v4339_v59 = vrot.slane %v4335_v32, 2 }
 0x61f   :  { %4245 = vrot.lane.b32.xlu1 %v4243_v0, %s11227_s1  ;;  %4295 = vrot.lane.b32.xlu0 %v4292_v35, %s11203_s11 }
 0x620   :  { %v4340_v62 = vrot.slane %v4336_v27, 2 }
 0x621   :  { %v9560_v52 = vpop.permute.xlu1 %2927  ;;  %v9562_v13 = vpop.permute.xlu0 %3063 }
 0x623   :  { %4311 = vrot.lane.b32.xlu1 %v4308_v42, %s11203_s11  ;;  %4277 = vrot.lane.b32.xlu0 %v4275_v3, %s11203_s11  ;;  %v4366_v42 = vstv %s9558_s9  ;;  %s9778_s9 = sld [smem:[#allocation11 + $0x8b]] }
 0x624   :  { %v4368_v27 = vmul.f32 %v4366_v42, %v8795_v33  ;;  %v4367_v9 = vmul.f32 %v4366_v42, %v8751_v23 }
 0x625   :  { %v9571_v0 = vpop.permute.xlu1 %2983  ;;  %v9573_v35 = vpop.permute.xlu0 %3127 }
 0x626   :  { %v4372_v2 = vrot.slane %v4368_v27, 2 }
 0x627   :  { %4293 = vrot.lane.b32.xlu1 %v4291_v19, %s11203_s11  ;;  %4343 = vrot.lane.b32.xlu0 %v4340_v62, %s11210_s21  ;;  %v4398_v19 = vstv %s9569_s15  ;;  %s9787_s15 = sld [smem:[#allocation11 + $0x44]] }
 0x628   :  { %v4400_v12 = vmul.f32 %v4398_v19, %v8795_v33  ;;  %v4399_v42 = vmul.f32 %v4398_v19, %v8751_v23  ;;  %v4460_v19 = vstv %s9611_s6  ;;  %s9822_s6 = sld [smem:[#allocation11 + $0x8c]] }
 0x629   :  { %v9582_v3 = vpop.permute.xlu1 %3391  ;;  %v9584_v63 = vpop.permute.xlu0 %3143  ;;  %v4461_v46 = vmul.f32 %v4460_v19, %v8751_v23 }
 0x62a   :  { %v4404_v36 = vrot.slane %v4400_v12, 2  ;;  %v4432_v12 = vmul.f32 %v4430_v11, %v8795_v33 }
 0x62b   :  { %4309 = vrot.lane.b32.xlu1 %v4307_v20, %s11203_s11  ;;  %4359 = vrot.lane.b32.xlu0 %v4356_v29, %s11210_s21  ;;  %v4414_v20 = vstv %s9580_s17  ;;  %s9790_s17 = sld [smem:[#allocation11 + $0x4]] }
 0x62c   :  { %v4416_v27 = vmul.f32 %v4414_v20, %v8795_v33  ;;  %v4436_v16 = vrot.slane %v4432_v12, 2  ;;  %v4431_v12 = vmul.f32 %v4430_v11, %v8751_v23  ;;  %v4488_v11 = vstv %s9631_s5  ;;  %s9835_s5 = sld [smem:[#allocation11 + $0x5]] }
 0x62d   :  { %v9593_v62 = vpop.permute.xlu1 %3447  ;;  %v9595_v5 = vpop.permute.xlu0 %3239 }
 0x62e   :  { %11291 = vst [vmem:[#allocation110_spill] sm:$0xff] %v9593_v62  ;;  %v4420_v30 = vrot.slane %v4416_v27, 2 }
 0x62f   :  { %4375 = vrot.lane.b32.xlu1 %v4372_v2, %s11210_s21  ;;  %4341 = vrot.lane.b32.xlu0 %v4339_v59, %s11210_s21  ;;  %v4371_v59 = vrot.slane %v4367_v9, 2  ;;  %v4415_v9 = vmul.f32 %v4414_v20, %v8751_v23  ;;  %v4474_v20 = vstv %s9621_s7  ;;  %s9825_s7 = sld [smem:[#allocation11 + $0x45]] }
 0x630   :  { %v4475_v26 = vmul.f32 %v4474_v20, %v8751_v23 }
 0x631   :  { %v9602_v21 = vpop.permute.xlu1 %3503  ;;  %v9604_v29 = vpop.permute.xlu0 %3303 }
 0x632   :  { %11292 = vst [vmem:[#allocation106_spill] sm:$0xff] %v9602_v21 }
 0x633   :  { %4357 = vrot.lane.b32.xlu1 %v4355_v4, %s11210_s21  ;;  %4407 = vrot.lane.b32.xlu0 %v4404_v36, %s11227_s1 }
 0x635   :  { %v9613_v2 = vpop.permute.xlu1 %3943  ;;  %v9615_v32 = vpop.permute.xlu0 %3319 }
 0x636   :  { %11293 = vst [vmem:[#allocation29_spill] sm:$0xff] %v9613_v2  ;;  %v4403_v2 = vrot.slane %v4399_v42, 2 }
 0x637   :  { %4373 = vrot.lane.b32.xlu1 %v4371_v59, %s11210_s21  ;;  %4423 = vrot.lane.b32.xlu0 %v4420_v30, %s11227_s1  ;;  %v4419_v59 = vrot.slane %v4415_v9, 2  ;;  %v4476_v9 = vmul.f32 %v4474_v20, %v8795_v33  ;;  %v4489_v20 = vmul.f32 %v4488_v11, %v8751_v23 }
 0x639   :  { %v9623_v36 = vpop.permute.xlu1 %3999  ;;  %v9625_v4 = vpop.permute.xlu0 %3535 }
 0x63a   :  { %11294 = vst [vmem:[#allocation107_spill] sm:$0xff] %v9623_v36  ;;  %11295 = vst [vmem:[#allocation30_spill] sm:$0xff] %v9625_v4  ;;  %v4462_v36 = vmul.f32 %v4460_v19, %v8795_v33 }
 0x63b   :  { %4439 = vrot.lane.b32.xlu1 %v4436_v16, %s11227_s1  ;;  %4405 = vrot.lane.b32.xlu0 %v4403_v2, %s11227_s1  ;;  %v4435_v16 = vrot.slane %v4431_v12, 2  ;;  %v4516_v12 = vstv %s9642_s16  ;;  %s9847_s16 = sld [smem:[#allocation11 + $0x69]] }
 0x63c   :  { %v4518_v18 = vmul.f32 %v4516_v12, %v8795_v33 }
 0x63d   :  { %v9633_v27 = vpop.permute.xlu1 %4055  ;;  %v9635_v30 = vpop.permute.xlu0 %3551 }
 0x63e   :  { %11296 = vst [vmem:[#allocation114_spill] sm:$0xff] %v9633_v27  ;;  %v4490_v27 = vmul.f32 %v4488_v11, %v8795_v33  ;;  %v4572_v11 = vstv %s9673_s22  ;;  %s9889_s22 = sld [smem:[#allocation11 + $0x6a]] }
 0x63f   :  { %4421 = vrot.lane.b32.xlu1 %v4419_v59, %s11227_s1  ;;  %4467 = vrot.lane.b32.xlu0 %v4462_v36, %s6327_s8 }
 0x641   :  { %v9644_v2 = vpop.permute.xlu1 %3079  ;;  %v9646_v42 = vpop.permute.xlu0 %3599 }
 0x642   :  { %11297 = vst [vmem:[#allocation36_spill] sm:$0xff] %v9646_v42  ;;  %v4517_v42 = vmul.f32 %v4516_v12, %v8751_v23 }
 0x643   :  { %4437 = vrot.lane.b32.xlu1 %v4435_v16, %s11227_s1  ;;  %4481 = vrot.lane.b32.xlu0 %v4476_v9, %s6327_s8 }
 0x645   :  { %v9654_v59 = vpop.permute.xlu1 %3095  ;;  %v9656_v36 = vpop.permute.xlu0 %3615 }
 0x646   :  { %11298 = vst [vmem:[#allocation111_spill] sm:$0xff] %v9656_v36 }
 0x647   :  { %4495 = vrot.lane.b32.xlu1 %v4490_v27, %s6327_s8  ;;  %4465 = vrot.lane.b32.xlu0 %v4461_v46, %s6327_s8  ;;  %v4530_v46 = vstv %s9652_s3  ;;  %s9866_s3 = sld [smem:[#allocation11 + $0x8d]] }
 0x648   :  { %v4531_v4 = vmul.f32 %v4530_v46, %v8751_v23 }
 0x649   :  { %v9665_v16 = vpop.permute.xlu1 %3159  ;;  %v9667_v9 = vpop.permute.xlu0 %3663 }
 0x64a   :  { %11299 = vst [vmem:[#allocation112_spill] sm:$0xff] %v9667_v9  ;;  %v4532_v9 = vmul.f32 %v4530_v46, %v8795_v33  ;;  %v4573_v46 = vmul.f32 %v4572_v11, %v8751_v23 }
 0x64b   :  { %4479 = vrot.lane.b32.xlu1 %v4475_v26, %s6327_s8  ;;  %4523 = vrot.lane.b32.xlu0 %v4518_v18, %s6328_s4  ;;  %v4544_v26 = vstv %s9663_s19  ;;  %s9869_s19 = sld [smem:[#allocation11 + $0x46]] }
 0x64c   :  { %v4546_v24 = vmul.f32 %v4544_v26, %v8795_v33 }
 0x64d   :  { %v9678_v19 = vpop.permute.xlu1 %3255  ;;  %v9680_v27 = vpop.permute.xlu0 %3679 }
 0x64e   :  { %11300 = vst [vmem:[#allocation115_spill] sm:$0xff] %v9680_v27  ;;  %v4574_v27 = vmul.f32 %v4572_v11, %v8795_v33  ;;  %v4646_v11 = vstv %s9723_s27  ;;  %s9954_s27 = sld [smem:[#allocation11 + $0x8]] }
 0x64f   :  { %4493 = vrot.lane.b32.xlu1 %v4489_v20, %s6327_s8  ;;  %4537 = vrot.lane.b32.xlu0 %v4532_v9, %s6328_s4  ;;  %v2878_v20 = vstv %s9676_s24  ;;  %s9899_s24 = sld [smem:[#allocation11 + $0x8e]] }
 0x651   :  { %v9689_v18 = vpop.permute.xlu1 %3271  ;;  %v9691_v43 = vpop.permute.xlu0 %3727 }
 0x652   :  { %11301 = vst [vmem:[#allocation119_spill] sm:$0xff] %v9691_v43  ;;  %v2880_v43 = vmul.f32 %v2878_v20, %v8795_v33 }
 0x653   :  { %4551 = vrot.lane.b32.xlu1 %v4546_v24, %s6328_s4  ;;  %4521 = vrot.lane.b32.xlu0 %v4517_v42, %s6328_s4  ;;  %v4586_v24 = vstv %s9687_s23  ;;  %s9909_s23 = sld [smem:[#allocation11 + $0x47]] }
 0x655   :  { %v9701_v9 = vpop.permute.xlu1 %3335  ;;  %v9703_v41 = vpop.permute.xlu0 %3743 }
 0x656   :  { %11302 = vst [vmem:[#allocation120_spill] sm:$0xff] %v9703_v41  ;;  %v4588_v41 = vmul.f32 %v4586_v24, %v8795_v33 }
 0x657   :  { %4579 = vrot.lane.b32.xlu0 %v4574_v27, %s6329_s0  ;;  %2885 = vrot.lane.b32.xlu1 %v2880_v43, %s11204_s12  ;;  %v4630_v27 = vstv %s9699_s26  ;;  %s9912_s26 = sld [smem:[#allocation11 + $0x7]] }
 0x658   :  { %v4632_v17 = vmul.f32 %v4630_v27, %v8795_v33 }
 0x659   :  { %v9712_v42 = vpop.permute.xlu1 %3567  ;;  %v9714_v12 = vpop.permute.xlu0 %3791 }
 0x65a   :  { %11303 = vst [vmem:[#allocation113_spill] sm:$0xff] %v9712_v42  ;;  %11304 = vst [vmem:[#allocation116_spill] sm:$0xff] %v9714_v12  ;;  %v4545_v12 = vmul.f32 %v4544_v26, %v8751_v23  ;;  %v4636_v28 = vrot.slane %v4632_v17, 1  ;;  %v2934_v26 = vstv %s9720_s14  ;;  %s9944_s14 = sld [smem:[#allocation11 + $0x8f]] }
 0x65b   :  { %4535 = vrot.lane.b32.xlu0 %v4531_v4, %s6328_s4  ;;  %4593 = vrot.lane.b32.xlu1 %v4588_v41, %s6329_s0  ;;  %v4600_v41 = vstv %s9710_s29  ;;  %v2936_v17 = vmul.f32 %v2934_v26, %v8795_v33  ;;  %s9923_s29 = sld [smem:[#allocation11 + $0x6b]] }
 0x65d   :  { %v9725_v43 = vpop.permute.xlu1 %3631  ;;  %v9727_v42 = vpop.permute.xlu0 %3807 }
 0x65e   :  { %11305 = vst [vmem:[#allocation37_spill] sm:$0xff] %v9725_v43  ;;  %11306 = vst [vmem:[#allocation117_spill] sm:$0xff] %v9727_v42  ;;  %v4602_v43 = vmul.f32 %v4600_v41, %v8795_v33  ;;  %v4587_v42 = vmul.f32 %v4586_v24, %v8751_v23 }
 0x65f   :  { %4549 = vrot.lane.b32.xlu0 %v4545_v12, %s6328_s4  ;;  %4577 = vrot.lane.b32.xlu1 %v4573_v46, %s6329_s0 }
 0x661   :  { %v9735_v4 = vpop.permute.xlu1 %3695  ;;  %v9737_v57 = vpop.permute.xlu0 %3855 }
 0x662   :  { %11307 = vst [vmem:[#allocation34_spill] sm:$0xff] %v9735_v4  ;;  %11308 = vst [vmem:[#allocation118_spill] sm:$0xff] %v9737_v57  ;;  %v2879_v57 = vmul.f32 %v2878_v20, %v8751_v23  ;;  %v4662_v20 = vstv %s9742_s30  ;;  %s9973_s30 = sld [smem:[#allocation11 + $0x48]] }
 0x663   :  { %4607 = vrot.lane.b32.xlu0 %v4602_v43, %s6329_s0  ;;  %4639 = vrot.lane.b32.xlu1 %v4636_v28, %s6327_s8  ;;  %v4648_v43 = vmul.f32 %v4646_v11, %v8795_v33  ;;  %v4664_v24 = vmul.f32 %v4662_v20, %v8795_v33 }
 0x665   :  { %v9748_v12 = vpop.permute.xlu1 %3759  ;;  %v9750_v46 = vpop.permute.xlu0 %3871  ;;  %v4652_v21 = vrot.slane %v4648_v43, 1  ;;  %v4668_v43 = vrot.slane %v4664_v24, 1 }
 0x666   :  { %11309 = vst [vmem:[#allocation121_spill] sm:$0xff] %v9748_v12  ;;  %11310 = vst [vmem:[#allocation123_spill] sm:$0xff] %v9750_v46  ;;  %v4631_v12 = vmul.f32 %v4630_v27, %v8751_v23  ;;  %v4694_v46 = vstv %s9746_s10  ;;  %s9982_s10 = sld [smem:[#allocation11 + $0x9]] }
 0x667   :  { %2883 = vrot.lane.b32.xlu0 %v2879_v57, %s11204_s12  ;;  %2941 = vrot.lane.b32.xlu1 %v2936_v17, %s11206_s28  ;;  %v4696_v27 = vmul.f32 %v4694_v46, %v8795_v33 }
 0x669   :  { %v9757_v28 = vpop.permute.xlu1 %3823  ;;  %v9759_v4 = vpop.permute.xlu0 %4087 }
 0x66a   :  { %11311 = vst [vmem:[#allocation178_spill] sm:$0xff] %v9757_v28  ;;  %11312 = vst [vmem:[#allocation35_spill] sm:$0xff] %v9759_v4  ;;  %v4601_v4 = vmul.f32 %v4600_v41, %v8751_v23  ;;  %v4635_v28 = vrot.slane %v4631_v12, 1  ;;  %v4647_v41 = vmul.f32 %v4646_v11, %v8751_v23 }
 0x66b   :  { %4591 = vrot.lane.b32.xlu0 %v4587_v42, %s6329_s0  ;;  %4655 = vrot.lane.b32.xlu1 %v4652_v21, %s6327_s8 }
 0x66c   :  { %v4651_v24 = vrot.slane %v4647_v41, 1  ;;  %v4695_v41 = vmul.f32 %v4694_v46, %v8751_v23  ;;  %v4774_v46 = vstv %s9802_s18  ;;  %s10010_s18 = sld [smem:[#allocation11 + $0xb]] }
 0x66d   :  { %v9769_v57 = vpop.permute.xlu1 %3887  ;;  %v9771_v17 = vpop.permute.xlu0 %4103 }
 0x66e   :  { %11313 = vst [vmem:[#allocation122_spill] sm:$0xff] %v9769_v57  ;;  %11314 = vst [vmem:[#allocation124_spill] sm:$0xff] %v9771_v17  ;;  %v4700_v17 = vrot.slane %v4696_v27, 1  ;;  %v4663_v27 = vmul.f32 %v4662_v20, %v8751_v23  ;;  %v4758_v20 = vstv %s9787_s15  ;;  %s9996_s15 = sld [smem:[#allocation11 + $0x24]] }
 0x66f   :  { %4605 = vrot.lane.b32.xlu0 %v4601_v4, %s6329_s0  ;;  %4637 = vrot.lane.b32.xlu1 %v4635_v28, %s6327_s8  ;;  %v4710_v4 = vstv %s9767_s2  ;;  %s9986_s2 = sld [smem:[#allocation11 + $0x4b]] }
 0x670   :  { %v4712_v11 = vmul.f32 %v4710_v4, %v8795_v33 }
 0x671   :  { %v9780_v21 = vpop.permute.xlu1 %4119  ;;  %v9782_v42 = vpop.permute.xlu0 %4085 }
 0x672   :  { %11315 = vst [vmem:[#allocation127_spill] sm:$0xff] %v9780_v21  ;;  %11316 = vst [vmem:[#allocation125_spill] sm:$0xff] %v9782_v42  ;;  %v2935_v21 = vmul.f32 %v2934_v26, %v8751_v23  ;;  %v4716_v42 = vrot.slane %v4712_v11, 1  ;;  %v4667_v26 = vrot.slane %v4663_v27, 1  ;;  %v4760_v11 = vmul.f32 %v4758_v20, %v8795_v33 }
 0x673   :  { %4671 = vrot.lane.b32.xlu0 %v4668_v43, %s6327_s8  ;;  %4703 = vrot.lane.b32.xlu1 %v4700_v17, %s6328_s4  ;;  %v4726_v17 = vstv %s9778_s9  ;;  %s9994_s9 = sld [smem:[#allocation11 + $0xa]] }
 0x675   :  { %v9792_v12 = vpop.permute.xlu1 %4101  ;;  %v9794_v28 = vpop.permute.xlu0 %4151 }
 0x676   :  { %11317 = vst [vmem:[#allocation126_spill] sm:$0xff] %v9792_v12  ;;  %11318 = vst [vmem:[#allocation128_spill] sm:$0xff] %v9794_v28  ;;  %v4728_v28 = vmul.f32 %v4726_v17, %v8795_v33 }
 0x677   :  { %2939 = vrot.lane.b32.xlu0 %v2935_v21, %s11206_s28  ;;  %4653 = vrot.lane.b32.xlu1 %v4651_v24, %s6327_s8  ;;  %v3038_v21 = vstv %s9790_s17  ;;  %s10001_s17 = sld [smem:[#allocation11 + $0x6c]] }
 0x678   :  { %v4732_v51 = vrot.slane %v4728_v28, 1  ;;  %v3040_v27 = vmul.f32 %v3038_v21, %v8795_v33 }
 0x679   :  { %v9804_v43 = vpop.permute.xlu1 %4117  ;;  %v9806_v12 = vpop.permute.xlu0 %4167 }
 0x67a   :  { %11319 = vst [vmem:[#allocation129_spill] sm:$0xff] %v9804_v43  ;;  %11320 = vst [vmem:[#allocation132_spill] sm:$0xff] %v9806_v12  ;;  %v4699_v43 = vrot.slane %v4695_v41, 1  ;;  %v4764_v41 = vrot.slane %v4760_v11, 1  ;;  %v3044_v28 = vrot.slane %v3040_v27, 1  ;;  %v4727_v11 = vmul.f32 %v4726_v17, %v8751_v23 }
 0x67b   :  { %4719 = vrot.lane.b32.xlu0 %v4716_v42, %s6328_s4  ;;  %4669 = vrot.lane.b32.xlu1 %v4667_v26, %s6327_s8  ;;  %v4759_v27 = vmul.f32 %v4758_v20, %v8751_v23  ;;  %v3102_v20 = vstv %s9835_s5  ;;  %s10021_s5 = sld [smem:[#allocation11 + $0xd]] }
 0x67d   :  { %v9814_v24 = vpop.permute.xlu1 %4183  ;;  %v9816_v57 = vpop.permute.xlu0 %4149 }
 0x67e   :  { %11321 = vst [vmem:[#allocation133_spill] sm:$0xff] %v9814_v24  ;;  %11322 = vst [vmem:[#allocation134_spill] sm:$0xff] %v9816_v57  ;;  %v4711_v24 = vmul.f32 %v4710_v4, %v8751_v23  ;;  %v4776_v57 = vmul.f32 %v4774_v46, %v8795_v33  ;;  %v4790_v4 = vstv %s9822_s6  ;;  %s10013_s6 = sld [smem:[#allocation11 + $0xc]] }
 0x67f   :  { %4701 = vrot.lane.b32.xlu0 %v4699_v43, %s6328_s4  ;;  %4735 = vrot.lane.b32.xlu1 %v4732_v51, %s6328_s4  ;;  %v4791_v36 = vmul.f32 %v4790_v4, %v8751_v23 }
 0x681   :  { %v9827_v42 = vpop.permute.xlu1 %4165  ;;  %v9829_v26 = vpop.permute.xlu0 %4215 }
 0x682   :  { %11323 = vst [vmem:[#allocation130_spill] sm:$0xff] %v9827_v42  ;;  %11324 = vst [vmem:[#allocation131_spill] sm:$0xff] %v9829_v26  ;;  %v4715_v42 = vrot.slane %v4711_v24, 1  ;;  %v4780_v26 = vrot.slane %v4776_v57, 1  ;;  %v4763_v57 = vrot.slane %v4759_v27, 1  ;;  %v4792_v24 = vmul.f32 %v4790_v4, %v8795_v33 }
 0x683   :  { %4767 = vrot.lane.b32.xlu0 %v4764_v41, %s6329_s0  ;;  %3047 = vrot.lane.b32.xlu1 %v3044_v28, %s11204_s12  ;;  %v4822_v41 = vstv %s9825_s7  ;;  %s10015_s7 = sld [smem:[#allocation11 + $0x27]] }
 0x684   :  { %v4824_v17 = vmul.f32 %v4822_v41, %v8795_v33  ;;  %v4796_v12 = vrot.slane %v4792_v24, 1 }
 0x685   :  { %v9837_v51 = vpop.permute.xlu1 %4181  ;;  %v9839_v43 = vpop.permute.xlu0 %4231 }
 0x686   :  { %11325 = vst [vmem:[#allocation39_spill] sm:$0xff] %v9837_v51  ;;  %11326 = vst [vmem:[#allocation183_spill] sm:$0xff] %v9839_v43  ;;  %v4731_v43 = vrot.slane %v4727_v11, 1  ;;  %v3104_v11 = vmul.f32 %v3102_v20, %v8795_v33 }
 0x687   :  { %4717 = vrot.lane.b32.xlu0 %v4715_v42, %s6328_s4  ;;  %4783 = vrot.lane.b32.xlu1 %v4780_v26, %s6329_s0 }
 0x689   :  { %v9849_v28 = vpop.permute.xlu1 %4247  ;;  %v9851_v51 = vpop.permute.xlu0 %4213 }
 0x68a   :  { %11327 = vst [vmem:[#allocation138_spill] sm:$0xff] %v9849_v28  ;;  %11328 = vst [vmem:[#allocation139_spill] sm:$0xff] %v9851_v51  ;;  %v4828_v28 = vrot.slane %v4824_v17, 2  ;;  %v3039_v51 = vmul.f32 %v3038_v21, %v8751_v23  ;;  %v3108_v17 = vrot.slane %v3104_v11, 1  ;;  %v4775_v21 = vmul.f32 %v4774_v46, %v8751_v23 }
 0x68b   :  { %4733 = vrot.lane.b32.xlu0 %v4731_v43, %s6328_s4  ;;  %4765 = vrot.lane.b32.xlu1 %v4763_v57, %s6329_s0  ;;  %v4838_v43 = vstv %s9847_s16  ;;  %v4854_v46 = vstv %s9866_s3  ;;  %s10023_s16 = sld [smem:[#allocation11 + $0x2a]] }
 0x68c   :  { %v3043_v24 = vrot.slane %v3039_v51, 1  ;;  %v4886_v51 = vstv %s9869_s19  ;;  %s10034_s3 = sld [smem:[#allocation11 + $0x4e]] }
 0x68d   :  { %v9858_v42 = vpop.permute.xlu1 %4229  ;;  %v9860_v26 = vpop.permute.xlu0 %4279  ;;  %v4888_v4 = vmul.f32 %v4886_v51, %v8795_v33  ;;  %s10042_s19 = sld [smem:[#allocation11 + $0x72]] }
 0x68e   :  { %11329 = vst [vmem:[#allocation135_spill] sm:$0xff] %v9858_v42  ;;  %11330 = vst [vmem:[#allocation136_spill] sm:$0xff] %v9860_v26  ;;  %v4840_v42 = vmul.f32 %v4838_v43, %v8795_v33  ;;  %v4779_v26 = vrot.slane %v4775_v21, 1 }
 0x68f   :  { %4799 = vrot.lane.b32.xlu0 %v4796_v12, %s6329_s0  ;;  %4831 = vrot.lane.b32.xlu1 %v4828_v28, %s6327_s8 }
 0x691   :  { %v9871_v27 = vpop.permute.xlu1 %4245  ;;  %v9873_v57 = vpop.permute.xlu0 %4295 }
 0x692   :  { %11331 = vst [vmem:[#allocation137_spill] sm:$0xff] %v9871_v27  ;;  %11332 = vst [vmem:[#allocation140_spill] sm:$0xff] %v9873_v57  ;;  %v4844_v27 = vrot.slane %v4840_v42, 2  ;;  %v4823_v57 = vmul.f32 %v4822_v41, %v8751_v23  ;;  %v4856_v42 = vmul.f32 %v4854_v46, %v8795_v33 }
 0x693   :  { %3045 = vrot.lane.b32.xlu0 %v3043_v24, %s11204_s12  ;;  %3111 = vrot.lane.b32.xlu1 %v3108_v17, %s11206_s28  ;;  %v4795_v17 = vrot.slane %v4791_v36, 1  ;;  %v3103_v36 = vmul.f32 %v3102_v20, %v8751_v23 }
 0x694   :  { %v4827_v21 = vrot.slane %v4823_v57, 2  ;;  %v4839_v57 = vmul.f32 %v4838_v43, %v8751_v23  ;;  %v4855_v43 = vmul.f32 %v4854_v46, %v8751_v23  ;;  %v4950_v46 = vstv %s9909_s23  ;;  %s10073_s23 = sld [smem:[#allocation11 + $0x10]] }
 0x695   :  { %v9879_v12 = vpop.permute.xlu1 %4311  ;;  %v9881_v28 = vpop.permute.xlu0 %4277 }
 0x696   :  { %11333 = vst [vmem:[#allocation142_spill] sm:$0xff] %v9879_v12  ;;  %11334 = vst [vmem:[#allocation146_spill] sm:$0xff] %v9881_v28 }
 0x697   :  { %4781 = vrot.lane.b32.xlu0 %v4779_v26, %s6329_s0  ;;  %4847 = vrot.lane.b32.xlu1 %v4844_v27, %s6327_s8  ;;  %v4860_v27 = vrot.slane %v4856_v42, 2  ;;  %v3107_v42 = vrot.slane %v3103_v36, 1  ;;  %v4859_v36 = vrot.slane %v4855_v43, 2 }
 0x699   :  { %v9891_v11 = vpop.permute.xlu1 %4293  ;;  %v9893_v24 = vpop.permute.xlu0 %4343 }
 0x69a   :  { %11335 = vst [vmem:[#allocation143_spill] sm:$0xff] %v9891_v11  ;;  %11336 = vst [vmem:[#allocation144_spill] sm:$0xff] %v9893_v24  ;;  %v4892_v11 = vrot.slane %v4888_v4, 2  ;;  %v4843_v4 = vrot.slane %v4839_v57, 2  ;;  %v4887_v57 = vmul.f32 %v4886_v51, %v8751_v23  ;;  %v4966_v51 = vstv %s9923_s29  ;;  %s10162_s29 = sld [smem:[#allocation11 + $0x12]] }
 0x69b   :  { %4797 = vrot.lane.b32.xlu0 %v4795_v17, %s6329_s0  ;;  %4829 = vrot.lane.b32.xlu1 %v4827_v21, %s6327_s8  ;;  %v4902_v17 = vstv %s9889_s22  ;;  %s10052_s22 = sld [smem:[#allocation11 + $0xe]] }
 0x69c   :  { %v4904_v20 = vmul.f32 %v4902_v17, %v8795_v33 }
 0x69d   :  { %v9901_v41 = vpop.permute.xlu1 %4309  ;;  %v9903_v26 = vpop.permute.xlu0 %4359 }
 0x69e   :  { %11337 = vst [vmem:[#allocation141_spill] sm:$0xff] %v9901_v41  ;;  %11338 = vst [vmem:[#allocation153_spill] sm:$0xff] %v9903_v26 }
 0x69f   :  { %4863 = vrot.lane.b32.xlu0 %v4860_v27, %s6327_s8  ;;  %4895 = vrot.lane.b32.xlu1 %v4892_v11, %s6328_s4  ;;  %v4918_v11 = vstv %s9899_s24  ;;  %s10067_s24 = sld [smem:[#allocation11 + $0xf]] }
 0x6a0   :  { %v4920_v12 = vmul.f32 %v4918_v11, %v8795_v33 }
 0x6a1   :  { %v9914_v21 = vpop.permute.xlu1 %4375  ;;  %v9916_v41 = vpop.permute.xlu0 %4341  ;;  %v3638_v62 = vstv %s10052_s22  ;;  %s10572_s22 = sld [smem:[#allocation13 + $0x3]] }
 0x6a2   :  { %11339 = vst [vmem:[#allocation145_spill] sm:$0xff] %v9914_v21  ;;  %11340 = vst [vmem:[#allocation147_spill] sm:$0xff] %v9916_v41  ;;  %v4908_v41 = vrot.slane %v4904_v20, 2  ;;  %v4924_v26 = vrot.slane %v4920_v12, 2  ;;  %v4952_v20 = vmul.f32 %v4950_v46, %v8795_v33  ;;  %v4903_v12 = vmul.f32 %v4902_v17, %v8751_v23 }
 0x6a3   :  { %3109 = vrot.lane.b32.xlu0 %v3107_v42, %s11206_s28  ;;  %4845 = vrot.lane.b32.xlu1 %v4843_v4, %s6327_s8  ;;  %v3214_v42 = vstv %s9912_s26  ;;  %v4982_v17 = vstv %s9944_s14  ;;  %s10106_s26 = sld [smem:[#allocation11 + $0x11]] }
 0x6a4   :  { %v3216_v43 = vmul.f32 %v3214_v42, %v8795_v33  ;;  %s10194_s14 = sld [smem:[#allocation11 + $0x14]] }
 0x6a5   :  { %v9925_v27 = vpop.permute.xlu1 %4357  ;;  %v9927_v21 = vpop.permute.xlu0 %4407 }
 0x6a6   :  { %11341 = vst [vmem:[#allocation148_spill] sm:$0xff] %v9925_v27  ;;  %11342 = vst [vmem:[#allocation152_spill] sm:$0xff] %v9927_v21  ;;  %v4891_v27 = vrot.slane %v4887_v57, 2  ;;  %v4968_v57 = vmul.f32 %v4966_v51, %v8795_v33 }
 0x6a7   :  { %4911 = vrot.lane.b32.xlu0 %v4908_v41, %s6328_s4  ;;  %4861 = vrot.lane.b32.xlu1 %v4859_v36, %s6327_s8 }
 0x6a9   :  { %v9935_v4 = vpop.permute.xlu1 %4373  ;;  %v9937_v28 = vpop.permute.xlu0 %4423 }
 0x6aa   :  { %11343 = vst [vmem:[#allocation149_spill] sm:$0xff] %v9935_v4  ;;  %11344 = vst [vmem:[#allocation150_spill] sm:$0xff] %v9937_v28  ;;  %v4956_v4 = vrot.slane %v4952_v20, 2  ;;  %v3220_v28 = vrot.slane %v3216_v43, 2  ;;  %v4919_v20 = vmul.f32 %v4918_v11, %v8751_v23  ;;  %v4951_v43 = vmul.f32 %v4950_v46, %v8751_v23 }
 0x6ab   :  { %4893 = vrot.lane.b32.xlu0 %v4891_v27, %s6328_s4  ;;  %4927 = vrot.lane.b32.xlu1 %v4924_v26, %s6328_s4  ;;  %v3278_v11 = vstv %s9954_s27  ;;  %s10209_s27 = sld [smem:[#allocation11 + $0x16]] }
 0x6ac   :  { %v4923_v21 = vrot.slane %v4919_v20, 2  ;;  %v3280_v20 = vmul.f32 %v3278_v11, %v8795_v33 }
 0x6ad   :  { %v9946_v41 = vpop.permute.xlu1 %4439  ;;  %v9948_v36 = vpop.permute.xlu0 %4405 }
 0x6ae   :  { %11345 = vst [vmem:[#allocation151_spill] sm:$0xff] %v9946_v41  ;;  %11346 = vst [vmem:[#allocation154_spill] sm:$0xff] %v9948_v36  ;;  %v4907_v41 = vrot.slane %v4903_v12, 2  ;;  %v4972_v36 = vrot.slane %v4968_v57, 2  ;;  %v3215_v12 = vmul.f32 %v3214_v42, %v8751_v23 }
 0x6af   :  { %4959 = vrot.lane.b32.xlu0 %v4956_v4, %s6329_s0  ;;  %3223 = vrot.lane.b32.xlu1 %v3220_v28, %s11204_s12 }
 0x6b0   :  { %v3219_v57 = vrot.slane %v3215_v12, 2  ;;  %v4983_v12 = vmul.f32 %v4982_v17, %v8751_v23 }
 0x6b1   :  { %v9956_v26 = vpop.permute.xlu1 %4421  ;;  %v9958_v27 = vpop.permute.xlu0 %4467 }
 0x6b2   :  { %11347 = vst [vmem:[#allocation156_spill] sm:$0xff] %v9956_v26  ;;  %11348 = vst [vmem:[#allocation157_spill] sm:$0xff] %v9958_v27  ;;  %v4955_v26 = vrot.slane %v4951_v43, 2  ;;  %v4984_v27 = vmul.f32 %v4982_v17, %v8795_v33  ;;  %v4967_v43 = vmul.f32 %v4966_v51, %v8751_v23  ;;  %v3279_v51 = vmul.f32 %v3278_v11, %v8751_v23 }
 0x6b3   :  { %4909 = vrot.lane.b32.xlu0 %v4907_v41, %s6328_s4  ;;  %4975 = vrot.lane.b32.xlu1 %v4972_v36, %s6329_s0  ;;  %v4987_v11 = vrot.slane %v4983_v12, 2 }
 0x6b4   :  { %v4988_v36 = vrot.slane %v4984_v27, 2  ;;  %v4971_v27 = vrot.slane %v4967_v43, 2  ;;  %v3283_v43 = vrot.slane %v3279_v51, 2 }
 0x6b5   :  { %v9965_v4 = vpop.permute.xlu1 %4437  ;;  %v9967_v28 = vpop.permute.xlu0 %4481 }
 0x6b6   :  { %11349 = vst [vmem:[#allocation158_spill] sm:$0xff] %v9965_v4  ;;  %11350 = vst [vmem:[#allocation155_spill] sm:$0xff] %v9967_v28 }
 0x6b7   :  { %4925 = vrot.lane.b32.xlu0 %v4923_v21, %s6328_s4  ;;  %4957 = vrot.lane.b32.xlu1 %v4955_v26, %s6329_s0  ;;  %v3284_v26 = vrot.slane %v3280_v20, 2 }
 0x6b9   :  { %v9976_v46 = vpop.permute.xlu1 %4495  ;;  %v9978_v41 = vpop.permute.xlu0 %4465 }
 0x6ba   :  { %11351 = vst [vmem:[#allocation162_spill] sm:$0xff] %v9976_v46  ;;  %11352 = vst [vmem:[#allocation170_spill] sm:$0xff] %v9978_v41  ;;  %v3510_v46 = vstv %s10013_s6  ;;  %v3002_v41 = vstv %s10015_s7  ;;  %s10333_s6 = sld [smem:[#allocation11 + $0x1d]] }
 0x6bb   :  { %4991 = vrot.lane.b32.xlu0 %v4988_v36, %s6329_s0  ;;  %3221 = vrot.lane.b32.xlu1 %v3219_v57, %s11204_s12  ;;  %v10730_v36 = vstv %s9973_s30  ;;  %s10356_s7 = sld [smem:[#allocation11 + $0x1e]] }
 0x6bc   :  { %v2872_v57 = vmul.f32 %v10730_v36, %v8795_v33  ;;  %v10731_v36 = vstv %s9986_s2 }
 0x6bd   :  { %v9988_v21 = vpop.permute.xlu1 %4479  ;;  %v9990_v42 = vpop.permute.xlu0 %4523  ;;  %v3016_v12 = vmul.f32 %v10731_v36, %v8795_v33 }
 0x6be   :  { %11353 = vst [vmem:[#allocation163_spill] sm:$0xff] %v9988_v21  ;;  %11354 = vst [vmem:[#allocation166_spill] sm:$0xff] %v9990_v42  ;;  %v10732_v42 = vstv %s10034_s3 }
 0x6bf   :  { %3287 = vrot.lane.b32.xlu0 %v3284_v26, %s11206_s28  ;;  %4973 = vrot.lane.b32.xlu1 %v4971_v27, %s6329_s0  ;;  %v3342_v26 = vstv %s9982_s10  ;;  %v2918_v27 = vadd.f32 %v9549_v8, %v2872_v57  ;;  %v3020_v36 = vrot.slane %v3016_v12, 1  ;;  %s10242_s10 = sld [smem:[#allocation11 + $0x3]] }
 0x6c0   :  { %v3344_v8 = vmul.f32 %v3342_v26, %v8795_v33  ;;  %v3343_v57 = vmul.f32 %v3342_v26, %v8751_v23 }
 0x6c1   :  { %v10006_v20 = vpop.permute.xlu1 %4493  ;;  %v10008_v17 = vpop.permute.xlu0 %4537 }
 0x6c2   :  { %11355 = vst [vmem:[#allocation46_spill] sm:$0xff] %v10006_v20  ;;  %11356 = vst [vmem:[#allocation51_spill] sm:$0xff] %v10008_v17  ;;  %v3178_v17 = vstv %s10023_s16  ;;  %s10382_s16 = sld [smem:[#allocation11 + $0x20]] }
 0x6c3   :  { %4989 = vrot.lane.b32.xlu0 %v4987_v11, %s6329_s0  ;;  %3285 = vrot.lane.b32.xlu1 %v3283_v43, %s11206_s28  ;;  %v3398_v11 = vstv %s9994_s9  ;;  %s10037_s28 = sld [smem:[#allocation11 + $0x6f]]  ;;  %v2974_v43 = vadd.f32 %v9411_v44, %v2918_v27  ;;  %v2866_v27 = vstv %s9996_s15 }
 0x6c4   :  { %v3400_v26 = vmul.f32 %v3398_v11, %v8795_v33  ;;  %s10266_s9 = sld [smem:[#allocation11 + $0x19]] }
 0x6c5   :  { %v10028_v51 = vpop.permute.xlu1 %4551  ;;  %v10030_v20 = vpop.permute.xlu0 %4521  ;;  %v3024_v44 = vadd.f32 %v3020_v36, %v2974_v43  ;;  %v3512_v43 = vmul.f32 %v3510_v46, %v8795_v33  ;;  %s10297_s15 = sld [smem:[#allocation11 + $0x1a]] }
 0x6c6   :  { %11357 = vst [vmem:[#allocation190_spill] sm:$0xff] %v10028_v51  ;;  %11358 = vst [vmem:[#allocation159_spill] sm:$0xff] %v10030_v20  ;;  %v3399_v51 = vmul.f32 %v3398_v11, %v8751_v23  ;;  %v3454_v20 = vstv %s10010_s18  ;;  %s10327_s18 = sld [smem:[#allocation11 + $0x1c]] }
 0x6c7   :  { %3349 = vrot.lane.b32.xlu0 %v3344_v8, %s11215_s25  ;;  %3347 = vrot.lane.b32.xlu1 %v3343_v57, %s11215_s25  ;;  %v3456_v12 = vmul.f32 %v3454_v20, %v8795_v33  ;;  %v3574_v8 = vstv %s10021_s5  ;;  %v3084_v57 = vadd.f32 %v9644_v2, %v3024_v44  ;;  %v3455_v36 = vmul.f32 %v3454_v20, %v8751_v23  ;;  %s10361_s5 = sld [smem:[#allocation11 + $0x1f]] }
 0x6c8   :  { %v2867_v2 = vmul.f32 %v2866_v27, %v8751_v23  ;;  %v3192_v20 = vmul.f32 %v10732_v42, %v8795_v33  ;;  %v3576_v28 = vmul.f32 %v3574_v8, %v8795_v33  ;;  %v3575_v44 = vmul.f32 %v3574_v8, %v8751_v23 }
 0x6c9   :  { %v10044_v4 = vpop.permute.xlu0 %4579  ;;  %v10046_v21 = vpop.permute.xlu1 %2885  ;;  %v3148_v24 = vadd.f32 %v9584_v63, %v3084_v57  ;;  %v3003_v8 = vmul.f32 %v3002_v41, %v8751_v23 }
 0x6ca   :  { %11359 = vst [vmem:[#allocation160_spill] sm:$0xff] %v10044_v4  ;;  %11360 = vst [vmem:[#allocation161_spill] sm:$0xff] %v10046_v21  ;;  %v2903_v56 = vadd.f32 %v9135_v31, %v2867_v2  ;;  %v3196_v63 = vrot.slane %v3192_v20, 2  ;;  %v3640_v31 = vmul.f32 %v3638_v62, %v8795_v33  ;;  %v3639_v2 = vmul.f32 %v3638_v62, %v8751_v23 }
 0x6cb   :  { %3405 = vrot.lane.b32.xlu0 %v3400_v26, %s11218_s20  ;;  %3403 = vrot.lane.b32.xlu1 %v3399_v51, %s11218_s20  ;;  %v3511_v26 = vmul.f32 %v3510_v46, %v8751_v23  ;;  %v10733_v51 = vstv %s10001_s17 }
 0x6cc   :  { %v2876_v46 = vmul.f32 %v10733_v51, %v8795_v33  ;;  %v11363_v51 = vstv %s10037_s28 }
 0x6cd   :  { %v10060_v11 = vpop.permute.xlu0 %4535  ;;  %v10062_v4 = vpop.permute.xlu1 %4593  ;;  %v3515_v7 = vrot.slane %v3511_v26, 1  ;;  %v3028_v50 = vmul.f32 %v11363_v51, %v8795_v33  ;;  %v3579_v51 = vrot.slane %v3575_v44, 1 }
 0x6ce   :  { %11361 = vst [vmem:[#allocation185_spill] sm:$0xff] %v10060_v11  ;;  %11362 = vst [vmem:[#allocation174_spill] sm:$0xff] %v10062_v4  ;;  %v2868_v11 = vmul.f32 %v2866_v27, %v8795_v33  ;;  %v3004_v4 = vmul.f32 %v3002_v41, %v8795_v33  ;;  %v2932_v40 = vadd.f32 %v9560_v52, %v2876_v46 }
 0x6cf   :  { %3461 = vrot.lane.b32.xlu0 %v3456_v12, %s11200_s13  ;;  %3459 = vrot.lane.b32.xlu1 %v3455_v36, %s11200_s13  ;;  %v3516_v12 = vrot.slane %v3512_v43, 1  ;;  %v3202_v36 = vstv %s10042_s19  ;;  %v2959_v41 = vadd.f32 %v9150_v34, %v2903_v56  ;;  %v3200_v43 = vadd.f32 %v3196_v63, %v3148_v24  ;;  %s10553_s19 = sld [smem:[#allocation13 + $0x2]] }
 0x6d0   :  { %v2904_v27 = vadd.f32 %v9383_v39, %v2868_v11  ;;  %v3008_v52 = vrot.slane %v3004_v4, 1  ;;  %v2988_v57 = vadd.f32 %v9571_v0, %v2932_v40  ;;  %v3580_v11 = vrot.slane %v3576_v28, 1 }
 0x6d1   :  { %v10091_v21 = vpop.permute.xlu0 %4549  ;;  %v10093_v42 = vpop.permute.xlu1 %4577  ;;  %v3032_v46 = vrot.slane %v3028_v50, 1  ;;  %v3702_v4 = vstv %s10067_s24  ;;  %v3007_v40 = vrot.slane %v3003_v8, 1  ;;  %v3179_v0 = vmul.f32 %v3178_v17, %v8751_v23 }
 0x6d2   :  { %v2960_v39 = vadd.f32 %v9397_v47, %v2904_v27  ;;  %v3766_v27 = vstv %s10073_s23  ;;  %v3260_v34 = vadd.f32 %v9678_v19, %v3200_v43  ;;  %v3180_v56 = vmul.f32 %v3178_v17, %v8795_v33 }
 0x6d3   :  { %3519 = vrot.lane.b32.xlu0 %v3516_v12, %s11215_s25  ;;  %3517 = vrot.lane.b32.xlu1 %v3515_v7, %s11215_s25  ;;  %v11364_v7 = vstv %s9973_s30  ;;  %v3036_v62 = vadd.f32 %v3032_v46, %v2988_v57  ;;  %v3644_v24 = vrot.slane %v3640_v31, 1  ;;  %v3704_v50 = vmul.f32 %v3702_v4, %v8795_v33  ;;  %s10236_s30 = sld [smem:[#allocation11]] }
 0x6d4   :  { %v2871_v20 = vmul.f32 %v11364_v7, %v8751_v23  ;;  %v3012_v28 = vadd.f32 %v3008_v52, %v2960_v39  ;;  %v3011_v44 = vadd.f32 %v3007_v40, %v2959_v41  ;;  %v3643_v19 = vrot.slane %v3639_v2, 1 }
 0x6d5   :  { %v10111_v26 = vpop.permute.xlu0 %4607  ;;  %v10113_v47 = vpop.permute.xlu1 %4639  ;;  %v3703_v63 = vmul.f32 %v3702_v4, %v8751_v23  ;;  %v3100_v57 = vadd.f32 %v9654_v59, %v3036_v62  ;;  %v3204_v31 = vmul.f32 %v3202_v36, %v8795_v33  ;;  %v3324_v43 = vadd.f32 %v9615_v32, %v3260_v34 }
 0x6d6   :  { %v3068_v12 = vadd.f32 %v9562_v13, %v3012_v28  ;;  %v2917_v52 = vadd.f32 %v9133_v55, %v2871_v20  ;;  %v3067_v41 = vadd.f32 %v9248_v45, %v3011_v44  ;;  %v3830_v55 = vstv %s10106_s26  ;;  %s11490_s26 = sld [smem:[#allocation226_spill]] }
 0x6d7   :  { %3583 = vrot.lane.b32.xlu0 %v3580_v11, %s11218_s20  ;;  %3581 = vrot.lane.b32.xlu1 %v3579_v51, %s11218_s20  ;;  %v11365_v11 = vstv %s9986_s2  ;;  %v3184_v2 = vrot.slane %v3180_v56, 2  ;;  %v3164_v59 = vadd.f32 %v9665_v16, %v3100_v57  ;;  %v3768_v7 = vmul.f32 %v3766_v27, %v8795_v33  ;;  %s10250_s2 = sld [smem:[#allocation11 + $0x18]] }
 0x6d8   :  { %v3015_v17 = vmul.f32 %v11365_v11, %v8751_v23  ;;  %v3132_v13 = vadd.f32 %v9573_v35, %v3068_v12  ;;  %v2973_v51 = vadd.f32 %v9163_v14, %v2917_v52  ;;  %v3131_v45 = vadd.f32 %v9260_v22, %v3067_v41 }
 0x6d9   :  { %v10128_v8 = vpop.permute.xlu0 %2883  ;;  %v10130_v39 = vpop.permute.xlu1 %2941  ;;  %v3708_v32 = vrot.slane %v3704_v50, 2  ;;  %v3707_v46 = vrot.slane %v3703_v63, 2  ;;  %v3767_v4 = vmul.f32 %v3766_v27, %v8751_v23  ;;  %v11366_v40 = vstv %s10001_s17  ;;  %s10311_s17 = sld [smem:[#allocation11 + $0x1b]] }
 0x6da   :  { %v2875_v28 = vmul.f32 %v11366_v40, %v8751_v23  ;;  %v3019_v34 = vrot.slane %v3015_v17, 1  ;;  %v11367_v14 = vstv %s10037_s28  ;;  %v3208_v16 = vrot.slane %v3204_v31, 2  ;;  %s10545_s28 = sld [smem:[#allocation13 + $0x1]] }
 0x6db   :  { %3647 = vrot.lane.b32.xlu0 %v3644_v24, %s11200_s13  ;;  %3645 = vrot.lane.b32.xlu1 %v3643_v19, %s11200_s13  ;;  %v3027_v56 = vmul.f32 %v11367_v14, %v8751_v23  ;;  %v3183_v62 = vrot.slane %v3179_v0, 2  ;;  %v3188_v22 = vadd.f32 %v3184_v2, %v3132_v13  ;;  %v3382_v24 = vadd.f32 %v9439_v10, %v3324_v43 }
 0x6dc   :  { %v3832_v27 = vmul.f32 %v3830_v55, %v8795_v33  ;;  %v2931_v50 = vadd.f32 %v9148_v48, %v2875_v28  ;;  %v3023_v44 = vadd.f32 %v3019_v34, %v2973_v51  ;;  %v3212_v12 = vadd.f32 %v3208_v16, %v3164_v59 }
 0x6dd   :  { %v10151_v20 = vpop.permute.xlu0 %4591  ;;  %v10153_v35 = vpop.permute.xlu1 %4655  ;;  %v3831_v19 = vmul.f32 %v3830_v55, %v8751_v23  ;;  %v3187_v63 = vadd.f32 %v3183_v62, %v3131_v45  ;;  %v3244_v52 = vadd.f32 %v9595_v5, %v3188_v22  ;;  %v3772_v10 = vrot.slane %v3768_v7, 2  ;;  %v11370_v62 = vld [vmem:[#allocation110_spill] sm:$0xff] }
 0x6de   :  { %v3771_v17 = vrot.slane %v3767_v4, 2  ;;  %v2987_v57 = vadd.f32 %v9161_v6, %v2931_v50  ;;  %v3083_v31 = vadd.f32 %v9321_v49, %v3023_v44  ;;  %v3276_v48 = vadd.f32 %v9689_v18, %v3212_v12  ;;  %v11372_v12 = vld [vmem:[#allocation87_spill] sm:$0xff] }
 0x6df   :  { %3711 = vrot.lane.b32.xlu0 %v3708_v32, %s11215_s25  ;;  %3709 = vrot.lane.b32.xlu1 %v3707_v46, %s11215_s25  ;;  %s10178_s25 = sld [smem:[#allocation11 + $0x13]]  ;;  %v3243_v41 = vadd.f32 %v9284_v1, %v3187_v63  ;;  %v3308_v13 = vadd.f32 %v9604_v29, %v3244_v52  ;;  %v3438_v5 = vadd.f32 %v9463_v25, %v3382_v24  ;;  %v3031_v43 = vrot.slane %v3027_v56, 1 }
 0x6e0   :  { %v11368_v6 = vstv %s10034_s3  ;;  %v3340_v49 = vadd.f32 %v9701_v9, %v3276_v48  ;;  %v3836_v29 = vrot.slane %v3832_v27, 2  ;;  %v3835_v2 = vrot.slane %v3831_v19, 2  ;;  %v11375_v48 = vld [vmem:[#allocation83_spill] sm:$0xff]  ;;  %s10524_s3 = sld [smem:[#allocation11 + $0x23]] }
 0x6e1   :  { %v10171_v0 = vpop.permute.xlu0 %4605  ;;  %v10173_v11 = vpop.permute.xlu1 %4637  ;;  %v3191_v55 = vmul.f32 %v11368_v6, %v8751_v23  ;;  %v3307_v18 = vadd.f32 %v9296_v54, %v3243_v41  ;;  %v3147_v25 = vadd.f32 %v9272_v15, %v3083_v31  ;;  %v3035_v59 = vadd.f32 %v3031_v43, %v2987_v57  ;;  %v11374_v57 = vld [vmem:[#allocation111_spill] sm:$0xff] }
 0x6e2   :  { %v3894_v7 = vstv %s10162_s29  ;;  %v3368_v45 = vadd.f32 %v9426_v38, %v3308_v13  ;;  %v3494_v54 = vadd.f32 %v9485_v37, %v3438_v5  ;;  %v3203_v46 = vmul.f32 %v3202_v36, %v8751_v23  ;;  %v11376_v13 = vld [vmem:[#allocation106_spill] sm:$0xff] }
 0x6e3   :  { %3775 = vrot.lane.b32.xlu0 %v3772_v10, %s11218_s20  ;;  %3773 = vrot.lane.b32.xlu1 %v3771_v17, %s11218_s20  ;;  %s10198_s20 = sld [smem:[#allocation11 + $0x15]]  ;;  %v3099_v9 = vadd.f32 %v9333_v61, %v3035_v59  ;;  %v3195_v32 = vrot.slane %v3191_v55, 2  ;;  %v3396_v15 = vadd.f32 %v9582_v3, %v3340_v49  ;;  %v3367_v4 = vadd.f32 %v9176_v58, %v3307_v18  ;;  %v11369_v58 = vld [vmem:[#allocation78_spill] sm:$0xff]  ;;  %v11377_v55 = vld [vmem:[#allocation64_spill] sm:$0xff] }
 0x6e4   :  { %v3896_v37 = vmul.f32 %v3894_v7, %v8795_v33  ;;  %v3895_v28 = vmul.f32 %v3894_v7, %v8751_v23  ;;  %v3424_v36 = vadd.f32 %v9452_v60, %v3368_v45  ;;  %v3556_v3 = vadd.f32 %v9635_v30, %v3494_v54  ;;  %v11373_v10 = vld [vmem:[#allocation94_spill] sm:$0xff]  ;;  %v11378_v7 = vld [vmem:[#allocation192_spill] sm:$0xff] }
 0x6e5   :  { %v10190_v51 = vpop.permute.xlu0 %4671  ;;  %v10192_v1 = vpop.permute.xlu1 %4703  ;;  %v3163_v61 = vadd.f32 %v9345_v53, %v3099_v9  ;;  %v3199_v34 = vadd.f32 %v3195_v32, %v3147_v25  ;;  %v3950_v14 = vstv %s10178_s25  ;;  %v3207_v16 = vrot.slane %v3203_v46, 2  ;;  %v11371_v53 = vld [vmem:[#allocation67_spill] sm:$0xff]  ;;  %v11379_v54 = vld [vmem:[#allocation90_spill] sm:$0xff] }
 0x6e6   :  { %v3452_v22 = vadd.f32 %v11370_v62, %v3396_v15  ;;  %v3423_v24 = vadd.f32 %v11371_v53, %v3367_v4  ;;  %v3952_v30 = vmul.f32 %v3950_v14, %v8795_v33  ;;  %v3951_v50 = vmul.f32 %v3950_v14, %v8751_v23  ;;  %v11380_v32 = vld [vmem:[#allocation30_spill] sm:$0xff]  ;;  %v11381_v15 = vld [vmem:[#allocation115_spill] sm:$0xff] }
 0x6e7   :  { %3839 = vrot.lane.b32.xlu0 %v3836_v29, %s11200_s13  ;;  %3837 = vrot.lane.b32.xlu1 %v3835_v2, %s11200_s13  ;;  %v3259_v56 = vadd.f32 %v11369_v58, %v3199_v34  ;;  %s10226_s13 = sld [smem:[#allocation11 + $0x17]]  ;;  %v3211_v44 = vadd.f32 %v3207_v16, %v3163_v61  ;;  %v4006_v63 = vstv %s10194_s14  ;;  %v3480_v17 = vadd.f32 %v11373_v10, %v3424_v36  ;;  %v11383_v36 = vld [vmem:[#allocation80_spill] sm:$0xff] }
 0x6e8   :  { %v3620_v31 = vadd.f32 %v11374_v57, %v3556_v3  ;;  %v3508_v5 = vadd.f32 %v11376_v13, %v3452_v22  ;;  %v4008_v43 = vmul.f32 %v4006_v63, %v8795_v33  ;;  %v4126_v6 = vstv %s10209_s27  ;;  %v11384_v58 = vld [vmem:[#allocation36_spill] sm:$0xff]  ;;  %s4997_s14 = sld [smem:[#allocation13]] }
 0x6e9   :  { %v10212_v38 = vpop.permute.xlu0 %2939  ;;  %v10214_v40 = vpop.permute.xlu1 %4653  ;;  %v3323_v19 = vadd.f32 %v11372_v12, %v3259_v56  ;;  %v4062_v52 = vstv %s10198_s20  ;;  %v3275_v41 = vadd.f32 %v11375_v48, %v3211_v44  ;;  %v3479_v49 = vadd.f32 %v11377_v55, %v3423_v24  ;;  %v11385_v24 = vld [vmem:[#allocation66_spill] sm:$0xff]  ;;  %v11391_v55 = vld [vmem:[#allocation119_spill] sm:$0xff] }
 0x6ea   :  { %v4007_v2 = vmul.f32 %v4006_v63, %v8751_v23  ;;  %v4064_v25 = vmul.f32 %v4062_v52, %v8795_v33  ;;  %v4063_v59 = vmul.f32 %v4062_v52, %v8751_v23  ;;  %v3540_v46 = vadd.f32 %v11380_v32, %v3480_v17  ;;  %v11388_v52 = vld [vmem:[#allocation120_spill] sm:$0xff] }
 0x6eb   :  { %3901 = vrot.lane.b32.xlu0 %v3896_v37, %s11203_s11  ;;  %3899 = vrot.lane.b32.xlu1 %v3895_v28, %s11203_s11  ;;  %v3381_v45 = vadd.f32 %v11378_v7, %v3323_v19  ;;  %v3339_v9 = vadd.f32 %v11379_v54, %v3275_v41  ;;  %v3684_v4 = vadd.f32 %v11381_v15, %v3620_v31  ;;  %v11382_v37 = vld [vmem:[#allocation113_spill] sm:$0xff]  ;;  %v2862_v12 = vstv %s10236_s30  ;;  %v11387_v19 = vld [vmem:[#allocation112_spill] sm:$0xff]  ;;  %s11494_s30 = sld [smem:[#allocation225_spill]] }
 0x6ec   :  { %v3572_v28 = vadd.f32 %v11382_v37, %v3508_v5  ;;  %v4128_v61 = vmul.f32 %v4126_v6, %v8795_v33  ;;  %v4127_v34 = vmul.f32 %v4126_v6, %v8751_v23  ;;  %v3539_v3 = vadd.f32 %v11383_v36, %v3479_v49  ;;  %v11389_v31 = vld [vmem:[#allocation37_spill] sm:$0xff]  ;;  %v11396_v36 = vld [vmem:[#allocation34_spill] sm:$0xff] }
 0x6ed   :  { %v10229_v27 = vpop.permute.xlu0 %4719  ;;  %v10231_v60 = vpop.permute.xlu1 %4669  ;;  %v4190_v14 = vstv %s10226_s13  ;;  %v3604_v56 = vadd.f32 %v11384_v58, %v3540_v46  ;;  %v4068_v22 = vrot.slane %v4064_v25, 1  ;;  %v4067_v53 = vrot.slane %v4063_v59, 1  ;;  %v11397_v58 = vld [vmem:[#allocation161_spill] sm:$0xff] }
 0x6ee   :  { %v3748_v10 = vadd.f32 %v11388_v52, %v3684_v4  ;;  %v2864_v17 = vmul.f32 %v2862_v12, %v8795_v33  ;;  %v2990_v57 = vstv %s10242_s10  ;;  %v3636_v48 = vadd.f32 %v11389_v31, %v3572_v28  ;;  %v11394_v4 = vld [vmem:[#allocation116_spill] sm:$0xff]  ;;  %v11395_v28 = vld [vmem:[#allocation117_spill] sm:$0xff]  ;;  %v11401_v31 = vld [vmem:[#allocation91_spill] sm:$0xff] }
 0x6ef   :  { %3957 = vrot.lane.b32.xlu0 %v3952_v30, %s11210_s21  ;;  %3955 = vrot.lane.b32.xlu1 %v3951_v50, %s11210_s21  ;;  %v3395_v30 = vadd.f32 %v11385_v24, %v3339_v9  ;;  %v11386_v50 = vld [vmem:[#allocation63_spill] sm:$0xff]  ;;  %v3668_v63 = vadd.f32 %v11387_v19, %v3604_v56  ;;  %v4192_v41 = vmul.f32 %v4190_v14, %v8795_v33  ;;  %v4254_v5 = vstv %s10250_s2  ;;  %v11393_v9 = vld [vmem:[#allocation65_spill] sm:$0xff]  ;;  %v11398_v24 = vld [vmem:[#allocation84_spill] sm:$0xff] }
 0x6f0   :  { %v3437_v44 = vadd.f32 %v11386_v50, %v3381_v45  ;;  %v4191_v13 = vmul.f32 %v4190_v14, %v8751_v23  ;;  %v4132_v59 = vrot.slane %v4128_v61, 1  ;;  %v4131_v7 = vrot.slane %v4127_v34, 1  ;;  %v11392_v45 = vld [vmem:[#allocation69_spill] sm:$0xff]  ;;  %v11399_v50 = vld [vmem:[#allocation118_spill] sm:$0xff] }
 0x6f1   :  { %v10253_v18 = vpop.permute.xlu0 %4701  ;;  %v10255_v29 = vpop.permute.xlu1 %4735  ;;  %v3732_v49 = vadd.f32 %v11391_v55, %v3668_v63  ;;  %v3451_v32 = vadd.f32 %v11393_v9, %v3395_v30  ;;  %v10302_v46 = vmul.f32 %v2862_v12, %v8751_v23  ;;  %v2992_v15 = vmul.f32 %v2990_v57, %v8795_v33  ;;  %v11400_v12 = vld [vmem:[#allocation123_spill] sm:$0xff]  ;;  %v11406_v9 = vld [vmem:[#allocation178_spill] sm:$0xff] }
 0x6f2   :  { %v3493_v54 = vadd.f32 %v11392_v45, %v3437_v44  ;;  %v3812_v14 = vadd.f32 %v11395_v28, %v3748_v10  ;;  %v4256_v61 = vmul.f32 %v4254_v5, %v8795_v33  ;;  %v4318_v34 = vstv %s10266_s9  ;;  %v11402_v55 = vld [vmem:[#allocation71_spill] sm:$0xff]  ;;  %s11495_s9 = sld [smem:[#allocation223_spill]] }
 0x6f3   :  { %4013 = vrot.lane.b32.xlu0 %v4008_v43, %s11227_s1  ;;  %4011 = vrot.lane.b32.xlu1 %v4007_v2, %s11227_s1  ;;  %v11390_v43 = vld [vmem:[#allocation81_spill] sm:$0xff]  ;;  %v3796_v37 = vadd.f32 %v11394_v4, %v3732_v49  ;;  %v2890_v56 = vadd.f32 %v11397_v58, %v2864_v17  ;;  %v4195_v10 = vrot.slane %v4191_v13, 1  ;;  %v4320_v13 = vmul.f32 %v4318_v34, %v8795_v33  ;;  %v11405_v45 = vld [vmem:[#allocation95_spill] sm:$0xff] }
 0x6f4   :  { %v3603_v6 = vadd.f32 %v11390_v43, %v3539_v3  ;;  %v3700_v3 = vadd.f32 %v11396_v36, %v3636_v48  ;;  %v3876_v19 = vadd.f32 %v11400_v12, %v3812_v14  ;;  %v3555_v43 = vadd.f32 %v11401_v31, %v3493_v54  ;;  %v11403_v49 = vld [vmem:[#allocation121_spill] sm:$0xff]  ;;  %v11409_v36 = vld [vmem:[#allocation100_spill] sm:$0xff]  ;;  %v11412_v12 = vld [vmem:[#allocation122_spill] sm:$0xff] }
 0x6f5   :  { %v10274_v16 = vpop.permute.xlu0 %4767  ;;  %v10276_v62 = vpop.permute.xlu1 %3047  ;;  %v3860_v44 = vadd.f32 %v11399_v50, %v3796_v37  ;;  %v3507_v48 = vadd.f32 %v11402_v55, %v3451_v32  ;;  %v4319_v4 = vmul.f32 %v4318_v34, %v8751_v23  ;;  %v11407_v37 = vld [vmem:[#allocation82_spill] sm:$0xff]  ;;  %v11414_v55 = vld [vmem:[#allocation89_spill] sm:$0xff] }
 0x6f6   :  { %v3667_v30 = vadd.f32 %v11398_v24, %v3603_v6  ;;  %v3764_v17 = vadd.f32 %v11403_v49, %v3700_v3  ;;  %v3619_v54 = vadd.f32 %v11405_v45, %v3555_v43  ;;  %v3934_v3 = vadd.f32 %v11409_v36, %v3876_v19  ;;  %v11413_v34 = vld [vmem:[#allocation86_spill] sm:$0xff]  ;;  %v11415_v49 = vld [vmem:[#allocation96_spill] sm:$0xff] }
 0x6f7   :  { %4071 = vrot.lane.b32.xlu0 %v4068_v22, %s11203_s11  ;;  %4069 = vrot.lane.b32.xlu1 %v4067_v53, %s11203_s11  ;;  %v4196_v22 = vrot.slane %v4192_v41, 1  ;;  %v4255_v53 = vmul.f32 %v4254_v5, %v8751_v23  ;;  %v2946_v41 = vadd.f32 %v10130_v39, %v2890_v56  ;;  %v11404_v5 = vld [vmem:[#allocation85_spill] sm:$0xff]  ;;  %v4382_v56 = vstv %s10297_s15 }
 0x6f8   :  { %v3731_v6 = vadd.f32 %v11404_v5, %v3667_v30  ;;  %v3828_v32 = vadd.f32 %v11406_v9, %v3764_v17  ;;  %v11411_v30 = vld [vmem:[#allocation92_spill] sm:$0xff]  ;;  %v10351_v43 = vmul.f32 %v2990_v57, %v8751_v23  ;;  %v4446_v19 = vstv %s10311_s17 }
 0x6f9   :  { %v10293_v2 = vpop.permute.xlu0 %4717  ;;  %v10295_v25 = vpop.permute.xlu1 %4783  ;;  %v4259_v39 = vrot.slane %v4255_v53, 2  ;;  %v3683_v50 = vadd.f32 %v11411_v30, %v3619_v54  ;;  %v4384_v54 = vmul.f32 %v4382_v56, %v8795_v33  ;;  %v4383_v9 = vmul.f32 %v4382_v56, %v8751_v23 }
 0x6fa   :  { %v3795_v28 = vadd.f32 %v11407_v37, %v3731_v6  ;;  %v3892_v53 = vadd.f32 %v11412_v12, %v3828_v32  ;;  %v11416_v6 = vld [vmem:[#allocation102_spill] sm:$0xff]  ;;  %v11418_v32 = vld [vmem:[#allocation93_spill] sm:$0xff]  ;;  %v4558_v56 = vstv %s10333_s6 }
 0x6fb   :  { %4135 = vrot.lane.b32.xlu0 %v4132_v59, %s11210_s21  ;;  %4133 = vrot.lane.b32.xlu1 %v4131_v7, %s11210_s21  ;;  %v2996_v59 = vrot.slane %v2992_v15, 1  ;;  %v4260_v7 = vrot.slane %v4256_v61, 2  ;;  %v11408_v15 = vld [vmem:[#allocation98_spill] sm:$0xff]  ;;  %v3747_v17 = vadd.f32 %v11415_v49, %v3683_v50  ;;  %v11420_v37 = vld [vmem:[#allocation29_spill] sm:$0xff]  ;;  %v11423_v50 = vld [vmem:[#allocation103_spill] sm:$0xff]  ;;  %v4388_v49 = vrot.slane %v4384_v54, 2 }
 0x6fc   :  { %v3920_v14 = vadd.f32 %v11408_v15, %v3860_v44  ;;  %v3859_v31 = vadd.f32 %v11413_v34, %v3795_v28  ;;  %v4324_v44 = vrot.slane %v4320_v13, 2  ;;  %v3948_v28 = vadd.f32 %v11420_v37, %v3892_v53  ;;  %v11424_v34 = vld [vmem:[#allocation108_spill] sm:$0xff] }
 0x6fd   :  { %v10319_v63 = vpop.permute.xlu0 %4733  ;;  %v10321_v52 = vpop.permute.xlu1 %4765  ;;  %v4448_v53 = vmul.f32 %v4446_v19, %v8795_v33  ;;  %v4559_v54 = vmul.f32 %v4558_v56, %v8751_v23 }
 0x6fe   :  { %v3976_v57 = vadd.f32 %v11416_v6, %v3920_v14  ;;  %v11421_v14 = vld [vmem:[#allocation68_spill] sm:$0xff]  ;;  %v11427_v6 = vld [vmem:[#allocation107_spill] sm:$0xff] }
 0x6ff   :  { %4199 = vrot.lane.b32.xlu0 %v4196_v22, %s11227_s1  ;;  %4197 = vrot.lane.b32.xlu1 %v4195_v10, %s11227_s1  ;;  %v11410_v22 = vld [vmem:[#allocation88_spill] sm:$0xff]  ;;  %v3000_v10 = vadd.f32 %v2996_v59, %v2946_v41  ;;  %v4323_v41 = vrot.slane %v4319_v4, 2  ;;  %v3919_v36 = vadd.f32 %v11421_v14, %v3859_v31  ;;  %v4678_v14 = vstv %s10361_s5 }
 0x700   :  { %v3571_v24 = vadd.f32 %v11410_v22, %v3507_v48  ;;  %v11417_v59 = vld [vmem:[#allocation104_spill] sm:$0xff]  ;;  %v4502_v22 = vstv %s10327_s18  ;;  %v4032_v31 = vadd.f32 %v11424_v34, %v3976_v57 }
 0x701   :  { %v10341_v58 = vpop.permute.xlu0 %4799  ;;  %v10343_v61 = vpop.permute.xlu1 %4831  ;;  %v3052_v5 = vadd.f32 %v10276_v62, %v3000_v10  ;;  %v4447_v10 = vmul.f32 %v4446_v19, %v8751_v23  ;;  %v4503_v19 = vmul.f32 %v4502_v22, %v8751_v23 }
 0x702   :  { %v3635_v48 = vadd.f32 %v11414_v55, %v3571_v24  ;;  %v11422_v24 = vld [vmem:[#allocation97_spill] sm:$0xff] }
 0x703   :  { %4263 = vrot.lane.b32.xlu0 %v4260_v7, %s11203_s11  ;;  %4261 = vrot.lane.b32.xlu1 %v4259_v39, %s11203_s11  ;;  %v3990_v7 = vadd.f32 %v11417_v59, %v3934_v3  ;;  %s10369_s11 = sld [smem:[#allocation11 + $0x6]]  ;;  %v11419_v39 = vld [vmem:[#allocation99_spill] sm:$0xff]  ;;  %v2995_v3 = vrot.slane %v10351_v43, 1  ;;  %v11425_v43 = vld [vmem:[#allocation109_spill] sm:$0xff]  ;;  %v4004_v59 = vadd.f32 %v11427_v6, %v3948_v28  ;;  %v2889_v28 = vadd.f32 %v10128_v8, %v10302_v46  ;;  %v11437_v6 = vld [vmem:[#allocation132_spill] sm:$0xff] }
 0x704   :  { %v3699_v62 = vadd.f32 %v11418_v32, %v3635_v48  ;;  %v3811_v4 = vadd.f32 %v11419_v39, %v3747_v17  ;;  %v4387_v17 = vrot.slane %v4383_v9, 2  ;;  %v11428_v32 = vld [vmem:[#allocation70_spill] sm:$0xff]  ;;  %v4614_v9 = vstv %s10356_s7  ;;  %s11496_s7 = sld [smem:[#allocation224_spill]] }
 0x705   :  { %v10365_v45 = vpop.permute.xlu0 %3045  ;;  %v3112_v13 = vpop.permute.xlu1 %3111  ;;  %v4046_v55 = vadd.f32 %v11425_v43, %v3990_v7  ;;  %v3975_v57 = vadd.f32 %v11428_v32, %v3919_v36  ;;  %v4560_v7 = vmul.f32 %v4558_v56, %v8795_v33  ;;  %v10416_v56 = vmul.f32 %v4614_v9, %v8795_v33  ;;  %v11434_v43 = vld [vmem:[#allocation114_spill] sm:$0xff] }
 0x706   :  { %v10374_v15 = vadd.f32 %v3112_v13, %v3052_v5  ;;  %v3763_v30 = vadd.f32 %v11422_v24, %v3699_v62  ;;  %v3875_v12 = vadd.f32 %v11423_v50, %v3811_v4  ;;  %v11426_v5 = vld [vmem:[#allocation101_spill] sm:$0xff]  ;;  %v4504_v13 = vmul.f32 %v4502_v22, %v8795_v33  ;;  %v11431_v22 = vld [vmem:[#allocation35_spill] sm:$0xff]  ;;  %v11432_v24 = vld [vmem:[#allocation124_spill] sm:$0xff] }
 0x707   :  { %4327 = vrot.lane.b32.xlu0 %v4324_v44, %s11210_s21  ;;  %4325 = vrot.lane.b32.xlu1 %v4323_v41, %s11210_s21  ;;  %v11429_v62 = vld [vmem:[#allocation73_spill] sm:$0xff]  ;;  %v4092_v36 = vadd.f32 %v11431_v22, %v4032_v31  ;;  %v10422_v8 = vmul.f32 %v4614_v9, %v8751_v23  ;;  %v10425_v46 = vmul.f32 %v4678_v14, %v8795_v33  ;;  %v11435_v31 = vld [vmem:[#allocation72_spill] sm:$0xff]  ;;  %s10433_s21 = sld [smem:[#allocation11 + $0x21]]  ;;  %v11439_v9 = vld [vmem:[#allocation74_spill] sm:$0xff] }
 0x708   :  { %v3827_v41 = vadd.f32 %v11426_v5, %v3763_v30  ;;  %v3933_v39 = vadd.f32 %v11429_v62, %v3875_v12  ;;  %v11430_v4 = vld [vmem:[#allocation105_spill] sm:$0xff]  ;;  %v4108_v30 = vadd.f32 %v11432_v24, %v4046_v55  ;;  %v4031_v55 = vadd.f32 %v11435_v31, %v3975_v57  ;;  %v11436_v5 = vld [vmem:[#allocation128_spill] sm:$0xff]  ;;  %v11441_v24 = vld [vmem:[#allocation131_spill] sm:$0xff] }
 0x709   :  { %v10390_v44 = vpop.permute.xlu0 %4781  ;;  %v10392_v48 = vpop.permute.xlu1 %4847  ;;  %v10734_v12 = vstv %s10369_s11  ;;  %v4742_v62 = vstv %s10382_s16  ;;  %v11440_v22 = vld [vmem:[#allocation125_spill] sm:$0xff] }
 0x70a   :  { %v3891_v37 = vadd.f32 %v11430_v4, %v3827_v41  ;;  %v4156_v41 = vadd.f32 %v11436_v5, %v4092_v36  ;;  %v4172_v32 = vadd.f32 %v11437_v6, %v4108_v30  ;;  %v3989_v4 = vadd.f32 %v11439_v9, %v3933_v39  ;;  %v11442_v30 = vld [vmem:[#allocation183_spill] sm:$0xff]  ;;  %v11444_v9 = vld [vmem:[#allocation134_spill] sm:$0xff] }
 0x70b   :  { %4391 = vrot.lane.b32.xlu0 %v4388_v49, %s11227_s1  ;;  %4389 = vrot.lane.b32.xlu1 %v4387_v17, %s11227_s1  ;;  %v4060_v49 = vadd.f32 %v11434_v43, %v4004_v59  ;;  %v2945_v17 = vadd.f32 %v10212_v38, %v2889_v28  ;;  %v11438_v38 = vld [vmem:[#allocation75_spill] sm:$0xff]  ;;  %v10438_v28 = vmul.f32 %v4678_v14, %v8751_v23  ;;  %v4620_v6 = vrot.slane %v10416_v56, 1  ;;  %s10468_s1 = sld [smem:[#allocation11 + $0x22]] }
 0x70c   :  { %v3947_v59 = vadd.f32 %v11438_v38, %v3891_v37  ;;  %v10443_v57 = vmul.f32 %v10734_v12, %v8795_v33  ;;  %v4091_v36 = vadd.f32 %v11440_v22, %v4031_v55  ;;  %v10453_v37 = vmul.f32 %v4742_v62, %v8795_v33  ;;  %v11443_v39 = vld [vmem:[#allocation127_spill] sm:$0xff]  ;;  %v11445_v22 = vld [vmem:[#allocation136_spill] sm:$0xff]  ;;  %v11447_v12 = vld [vmem:[#allocation77_spill] sm:$0xff] }
 0x70d   :  { %v10411_v50 = vpop.permute.xlu0 %4797  ;;  %v10413_v34 = vpop.permute.xlu1 %4829  ;;  %v4124_v14 = vadd.f32 %v11443_v39, %v4060_v49  ;;  %v2999_v5 = vadd.f32 %v2995_v3, %v2945_v17  ;;  %v4619_v38 = vrot.slane %v10422_v8, 1  ;;  %v11448_v49 = vld [vmem:[#allocation76_spill] sm:$0xff]  ;;  %v11449_v17 = vld [vmem:[#allocation133_spill] sm:$0xff] }
 0x70e   :  { %11433 = vst [vmem:[#allocation164_spill] sm:$0xff] %v10411_v50  ;;  %v4155_v55 = vadd.f32 %v11444_v9, %v4091_v36  ;;  %v4045_v50 = vadd.f32 %v11447_v12, %v3989_v4  ;;  %v4003_v3 = vadd.f32 %v11448_v49, %v3947_v59  ;;  %v11450_v36 = vld [vmem:[#allocation139_spill] sm:$0xff]  ;;  %v4683_v12 = vrot.slane %v10438_v28, 1  ;;  %v11454_v4 = vld [vmem:[#allocation138_spill] sm:$0xff] }
 0x70f   :  { %4453 = vrot.lane.b32.xlu0 %v4448_v53, %s6327_s8  ;;  %4451 = vrot.lane.b32.xlu1 %v4447_v10, %s6327_s8  ;;  %v4220_v53 = vadd.f32 %v11441_v24, %v4156_v41  ;;  %v4236_v10 = vadd.f32 %v11442_v30, %v4172_v32  ;;  %v11446_v24 = vld [vmem:[#allocation140_spill] sm:$0xff]  ;;  %v4684_v30 = vrot.slane %v10425_v46, 1  ;;  %v4188_v56 = vadd.f32 %v11449_v17, %v4124_v14  ;;  %v11453_v46 = vld [vmem:[#allocation126_spill] sm:$0xff]  ;;  %v11459_v28 = vld [vmem:[#allocation79_spill] sm:$0xff] }
 0x710   :  { %v3051_v8 = vadd.f32 %v10365_v45, %v2999_v5  ;;  %v4107_v59 = vadd.f32 %v11453_v46, %v4045_v50  ;;  %v3172_v45 = vrot.slane %v10443_v57, 2  ;;  %v11456_v5 = vld [vmem:[#allocation146_spill] sm:$0xff]  ;;  %v11462_v57 = vld [vmem:[#allocation147_spill] sm:$0xff] }
 0x711   :  { %v10448_v43 = vpop.permute.xlu0 %4863  ;;  %v10450_v31 = vpop.permute.xlu1 %4895  ;;  %v4284_v41 = vadd.f32 %v11445_v22, %v4220_v53  ;;  %v4300_v32 = vadd.f32 %v11446_v24, %v4236_v10  ;;  %v4219_v53 = vadd.f32 %v11450_v36, %v4155_v55  ;;  %v11451_v10 = vld [vmem:[#allocation144_spill] sm:$0xff]  ;;  %v4252_v14 = vadd.f32 %v11454_v4, %v4188_v56  ;;  %v11460_v50 = vld [vmem:[#allocation130_spill] sm:$0xff] }
 0x712   :  { %v11457_v55 = vld [vmem:[#allocation152_spill] sm:$0xff]  ;;  %v11461_v56 = vld [vmem:[#allocation142_spill] sm:$0xff] }
 0x713   :  { %4509 = vrot.lane.b32.xlu0 %v4504_v13, %s6328_s4  ;;  %4507 = vrot.lane.b32.xlu1 %v4503_v19, %s6328_s4  ;;  %v4348_v39 = vadd.f32 %v11451_v10, %v4284_v41  ;;  %v11452_v13 = vld [vmem:[#allocation153_spill] sm:$0xff]  ;;  %v4283_v49 = vadd.f32 %v11456_v5, %v4219_v53  ;;  %v11458_v41 = vld [vmem:[#allocation150_spill] sm:$0xff]  ;;  %v4059_v10 = vadd.f32 %v11459_v28, %v4003_v3 }
 0x714   :  { %v4364_v9 = vadd.f32 %v11452_v13, %v4300_v32  ;;  %v4806_v32 = vstv %s10433_s21  ;;  %v4171_v13 = vadd.f32 %v11460_v50, %v4107_v59  ;;  %v11463_v53 = vld [vmem:[#allocation157_spill] sm:$0xff] }
 0x715   :  { %v3110_v19 = vpop.permute.xlu0 %3109  ;;  %v10473_v22 = vpop.permute.xlu1 %4845  ;;  %v4412_v17 = vadd.f32 %v11457_v55, %v4348_v39  ;;  %v4347_v46 = vadd.f32 %v11462_v57, %v4283_v49  ;;  %v11464_v39 = vld [vmem:[#allocation155_spill] sm:$0xff]  ;;  %v11465_v3 = vld [vmem:[#allocation129_spill] sm:$0xff]  ;;  %v10505_v49 = vmul.f32 %v4806_v32, %v8751_v23 }
 0x716   :  { %v10478_v24 = vadd.f32 %v3110_v19, %v3051_v8  ;;  %v4428_v36 = vadd.f32 %v11458_v41, %v4364_v9  ;;  %v4316_v8 = vadd.f32 %v11461_v56, %v4252_v14  ;;  %v4743_v19 = vmul.f32 %v4742_v62, %v8751_v23  ;;  %v11466_v55 = vld [vmem:[#allocation135_spill] sm:$0xff]  ;;  %v11467_v41 = vld [vmem:[#allocation145_spill] sm:$0xff] }
 0x717   :  { %4565 = vrot.lane.b32.xlu0 %v4560_v7, %s6329_s0  ;;  %4563 = vrot.lane.b32.xlu1 %v4559_v54, %s6329_s0  ;;  %v4472_v4 = vadd.f32 %v11463_v53, %v4412_v17  ;;  %v10499_v54 = vmul.f32 %v4806_v32, %v8795_v33  ;;  %v4123_v59 = vadd.f32 %v11465_v3, %v4059_v10  ;;  %v11468_v17 = vld [vmem:[#allocation154_spill] sm:$0xff]  ;;  %v11470_v56 = vld [vmem:[#allocation51_spill] sm:$0xff]  ;;  %v4748_v53 = vrot.slane %v10453_v37, 1  ;;  %v11477_v37 = vld [vmem:[#allocation137_spill] sm:$0xff] }
 0x718   :  { %11455 = vst [vmem:[#allocation165_spill] sm:$0xff] %v10478_v24  ;;  %v4486_v5 = vadd.f32 %v11464_v39, %v4428_v36  ;;  %v4235_v14 = vadd.f32 %v11466_v55, %v4171_v13  ;;  %v4380_v62 = vadd.f32 %v11467_v41, %v4316_v8  ;;  %v4411_v28 = vadd.f32 %v11468_v17, %v4347_v46  ;;  %v11469_v36 = vld [vmem:[#allocation166_spill] sm:$0xff]  ;;  %v11471_v10 = vld [vmem:[#allocation39_spill] sm:$0xff]  ;;  %v11475_v46 = vld [vmem:[#allocation160_spill] sm:$0xff] }
 0x719   :  { %v10494_v9 = vpop.permute.xlu0 %4911  ;;  %v10496_v7 = vpop.permute.xlu1 %4861  ;;  %v4528_v50 = vadd.f32 %v11469_v36, %v4472_v4  ;;  %v4187_v39 = vadd.f32 %v11471_v10, %v4123_v59  ;;  %v11472_v13 = vld [vmem:[#allocation143_spill] sm:$0xff]  ;;  %v4870_v32 = vstv %s10468_s1  ;;  %v11474_v41 = vld [vmem:[#allocation170_spill] sm:$0xff] }
 0x71a   :  { %v4542_v57 = vadd.f32 %v11470_v56, %v4486_v5  ;;  %v4299_v3 = vadd.f32 %v11472_v13, %v4235_v14  ;;  %v11473_v8 = vld [vmem:[#allocation151_spill] sm:$0xff]  ;;  %v4471_v24 = vadd.f32 %v11474_v41, %v4411_v28  ;;  %v11476_v4 = vld [vmem:[#allocation174_spill] sm:$0xff]  ;;  %v11478_v56 = vld [vmem:[#allocation148_spill] sm:$0xff]  ;;  %v10530_v13 = vmul.f32 %v4870_v32, %v8795_v33 }
 0x71b   :  { %4623 = vrot.lane.b32.xlu0 %v4620_v6, %s6327_s8  ;;  %4621 = vrot.lane.b32.xlu1 %v4619_v38, %s6327_s8  ;;  %v4444_v55 = vadd.f32 %v11473_v8, %v4380_v62  ;;  %v4584_v17 = vadd.f32 %v11475_v46, %v4528_v50  ;;  %v4747_v38 = vrot.slane %v4743_v19, 1  ;;  %v4251_v59 = vadd.f32 %v11477_v37, %v4187_v39  ;;  %v11479_v10 = vld [vmem:[#allocation162_spill] sm:$0xff]  ;;  %v11480_v28 = vld [vmem:[#allocation159_spill] sm:$0xff]  ;;  %v11481_v39 = vld [vmem:[#allocation141_spill] sm:$0xff] }
 0x71c   :  { %v4598_v36 = vadd.f32 %v11476_v4, %v4542_v57  ;;  %v4363_v14 = vadd.f32 %v11478_v56, %v4299_v3  ;;  %v4527_v50 = vadd.f32 %v11480_v28, %v4471_v24  ;;  %v4812_v19 = vrot.slane %v10499_v54, 2  ;;  %v11482_v3 = vld [vmem:[#allocation156_spill] sm:$0xff] }
 0x71d   :  { %v10520_v5 = vpop.permute.xlu0 %4893  ;;  %v10522_v6 = vpop.permute.xlu1 %4927  ;;  %v4500_v62 = vadd.f32 %v11479_v10, %v4444_v55  ;;  %v4644_v57 = vadd.f32 %v10113_v47, %v4584_v17  ;;  %v4315_v41 = vadd.f32 %v11481_v39, %v4251_v59  ;;  %v11483_v55 = vld [vmem:[#allocation190_spill] sm:$0xff]  ;;  %v3176_v37 = vadd.f32 %v3172_v45, %v10374_v15  ;;  %v11484_v17 = vld [vmem:[#allocation149_spill] sm:$0xff]  ;;  %v11485_v59 = vld [vmem:[#allocation163_spill] sm:$0xff] }
 0x71e   :  { %v4660_v8 = vadd.f32 %v10153_v35, %v4598_v36  ;;  %v4427_v46 = vadd.f32 %v11482_v3, %v4363_v14  ;;  %v4583_v24 = vadd.f32 %v10093_v42, %v4527_v50  ;;  %v4871_v54 = vmul.f32 %v4870_v32, %v8751_v23  ;;  %v11486_v45 = vld [vmem:[#allocation158_spill] sm:$0xff] }
 0x71f   :  { %4687 = vrot.lane.b32.xlu0 %v4684_v30, %s6328_s4  ;;  %4685 = vrot.lane.b32.xlu1 %v4683_v12, %s6328_s4  ;;  %v4556_v4 = vadd.f32 %v11483_v55, %v4500_v62  ;;  %v4708_v47 = vadd.f32 %v10192_v1, %v4644_v57  ;;  %v4379_v36 = vadd.f32 %v11484_v17, %v4315_v41  ;;  %v4811_v15 = vrot.slane %v10505_v49, 2 }
 0x720   :  { %v4724_v35 = vadd.f32 %v10229_v27, %v4660_v8  ;;  %v4485_v56 = vadd.f32 %v11485_v59, %v4427_v46  ;;  %v4643_v42 = vadd.f32 %v10173_v11, %v4583_v24  ;;  %v4876_v50 = vrot.slane %v10530_v13, 2 }
 0x721   :  { %v4960_v30 = vpop.permute.xlu0 %4959  ;;  %v3224_v12 = vpop.permute.xlu1 %3223  ;;  %v4612_v14 = vadd.f32 %v10111_v26, %v4556_v4  ;;  %v4772_v1 = vadd.f32 %v10274_v16, %v4708_v47  ;;  %v4443_v32 = vadd.f32 %v11486_v45, %v4379_v36  ;;  %v11487_v26 = vld [vmem:[#allocation185_spill] sm:$0xff]  ;;  %v4934_v8 = vstv %s10524_s3 }
 0x722   :  { %v10551_v10 = vadd.f32 %v3224_v12, %v3176_v37  ;;  %v4788_v27 = vadd.f32 %v10295_v25, %v4724_v35  ;;  %v4541_v62 = vadd.f32 %v11487_v26, %v4485_v56  ;;  %v4707_v11 = vadd.f32 %v10253_v18, %v4643_v42 }
 0x723   :  { %4751 = vrot.lane.b32.xlu0 %v4748_v53, %s6329_s0  ;;  %4749 = vrot.lane.b32.xlu1 %v4747_v38, %s6329_s0  ;;  %v4676_v28 = vadd.f32 %v10190_v51, %v4612_v14  ;;  %v4836_v16 = vadd.f32 %v10343_v61, %v4772_v1  ;;  %v11488_v38 = vld [vmem:[#allocation46_spill] sm:$0xff]  ;;  %v4936_v51 = vmul.f32 %v4934_v8, %v8795_v33  ;;  %v4875_v13 = vrot.slane %v4871_v54, 2 }
 0x724   :  { %v4852_v25 = vadd.f32 %v10392_v48, %v4788_v27  ;;  %v4499_v39 = vadd.f32 %v11488_v38, %v4443_v32  ;;  %v4597_v49 = vadd.f32 %v10151_v20, %v4541_v62  ;;  %v4771_v18 = vadd.f32 %v10321_v52, %v4707_v11 }
 0x725   :  { %v4910_v57 = vpop.permute.xlu0 %4909  ;;  %v4976_v53 = vpop.permute.xlu1 %4975  ;;  %v4740_v41 = vadd.f32 %v10255_v29, %v4676_v28  ;;  %v4900_v61 = vadd.f32 %v10450_v31, %v4836_v16  ;;  %v4935_v33 = vmul.f32 %v4934_v8, %v8751_v23  ;;  %v5004_v46 = vstv %s10545_s28  ;;  %v5071_v16 = vld [vmem:[%s11490_s26 + $0x10] sm:$0x7]  ;;  %s6333_s28 = smov [#allocation18]  }
 0x726   :  { %v4916_v48 = vadd.f32 %v10494_v9, %v4852_v25  ;;  %v4555_v20 = vadd.f32 %v10091_v21, %v4499_v39  ;;  %v4659_v29 = vadd.f32 %v10214_v40, %v4597_v49  ;;  %v4835_v52 = vadd.f32 %v10413_v34, %v4771_v18  ;;  %6036 = vmatpush3.msk.msra.mxu1 %vm5076_vm13, %v5071_v16 }
 0x727   :  { %4815 = vrot.lane.b32.xlu0 %v4812_v19, %s6327_s8  ;;  %4813 = vrot.lane.b32.xlu1 %v4811_v15, %s6327_s8  ;;  %v4804_v3 = vadd.f32 %v10341_v58, %v4740_v41  ;;  %v4964_v31 = vadd.f32 %v4960_v30, %v4900_v61  ;;  %v5010_v21 = vstv %s10553_s19  ;;  %v4940_v35 = vrot.slane %v4936_v51, 2  ;;  %s6330_s8 = smov 10   ;;  %s5640_s19 = sshll.u32 %s6333_s28, 4  ;;  %s5641_s19 = int_to_ptr.vmem [resolvable:$true] %s5640_s19 }
 0x728   :  { %v4980_v55 = vadd.f32 %v4976_v53, %v4916_v48  ;;  %v4611_v19 = vadd.f32 %v10171_v0, %v4555_v20  ;;  %v4723_v37 = vadd.f32 %v10293_v2, %v4659_v29  ;;  %v4899_v40 = vadd.f32 %v10520_v5, %v4835_v52  ;;  %6027 = vmatpush3.msk.msra.mxu0 %vm5076_vm13, %v5071_v16  ;;  %p6276_p12 = scmp.lt.s32.totalorder %s5641_s19, %s5641_s19 }
 0x729   :  { %v4926_v9 = vpop.permute.xlu0 %4925  ;;  %v4958_v4 = vpop.permute.xlu1 %4957  ;;  %v4868_v24 = vadd.f32 %v10448_v43, %v4804_v3  ;;  %v5006_v0 = vadd.f32 %v5004_v46, %v4964_v31  ;;  %v4939_v54 = vrot.slane %v4935_v33, 2  ;;  %v5016_v36 = vstv %s10572_s22  ;;  %s6271_s22 = scalar_lea.vmem %s5641_s19, 32 }
 0x72a   :  { %v4675_v58 = vadd.f32 %v10231_v60, %v4611_v19  ;;  %v4787_v34 = vadd.f32 %v10390_v44, %v4723_v37  ;;  %v5012_v30 = vadd.f32 %v5010_v21, %v4980_v55  ;;  %v4963_v2 = vadd.f32 %v4958_v4, %v4899_v40  ;;  %v11489_v60 = vld [vmem:[#allocation164_spill] sm:$0xff]  ;;  %p6272_p11 = scmp.ne.s32.totalorder %s5641_s19, %s6271_s22  ;;  %p6277_p13 = scmp.lt.s32.totalorder %s6271_s22, %s6271_s22 }
 0x72b   :  { %4879 = vrot.lane.b32.xlu0 %v4876_v50, %s6328_s4  ;;  %4877 = vrot.lane.b32.xlu1 %v4875_v13, %s6328_s4  ;;  %v4932_v47 = vadd.f32 %v10522_v6, %v4868_v24  ;;  %v5008_v56 = vmax.f32 %v5006_v0, 0.0  ;;  %s6331_s4 = smov 5   ;;  %v11491_v38 = vmov 0.0  }
 0x72c   :  { %v4739_v5 = vadd.f32 %v10319_v63, %v4675_v58  ;;  %v4851_v17 = vadd.f32 %v10473_v22, %v4787_v34  ;;  %v5014_v14 = vmax.f32 %v5012_v30, 0.0  ;;  %v5005_v42 = vadd.f32 %v5004_v46, %v4963_v2  ;;  %6037 = vmatprep.subr.mxu1 %v11491_v38  ;;  %6028 = vmatprep.subr.mxu0 %v11491_v38  ;;  %p6278_p0 = por %p6277_p13, %p6276_p12 }
 0x72d   :  { %v4992_v12 = vpop.permute.xlu0 %4991  ;;  %v10596_v43 = vpop.permute.xlu1 %3221 }
 0x72e   :  { %v4996_v59 = vadd.f32 %v4992_v12, %v4932_v47  ;;  %v4803_v44 = vadd.f32 %v11489_v60, %v4739_v5  ;;  %v4915_v6 = vadd.f32 %v4910_v57, %v4851_v17  ;;  %v5007_v32 = vmax.f32 %v5005_v42, 0.0  ;;  %p6279_p1 = pnand %p6278_p0, %p6272_p11 }
 0x72f   :  { %4943 = vrot.lane.b32.xlu0 %v4940_v35, %s6329_s0  ;;  %4941 = vrot.lane.b32.xlu1 %v4939_v54, %s6329_s0  ;;  %s6332_s0 = smov 15   ;;  %v11493_v35 = vld [vmem:[#allocation165_spill] sm:$0xff] }
 0x730   :  { %v5018_v1 = vadd.f32 %v5016_v36, %v4996_v59  ;;  %v4867_v63 = vadd.f32 %v10496_v7, %v4803_v44  ;;  %v5070_v7 = vld [vmem:[%s11490_s26 + $0x8] sm:$0xff] }
 0x731   :  { %v10604_v27 = vpop.permute.xlu0 %3287  ;;  %v4974_v15 = vpop.permute.xlu1 %4973  ;;  %6038 = vmatpush3.msra.mxu1 %v5070_v7  ;;  %6029 = vmatpush3.msra.mxu0 %v5070_v7 }
 0x732   :  { %v4979_v45 = vadd.f32 %v4974_v15, %v4915_v6  ;;  %v4931_v22 = vadd.f32 %v4926_v9, %v4867_v63  ;;  %v5020_v26 = vmax.f32 %v5018_v1, 0.0  ;;  %6039 = vmatprep.subr.mxu1 %v11491_v38  ;;  %6030 = vmatprep.subr.mxu0 %v11491_v38  ;;  %v3292_v54 = vadd.f32 %v10604_v27, %v10551_v10 }
 0x733   :  { %5039 = vrot.lane.b32.xlu1 %v5014_v14, %s6330_s8  ;;  %5028 = vrot.lane.b32.xlu0 %v5008_v56, %s6331_s4 }
 0x734   :  { %v5011_v62 = vadd.f32 %v5010_v21, %v4979_v45  ;;  %v11492_v21 = vstv %s10369_s11 }
 0x735   :  { %v4990_v28 = vpop.permute.xlu0 %4989  ;;  %v3286_v50 = vpop.permute.xlu1 %3285  ;;  %v3167_v40 = vmul.f32 %v11492_v21, %v8751_v23 }
 0x736   :  { %v4995_v11 = vadd.f32 %v4990_v28, %v4931_v22  ;;  %v5013_v57 = vmax.f32 %v5011_v62, 0.0 }
 0x737   :  { %5050 = vrot.lane.b32.xlu1 %v5020_v26, %s6332_s0  ;;  %5026 = vrot.lane.b32.xlu0 %v5007_v32, %s6331_s4  ;;  %v3171_v47 = vrot.slane %v3167_v40, 2 }
 0x738   :  { %v5017_v25 = vadd.f32 %v5016_v36, %v4995_v11 }
 0x739   :  { %v3350_v53 = vpop.permute.xlu0 %3349  ;;  %v3348_v8 = vpop.permute.xlu1 %3347  ;;  %v3175_v0 = vadd.f32 %v3171_v47, %v11493_v35 }
 0x73a   :  { %v5019_v39 = vmax.f32 %v5017_v25, 0.0  ;;  %v3354_v59 = vadd.f32 %v3350_v53, %v3292_v54 }
 0x73b   :  { %5037 = vrot.lane.b32.xlu0 %v5013_v57, %s6330_s8  ;;  %v3227_v12 = vadd.f32 %v10596_v43, %v3175_v0 }
 0x73c   :  { %5048 = vrot.lane.b32.xlu1 %v5019_v39, %s6332_s0 }
 0x73d   :  { %v3406_v49 = vpop.permute.xlu0 %3405  ;;  %v3404_v41 = vpop.permute.xlu1 %3403  ;;  %v3291_v5 = vadd.f32 %v3286_v50, %v3227_v12 }
 0x73e   :  { %v3410_v44 = vadd.f32 %v3406_v49, %v3354_v59 }
 0x73f   :  { %v3353_v60 = vadd.f32 %v3348_v8, %v3291_v5 }
 0x741   :  { %v3462_v51 = vpop.permute.xlu0 %3461  ;;  %v3460_v18 = vpop.permute.xlu1 %3459  ;;  %v3409_v6 = vadd.f32 %v3404_v41, %v3353_v60 }
 0x742   :  { %v3466_v14 = vadd.f32 %v3462_v51, %v3410_v44 }
 0x743   :  { %v3465_v42 = vadd.f32 %v3460_v18, %v3409_v6 }
 0x745   :  { %v3520_v61 = vpop.permute.xlu0 %3519  ;;  %v3518_v48 = vpop.permute.xlu1 %3517 }
 0x746   :  { %v3524_v1 = vadd.f32 %v3520_v61, %v3466_v14  ;;  %v3523_v15 = vadd.f32 %v3518_v48, %v3465_v42 }
 0x749   :  { %v3584_v13 = vpop.permute.xlu0 %3583  ;;  %v3582_v20 = vpop.permute.xlu1 %3581 }
 0x74a   :  { %v3588_v22 = vadd.f32 %v3584_v13, %v3524_v1  ;;  %v3587_v43 = vadd.f32 %v3582_v20, %v3523_v15 }
 0x74d   :  { %v3648_v29 = vpop.permute.xlu0 %3647  ;;  %v3646_v3 = vpop.permute.xlu1 %3645 }
 0x74e   :  { %v3652_v32 = vadd.f32 %v3648_v29, %v3588_v22  ;;  %v3651_v26 = vadd.f32 %v3646_v3, %v3587_v43  ;;  %v4998_v43 = vstv %s4997_s14 }
 0x751   :  { %v3712_v33 = vpop.permute.xlu0 %3711  ;;  %v3710_v52 = vpop.permute.xlu1 %3709 }
 0x752   :  { %v3716_v62 = vadd.f32 %v3712_v33, %v3652_v32  ;;  %v3715_v28 = vadd.f32 %v3710_v52, %v3651_v26 }
 0x755   :  { %v3776_v46 = vpop.permute.xlu0 %3775  ;;  %v3774_v31 = vpop.permute.xlu1 %3773 }
 0x756   :  { %v3780_v50 = vadd.f32 %v3776_v46, %v3716_v62  ;;  %v3779_v11 = vadd.f32 %v3774_v31, %v3715_v28 }
 0x759   :  { %v3840_v55 = vpop.permute.xlu0 %3839  ;;  %v3838_v9 = vpop.permute.xlu1 %3837 }
 0x75a   :  { %v3844_v25 = vadd.f32 %v3840_v55, %v3780_v50  ;;  %v3843_v57 = vadd.f32 %v3838_v9, %v3779_v11 }
 0x75d   :  { %v3902_v4 = vpop.permute.xlu0 %3901  ;;  %v3900_v19 = vpop.permute.xlu1 %3899 }
 0x75e   :  { %v3906_v53 = vadd.f32 %v3902_v4, %v3844_v25  ;;  %v3905_v8 = vadd.f32 %v3900_v19, %v3843_v57  ;;  %v5069_v25 = vld [vmem:[%s11490_s26] sm:$0xff] }
 0x75f   :  { %6040 = vmatpush3.msra.mxu1 %v5069_v25  ;;  %6031 = vmatpush3.msra.mxu0 %v5069_v25 }
 0x760   :  { %6049 = vmatprep.subr.mxu1 %v11491_v38  ;;  %6044 = vmatprep.subr.mxu0 %v11491_v38 }
 0x761   :  { %v3958_v37 = vpop.permute.xlu0 %3957  ;;  %v3956_v24 = vpop.permute.xlu1 %3955 }
 0x762   :  { %v3962_v41 = vadd.f32 %v3958_v37, %v3906_v53  ;;  %v3961_v51 = vadd.f32 %v3956_v24, %v3905_v8 }
 0x765   :  { %v4014_v58 = vpop.permute.xlu0 %4013  ;;  %v4012_v34 = vpop.permute.xlu1 %4011 }
 0x766   :  { %v4018_v18 = vadd.f32 %v4014_v58, %v3962_v41  ;;  %v4017_v61 = vadd.f32 %v4012_v34, %v3961_v51 }
 0x769   :  { %v4072_v30 = vpop.permute.xlu0 %4071  ;;  %v4070_v2 = vpop.permute.xlu1 %4069 }
 0x76a   :  { %v4076_v20 = vadd.f32 %v4072_v30, %v4018_v18  ;;  %v4075_v29 = vadd.f32 %v4070_v2, %v4017_v61 }
 0x76d   :  { %v4136_v17 = vpop.permute.xlu0 %4135  ;;  %v4134_v36 = vpop.permute.xlu1 %4133 }
 0x76e   :  { %v4140_v3 = vadd.f32 %v4136_v17, %v4076_v20  ;;  %v4139_v33 = vadd.f32 %v4134_v36, %v4075_v29 }
 0x771   :  { %v4200_v23 = vpop.permute.xlu0 %4199  ;;  %v4198_v56 = vpop.permute.xlu1 %4197 }
 0x772   :  { %v4204_v31 = vadd.f32 %v4200_v23, %v4140_v3  ;;  %v4203_v21 = vadd.f32 %v4198_v56, %v4139_v33  ;;  %v5231_v33 = vld [vmem:[%s11494_s30] sm:$0x3] }
 0x775   :  { %v4264_v63 = vpop.permute.xlu0 %4263  ;;  %v4262_v45 = vpop.permute.xlu1 %4261 }
 0x776   :  { %v4268_v55 = vadd.f32 %v4264_v63, %v4204_v31  ;;  %v4267_v9 = vadd.f32 %v4262_v45, %v4203_v21 }
 0x779   :  { %v4328_v10 = vpop.permute.xlu0 %4327  ;;  %v4326_v27 = vpop.permute.xlu1 %4325 }
 0x77a   :  { %v4332_v40 = vadd.f32 %v4328_v10, %v4268_v55  ;;  %v4331_v47 = vadd.f32 %v4326_v27, %v4267_v9  ;;  %v5384_v55 = vld [vmem:[%s11495_s9] sm:$0xff]  ;;  %v5470_v9 = vld [vmem:[%s11495_s9 + $0x8] sm:$0xff] }
 0x77d   :  { %v4392_v16 = vpop.permute.xlu0 %4391  ;;  %v4390_v7 = vpop.permute.xlu1 %4389 }
 0x77e   :  { %v4396_v37 = vadd.f32 %v4392_v16, %v4332_v40  ;;  %v4395_v24 = vadd.f32 %v4390_v7, %v4331_v47 }
 0x781   :  { %v4454_v39 = vpop.permute.xlu0 %4453  ;;  %v4452_v49 = vpop.permute.xlu1 %4451 }
 0x782   :  { %v4458_v35 = vadd.f32 %v4454_v39, %v4396_v37  ;;  %v4457_v0 = vadd.f32 %v4452_v49, %v4395_v24 }
 0x785   :  { %v4510_v48 = vpop.permute.xlu0 %4509  ;;  %v4508_v13 = vpop.permute.xlu1 %4507 }
 0x786   :  { %v4514_v30 = vadd.f32 %v4510_v48, %v4458_v35  ;;  %v4513_v2 = vadd.f32 %v4508_v13, %v4457_v0  ;;  %v5550_v35 = vld [vmem:[%s11496_s7 + $0x18] sm:$0xff]  ;;  %v5549_v0 = vld [vmem:[%s11496_s7 + $0x10] sm:$0xff] }
 0x789   :  { %v4566_v52 = vpop.permute.xlu0 %4565  ;;  %v4564_v46 = vpop.permute.xlu1 %4563 }
 0x78a   :  { %v4570_v5 = vadd.f32 %v4566_v52, %v4514_v30  ;;  %v4569_v17 = vadd.f32 %v4564_v46, %v4513_v2  ;;  %v5548_v30 = vld [vmem:[%s11496_s7 + $0x8] sm:$0xff]  ;;  %v5547_v2 = vld [vmem:[%s11496_s7] sm:$0xff] }
 0x78d   :  { %v4624_v4 = vpop.permute.xlu0 %4623  ;;  %v4622_v19 = vpop.permute.xlu1 %4621 }
 0x78e   :  { %v4628_v36 = vadd.f32 %v4624_v4, %v4570_v5  ;;  %v4627_v59 = vadd.f32 %v4622_v19, %v4569_v17 }
 0x791   :  { %v4688_v58 = vpop.permute.xlu0 %4687  ;;  %v4686_v34 = vpop.permute.xlu1 %4685 }
 0x792   :  { %v4692_v6 = vadd.f32 %v4688_v58, %v4628_v36  ;;  %v4691_v23 = vadd.f32 %v4686_v34, %v4627_v59 }
 0x795   :  { %v4752_v12 = vpop.permute.xlu0 %4751  ;;  %v4750_v54 = vpop.permute.xlu1 %4749 }
 0x796   :  { %v4756_v56 = vadd.f32 %v4752_v12, %v4692_v6  ;;  %v4755_v14 = vadd.f32 %v4750_v54, %v4691_v23  ;;  %v5929_v12 = vld [vmem:[#allocation15] ss:$0 sm:$0xff]  ;;  %v5931_v6 = vld [vmem:[#allocation17] ss:$0 sm:$0xff] }
 0x799   :  { %v4816_v60 = vpop.permute.xlu0 %4815  ;;  %v4814_v44 = vpop.permute.xlu1 %4813 }
 0x79a   :  { %v4820_v15 = vadd.f32 %v4816_v60, %v4756_v56  ;;  %v4819_v63 = vadd.f32 %v4814_v44, %v4755_v14 }
 0x79d   :  { %v4880_v42 = vpop.permute.xlu0 %4879  ;;  %v4878_v1 = vpop.permute.xlu1 %4877 }
 0x79e   :  { %v4884_v45 = vadd.f32 %v4880_v42, %v4820_v15  ;;  %v4883_v22 = vadd.f32 %v4878_v1, %v4819_v63 }
 0x7a1   :  { %v4944_v32 = vpop.permute.xlu0 %4943  ;;  %v4942_v26 = vpop.permute.xlu1 %4941 }
 0x7a2   :  { %v4948_v10 = vadd.f32 %v4944_v32, %v4884_v45  ;;  %v4947_v27 = vadd.f32 %v4942_v26, %v4883_v22 }
 0x7a4   :  { %v5000_v62 = vadd.f32 %v4998_v43, %v4948_v10  ;;  %v4999_v28 = vadd.f32 %v4998_v43, %v4947_v27 }
 0x7a5   :  { %v5040_v50 = vpop.permute.xlu1 %5039  ;;  %v5029_v11 = vpop.permute.xlu0 %5028 }
 0x7a6   :  { %v5002_v16 = vmax.f32 %v5000_v62, 0.0  ;;  %v5001_v7 = vmax.f32 %v4999_v28, 0.0 }
 0x7a8   :  { %5023 = vst.msk [vmem:[#allocation3 + $0x8] sm:$0x1f] %vm5021_vm14, %v5002_v16  ;;  %5022 = vst.msk [vmem:[#allocation3] sm:$0x1f] %vm5021_vm14, %v5001_v7 }
 0x7a9   :  { %5034 = vst.msk [vmem:[#allocation3 + $0x8] sm:$0x1f] %vm5032_vm15, %v5029_v11  ;;  %v5051_v57 = vpop.permute.xlu1 %5050  ;;  %v5027_v53 = vpop.permute.xlu0 %5026 }
 0x7aa   :  { %5045 = vst.msk [vmem:[#allocation3 + $0x8] sm:$0x1f] %vm5043_vm0, %v5040_v50 }
 0x7ab   :  { %5033 = vst.msk [vmem:[#allocation3] sm:$0x1f] %vm5032_vm15, %v5027_v53 }
 0x7ac   :  { %5056 = vst.msk [vmem:[#allocation3 + $0x8] sm:$0x1f] %vm5054_vm1, %v5051_v57 }
 0x7ad   :  { %v5038_v8 = vpop.permute.xlu0 %5037 }
 0x7ae   :  { %5044 = vst.msk [vmem:[#allocation3] sm:$0x1f] %vm5043_vm0, %v5038_v8  ;;  %v5049_v39 = vpop.permute.xlu1 %5048 }
 0x7af   :  { %5055 = vst.msk [vmem:[#allocation3] sm:$0x1f] %vm5054_vm1, %v5049_v39 }
 0x7b3   :  { %v5058_v49 = vld [vmem:[#allocation3 + $0x8] sm:$0x1f] }
 0x7b4   :  { %5063 = vrot.lane.b32.xlu0 %v5058_v49, %s11204_s12 }
 0x7b6   :  { %v5057_v41 = vld [vmem:[#allocation3] sm:$0x1f] }
 0x7b7   :  { %5061 = vrot.lane.b32.xlu1 %v5057_v41, %s11204_s12 }
 0x826   :  { %v5064_v51 = vpop.permute.xlu0 %5063 }
 0x827   :  { %v5068_v18 = vmax.f32 %v5058_v49, %v5064_v51 }
 0x829   :  { %6042 = vmatmul.mubr.msk.f32.vlgmr.msra.gmra.mxu1 %vm5072_vm2, %v5068_v18  ;;  %v5062_v61 = vpop.permute.xlu1 %5061 }
 0x82a   :  { %6051 = vmatprep.mubr.msk.f32.mxu1 %vm6320_vm10, %v11491_v38  ;;  %v5067_v48 = vmax.f32 %v5057_v41, %v5062_v61 }
 0x82c   :  { %6033 = vmatmul.mubr.msk.f32.vlgmr.msra.gmra.mxu0 %vm5072_vm2, %v5067_v48 }
 0x82d   :  { %6046 = vmatprep.mubr.msk.f32.mxu0 %vm6320_vm10, %v11491_v38 }
 0x8e9   :  { %v5219_v13 = vpop.f32.mrf.mxu1 }
 0x8ea   :  { %v5226_v20 = vrot.slane %v5219_v13, 1 }
 0x8eb   :  { %v6043_v29 = vpop.f32.mrf.mxu1 }
 0x8ec   :  { %v5230_v3 = vmax.f32 %v5219_v13, %v5226_v20  ;;  %v5146_v52 = vpop.f32.mrf.mxu0 }
 0x8ed   :  { %v5225_v46 = vrot.slane %v5146_v52, 1 }
 0x8ee   :  { %6050 = vmatpush3.msk.msra.mxu1 %vm5236_vm3, %v5230_v3  ;;  %v6034_v31 = vpop.f32.mrf.mxu0 }
 0x8ef   :  { %6052 = vmatmul.mubr.msk.f32.vlgmr.msra.gmra.mxu1 %vm5232_vm4, %v5231_v33  ;;  %6059 = vmatprep.subr.mxu1 %v11491_v38  ;;  %v5229_v21 = vmax.f32 %v5146_v52, %v5225_v46 }
 0x8f0   :  { %6061 = vmatprep.mubr.msk.f32.mxu1 %vm6320_vm10, %v11491_v38  ;;  %6060 = vmatpush3.msra.mxu1 %v5470_v9 }
 0x8f1   :  { %6045 = vmatpush3.msk.msra.mxu0 %vm5236_vm3, %v5229_v21 }
 0x8f2   :  { %6047 = vmatmul.mubr.msk.f32.vlgmr.msra.gmra.mxu0 %vm5232_vm4, %v5231_v33  ;;  %6054 = vmatprep.subr.mxu0 %v11491_v38 }
 0x8f3   :  { %6056 = vmatprep.mubr.msk.f32.mxu0 %vm6320_vm10, %v11491_v38  ;;  %6055 = vmatpush3.msra.mxu0 %v5384_v55 }
 0x8f4   :  { %6064 = vmatprep.subr.mxu0 %v11491_v38 }
 0x9af   :  { %v5379_v4 = vpop.f32.mrf.mxu1 }
 0x9b0   :  { %v5387_v19 = vrot.slane %v5379_v4, 7 }
 0x9b1   :  { %v6053_v40 = vpop.f32.mrf.mxu1 }
 0x9b2   :  { %v5306_v47 = vpop.f32.mrf.mxu0 }
 0x9b3   :  { %v5389_v37 = vsel %vm5388_vm5, %v5387_v19, %v5306_v47  ;;  %v5471_v24 = vrot.slane %v5306_v47, 1 }
 0x9b4   :  { %6057 = vmatmul.mubr.msk.f32.vlgmr.msra.gmra.mxu0 %vm5390_vm6, %v5389_v37  ;;  %v6048_v58 = vpop.f32.mrf.mxu0 }
 0x9b5   :  { %v5472_v34 = vsel %vm5388_vm5, %v5379_v4, %v5471_v24  ;;  %6072 = vmatprep.mubr.msk.f32.mxu0 %vm6320_vm10, %v11491_v38  ;;  %6065 = vmatpush3.msra.mxu0 %v5550_v35 }
 0x9b6   :  { %6062 = vmatmul.mubr.msk.f32.vlgmr.msra.gmra.mxu1 %vm5390_vm6, %v5472_v34  ;;  %6066 = vmatprep.subr.mxu0 %v11491_v38 }
 0x9b7   :  { %6067 = vmatpush3.msra.mxu0 %v5549_v0 }
 0x9b8   :  { %6068 = vmatprep.subr.mxu0 %v11491_v38 }
 0x9b9   :  { %6069 = vmatpush3.msra.mxu0 %v5548_v30 }
 0x9ba   :  { %6070 = vmatprep.subr.mxu0 %v11491_v38 }
 0x9bb   :  { %6071 = vmatpush3.msra.mxu0 %v5547_v2 }
 0xa74   :  { %v5459_v54 = vpop.f32.mrf.mxu0 }
 0xa75   :  { %v5469_v5 = vadd.f32 %v5929_v12, %v5459_v54 }
 0xa76   :  { %v5541_v17 = vpop.f32.mrf.mxu1  ;;  %v6058_v36 = vpop.f32.mrf.mxu0 }
 0xa77   :  { %v5545_v59 = vadd.f32 %v5541_v17, %v5469_v5 }
 0xa78   :  { %v6063_v60 = vpop.f32.mrf.mxu1 }
 0xa79   :  { %v5546_v44 = vmax.f32 %v5545_v59, 0.0 }
 0xa7b   :  { %6073 = vmatmul.mubr.msk.f32.vlgmr.msra.gmra.mxu0 %vm5558_vm7, %v5546_v44 }
 0xb3b   :  { %v5628_v23 = vpop.f32.mrf.mxu0 }
 0xb3c   :  { %v5629_v56 = vadd.f32 %v5931_v6, %v5628_v23 }
 0xb3d   :  { %v6074_v14 = vpop.f32.mrf.mxu0 }
 0xb3e   :  { %5633 = vst.msk [vmem:[#allocation18] sm:$0x3] %vm5632_vm8, %v5629_v56 }
 0xb3f   :  { %6282 = shalt.err (!%p6279_p1)
}
 0xb40   :  { %s11497_s0 = sld [smem:[#allocation227_spill]] }
 0xb46   :  { %5643 = dma.vmem_to_hbm [thread:$0]  %s5641_s19, 32, %s11497_s0, [#allocation6]  }
 0xb47   :  { %6303 = dma.done.wait [#allocation6], 32  }
 0xb48   :  { %6304 = vsyncadd [#allocation6], 4294967264 }
 0xb49   :  { %5647 = vsyncpa [#allocation5], 1 }
 0xb4a   :  { %5648 = vsyncpa [#allocation16], 1 }
 0xb4b   :  { %5649 = vsyncpa [#allocation6], 1 }
 0xb4c   :  { %5650 = vsyncpa [#allocation7], 1 }
 0xb4d   :  { %5651 = vsyncpa [#allocation14], 1 }
 0xb4e   :  { %5652 = vsyncpa [#allocation8], 1 }
 0xb4f   :  { %5653 = vsyncpa [#allocation12], 1 }

</bundles_post_ra>
